<compile_context>
chip_gen: v5e
topology: v5e:2x2
jax: 0.10.0
libtpu: 0.0.40
codegen_flags: <defaults>
</compile_context>

<pallas_src>
import numpy as np
import jax
import jax.numpy as jnp
from jax import lax
from jax.experimental import pallas as pl
from jax.experimental.pallas import tpu as pltpu

LANES = 128      # every channel dim is zero-padded to this many lanes
SUBLANES = 8     # every spatial (M) dim is padded to a multiple of this


def _conv_out(n):
    # PyTorch Conv2d(kernel=3, stride=2, padding=0) output size.
    return (n - 3) // 2 + 1


def _round_up(n, m):
    return ((n + m - 1) // m) * m


# --------------------------------------------------------------------------
# Kernel: processes one batch block (TB images) end to end.
# --------------------------------------------------------------------------
def _encoder_kernel(x_ref, w1_ref, b1_ref, s2_ref, w2_ref, b2_ref,
                    s3_ref, w3_ref, b3_ref, out_ref, p2_buf, p3_buf):
    # ---- conv1: single K-stacked matmul on the pre-im2col'd input ----------
    a1 = jnp.dot(x_ref[...], w1_ref[...], preferred_element_type=jnp.float32)
    a1 = jnp.maximum(a1 + b1_ref[...], 0.0).astype(jnp.bfloat16)  # (TB*p1p,128)

    # ---- conv2: build im2col patch on the MXU (9 precomputed bf16 selection
    # matmuls, lane-concatenated into VMEM scratch), then ONE K=1152 dot. -----
    for t in range(9):
        g = jnp.dot(s2_ref[t], a1, preferred_element_type=jnp.float32)
        p2_buf[:, t * LANES:(t + 1) * LANES] = g.astype(jnp.bfloat16)
    a2 = jnp.dot(p2_buf[...], w2_ref[...], preferred_element_type=jnp.float32)
    a2 = jnp.maximum(a2 + b2_ref[...], 0.0).astype(jnp.bfloat16)  # (TB*p2p,128)

    # ---- conv3: same structure ---------------------------------------------
    for t in range(9):
        g = jnp.dot(s3_ref[t], a2, preferred_element_type=jnp.float32)
        p3_buf[:, t * LANES:(t + 1) * LANES] = g.astype(jnp.bfloat16)
    a3 = jnp.dot(p3_buf[...], w3_ref[...], preferred_element_type=jnp.float32)
    out_ref[...] = jnp.maximum(a3 + b3_ref[...], 0.0)             # lane-dense


# --------------------------------------------------------------------------
# Host-side (trace-time) constant builders.
# --------------------------------------------------------------------------
def _sel_taps_np(tb, h_out, w_out, p_out_pad, w_in, p_in_pad):
    """Per-tap block-diagonal 0/1 selection matrices.

    S[t, img*p_out_pad + m, img*p_in_pad + src(m, t)] = 1
    where src(m, t) is the flattened input-row index of tap t for output m.
    """
    S = np.zeros((9, tb * p_out_pad, tb * p_in_pad), np.float32)
    for t in range(9):
        kh, kw = divmod(t, 3)
        for img in range(tb):
            for oi in range(h_out):
                for oj in range(w_out):
                    m = oi * w_out + oj
                    src = (2 * oi + kh) * w_in + (2 * oj + kw)
                    S[t, img * p_out_pad + m, img * p_in_pad + src] = 1.0
    return S


def _pack_stacked(w_hwio, b):
    """(3,3,Cin,Cout) -> tap-stacked (9*128, 128) bf16 weight + (1,128) f32 bias.

    Row ordering t*128 + c matches the in-kernel patch lane ordering
    (tap-major lane groups of 128, activation channel c within the group).
    """
    cin, cout = w_hwio.shape[2], w_hwio.shape[3]
    w9 = w_hwio.reshape(9, cin, cout)
    w9 = jnp.pad(w9, ((0, 0), (0, LANES - cin), (0, LANES - cout)))
    bp = jnp.pad(b, (0, LANES - cout)).reshape(1, LANES)
    return w9.reshape(9 * LANES, LANES).astype(jnp.bfloat16), bp.astype(jnp.float32)


def _im2col_input(x, ho, wo):
    """(B,H,W,C) -> (B, ho*wo, 9*C) im2col patches (pure XLA strided slices)."""
    cols = []
    for kh in range(3):
        for kw in range(3):
            cols.append(x[:, kh:kh + 2 * ho:2, kw:kw + 2 * wo:2, :])
    p = jnp.concatenate(cols, axis=-1)                 # (B, ho, wo, 9*C)
    return p.reshape(x.shape[0], ho * wo, -1)


def init_encoder_params(img_channels, key):
    """PyTorch-style uniform init (bound = 1/sqrt(fan_in)); HWIO f32 weights."""
    def conv_init(k, cin, cout):
        kw_key, kb_key = jax.random.split(k)
        bound = 1.0 / float((cin * 9) ** 0.5)
        w = jax.random.uniform(kw_key, (3, 3, cin, cout), jnp.float32, -bound, bound)
        b = jax.random.uniform(kb_key, (cout,), jnp.float32, -bound, bound)
        return w, b

    k1, k2, k3 = jax.random.split(key, 3)
    return {
        "conv1": conv_init(k1, img_channels, 32),
        "conv2": conv_init(k2, 32, 64),
        "conv3": conv_init(k3, 64, 64),
    }


# --------------------------------------------------------------------------
# Wrapper.
# --------------------------------------------------------------------------
def encoder_forward(params, state, *, batch_block=8):
    """state: (B, H, W, C) NHWC — same tensor the PyTorch forward receives."""
    B, H, W, C = state.shape
    ho1, wo1 = _conv_out(H), _conv_out(W)
    ho2, wo2 = _conv_out(ho1), _conv_out(wo1)
    ho3, wo3 = _conv_out(ho2), _conv_out(wo2)
    p1, p2, p3 = ho1 * wo1, ho2 * wo2, ho3 * wo3
    p1p = _round_up(p1, SUBLANES)
    p2p = _round_up(p2, SUBLANES)
    p3p = _round_up(p3, SUBLANES)
    c3 = params["conv3"][0].shape[-1]

    tb = batch_block
    bpad = _round_up(B, tb)          # batch padded to a whole number of blocks
    grid = bpad // tb

    # ---- conv1 weights: tap-stacked K = 9*C, lane-padded to k1p -------------
    w1, b1 = params["conv1"]
    k1 = 9 * C
    k1p = _round_up(k1, LANES)
    w1s = jnp.pad(w1.reshape(k1, -1),
                  ((0, k1p - k1), (0, LANES - w1.shape[-1]))).astype(jnp.bfloat16)
    b1p = jnp.pad(b1, (0, LANES - b1.shape[0])).reshape(1, LANES).astype(jnp.float32)

    w2s, b2p = _pack_stacked(*params["conv2"])
    w3s, b3p = _pack_stacked(*params["conv3"])

    # ---- static selection constants (trace-time numpy, bf16) ---------------
    s2 = jnp.asarray(_sel_taps_np(tb, ho2, wo2, p2p, wo1, p1p), jnp.bfloat16)
    s3 = jnp.asarray(_sel_taps_np(tb, ho3, wo3, p3p, wo2, p2p), jnp.bfloat16)

    # ---- layer-1 im2col in the wrapper (pure XLA), padded + bf16 -----------
    x = _im2col_input(state, ho1, wo1)                       # (B, p1, 9C)
    x = jnp.pad(x, ((0, bpad - B), (0, p1p - p1), (0, k1p - k1)))
    x = x.reshape(bpad * p1p, k1p).astype(jnp.bfloat16)      # (bpad*p1p, k1p)

    m1, m2, m3 = tb * p1p, tb * p2p, tb * p3p

    out = pl.pallas_call(
        _encoder_kernel,
        out_shape=jax.ShapeDtypeStruct((bpad * p3p, LANES), jnp.float32),
        grid_spec=pltpu.PrefetchScalarGridSpec(
            num_scalar_prefetch=0,
            grid=(grid,),
            in_specs=[
                pl.BlockSpec((m1, k1p), lambda b: (b, 0)),          # x patches
                pl.BlockSpec((k1p, LANES), lambda b: (0, 0)),       # w1 stacked
                pl.BlockSpec((1, LANES), lambda b: (0, 0)),         # b1
                pl.BlockSpec((9, m2, m1), lambda b: (0, 0, 0)),     # sel2
                pl.BlockSpec((9 * LANES, LANES), lambda b: (0, 0)),  # w2 stacked
                pl.BlockSpec((1, LANES), lambda b: (0, 0)),         # b2
                pl.BlockSpec((9, m3, m2), lambda b: (0, 0, 0)),     # sel3
                pl.BlockSpec((9 * LANES, LANES), lambda b: (0, 0)),  # w3 stacked
                pl.BlockSpec((1, LANES), lambda b: (0, 0)),         # b3
            ],
            out_specs=pl.BlockSpec((m3, LANES), lambda b: (b, 0)),
            scratch_shapes=[
                pltpu.VMEM((m2, 9 * LANES), jnp.bfloat16),  # layer-2 im2col patch
                pltpu.VMEM((m3, 9 * LANES), jnp.bfloat16),  # layer-3 im2col patch
            ],
        ),
        compiler_params=pltpu.CompilerParams(
            dimension_semantics=("parallel",)),
    )(x, w1s, b1p, s2, w2s, b2p, s3, w3s, b3p)

    # Drop batch/row/lane padding and flatten in NCHW (c, h, w) order to match
    # PyTorch's x.reshape(B, -1).
    out = out.reshape(bpad, p3p, LANES)[:B, :p3, :c3]
    out = jnp.transpose(out, (0, 2, 1))
    return out.reshape(B, -1)


# --------------------------------------------------------------------------
# Reference (XLA convs with the same bf16 operand roundings as the kernel).
# --------------------------------------------------------------------------
def _reference_forward(params, state):
    x = state
    for name in ("conv1", "conv2", "conv3"):
        w, b = params[name]
        x = lax.conv_general_dilated(
            x.astype(jnp.bfloat16), w.astype(jnp.bfloat16),
            window_strides=(2, 2), padding="VALID",
            dimension_numbers=("NHWC", "HWIO", "NHWC"),
            preferred_element_type=jnp.float32)
        x = jnp.maximum(x + b, 0.0)
    x = jnp.transpose(x, (0, 3, 1, 2))
    return x.reshape(x.shape[0], -1)


if __name__ == "__main__":
    key = jax.random.PRNGKey(0)
    pkey, xkey = jax.random.split(key)

    # SAC-style encoder batch; conv stack 16 -> 7 -> 3 -> 1.
    # B=16 with batch_block=8 -> grid=(2,), even, so both v7x TCs get work.
    B, H, W, C = 16, 16, 16, 4
    params = init_encoder_params(C, pkey)
    state = jax.random.uniform(xkey, (B, H, W, C), jnp.float32)

    out = jax.block_until_ready(jax.jit(encoder_forward)(params, state))
    ref = jax.block_until_ready(_reference_forward(params, state))

    assert out.shape == (B, 64), out.shape
    assert jnp.allclose(out, ref, atol=2e-3, rtol=2e-3), (
        "mismatch vs XLA conv reference")
    print("KERNEL_OK")
</pallas_src>

<mosaic_0001>
module attributes {stable_mosaic.version = 11 : i64} {
  func.func @_encoder_kernel(%arg0: i32, %arg1: memref<448x128xbf16, #tpu.memory_space<vmem>>, %arg2: memref<128x128xbf16, #tpu.memory_space<vmem>>, %arg3: memref<1x128xf32, #tpu.memory_space<vmem>>, %arg4: memref<9x128x448xbf16, #tpu.memory_space<vmem>>, %arg5: memref<1152x128xbf16, #tpu.memory_space<vmem>>, %arg6: memref<1x128xf32, #tpu.memory_space<vmem>>, %arg7: memref<9x64x128xbf16, #tpu.memory_space<vmem>>, %arg8: memref<1152x128xbf16, #tpu.memory_space<vmem>>, %arg9: memref<1x128xf32, #tpu.memory_space<vmem>>, %arg10: memref<64x128xf32, #tpu.memory_space<vmem>>, %arg11: memref<128x1152xbf16, #tpu.memory_space<vmem>>, %arg12: memref<64x1152xbf16, #tpu.memory_space<vmem>>) attributes {dimension_semantics = [#tpu.dimension_semantics<parallel>], iteration_bounds = array<i64: 2>, scalar_prefetch = 0 : i64, scratch_operands = 2 : i64, tpu.core_type = #tpu.core_type<tc>, window_params = [{transform_indices = @transform_0, window_bounds = array<i64: 448, 128>}, {pipeline_mode = #tpu.pipeline_mode<synchronous>, transform_indices = @transform_1, window_bounds = array<i64: 128, 128>}, {pipeline_mode = #tpu.pipeline_mode<synchronous>, transform_indices = @transform_2, window_bounds = array<i64: 1, 128>}, {pipeline_mode = #tpu.pipeline_mode<synchronous>, transform_indices = @transform_3, window_bounds = array<i64: 9, 128, 448>}, {pipeline_mode = #tpu.pipeline_mode<synchronous>, transform_indices = @transform_4, window_bounds = array<i64: 1152, 128>}, {pipeline_mode = #tpu.pipeline_mode<synchronous>, transform_indices = @transform_5, window_bounds = array<i64: 1, 128>}, {pipeline_mode = #tpu.pipeline_mode<synchronous>, transform_indices = @transform_6, window_bounds = array<i64: 9, 64, 128>}, {pipeline_mode = #tpu.pipeline_mode<synchronous>, transform_indices = @transform_7, window_bounds = array<i64: 1152, 128>}, {pipeline_mode = #tpu.pipeline_mode<synchronous>, transform_indices = @transform_8, window_bounds = array<i64: 1, 128>}, {transform_indices = @transform_9, window_bounds = array<i64: 64, 128>}]} {
    %c0 = arith.constant 0 : index
    %c0_0 = arith.constant 0 : index
    %0 = vector.load %arg1[%c0, %c0_0] : memref<448x128xbf16, #tpu.memory_space<vmem>>, vector<448x128xbf16>
    %c0_1 = arith.constant 0 : index
    %c0_2 = arith.constant 0 : index
    %1 = vector.load %arg2[%c0_1, %c0_2] : memref<128x128xbf16, #tpu.memory_space<vmem>>, vector<128x128xbf16>
    %cst = arith.constant dense<0.000000e+00> : vector<448x128xf32>
    %2 = tpu.matmul %0, %1, %cst {dimension_numbers = #tpu.dot_dimension_numbers<[1], [0], [0], [1], [0, 0, 1, 1], [], []>} : vector<448x128xbf16>, vector<128x128xbf16>, vector<448x128xf32> -> vector<448x128xf32>
    %c0_3 = arith.constant 0 : index
    %c0_4 = arith.constant 0 : index
    %3 = vector.load %arg3[%c0_3, %c0_4] : memref<1x128xf32, #tpu.memory_space<vmem>>, vector<1x128xf32>
    %4 = vector.broadcast %3 : vector<1x128xf32> to vector<448x128xf32>
    %5 = arith.addf %2, %4 : vector<448x128xf32>
    %cst_5 = arith.constant 0.000000e+00 : f32
    %6 = vector.broadcast %cst_5 : f32 to vector<448x128xf32>
    %7 = arith.maximumf %5, %6 : vector<448x128xf32>
    %8 = arith.truncf %7 : vector<448x128xf32> to vector<448x128xbf16>
    %c0_6 = arith.constant 0 : index
    %c0_7 = arith.constant 0 : index
    %c0_8 = arith.constant 0 : index
    %9 = vector.load %arg4[%c0_6, %c0_7, %c0_8] : memref<9x128x448xbf16, #tpu.memory_space<vmem>>, vector<1x128x448xbf16>
    %10 = vector.shape_cast %9 : vector<1x128x448xbf16> to vector<128x448xbf16>
    %cst_9 = arith.constant dense<0.000000e+00> : vector<128x128xf32>
    %11 = tpu.matmul %10, %8, %cst_9 {dimension_numbers = #tpu.dot_dimension_numbers<[1], [0], [0], [1], [0, 0, 1, 1], [], []>} : vector<128x448xbf16>, vector<448x128xbf16>, vector<128x128xf32> -> vector<128x128xf32>
    %12 = arith.truncf %11 : vector<128x128xf32> to vector<128x128xbf16>
    %c0_10 = arith.constant 0 : index
    %c0_11 = arith.constant 0 : index
    %13 = vector.load %arg11[%c0_10, %c0_11] : memref<128x1152xbf16, #tpu.memory_space<vmem>>, vector<128x128xbf16>
    tpu.vector_store %arg11[%c0_10, %c0_11], %12 {strides = array<i32>} : memref<128x1152xbf16, #tpu.memory_space<vmem>>, vector<128x128xbf16>,
    %c1 = arith.constant 1 : index
    %c0_12 = arith.constant 0 : index
    %c0_13 = arith.constant 0 : index
    %14 = vector.load %arg4[%c1, %c0_12, %c0_13] : memref<9x128x448xbf16, #tpu.memory_space<vmem>>, vector<1x128x448xbf16>
    %15 = vector.shape_cast %14 : vector<1x128x448xbf16> to vector<128x448xbf16>
    %cst_14 = arith.constant dense<0.000000e+00> : vector<128x128xf32>
    %16 = tpu.matmul %15, %8, %cst_14 {dimension_numbers = #tpu.dot_dimension_numbers<[1], [0], [0], [1], [0, 0, 1, 1], [], []>} : vector<128x448xbf16>, vector<448x128xbf16>, vector<128x128xf32> -> vector<128x128xf32>
    %17 = arith.truncf %16 : vector<128x128xf32> to vector<128x128xbf16>
    %c0_15 = arith.constant 0 : index
    %c128 = arith.constant 128 : index
    %18 = vector.load %arg11[%c0_15, %c128] : memref<128x1152xbf16, #tpu.memory_space<vmem>>, vector<128x128xbf16>
    tpu.vector_store %arg11[%c0_15, %c128], %17 {strides = array<i32>} : memref<128x1152xbf16, #tpu.memory_space<vmem>>, vector<128x128xbf16>,
    %c2 = arith.constant 2 : index
    %c0_16 = arith.constant 0 : index
    %c0_17 = arith.constant 0 : index
    %19 = vector.load %arg4[%c2, %c0_16, %c0_17] : memref<9x128x448xbf16, #tpu.memory_space<vmem>>, vector<1x128x448xbf16>
    %20 = vector.shape_cast %19 : vector<1x128x448xbf16> to vector<128x448xbf16>
    %cst_18 = arith.constant dense<0.000000e+00> : vector<128x128xf32>
    %21 = tpu.matmul %20, %8, %cst_18 {dimension_numbers = #tpu.dot_dimension_numbers<[1], [0], [0], [1], [0, 0, 1, 1], [], []>} : vector<128x448xbf16>, vector<448x128xbf16>, vector<128x128xf32> -> vector<128x128xf32>
    %22 = arith.truncf %21 : vector<128x128xf32> to vector<128x128xbf16>
    %c0_19 = arith.constant 0 : index
    %c256 = arith.constant 256 : index
    %23 = vector.load %arg11[%c0_19, %c256] : memref<128x1152xbf16, #tpu.memory_space<vmem>>, vector<128x128xbf16>
    tpu.vector_store %arg11[%c0_19, %c256], %22 {strides = array<i32>} : memref<128x1152xbf16, #tpu.memory_space<vmem>>, vector<128x128xbf16>,
    %c3 = arith.constant 3 : index
    %c0_20 = arith.constant 0 : index
    %c0_21 = arith.constant 0 : index
    %24 = vector.load %arg4[%c3, %c0_20, %c0_21] : memref<9x128x448xbf16, #tpu.memory_space<vmem>>, vector<1x128x448xbf16>
    %25 = vector.shape_cast %24 : vector<1x128x448xbf16> to vector<128x448xbf16>
    %cst_22 = arith.constant dense<0.000000e+00> : vector<128x128xf32>
    %26 = tpu.matmul %25, %8, %cst_22 {dimension_numbers = #tpu.dot_dimension_numbers<[1], [0], [0], [1], [0, 0, 1, 1], [], []>} : vector<128x448xbf16>, vector<448x128xbf16>, vector<128x128xf32> -> vector<128x128xf32>
    %27 = arith.truncf %26 : vector<128x128xf32> to vector<128x128xbf16>
    %c0_23 = arith.constant 0 : index
    %c384 = arith.constant 384 : index
    %28 = vector.load %arg11[%c0_23, %c384] : memref<128x1152xbf16, #tpu.memory_space<vmem>>, vector<128x128xbf16>
    tpu.vector_store %arg11[%c0_23, %c384], %27 {strides = array<i32>} : memref<128x1152xbf16, #tpu.memory_space<vmem>>, vector<128x128xbf16>,
    %c4 = arith.constant 4 : index
    %c0_24 = arith.constant 0 : index
    %c0_25 = arith.constant 0 : index
    %29 = vector.load %arg4[%c4, %c0_24, %c0_25] : memref<9x128x448xbf16, #tpu.memory_space<vmem>>, vector<1x128x448xbf16>
    %30 = vector.shape_cast %29 : vector<1x128x448xbf16> to vector<128x448xbf16>
    %cst_26 = arith.constant dense<0.000000e+00> : vector<128x128xf32>
    %31 = tpu.matmul %30, %8, %cst_26 {dimension_numbers = #tpu.dot_dimension_numbers<[1], [0], [0], [1], [0, 0, 1, 1], [], []>} : vector<128x448xbf16>, vector<448x128xbf16>, vector<128x128xf32> -> vector<128x128xf32>
    %32 = arith.truncf %31 : vector<128x128xf32> to vector<128x128xbf16>
    %c0_27 = arith.constant 0 : index
    %c512 = arith.constant 512 : index
    %33 = vector.load %arg11[%c0_27, %c512] : memref<128x1152xbf16, #tpu.memory_space<vmem>>, vector<128x128xbf16>
    tpu.vector_store %arg11[%c0_27, %c512], %32 {strides = array<i32>} : memref<128x1152xbf16, #tpu.memory_space<vmem>>, vector<128x128xbf16>,
    %c5 = arith.constant 5 : index
    %c0_28 = arith.constant 0 : index
    %c0_29 = arith.constant 0 : index
    %34 = vector.load %arg4[%c5, %c0_28, %c0_29] : memref<9x128x448xbf16, #tpu.memory_space<vmem>>, vector<1x128x448xbf16>
    %35 = vector.shape_cast %34 : vector<1x128x448xbf16> to vector<128x448xbf16>
    %cst_30 = arith.constant dense<0.000000e+00> : vector<128x128xf32>
    %36 = tpu.matmul %35, %8, %cst_30 {dimension_numbers = #tpu.dot_dimension_numbers<[1], [0], [0], [1], [0, 0, 1, 1], [], []>} : vector<128x448xbf16>, vector<448x128xbf16>, vector<128x128xf32> -> vector<128x128xf32>
    %37 = arith.truncf %36 : vector<128x128xf32> to vector<128x128xbf16>
    %c0_31 = arith.constant 0 : index
    %c640 = arith.constant 640 : index
    %38 = vector.load %arg11[%c0_31, %c640] : memref<128x1152xbf16, #tpu.memory_space<vmem>>, vector<128x128xbf16>
    tpu.vector_store %arg11[%c0_31, %c640], %37 {strides = array<i32>} : memref<128x1152xbf16, #tpu.memory_space<vmem>>, vector<128x128xbf16>,
    %c6 = arith.constant 6 : index
    %c0_32 = arith.constant 0 : index
    %c0_33 = arith.constant 0 : index
    %39 = vector.load %arg4[%c6, %c0_32, %c0_33] : memref<9x128x448xbf16, #tpu.memory_space<vmem>>, vector<1x128x448xbf16>
    %40 = vector.shape_cast %39 : vector<1x128x448xbf16> to vector<128x448xbf16>
    %cst_34 = arith.constant dense<0.000000e+00> : vector<128x128xf32>
    %41 = tpu.matmul %40, %8, %cst_34 {dimension_numbers = #tpu.dot_dimension_numbers<[1], [0], [0], [1], [0, 0, 1, 1], [], []>} : vector<128x448xbf16>, vector<448x128xbf16>, vector<128x128xf32> -> vector<128x128xf32>
    %42 = arith.truncf %41 : vector<128x128xf32> to vector<128x128xbf16>
    %c0_35 = arith.constant 0 : index
    %c768 = arith.constant 768 : index
    %43 = vector.load %arg11[%c0_35, %c768] : memref<128x1152xbf16, #tpu.memory_space<vmem>>, vector<128x128xbf16>
    tpu.vector_store %arg11[%c0_35, %c768], %42 {strides = array<i32>} : memref<128x1152xbf16, #tpu.memory_space<vmem>>, vector<128x128xbf16>,
    %c7 = arith.constant 7 : index
    %c0_36 = arith.constant 0 : index
    %c0_37 = arith.constant 0 : index
    %44 = vector.load %arg4[%c7, %c0_36, %c0_37] : memref<9x128x448xbf16, #tpu.memory_space<vmem>>, vector<1x128x448xbf16>
    %45 = vector.shape_cast %44 : vector<1x128x448xbf16> to vector<128x448xbf16>
    %cst_38 = arith.constant dense<0.000000e+00> : vector<128x128xf32>
    %46 = tpu.matmul %45, %8, %cst_38 {dimension_numbers = #tpu.dot_dimension_numbers<[1], [0], [0], [1], [0, 0, 1, 1], [], []>} : vector<128x448xbf16>, vector<448x128xbf16>, vector<128x128xf32> -> vector<128x128xf32>
    %47 = arith.truncf %46 : vector<128x128xf32> to vector<128x128xbf16>
    %c0_39 = arith.constant 0 : index
    %c896 = arith.constant 896 : index
    %48 = vector.load %arg11[%c0_39, %c896] : memref<128x1152xbf16, #tpu.memory_space<vmem>>, vector<128x128xbf16>
    tpu.vector_store %arg11[%c0_39, %c896], %47 {strides = array<i32>} : memref<128x1152xbf16, #tpu.memory_space<vmem>>, vector<128x128xbf16>,
    %c8 = arith.constant 8 : index
    %c0_40 = arith.constant 0 : index
    %c0_41 = arith.constant 0 : index
    %49 = vector.load %arg4[%c8, %c0_40, %c0_41] : memref<9x128x448xbf16, #tpu.memory_space<vmem>>, vector<1x128x448xbf16>
    %50 = vector.shape_cast %49 : vector<1x128x448xbf16> to vector<128x448xbf16>
    %cst_42 = arith.constant dense<0.000000e+00> : vector<128x128xf32>
    %51 = tpu.matmul %50, %8, %cst_42 {dimension_numbers = #tpu.dot_dimension_numbers<[1], [0], [0], [1], [0, 0, 1, 1], [], []>} : vector<128x448xbf16>, vector<448x128xbf16>, vector<128x128xf32> -> vector<128x128xf32>
    %52 = arith.truncf %51 : vector<128x128xf32> to vector<128x128xbf16>
    %c0_43 = arith.constant 0 : index
    %c1024 = arith.constant 1024 : index
    %53 = vector.load %arg11[%c0_43, %c1024] : memref<128x1152xbf16, #tpu.memory_space<vmem>>, vector<128x128xbf16>
    tpu.vector_store %arg11[%c0_43, %c1024], %52 {strides = array<i32>} : memref<128x1152xbf16, #tpu.memory_space<vmem>>, vector<128x128xbf16>,
    %c0_44 = arith.constant 0 : index
    %c0_45 = arith.constant 0 : index
    %54 = vector.load %arg11[%c0_44, %c0_45] : memref<128x1152xbf16, #tpu.memory_space<vmem>>, vector<128x1152xbf16>
    %c0_46 = arith.constant 0 : index
    %c0_47 = arith.constant 0 : index
    %55 = vector.load %arg5[%c0_46, %c0_47] : memref<1152x128xbf16, #tpu.memory_space<vmem>>, vector<1152x128xbf16>
    %cst_48 = arith.constant dense<0.000000e+00> : vector<128x128xf32>
    %56 = tpu.matmul %54, %55, %cst_48 {dimension_numbers = #tpu.dot_dimension_numbers<[1], [0], [0], [1], [0, 0, 1, 1], [], []>} : vector<128x1152xbf16>, vector<1152x128xbf16>, vector<128x128xf32> -> vector<128x128xf32>
    %c0_49 = arith.constant 0 : index
    %c0_50 = arith.constant 0 : index
    %57 = vector.load %arg6[%c0_49, %c0_50] : memref<1x128xf32, #tpu.memory_space<vmem>>, vector<1x128xf32>
    %58 = vector.broadcast %57 : vector<1x128xf32> to vector<128x128xf32>
    %59 = arith.addf %56, %58 : vector<128x128xf32>
    %cst_51 = arith.constant 0.000000e+00 : f32
    %60 = vector.broadcast %cst_51 : f32 to vector<128x128xf32>
    %61 = arith.maximumf %59, %60 : vector<128x128xf32>
    %62 = arith.truncf %61 : vector<128x128xf32> to vector<128x128xbf16>
    %c0_52 = arith.constant 0 : index
    %c0_53 = arith.constant 0 : index
    %c0_54 = arith.constant 0 : index
    %63 = vector.load %arg7[%c0_52, %c0_53, %c0_54] : memref<9x64x128xbf16, #tpu.memory_space<vmem>>, vector<1x64x128xbf16>
    %64 = vector.shape_cast %63 : vector<1x64x128xbf16> to vector<64x128xbf16>
    %cst_55 = arith.constant dense<0.000000e+00> : vector<64x128xf32>
    %65 = tpu.matmul %64, %62, %cst_55 {dimension_numbers = #tpu.dot_dimension_numbers<[1], [0], [0], [1], [0, 0, 1, 1], [], []>} : vector<64x128xbf16>, vector<128x128xbf16>, vector<64x128xf32> -> vector<64x128xf32>
    %66 = arith.truncf %65 : vector<64x128xf32> to vector<64x128xbf16>
    %c0_56 = arith.constant 0 : index
    %c0_57 = arith.constant 0 : index
    %67 = vector.load %arg12[%c0_56, %c0_57] : memref<64x1152xbf16, #tpu.memory_space<vmem>>, vector<64x128xbf16>
    tpu.vector_store %arg12[%c0_56, %c0_57], %66 {strides = array<i32>} : memref<64x1152xbf16, #tpu.memory_space<vmem>>, vector<64x128xbf16>,
    %c1_58 = arith.constant 1 : index
    %c0_59 = arith.constant 0 : index
    %c0_60 = arith.constant 0 : index
    %68 = vector.load %arg7[%c1_58, %c0_59, %c0_60] : memref<9x64x128xbf16, #tpu.memory_space<vmem>>, vector<1x64x128xbf16>
    %69 = vector.shape_cast %68 : vector<1x64x128xbf16> to vector<64x128xbf16>
    %cst_61 = arith.constant dense<0.000000e+00> : vector<64x128xf32>
    %70 = tpu.matmul %69, %62, %cst_61 {dimension_numbers = #tpu.dot_dimension_numbers<[1], [0], [0], [1], [0, 0, 1, 1], [], []>} : vector<64x128xbf16>, vector<128x128xbf16>, vector<64x128xf32> -> vector<64x128xf32>
    %71 = arith.truncf %70 : vector<64x128xf32> to vector<64x128xbf16>
    %c0_62 = arith.constant 0 : index
    %c128_63 = arith.constant 128 : index
    %72 = vector.load %arg12[%c0_62, %c128_63] : memref<64x1152xbf16, #tpu.memory_space<vmem>>, vector<64x128xbf16>
    tpu.vector_store %arg12[%c0_62, %c128_63], %71 {strides = array<i32>} : memref<64x1152xbf16, #tpu.memory_space<vmem>>, vector<64x128xbf16>,
    %c2_64 = arith.constant 2 : index
    %c0_65 = arith.constant 0 : index
    %c0_66 = arith.constant 0 : index
    %73 = vector.load %arg7[%c2_64, %c0_65, %c0_66] : memref<9x64x128xbf16, #tpu.memory_space<vmem>>, vector<1x64x128xbf16>
    %74 = vector.shape_cast %73 : vector<1x64x128xbf16> to vector<64x128xbf16>
    %cst_67 = arith.constant dense<0.000000e+00> : vector<64x128xf32>
    %75 = tpu.matmul %74, %62, %cst_67 {dimension_numbers = #tpu.dot_dimension_numbers<[1], [0], [0], [1], [0, 0, 1, 1], [], []>} : vector<64x128xbf16>, vector<128x128xbf16>, vector<64x128xf32> -> vector<64x128xf32>
    %76 = arith.truncf %75 : vector<64x128xf32> to vector<64x128xbf16>
    %c0_68 = arith.constant 0 : index
    %c256_69 = arith.constant 256 : index
    %77 = vector.load %arg12[%c0_68, %c256_69] : memref<64x1152xbf16, #tpu.memory_space<vmem>>, vector<64x128xbf16>
    tpu.vector_store %arg12[%c0_68, %c256_69], %76 {strides = array<i32>} : memref<64x1152xbf16, #tpu.memory_space<vmem>>, vector<64x128xbf16>,
    %c3_70 = arith.constant 3 : index
    %c0_71 = arith.constant 0 : index
    %c0_72 = arith.constant 0 : index
    %78 = vector.load %arg7[%c3_70, %c0_71, %c0_72] : memref<9x64x128xbf16, #tpu.memory_space<vmem>>, vector<1x64x128xbf16>
    %79 = vector.shape_cast %78 : vector<1x64x128xbf16> to vector<64x128xbf16>
    %cst_73 = arith.constant dense<0.000000e+00> : vector<64x128xf32>
    %80 = tpu.matmul %79, %62, %cst_73 {dimension_numbers = #tpu.dot_dimension_numbers<[1], [0], [0], [1], [0, 0, 1, 1], [], []>} : vector<64x128xbf16>, vector<128x128xbf16>, vector<64x128xf32> -> vector<64x128xf32>
    %81 = arith.truncf %80 : vector<64x128xf32> to vector<64x128xbf16>
    %c0_74 = arith.constant 0 : index
    %c384_75 = arith.constant 384 : index
    %82 = vector.load %arg12[%c0_74, %c384_75] : memref<64x1152xbf16, #tpu.memory_space<vmem>>, vector<64x128xbf16>
    tpu.vector_store %arg12[%c0_74, %c384_75], %81 {strides = array<i32>} : memref<64x1152xbf16, #tpu.memory_space<vmem>>, vector<64x128xbf16>,
    %c4_76 = arith.constant 4 : index
    %c0_77 = arith.constant 0 : index
    %c0_78 = arith.constant 0 : index
    %83 = vector.load %arg7[%c4_76, %c0_77, %c0_78] : memref<9x64x128xbf16, #tpu.memory_space<vmem>>, vector<1x64x128xbf16>
    %84 = vector.shape_cast %83 : vector<1x64x128xbf16> to vector<64x128xbf16>
    %cst_79 = arith.constant dense<0.000000e+00> : vector<64x128xf32>
    %85 = tpu.matmul %84, %62, %cst_79 {dimension_numbers = #tpu.dot_dimension_numbers<[1], [0], [0], [1], [0, 0, 1, 1], [], []>} : vector<64x128xbf16>, vector<128x128xbf16>, vector<64x128xf32> -> vector<64x128xf32>
    %86 = arith.truncf %85 : vector<64x128xf32> to vector<64x128xbf16>
    %c0_80 = arith.constant 0 : index
    %c512_81 = arith.constant 512 : index
    %87 = vector.load %arg12[%c0_80, %c512_81] : memref<64x1152xbf16, #tpu.memory_space<vmem>>, vector<64x128xbf16>
    tpu.vector_store %arg12[%c0_80, %c512_81], %86 {strides = array<i32>} : memref<64x1152xbf16, #tpu.memory_space<vmem>>, vector<64x128xbf16>,
    %c5_82 = arith.constant 5 : index
    %c0_83 = arith.constant 0 : index
    %c0_84 = arith.constant 0 : index
    %88 = vector.load %arg7[%c5_82, %c0_83, %c0_84] : memref<9x64x128xbf16, #tpu.memory_space<vmem>>, vector<1x64x128xbf16>
    %89 = vector.shape_cast %88 : vector<1x64x128xbf16> to vector<64x128xbf16>
    %cst_85 = arith.constant dense<0.000000e+00> : vector<64x128xf32>
    %90 = tpu.matmul %89, %62, %cst_85 {dimension_numbers = #tpu.dot_dimension_numbers<[1], [0], [0], [1], [0, 0, 1, 1], [], []>} : vector<64x128xbf16>, vector<128x128xbf16>, vector<64x128xf32> -> vector<64x128xf32>
    %91 = arith.truncf %90 : vector<64x128xf32> to vector<64x128xbf16>
    %c0_86 = arith.constant 0 : index
    %c640_87 = arith.constant 640 : index
    %92 = vector.load %arg12[%c0_86, %c640_87] : memref<64x1152xbf16, #tpu.memory_space<vmem>>, vector<64x128xbf16>
    tpu.vector_store %arg12[%c0_86, %c640_87], %91 {strides = array<i32>} : memref<64x1152xbf16, #tpu.memory_space<vmem>>, vector<64x128xbf16>,
    %c6_88 = arith.constant 6 : index
    %c0_89 = arith.constant 0 : index
    %c0_90 = arith.constant 0 : index
    %93 = vector.load %arg7[%c6_88, %c0_89, %c0_90] : memref<9x64x128xbf16, #tpu.memory_space<vmem>>, vector<1x64x128xbf16>
    %94 = vector.shape_cast %93 : vector<1x64x128xbf16> to vector<64x128xbf16>
    %cst_91 = arith.constant dense<0.000000e+00> : vector<64x128xf32>
    %95 = tpu.matmul %94, %62, %cst_91 {dimension_numbers = #tpu.dot_dimension_numbers<[1], [0], [0], [1], [0, 0, 1, 1], [], []>} : vector<64x128xbf16>, vector<128x128xbf16>, vector<64x128xf32> -> vector<64x128xf32>
    %96 = arith.truncf %95 : vector<64x128xf32> to vector<64x128xbf16>
    %c0_92 = arith.constant 0 : index
    %c768_93 = arith.constant 768 : index
    %97 = vector.load %arg12[%c0_92, %c768_93] : memref<64x1152xbf16, #tpu.memory_space<vmem>>, vector<64x128xbf16>
    tpu.vector_store %arg12[%c0_92, %c768_93], %96 {strides = array<i32>} : memref<64x1152xbf16, #tpu.memory_space<vmem>>, vector<64x128xbf16>,
    %c7_94 = arith.constant 7 : index
    %c0_95 = arith.constant 0 : index
    %c0_96 = arith.constant 0 : index
    %98 = vector.load %arg7[%c7_94, %c0_95, %c0_96] : memref<9x64x128xbf16, #tpu.memory_space<vmem>>, vector<1x64x128xbf16>
    %99 = vector.shape_cast %98 : vector<1x64x128xbf16> to vector<64x128xbf16>
    %cst_97 = arith.constant dense<0.000000e+00> : vector<64x128xf32>
    %100 = tpu.matmul %99, %62, %cst_97 {dimension_numbers = #tpu.dot_dimension_numbers<[1], [0], [0], [1], [0, 0, 1, 1], [], []>} : vector<64x128xbf16>, vector<128x128xbf16>, vector<64x128xf32> -> vector<64x128xf32>
    %101 = arith.truncf %100 : vector<64x128xf32> to vector<64x128xbf16>
    %c0_98 = arith.constant 0 : index
    %c896_99 = arith.constant 896 : index
    %102 = vector.load %arg12[%c0_98, %c896_99] : memref<64x1152xbf16, #tpu.memory_space<vmem>>, vector<64x128xbf16>
    tpu.vector_store %arg12[%c0_98, %c896_99], %101 {strides = array<i32>} : memref<64x1152xbf16, #tpu.memory_space<vmem>>, vector<64x128xbf16>,
    %c8_100 = arith.constant 8 : index
    %c0_101 = arith.constant 0 : index
    %c0_102 = arith.constant 0 : index
    %103 = vector.load %arg7[%c8_100, %c0_101, %c0_102] : memref<9x64x128xbf16, #tpu.memory_space<vmem>>, vector<1x64x128xbf16>
    %104 = vector.shape_cast %103 : vector<1x64x128xbf16> to vector<64x128xbf16>
    %cst_103 = arith.constant dense<0.000000e+00> : vector<64x128xf32>
    %105 = tpu.matmul %104, %62, %cst_103 {dimension_numbers = #tpu.dot_dimension_numbers<[1], [0], [0], [1], [0, 0, 1, 1], [], []>} : vector<64x128xbf16>, vector<128x128xbf16>, vector<64x128xf32> -> vector<64x128xf32>
    %106 = arith.truncf %105 : vector<64x128xf32> to vector<64x128xbf16>
    %c0_104 = arith.constant 0 : index
    %c1024_105 = arith.constant 1024 : index
    %107 = vector.load %arg12[%c0_104, %c1024_105] : memref<64x1152xbf16, #tpu.memory_space<vmem>>, vector<64x128xbf16>
    tpu.vector_store %arg12[%c0_104, %c1024_105], %106 {strides = array<i32>} : memref<64x1152xbf16, #tpu.memory_space<vmem>>, vector<64x128xbf16>,
    %c0_106 = arith.constant 0 : index
    %c0_107 = arith.constant 0 : index
    %108 = vector.load %arg12[%c0_106, %c0_107] : memref<64x1152xbf16, #tpu.memory_space<vmem>>, vector<64x1152xbf16>
    %c0_108 = arith.constant 0 : index
    %c0_109 = arith.constant 0 : index
    %109 = vector.load %arg8[%c0_108, %c0_109] : memref<1152x128xbf16, #tpu.memory_space<vmem>>, vector<1152x128xbf16>
    %cst_110 = arith.constant dense<0.000000e+00> : vector<64x128xf32>
    %110 = tpu.matmul %108, %109, %cst_110 {dimension_numbers = #tpu.dot_dimension_numbers<[1], [0], [0], [1], [0, 0, 1, 1], [], []>} : vector<64x1152xbf16>, vector<1152x128xbf16>, vector<64x128xf32> -> vector<64x128xf32>
    %c0_111 = arith.constant 0 : index
    %c0_112 = arith.constant 0 : index
    %111 = vector.load %arg9[%c0_111, %c0_112] : memref<1x128xf32, #tpu.memory_space<vmem>>, vector<1x128xf32>
    %112 = vector.broadcast %111 : vector<1x128xf32> to vector<64x128xf32>
    %113 = arith.addf %110, %112 : vector<64x128xf32>
    %cst_113 = arith.constant 0.000000e+00 : f32
    %114 = vector.broadcast %cst_113 : f32 to vector<64x128xf32>
    %115 = arith.maximumf %113, %114 : vector<64x128xf32>
    %c0_114 = arith.constant 0 : index
    %c0_115 = arith.constant 0 : index
    %116 = vector.load %arg10[%c0_114, %c0_115] : memref<64x128xf32, #tpu.memory_space<vmem>>, vector<64x128xf32>
    tpu.vector_store %arg10[%c0_114, %c0_115], %115 {strides = array<i32>} : memref<64x128xf32, #tpu.memory_space<vmem>>, vector<64x128xf32>,
    return
  }
  func.func @transform_0(%arg0: i32) -> (i32, i32) {
    %c0_i32 = arith.constant 0 : i32
    %c0_i32_0 = arith.constant 0 : i32
    return %arg0, %c0_i32 : i32, i32
  }
  func.func @transform_1(%arg0: i32) -> (i32, i32) {
    %c0_i32 = arith.constant 0 : i32
    %c0_i32_0 = arith.constant 0 : i32
    %c0_i32_1 = arith.constant 0 : i32
    return %c0_i32, %c0_i32_0 : i32, i32
  }
  func.func @transform_2(%arg0: i32) -> (i32, i32) {
    %c0_i32 = arith.constant 0 : i32
    %c0_i32_0 = arith.constant 0 : i32
    %c0_i32_1 = arith.constant 0 : i32
    return %c0_i32, %c0_i32_0 : i32, i32
  }
  func.func @transform_3(%arg0: i32) -> (i32, i32, i32) {
    %c0_i32 = arith.constant 0 : i32
    %c0_i32_0 = arith.constant 0 : i32
    %c0_i32_1 = arith.constant 0 : i32
    %c0_i32_2 = arith.constant 0 : i32
    return %c0_i32, %c0_i32_0, %c0_i32_1 : i32, i32, i32
  }
  func.func @transform_4(%arg0: i32) -> (i32, i32) {
    %c0_i32 = arith.constant 0 : i32
    %c0_i32_0 = arith.constant 0 : i32
    %c0_i32_1 = arith.constant 0 : i32
    return %c0_i32, %c0_i32_0 : i32, i32
  }
  func.func @transform_5(%arg0: i32) -> (i32, i32) {
    %c0_i32 = arith.constant 0 : i32
    %c0_i32_0 = arith.constant 0 : i32
    %c0_i32_1 = arith.constant 0 : i32
    return %c0_i32, %c0_i32_0 : i32, i32
  }
  func.func @transform_6(%arg0: i32) -> (i32, i32, i32) {
    %c0_i32 = arith.constant 0 : i32
    %c0_i32_0 = arith.constant 0 : i32
    %c0_i32_1 = arith.constant 0 : i32
    %c0_i32_2 = arith.constant 0 : i32
    return %c0_i32, %c0_i32_0, %c0_i32_1 : i32, i32, i32
  }
  func.func @transform_7(%arg0: i32) -> (i32, i32) {
    %c0_i32 = arith.constant 0 : i32
    %c0_i32_0 = arith.constant 0 : i32
    %c0_i32_1 = arith.constant 0 : i32
    return %c0_i32, %c0_i32_0 : i32, i32
  }
  func.func @transform_8(%arg0: i32) -> (i32, i32) {
    %c0_i32 = arith.constant 0 : i32
    %c0_i32_0 = arith.constant 0 : i32
    %c0_i32_1 = arith.constant 0 : i32
    return %c0_i32, %c0_i32_0 : i32, i32
  }
  func.func @transform_9(%arg0: i32) -> (i32, i32) {
    %c0_i32 = arith.constant 0 : i32
    %c0_i32_0 = arith.constant 0 : i32
    return %arg0, %c0_i32 : i32, i32
  }
}

</mosaic_0001>

<bundles_post_ra>
// kernel: encoder_forward.1
= control target key start
LH: loop header
LB: loop body
LE: loop exit
PB: predicated region body
PF: predicated region fallthrough
CT: control target
= control target key end

     0   :  { %s11681_s30 = smov 0   ;;  %s16221_s0 = inlined_call_operand.vmem [shape: bf16[896,128], index: 0, kind: input, shape index: {}]   ;;  %s16222_s1 = inlined_call_operand.vmem [shape: bf16[128,128], index: 1, kind: input, shape index: {}]   ;;  %s16223_s2 = inlined_call_operand.vmem [shape: f32[1,128], index: 2, kind: input, shape index: {}]   ;;  %s16224_s3 = inlined_call_operand.vmem [shape: bf16[9,128,448], index: 3, kind: input, shape index: {}]   ;;  %s16225_s4 = inlined_call_operand.vmem [shape: bf16[1152,128], index: 4, kind: input, shape index: {}]   ;;  %s16226_s5 = inlined_call_operand.vmem [shape: f32[1,128], index: 5, kind: input, shape index: {}]   ;;  %s16227_s6 = inlined_call_operand.vmem [shape: bf16[9,64,128], index: 6, kind: input, shape index: {}]   ;;  %s16228_s7 = inlined_call_operand.vmem [shape: bf16[1152,128], index: 7, kind: input, shape index: {}]   ;;  %s16229_s8 = inlined_call_operand.vmem [shape: f32[1,128], index: 8, kind: input, shape index: {}]   ;;  %s16230_s9 = inlined_call_operand.vmem [shape: f32[128,128], index: 9, kind: output, shape index: {}]  }
   0x1 LB: > { %s8126_s10 = sadd.s32 4294967295, %s11629_s30   ;;  %p8130_p0 = scmp.ge.s32.totalorder %s11629_s30, 1  ;;  %s11629_s30 = sphi %s11681_s30, %s19_s30  }
   0x2   : > { %p288_p1 = scmp.lt.s32.totalorder %s11629_s30, 3 }
   0x4   : > { %p289_p2 = pnand %p8130_p0, %p288_p1 }
   0x6   : > { %292 = sbr.rel (%p289_p2) target bundleno = 2765 (0xacd), region = 56 }
   0xb   : > { %v11011_v0 = vld [vmem:[%s16222_s1 + $0x38] sm:$0xff]  ;;  %v11010_v1 = vld [vmem:[%s16222_s1 + $0x30] sm:$0xff]  ;;  %v11009_v2 = vld [vmem:[%s16222_s1 + $0x28] sm:$0xff]  ;;  %s324_s19 = smul.u32 56, %s8126_s10  ;;  %vm1046_vm0 = vcmask 523264   ;;  %s8132_s11 = sshll.u32 %s8126_s10, 3 }
   0xc   : > { %629 = vmatpush.bf16.msra.mxu0 %v11011_v0  ;;  %v11008_v3 = vld [vmem:[%s16222_s1 + $0x20] sm:$0xff]  ;;  %v11007_v4 = vld [vmem:[%s16222_s1 + $0x18] sm:$0xff]  ;;  %v11006_v5 = vld [vmem:[%s16222_s1 + $0x10] sm:$0xff]  ;;  %p331_p4 = scmp.lt.s32.totalorder %s8132_s11, 15 }
   0xd   : > { %p325_p3 = scmp.lt.s32.totalorder %s324_s19, 111  ;;  %v11005_v6 = vld [vmem:[%s16222_s1 + $0x8] sm:$0xff]  ;;  %v11004_v7 = vld [vmem:[%s16222_s1] sm:$0xff] }
   0xe   : > { %v11732_v18 = vld [vmem:[%s16223_s2] ss:$0 sm:$0xff]  ;;  %s16476_s11 = smov (!%p331_p4, %s8132_s11), 15 }
   0xf   : > { %s16474_s19 = smov (!%p325_p3, %s324_s19), 111 }
  0x10   : > { %630 = vmatpush.bf16.msra.mxu0 %v11010_v1  ;;  %s8131_s26 = sshll.u32 %s16474_s19, 2 }
  0x11   : > { %s11718_s12 = scalar_lea.vmem %s16221_s0, %s8131_s26 }
  0x12   : > { %v10976_v8 = vld [vmem:[%s11718_s12] sm:$0xff]  ;;  %v10977_v9 = vld [vmem:[%s11718_s12 + $0x8] sm:$0xff]  ;;  %v10978_v10 = vld [vmem:[%s11718_s12 + $0x10] sm:$0xff] }
  0x13   : > { %v10979_v11 = vld [vmem:[%s11718_s12 + $0x18] sm:$0xff]  ;;  %v10980_v12 = vld [vmem:[%s11718_s12 + $0x20] sm:$0xff]  ;;  %v10981_v13 = vld [vmem:[%s11718_s12 + $0x28] sm:$0xff] }
  0x14   : > { %631 = vmatpush.bf16.msra.mxu0 %v11009_v2  ;;  %v10982_v14 = vld [vmem:[%s11718_s12 + $0x30] sm:$0xff]  ;;  %v10983_v15 = vld [vmem:[%s11718_s12 + $0x38] sm:$0xff]  ;;  %v10984_v16 = vld [vmem:[%s11718_s12 + $0x40] sm:$0xff] }
  0x15   : > { %v10985_v25 = vld [vmem:[%s11718_s12 + $0x48] sm:$0xff]  ;;  %v10986_v33 = vld [vmem:[%s11718_s12 + $0x50] sm:$0xff]  ;;  %v10987_v41 = vld [vmem:[%s11718_s12 + $0x58] sm:$0xff] }
  0x16   : > { %v10988_v49 = vld [vmem:[%s11718_s12 + $0x60] sm:$0xff]  ;;  %v10989_v52 = vld [vmem:[%s11718_s12 + $0x68] sm:$0xff]  ;;  %v10990_v55 = vld [vmem:[%s11718_s12 + $0x70] sm:$0xff] }
  0x17   : > { %v10991_v58 = vld [vmem:[%s11718_s12 + $0x78] sm:$0xff] }
  0x18   : > { %632 = vmatpush.bf16.msra.mxu0 %v11008_v3 }
  0x1c   : > { %633 = vmatpush.bf16.msra.mxu0 %v11007_v4 }
  0x20   : > { %634 = vmatpush.bf16.msra.mxu0 %v11006_v5 }
  0x24   : > { %635 = vmatpush.bf16.msra.mxu0 %v11005_v6 }
  0x28   : > { %636 = vmatpush.bf16.msra.mxu0 %v11004_v7 }
  0x2b   : > { %637 = vmatmul.bf16.vlgmr.msra.gmra.mxu0 %v10976_v8  ;;  %v10992_v8 = vld [vmem:[%s11718_s12 + $0x80] sm:$0xff] }
  0x3b   : > { %642 = vmatmul.bf16.gmra.mxu0 %v10977_v9 }
  0x4b   : > { %647 = vmatmul.bf16.gmra.mxu0 %v10978_v10 }
  0x5b   : > { %652 = vmatmul.bf16.gmra.mxu0 %v10979_v11 }
  0x6b   : > { %657 = vmatmul.bf16.gmra.mxu0 %v10980_v12 }
  0x7b   : > { %662 = vmatmul.bf16.gmra.mxu0 %v10981_v13 }
  0x8b   : > { %667 = vmatmul.bf16.gmra.mxu0 %v10982_v14 }
  0x9b   : > { %672 = vmatmul.bf16.gmra.mxu0 %v10983_v15 }
  0xa8   : > { %v638_v17 = vpop.f32.mrf.mxu0 }
  0xa9   : > { %v639_v19 = vadd.f32 %v11732_v18, %v638_v17 }
  0xab   : > { %677 = vmatmul.bf16.gmra.mxu0 %v10984_v16  ;;  %v778_v22 = vmax.f32 %v639_v19, 0.0 }
  0xb0   : > { %v640_v20 = vpop.f32.mrf.mxu0 }
  0xb1   : > { %v641_v21 = vadd.f32 %v11732_v18, %v640_v20 }
  0xb3   : > { %v779_v23 = vmax.f32 %v641_v21, 0.0 }
  0xb5   : > { %v11736_v24 = vpack.c.bf16 %v779_v23, %v778_v22 }
  0xb8   : > { %v643_v26 = vpop.f32.mrf.mxu0 }
  0xb9   : > { %v644_v27 = vadd.f32 %v11732_v18, %v643_v26 }
  0xbb   : > { %682 = vmatmul.bf16.gmra.mxu0 %v10985_v25  ;;  %v780_v30 = vmax.f32 %v644_v27, 0.0  ;;  %v10993_v27 = vld [vmem:[%s11718_s12 + $0x88] sm:$0xff] }
  0xc0   : > { %v645_v28 = vpop.f32.mrf.mxu0 }
  0xc1   : > { %v646_v29 = vadd.f32 %v11732_v18, %v645_v28 }
  0xc3   : > { %v781_v31 = vmax.f32 %v646_v29, 0.0 }
  0xc5   : > { %v11741_v32 = vpack.c.bf16 %v781_v31, %v780_v30 }
  0xc8   : > { %v648_v34 = vpop.f32.mrf.mxu0 }
  0xc9   : > { %v649_v35 = vadd.f32 %v11732_v18, %v648_v34 }
  0xcb   : > { %687 = vmatmul.bf16.gmra.mxu0 %v10986_v33  ;;  %v782_v38 = vmax.f32 %v649_v35, 0.0 }
  0xd0   : > { %v650_v36 = vpop.f32.mrf.mxu0 }
  0xd1   : > { %v651_v37 = vadd.f32 %v11732_v18, %v650_v36  ;;  %v10994_v36 = vld [vmem:[%s11718_s12 + $0x90] sm:$0xff] }
  0xd3   : > { %v783_v39 = vmax.f32 %v651_v37, 0.0 }
  0xd5   : > { %v11746_v40 = vpack.c.bf16 %v783_v39, %v782_v38 }
  0xd8   : > { %v653_v42 = vpop.f32.mrf.mxu0 }
  0xd9   : > { %v654_v43 = vadd.f32 %v11732_v18, %v653_v42 }
  0xdb   : > { %692 = vmatmul.bf16.gmra.mxu0 %v10987_v41  ;;  %v784_v46 = vmax.f32 %v654_v43, 0.0 }
  0xe0   : > { %v655_v44 = vpop.f32.mrf.mxu0 }
  0xe1   : > { %v656_v45 = vadd.f32 %v11732_v18, %v655_v44 }
  0xe3   : > { %v785_v47 = vmax.f32 %v656_v45, 0.0  ;;  %v10995_v45 = vld [vmem:[%s11718_s12 + $0x98] sm:$0xff] }
  0xe5   : > { %v11751_v48 = vpack.c.bf16 %v785_v47, %v784_v46 }
  0xe8   : > { %v658_v50 = vpop.f32.mrf.mxu0 }
  0xe9   : > { %v659_v13 = vadd.f32 %v11732_v18, %v658_v50 }
  0xeb   : > { %697 = vmatmul.bf16.gmra.mxu0 %v10988_v49  ;;  %v786_v17 = vmax.f32 %v659_v13, 0.0 }
  0xf0   : > { %v660_v51 = vpop.f32.mrf.mxu0 }
  0xf1   : > { %v661_v10 = vadd.f32 %v11732_v18, %v660_v51 }
  0xf3   : > { %v787_v15 = vmax.f32 %v661_v10, 0.0 }
  0xf5   : > { %v11779_v21 = vpack.c.bf16 %v787_v15, %v786_v17  ;;  %v11000_v15 = vld [vmem:[%s11718_s12 + $0xc0] sm:$0xff] }
  0xf8   : > { %v663_v53 = vpop.f32.mrf.mxu0 }
  0xf9   : > { %v664_v6 = vadd.f32 %v11732_v18, %v663_v53 }
  0xfb   : > { %702 = vmatmul.bf16.gmra.mxu0 %v10989_v52  ;;  %v788_v14 = vmax.f32 %v664_v6, 0.0 }
 0x100   : > { %v665_v54 = vpop.f32.mrf.mxu0 }
 0x101   : > { %v666_v3 = vadd.f32 %v11732_v18, %v665_v54  ;;  %v10996_v54 = vld [vmem:[%s11718_s12 + $0xa0] sm:$0xff] }
 0x103   : > { %v789_v11 = vmax.f32 %v666_v3, 0.0 }
 0x105   : > { %v11774_v16 = vpack.c.bf16 %v789_v11, %v788_v14 }
 0x108   : > { %v668_v56 = vpop.f32.mrf.mxu0 }
 0x109   : > { %v669_v0 = vadd.f32 %v11732_v18, %v668_v56 }
 0x10b   : > { %707 = vmatmul.bf16.gmra.mxu0 %v10990_v55  ;;  %v790_v7 = vmax.f32 %v669_v0, 0.0 }
 0x110   : > { %v670_v57 = vpop.f32.mrf.mxu0 }
 0x111   : > { %v671_v62 = vadd.f32 %v11732_v18, %v670_v57  ;;  %v10997_v57 = vld [vmem:[%s11718_s12 + $0xa8] sm:$0xff] }
 0x113   : > { %v791_v4 = vmax.f32 %v671_v62, 0.0 }
 0x115   : > { %v11769_v12 = vpack.c.bf16 %v791_v4, %v790_v7 }
 0x117   : > { %16242 = vst [vmem:[#allocation5_spill] sm:$0xff] %v11769_v12 }
 0x118   : > { %v673_v59 = vpop.f32.mrf.mxu0 }
 0x119   : > { %v674_v60 = vadd.f32 %v11732_v18, %v673_v59 }
 0x11b   : > { %712 = vmatmul.bf16.gmra.mxu0 %v10991_v58  ;;  %v792_v1 = vmax.f32 %v674_v60, 0.0  ;;  %v10998_v60 = vld [vmem:[%s11718_s12 + $0xb0] sm:$0xff] }
 0x120   : > { %v675_v61 = vpop.f32.mrf.mxu0 }
 0x121   : > { %v676_v63 = vadd.f32 %v11732_v18, %v675_v61 }
 0x123   : > { %v793_v2 = vmax.f32 %v676_v63, 0.0  ;;  %v10999_v63 = vld [vmem:[%s11718_s12 + $0xb8] sm:$0xff] }
 0x125   : > { %v11762_v5 = vpack.c.bf16 %v793_v2, %v792_v1 }
 0x127   : > { %16241 = vst [vmem:[#allocation4_spill] sm:$0xff] %v11762_v5  ;;  %1071 = vmatpush.bf16.msra.mxu1 %v11762_v5  ;;  %2382 = vmatpush.bf16.msrb.mxu0 %v11762_v5 }
 0x128   : > { %v678_v9 = vpop.f32.mrf.mxu0 }
 0x129   : > { %v679_v19 = vadd.f32 %v11732_v18, %v678_v9 }
 0x12b   : > { %717 = vmatmul.bf16.gmra.mxu0 %v10992_v8  ;;  %1072 = vmatpush.bf16.msra.mxu1 %v11769_v12  ;;  %v794_v23 = vmax.f32 %v679_v19, 0.0 }
 0x12c   : > { %2383 = vmatpush.bf16.msrb.mxu0 %v11769_v12 }
 0x12f   : > { %1073 = vmatpush.bf16.msra.mxu1 %v11774_v16 }
 0x130   : > { %2384 = vmatpush.bf16.msrb.mxu0 %v11774_v16  ;;  %v680_v20 = vpop.f32.mrf.mxu0 }
 0x131   : > { %v681_v22 = vadd.f32 %v11732_v18, %v680_v20 }
 0x133   : > { %v795_v25 = vmax.f32 %v681_v22, 0.0  ;;  %1074 = vmatpush.bf16.msra.mxu1 %v11779_v21 }
 0x134   : > { %2385 = vmatpush.bf16.msrb.mxu0 %v11779_v21 }
 0x135   : > { %v11784_v26 = vpack.c.bf16 %v795_v25, %v794_v23 }
 0x137   : > { %1075 = vmatpush.bf16.msra.mxu1 %v11751_v48 }
 0x138   : > { %2386 = vmatpush.bf16.msrb.mxu0 %v11751_v48  ;;  %v683_v28 = vpop.f32.mrf.mxu0 }
 0x139   : > { %v684_v29 = vadd.f32 %v11732_v18, %v683_v28 }
 0x13b   : > { %722 = vmatmul.bf16.gmra.mxu0 %v10993_v27  ;;  %1076 = vmatpush.bf16.msra.mxu1 %v11746_v40  ;;  %v796_v33 = vmax.f32 %v684_v29, 0.0 }
 0x13c   : > { %2387 = vmatpush.bf16.msrb.mxu0 %v11746_v40 }
 0x13f   : > { %1077 = vmatpush.bf16.msra.mxu1 %v11741_v32 }
 0x140   : > { %2388 = vmatpush.bf16.msrb.mxu0 %v11741_v32  ;;  %v685_v30 = vpop.f32.mrf.mxu0 }
 0x141   : > { %v686_v31 = vadd.f32 %v11732_v18, %v685_v30 }
 0x143   : > { %v797_v34 = vmax.f32 %v686_v31, 0.0  ;;  %1078 = vmatpush.bf16.msra.mxu1 %v11736_v24 }
 0x144   : > { %2389 = vmatpush.bf16.msrb.mxu0 %v11736_v24 }
 0x145   : > { %v11797_v35 = vpack.c.bf16 %v797_v34, %v796_v33 }
 0x148   : > { %2819 = vmatpush.bf16.msra.mxu0 %v11762_v5  ;;  %v688_v37 = vpop.f32.mrf.mxu0 }
 0x149   : > { %v689_v38 = vadd.f32 %v11732_v18, %v688_v37 }
 0x14b   : > { %727 = vmatmul.bf16.gmra.mxu0 %v10994_v36  ;;  %v798_v42 = vmax.f32 %v689_v38, 0.0 }
 0x14c   : > { %2820 = vmatpush.bf16.msra.mxu0 %v11769_v12 }
 0x150   : > { %2821 = vmatpush.bf16.msra.mxu0 %v11774_v16  ;;  %v690_v39 = vpop.f32.mrf.mxu0 }
 0x151   : > { %v691_v41 = vadd.f32 %v11732_v18, %v690_v39  ;;  %v11001_v39 = vld [vmem:[%s11718_s12 + $0xc8] sm:$0xff] }
 0x153   : > { %v799_v43 = vmax.f32 %v691_v41, 0.0 }
 0x154   : > { %2822 = vmatpush.bf16.msra.mxu0 %v11779_v21 }
 0x155   : > { %v11806_v44 = vpack.c.bf16 %v799_v43, %v798_v42  ;;  %v11012_v43 = vld [vmem:[%s16224_s3 + $0x4] sm:$0xf] }
 0x158   : > { %2823 = vmatpush.bf16.msra.mxu0 %v11751_v48  ;;  %v693_v46 = vpop.f32.mrf.mxu0 }
 0x159   : > { %v694_v47 = vadd.f32 %v11732_v18, %v693_v46 }
 0x15b   : > { %732 = vmatmul.bf16.gmra.mxu0 %v10995_v45  ;;  %v800_v51 = vmax.f32 %v694_v47, 0.0  ;;  %v8282_v45 = vld [vmem:[%s16224_s3 + $0x10] sm:$0xf0] }
 0x15c   : > { %2824 = vmatpush.bf16.msra.mxu0 %v11746_v40 }
 0x160   : > { %2825 = vmatpush.bf16.msra.mxu0 %v11741_v32  ;;  %v695_v49 = vpop.f32.mrf.mxu0 }
 0x161   : > { %v696_v50 = vadd.f32 %v11732_v18, %v695_v49  ;;  %v8285_v49 = vor.u32 %v11012_v43, %v8282_v45  ;;  %v8312_v43 = vld [vmem:[%s16224_s3 + $0x40] sm:$0xf]  ;;  %v11022_v45 = vld [vmem:[%s16224_s3 + $0x4c] sm:$0xf0] }
 0x163   : > { %v801_v52 = vmax.f32 %v696_v50, 0.0 }
 0x164   : > { %2826 = vmatpush.bf16.msra.mxu0 %v11736_v24 }
 0x165   : > { %v11815_v53 = vpack.c.bf16 %v801_v52, %v800_v51 }
 0x168   : > { %v698_v55 = vpop.f32.mrf.mxu0 }
 0x169   : > { %v699_v23 = vadd.f32 %v11732_v18, %v698_v55 }
 0x16b   : > { %737 = vmatmul.bf16.gmra.mxu0 %v10996_v54  ;;  %v802_v29 = vmax.f32 %v699_v23, 0.0  ;;  %v11002_v54 = vld [vmem:[%s11718_s12 + $0xd0] sm:$0xff]  ;;  %v8296_v23 = vld [vmem:[%s16224_s3 + $0x20] sm:$0xf] }
 0x170   : > { %v700_v56 = vpop.f32.mrf.mxu0 }
 0x171   : > { %v701_v19 = vadd.f32 %v11732_v18, %v700_v56 }
 0x173   : > { %v803_v27 = vmax.f32 %v701_v19, 0.0  ;;  %v8784_v19 = vld [vmem:[%s16224_s3 + $0x300] sm:$0xf] }
 0x175   : > { %v11840_v33 = vpack.c.bf16 %v803_v27, %v802_v29 }
 0x178   : > { %v703_v58 = vpop.f32.mrf.mxu0 }
 0x179   : > { %v704_v13 = vadd.f32 %v11732_v18, %v703_v58  ;;  %v8298_v58 = vld [vmem:[%s16224_s3 + $0x30] sm:$0xf0] }
 0x17b   : > { %742 = vmatmul.bf16.gmra.mxu0 %v10997_v57  ;;  %v804_v25 = vmax.f32 %v704_v13, 0.0  ;;  %v11016_v57 = vld [vmem:[%s16224_s3 + $0x24] sm:$0xf] }
 0x180   : > { %v705_v59 = vpop.f32.mrf.mxu0 }
 0x181   : > { %v706_v9 = vadd.f32 %v11732_v18, %v705_v59 }
 0x183   : > { %v805_v20 = vmax.f32 %v706_v9, 0.0  ;;  %v8314_v9 = vld [vmem:[%s16224_s3 + $0x50] sm:$0xf0] }
 0x185   : > { %v11836_v28 = vpack.c.bf16 %v805_v20, %v804_v25  ;;  %v11110_v20 = vld [vmem:[%s16224_s3 + $0x30c] sm:$0xf0] }
 0x186   : > { %v11018_v25 = vld [vmem:[%s16224_s3 + $0x2c] sm:$0xf0] }
 0x187   : > { %v8297_v29 = vor.u32 %v11018_v25, %v8296_v23 }
 0x188   : > { %v708_v61 = vpop.f32.mrf.mxu0 }
 0x189   : > { %v709_v6 = vadd.f32 %v11732_v18, %v708_v61  ;;  %v8301_v61 = vor.u32 %v11016_v57, %v8298_v58  ;;  %v11118_v57 = vld [vmem:[%s16224_s3 + $0x34c] sm:$0xf0]  ;;  %v8328_v58 = vld [vmem:[%s16224_s3 + $0x60] sm:$0xf] }
 0x18b   : > { %747 = vmatmul.bf16.gmra.mxu0 %v10998_v60  ;;  %v806_v14 = vmax.f32 %v709_v6, 0.0 }
 0x190   : > { %v710_v62 = vpop.f32.mrf.mxu0 }
 0x191   : > { %v711_v3 = vadd.f32 %v11732_v18, %v710_v62 }
 0x193   : > { %v807_v10 = vmax.f32 %v711_v3, 0.0 }
 0x195   : > { %v11832_v22 = vpack.c.bf16 %v807_v10, %v806_v14 }
 0x198   : > { %v713_v0 = vpop.f32.mrf.mxu0 }
 0x199   : > { %v714_v1 = vadd.f32 %v11732_v18, %v713_v0  ;;  %v8280_v0 = vld [vmem:[%s16224_s3] sm:$0xf] }
 0x19b   : > { %752 = vmatmul.bf16.gmra.mxu0 %v10999_v63  ;;  %v808_v7 = vmax.f32 %v714_v1, 0.0  ;;  %v11014_v1 = vld [vmem:[%s16224_s3 + $0xc] sm:$0xf0] }
 0x19c   : > { %v8281_v3 = vor.u32 %v11014_v1, %v8280_v0  ;;  %v8362_v0 = vld [vmem:[%s16224_s3 + $0xb0] sm:$0xf0] }
 0x19e   : > { %1079 = vmatmul.bf16.vlgmr.msra.gmra.mxu1 %v8281_v3 }
 0x1a0   : > { %v715_v2 = vpop.f32.mrf.mxu0 }
 0x1a1   : > { %v716_v4 = vadd.f32 %v11732_v18, %v715_v2 }
 0x1a3   : > { %v809_v8 = vmax.f32 %v716_v4, 0.0  ;;  %v11003_v4 = vld [vmem:[%s11718_s12 + $0xd8] sm:$0xff]  ;;  %s8133_s12 = sshll.u32 %s16476_s11, 3 }
 0x1a4   : > { %s16198_s14 = scalar_lea.vmem %s16230_s9, %s8133_s12 }
 0x1a5   : > { %v11826_v11 = vpack.c.bf16 %v809_v8, %v808_v7  ;;  %v11020_v8 = vld [vmem:[%s16224_s3 + $0x44] sm:$0xf] }
 0x1a6   : > { %v8317_v14 = vor.u32 %v11020_v8, %v8314_v9  ;;  %v11030_v8 = vld [vmem:[%s16224_s3 + $0x8c] sm:$0xf0] }
 0x1a7   : > { %1120 = vmatpush.bf16.msra.mxu2 %v11826_v11 }
 0x1a8   : > { %v718_v17 = vpop.f32.mrf.mxu0 }
 0x1a9   : > { %v719_v30 = vadd.f32 %v11732_v18, %v718_v17 }
 0x1ab   : > { %757 = vmatmul.bf16.gmra.mxu0 %v11000_v15  ;;  %1121 = vmatpush.bf16.msra.mxu2 %v11832_v22  ;;  %v810_v36 = vmax.f32 %v719_v30, 0.0  ;;  %v8785_v30 = vor.u32 %v11110_v20, %v8784_v19 }
 0x1ae   : > { %1084 = vmatmul.bf16.gmra.mxu1 %v8297_v29 }
 0x1af   : > { %1122 = vmatpush.bf16.msra.mxu2 %v11836_v28 }
 0x1b0   : > { %v720_v31 = vpop.f32.mrf.mxu0 }
 0x1b1   : > { %v721_v34 = vadd.f32 %v11732_v18, %v720_v31 }
 0x1b3   : > { %v811_v37 = vmax.f32 %v721_v34, 0.0  ;;  %1123 = vmatpush.bf16.msra.mxu2 %v11840_v33  ;;  %v11024_v34 = vld [vmem:[%s16224_s3 + $0x64] sm:$0xf] }
 0x1b5   : > { %v11844_v38 = vpack.c.bf16 %v811_v37, %v810_v36  ;;  %v8330_v36 = vld [vmem:[%s16224_s3 + $0x70] sm:$0xf0] }
 0x1b7   : > { %16243 = vst [vmem:[#allocation6_spill] sm:$0xff] %v11844_v38  ;;  %1124 = vmatpush.bf16.msra.mxu2 %v11815_v53 }
 0x1b8   : > { %v723_v41 = vpop.f32.mrf.mxu0 }
 0x1b9   : > { %v724_v42 = vadd.f32 %v11732_v18, %v723_v41  ;;  %v8800_v41 = vld [vmem:[%s16224_s3 + $0x320] sm:$0xf] }
 0x1bb   : > { %762 = vmatmul.bf16.gmra.mxu0 %v11001_v39  ;;  %1125 = vmatpush.bf16.msra.mxu2 %v11806_v44  ;;  %v812_v50 = vmax.f32 %v724_v42, 0.0  ;;  %v8333_v39 = vor.u32 %v11024_v34, %v8330_v36  ;;  %v11114_v42 = vld [vmem:[%s16224_s3 + $0x32c] sm:$0xf0]  ;;  %v8848_v36 = vld [vmem:[%s16224_s3 + $0x380] sm:$0xf] }
 0x1bf   : > { %1126 = vmatpush.bf16.msra.mxu2 %v11797_v35 }
 0x1c0   : > { %v725_v46 = vpop.f32.mrf.mxu0 }
 0x1c1   : > { %v726_v47 = vadd.f32 %v11732_v18, %v725_v46  ;;  %v8313_v46 = vor.u32 %v11022_v45, %v8312_v43 }
 0x1c3   : > { %v813_v51 = vmax.f32 %v726_v47, 0.0  ;;  %1127 = vmatpush.bf16.msra.mxu2 %v11784_v26  ;;  %v8801_v47 = vor.u32 %v11114_v42, %v8800_v41  ;;  %1089 = vmatmul.bf16.gmra.mxu1 %v8313_v46  ;;  %v8360_v41 = vld [vmem:[%s16224_s3 + $0xa0] sm:$0xf]  ;;  %v11034_v42 = vld [vmem:[%s16224_s3 + $0xac] sm:$0xf0] }
 0x1c5   : > { %v11860_v52 = vpack.c.bf16 %v813_v51, %v812_v50  ;;  %v11028_v50 = vld [vmem:[%s16224_s3 + $0x84] sm:$0xf]  ;;  %v8346_v51 = vld [vmem:[%s16224_s3 + $0x90] sm:$0xf0] }
 0x1c6   : > { %1128 = vmatmul.bf16.vlgmr.msra.gmra.mxu2 %v8285_v49 }
 0x1c7   : > { %1508 = vmatpush.bf16.msrb.mxu2 %v11762_v5  ;;  %16244 = vst [vmem:[#allocation7_spill] sm:$0xff] %v11860_v52 }
 0x1c8   : > { %v728_v55 = vpop.f32.mrf.mxu0 }
 0x1c9   : > { %v729_v56 = vadd.f32 %v11732_v18, %v728_v55  ;;  %v8349_v55 = vor.u32 %v11028_v50, %v8346_v51 }
 0x1cb   : > { %1509 = vmatpush.bf16.msrb.mxu2 %v11769_v12  ;;  %767 = vmatmul.bf16.gmra.mxu0 %v11002_v54  ;;  %v814_v62 = vmax.f32 %v729_v56, 0.0  ;;  %v8816_v56 = vld [vmem:[%s16224_s3 + $0x340] sm:$0xf] }
 0x1cf   : > { %1510 = vmatpush.bf16.msrb.mxu2 %v11774_v16 }
 0x1d0   : > { %v730_v59 = vpop.f32.mrf.mxu0 }
 0x1d1   : > { %v731_v60 = vadd.f32 %v11732_v18, %v730_v59  ;;  %v11026_v59 = vld [vmem:[%s16224_s3 + $0x6c] sm:$0xf0] }
 0x1d3   : > { %1511 = vmatpush.bf16.msrb.mxu2 %v11779_v21  ;;  %v815_v63 = vmax.f32 %v731_v60, 0.0  ;;  %v8329_v60 = vor.u32 %v11026_v59, %v8328_v58 }
 0x1d5   : > { %v11881_v2 = vpack.c.bf16 %v815_v63, %v814_v62  ;;  %1094 = vmatmul.bf16.gmra.mxu1 %v8329_v60  ;;  %v11032_v63 = vld [vmem:[%s16224_s3 + $0xa4] sm:$0xf] }
 0x1d6   : > { %1133 = vmatmul.bf16.gmra.mxu2 %v8301_v61  ;;  %v8817_v61 = vor.u32 %v11118_v57, %v8816_v56  ;;  %v8365_v3 = vor.u32 %v11032_v63, %v8362_v0  ;;  %v8394_v63 = vld [vmem:[%s16224_s3 + $0xf0] sm:$0xf0] }
 0x1d7   : > { %1512 = vmatpush.bf16.msrb.mxu2 %v11751_v48  ;;  %16245 = vst [vmem:[#allocation8_spill] sm:$0xff] %v11881_v2 }
 0x1d8   : > { %v733_v6 = vpop.f32.mrf.mxu0 }
 0x1d9   : > { %v734_v7 = vadd.f32 %v11732_v18, %v733_v6  ;;  %v11122_v6 = vld [vmem:[%s16224_s3 + $0x36c] sm:$0xf0] }
 0x1db   : > { %1513 = vmatpush.bf16.msrb.mxu2 %v11746_v40  ;;  %772 = vmatmul.bf16.gmra.mxu0 %v11003_v4  ;;  %v816_v15 = vmax.f32 %v734_v7, 0.0  ;;  %v8832_v4 = vld [vmem:[%s16224_s3 + $0x360] sm:$0xf] }
 0x1dc   : > { %v8344_v7 = vld [vmem:[%s16224_s3 + $0x80] sm:$0xf] }
 0x1dd   : > { %v8345_v9 = vor.u32 %v11030_v8, %v8344_v7  ;;  %v11038_v7 = vld [vmem:[%s16224_s3 + $0xcc] sm:$0xf0] }
 0x1df   : > { %1514 = vmatpush.bf16.msrb.mxu2 %v11741_v32 }
 0x1e0   : > { %v735_v10 = vpop.f32.mrf.mxu0 }
 0x1e1   : > { %v736_v13 = vadd.f32 %v11732_v18, %v735_v10  ;;  %v8833_v10 = vor.u32 %v11122_v6, %v8832_v4  ;;  %v11130_v4 = vld [vmem:[%s16224_s3 + $0x3ac] sm:$0xf0]  ;;  %v8376_v6 = vld [vmem:[%s16224_s3 + $0xc0] sm:$0xf] }
 0x1e2   : > { %v8377_v8 = vor.u32 %v11038_v7, %v8376_v6  ;;  %v8320_v6 = vld [vmem:[%s16224_s3 + $0x48] sm:$0xf] }
 0x1e3   : > { %1515 = vmatpush.bf16.msrb.mxu2 %v11736_v24  ;;  %v817_v17 = vmax.f32 %v736_v13, 0.0 }
 0x1e5   : > { %v11907_v27 = vpack.c.bf16 %v817_v17, %v816_v15  ;;  %1099 = vmatmul.bf16.gmra.mxu1 %v8345_v9  ;;  %v11036_v15 = vld [vmem:[%s16224_s3 + $0xc4] sm:$0xf]  ;;  %v8378_v17 = vld [vmem:[%s16224_s3 + $0xd0] sm:$0xf0] }
 0x1e6   : > { %1138 = vmatmul.bf16.gmra.mxu2 %v8317_v14  ;;  %v8381_v25 = vor.u32 %v11036_v15, %v8378_v17  ;;  %v8448_v15 = vld [vmem:[%s16224_s3 + $0x100] sm:$0xf]  ;;  %v11046_v17 = vld [vmem:[%s16224_s3 + $0x10c] sm:$0xf0] }
 0x1e7   : > { %16246 = vst [vmem:[#allocation9_spill] sm:$0xff] %v11907_v27 }
 0x1e8   : > { %v11909_v31 = vpop.f32.mrf.mxu0 }
 0x1eb   : > { %2390 = vmatmul.bf16.vlgmr.msrb.gmra.mxu0 %v8785_v30 }
 0x1ec   : > { %3256 = vmatpush.bf16.msrb.mxu0 %v11762_v5 }
 0x1f0   : > { %3257 = vmatpush.bf16.msrb.mxu0 %v11769_v12  ;;  %v11919_v37 = vpop.f32.mrf.mxu0 }
 0x1f1   : > { %v741_v57 = vadd.f32 %v11732_v18, %v11919_v37  ;;  %v11040_v37 = vld [vmem:[%s16224_s3 + $0xe4] sm:$0xf] }
 0x1f4   : > { %3258 = vmatpush.bf16.msrb.mxu0 %v11774_v16 }
 0x1f6   : > { %1143 = vmatmul.bf16.gmra.mxu2 %v8333_v39  ;;  %v11126_v39 = vld [vmem:[%s16224_s3 + $0x38c] sm:$0xf0] }
 0x1f8   : > { %3259 = vmatpush.bf16.msrb.mxu0 %v11779_v21  ;;  %v743_v49 = vpop.f32.mrf.mxu0 }
 0x1f9   : > { %v744_v50 = vadd.f32 %v11732_v18, %v743_v49  ;;  %v819_v49 = vmax.f32 %v741_v57, 0.0 }
 0x1fb   : > { %2395 = vmatmul.bf16.gmra.mxu0 %v8801_v47  ;;  %v8361_v47 = vor.u32 %v11034_v42, %v8360_v41  ;;  %v820_v60 = vmax.f32 %v744_v50, 0.0  ;;  %v11050_v50 = vld [vmem:[%s16224_s3 + $0x12c] sm:$0xf0] }
 0x1fc   : > { %3260 = vmatpush.bf16.msrb.mxu0 %v11751_v48 }
 0x1fd   : > { %1104 = vmatmul.bf16.gmra.mxu1 %v8361_v47  ;;  %v8464_v47 = vld [vmem:[%s16224_s3 + $0x120] sm:$0xf] }
 0x200   : > { %3261 = vmatpush.bf16.msrb.mxu0 %v11746_v40  ;;  %v745_v54 = vpop.f32.mrf.mxu0 }
 0x201   : > { %v746_v43 = vadd.f32 %v11732_v18, %v745_v54  ;;  %v739_v54 = vadd.f32 %v11732_v18, %v11909_v31 }
 0x203   : > { %v821_v58 = vmax.f32 %v746_v43, 0.0  ;;  %v8304_v43 = vld [vmem:[%s16224_s3 + $0x28] sm:$0xf] }
 0x204   : > { %3262 = vmatpush.bf16.msrb.mxu0 %v11741_v32 }
 0x206   : > { %1148 = vmatmul.bf16.gmra.mxu2 %v8349_v55  ;;  %v8849_v55 = vor.u32 %v11126_v39, %v8848_v36 }
 0x208   : > { %3263 = vmatpush.bf16.msrb.mxu0 %v11736_v24  ;;  %v748_v62 = vpop.f32.mrf.mxu0 }
 0x209   : > { %v749_v29 = vadd.f32 %v11732_v18, %v748_v62  ;;  %v818_v62 = vmax.f32 %v739_v54, 0.0  ;;  %v8896_v54 = vld [vmem:[%s16224_s3 + $0x3e0] sm:$0xf] }
 0x20b   : > { %2400 = vmatmul.bf16.gmra.mxu0 %v8817_v61  ;;  %v822_v51 = vmax.f32 %v749_v29, 0.0  ;;  %v12011_v61 = vpack.c.bf16 %v821_v58, %v820_v60  ;;  %v12022_v31 = vpack.c.bf16 %v819_v49, %v818_v62  ;;  %v11134_v29 = vld [vmem:[%s16224_s3 + $0x3cc] sm:$0xf0]  ;;  %v8465_v58 = vor.u32 %v11050_v50, %v8464_v47 }
 0x20c   : > { %v11138_v60 = vld [vmem:[%s16224_s3 + $0x3ec] sm:$0xf0] }
 0x20d   : > { %1109 = vmatmul.bf16.gmra.mxu1 %v8377_v8 }
 0x210   : > { %v750_v1 = vpop.f32.mrf.mxu0 }
 0x211   : > { %v751_v20 = vadd.f32 %v11732_v18, %v750_v1  ;;  %v8397_v1 = vor.u32 %v11040_v37, %v8394_v63  ;;  %v8897_v37 = vor.u32 %v11138_v60, %v8896_v54 }
 0x213   : > { %v823_v45 = vmax.f32 %v751_v20, 0.0 }
 0x215   : > { %v12006_v59 = vpack.c.bf16 %v823_v45, %v822_v51  ;;  %v11019_v45 = vld [vmem:[%s16224_s3 + $0x34] sm:$0xf0] }
 0x216   : > { %1153 = vmatmul.bf16.gmra.mxu2 %v8365_v3  ;;  %v8864_v3 = vld [vmem:[%s16224_s3 + $0x3a0] sm:$0xf]  ;;  %v8305_v57 = vor.u32 %v11019_v45, %v8304_v43 }
 0x217   : > { %v8865_v9 = vor.u32 %v11130_v4, %v8864_v3  ;;  %v8952_v45 = vld [vmem:[%s16224_s3 + $0x400] sm:$0xf] }
 0x218   : > { %v753_v13 = vpop.f32.mrf.mxu0 }
 0x219   : > { %v754_v14 = vadd.f32 %v11732_v18, %v753_v13  ;;  %v8288_v13 = vld [vmem:[%s16224_s3 + $0x8] sm:$0xf] }
 0x21b   : > { %2405 = vmatmul.bf16.gmra.mxu0 %v8833_v10  ;;  %v824_v30 = vmax.f32 %v754_v14, 0.0  ;;  %v11015_v14 = vld [vmem:[%s16224_s3 + $0x14] sm:$0xf0]  ;;  %v1080_v49 = vpop.f32.mrf.mxu1 }
 0x21c   : > { %v8289_v20 = vor.u32 %v11015_v14, %v8288_v13  ;;  %v8480_v13 = vld [vmem:[%s16224_s3 + $0x140] sm:$0xf]  ;;  %v11054_v14 = vld [vmem:[%s16224_s3 + $0x14c] sm:$0xf0] }
 0x220   : > { %v755_v19 = vpop.f32.mrf.mxu0 }
 0x221   : > { %v756_v23 = vadd.f32 %v11732_v18, %v755_v19 }
 0x223   : > { %v825_v34 = vmax.f32 %v756_v23, 0.0  ;;  %v8449_v23 = vor.u32 %v11046_v17, %v8448_v15  ;;  %v12096_v3 = vpop.f32.mrf.mxu1 }
 0x225   : > { %v11998_v46 = vpack.c.bf16 %v825_v34, %v824_v30  ;;  %v8392_v30 = vld [vmem:[%s16224_s3 + $0xe0] sm:$0xf]  ;;  %v11042_v34 = vld [vmem:[%s16224_s3 + $0xec] sm:$0xf0] }
 0x226   : > { %1158 = vmatmul.bf16.gmra.mxu2 %v8381_v25  ;;  %v8880_v25 = vld [vmem:[%s16224_s3 + $0x3c0] sm:$0xf]  ;;  %v8393_v36 = vor.u32 %v11042_v34, %v8392_v30  ;;  %v8481_v30 = vor.u32 %v11054_v14, %v8480_v13  ;;  %v11058_v13 = vld [vmem:[%s16224_s3 + $0x16c] sm:$0xf0] }
 0x227   : > { %1169 = vmatpush.bf16.msra.mxu3 %v11998_v46  ;;  %v8881_v39 = vor.u32 %v11134_v29, %v8880_v25 }
 0x228   : > { %v12002_v56 = vpop.f32.mrf.mxu0  ;;  %1114 = vmatmul.bf16.gmra.mxu1 %v8393_v36 }
 0x22b   : > { %1170 = vmatpush.bf16.msra.mxu3 %v12006_v59  ;;  %2410 = vmatmul.bf16.gmra.mxu0 %v8849_v55 }
 0x22f   : > { %1171 = vmatpush.bf16.msra.mxu3 %v12011_v61 }
 0x230   : > { %v12020_v0 = vpop.f32.mrf.mxu0 }
 0x231   : > { %v761_v50 = vadd.f32 %v11732_v18, %v12020_v0  ;;  %v8336_v0 = vld [vmem:[%s16224_s3 + $0x68] sm:$0xf] }
 0x233   : > { %1172 = vmatpush.bf16.msra.mxu3 %v12022_v31 }
 0x236   : > { %1163 = vmatmul.bf16.gmra.mxu2 %v8397_v1 }
 0x237   : > { %1173 = vmatpush.bf16.msra.mxu3 %v11907_v27 }
 0x238   : > { %v12038_v10 = vpop.f32.mrf.mxu0 }
 0x239   : > { %v764_v25 = vadd.f32 %v11732_v18, %v12038_v10  ;;  %v11142_v10 = vld [vmem:[%s16224_s3 + $0x40c] sm:$0xf0] }
 0x23a   : > { %v8953_v60 = vor.u32 %v11142_v10, %v8952_v45  ;;  %v8352_v45 = vld [vmem:[%s16224_s3 + $0x88] sm:$0xf]  ;;  %v11031_v10 = vld [vmem:[%s16224_s3 + $0x94] sm:$0xf0] }
 0x23b   : > { %1174 = vmatpush.bf16.msra.mxu3 %v11881_v2  ;;  %2415 = vmatmul.bf16.gmra.mxu0 %v8865_v9  ;;  %v11023_v9 = vld [vmem:[%s16224_s3 + $0x54] sm:$0xf0] }
 0x23c   : > { %v8321_v29 = vor.u32 %v11023_v9, %v8320_v6  ;;  %v11013_v6 = vld [vmem:[%s16224_s3 + $0xc] sm:$0xf]  ;;  %v8496_v9 = vld [vmem:[%s16224_s3 + $0x160] sm:$0xf] }
 0x23f   : > { %1175 = vmatpush.bf16.msra.mxu3 %v11860_v52 }
 0x240   : > { %v765_v19 = vpop.f32.mrf.mxu0 }
 0x241   : > { %v766_v34 = vadd.f32 %v11732_v18, %v765_v19  ;;  %v759_v19 = vadd.f32 %v11732_v18, %v12002_v56 }
 0x243   : > { %1176 = vmatpush.bf16.msra.mxu3 %v11844_v38  ;;  %v826_v56 = vmax.f32 %v759_v19, 0.0  ;;  %v11017_v19 = vld [vmem:[%s16224_s3 + $0x2c] sm:$0xf] }
 0x246   : > { %1177 = vmatmul.bf16.vlgmr.msra.gmra.mxu3 %v8289_v20  ;;  %1516 = vmatmul.bf16.vlgmr.msrb.gmra.mxu2 %v8449_v23 }
 0x247   : > { %1557 = vmatpush.bf16.msrb.mxu3 %v11826_v11 }
 0x248   : > { %v768_v41 = vpop.f32.mrf.mxu0 }
 0x249   : > { %v1129_v42 = vpop.f32.mrf.mxu2  ;;  %v769_v7 = vadd.f32 %v11732_v18, %v768_v41 }
 0x24a   : > { %v12092_v62 = vadd.f32 %v1129_v42, %v1080_v49  ;;  %v1085_v42 = vpop.f32.mrf.mxu1 }
 0x24b   : > { %1558 = vmatpush.bf16.msrb.mxu3 %v11832_v22  ;;  %2420 = vmatmul.bf16.gmra.mxu0 %v8881_v39  ;;  %v830_v36 = vmax.f32 %v769_v7, 0.0  ;;  %v8290_v7 = vld [vmem:[%s16224_s3 + $0x18] sm:$0xf0] }
 0x24f   : > { %1559 = vmatpush.bf16.msrb.mxu3 %v11836_v28 }
 0x250   : > { %v770_v51 = vpop.f32.mrf.mxu0 }
 0x251   : > { %v12083_v55 = vpop.f32.mrf.mxu2  ;;  %v771_v8 = vadd.f32 %v11732_v18, %v770_v51  ;;  %v828_v51 = vmax.f32 %v764_v25, 0.0 }
 0x253   : > { %1560 = vmatpush.bf16.msrb.mxu3 %v11840_v33  ;;  %v831_v39 = vmax.f32 %v771_v8, 0.0 }
 0x256   : > { %1182 = vmatmul.bf16.gmra.mxu3 %v8305_v57  ;;  %1521 = vmatmul.bf16.gmra.mxu2 %v8465_v58  ;;  %v829_v57 = vmax.f32 %v766_v34, 0.0  ;;  %v12136_v58 = vpack.c.bf16 %v831_v39, %v830_v36 }
 0x257   : > { %1561 = vmatpush.bf16.msrb.mxu3 %v11815_v53 }
 0x258   : > { %v773_v63 = vpop.f32.mrf.mxu0 }
 0x259   : > { %v1134_v1 = vpop.f32.mrf.mxu2  ;;  %v774_v4 = vadd.f32 %v11732_v18, %v773_v63  ;;  %v12143_v63 = vpack.c.bf16 %v829_v57, %v828_v51  ;;  %v8512_v57 = vld [vmem:[%s16224_s3 + $0x180] sm:$0xf] }
 0x25a   : > { %v12130_v47 = vadd.f32 %v1134_v1, %v1085_v42 }
 0x25b   : > { %1562 = vmatpush.bf16.msrb.mxu3 %v11806_v44  ;;  %2425 = vmatmul.bf16.gmra.mxu0 %v8897_v37  ;;  %v832_v17 = vmax.f32 %v774_v4, 0.0  ;;  %v827_v37 = vmax.f32 %v761_v50, 0.0  ;;  %v11027_v4 = vld [vmem:[%s16224_s3 + $0x74] sm:$0xf0]  ;;  %v8306_v50 = vld [vmem:[%s16224_s3 + $0x38] sm:$0xf0] }
 0x25d   : > { %v12154_v1 = vpack.c.bf16 %v827_v37, %v826_v56  ;;  %v8353_v56 = vor.u32 %v11031_v10, %v8352_v45  ;;  %v8309_v37 = vor.u32 %v11017_v19, %v8306_v50  ;;  %v8528_v45 = vld [vmem:[%s16224_s3 + $0x1a0] sm:$0xf]  ;;  %v11066_v10 = vld [vmem:[%s16224_s3 + $0x1ac] sm:$0xf0] }
 0x25f   : > { %1563 = vmatpush.bf16.msrb.mxu3 %v11797_v35 }
 0x260   : > { %v775_v15 = vpop.f32.mrf.mxu0 }
 0x261   : > { %v776_v20 = vadd.f32 %v11732_v18, %v775_v15  ;;  %v12115_v23 = vpop.f32.mrf.mxu2  ;;  %v12147_v18 = vpop.f32.mrf.mxu1  ;;  %v8337_v15 = vor.u32 %v11027_v4, %v8336_v0 }
 0x263   : > { %1564 = vmatpush.bf16.msrb.mxu3 %v11784_v26  ;;  %v833_v41 = vmax.f32 %v776_v20, 0.0  ;;  %v8497_v20 = vor.u32 %v11058_v13, %v8496_v9 }
 0x265   : > { %v12121_v43 = vpack.c.bf16 %v833_v41, %v832_v17  ;;  %v8293_v17 = vor.u32 %v11013_v6, %v8290_v7  ;;  %v8984_v6 = vld [vmem:[%s16224_s3 + $0x440] sm:$0xf]  ;;  %v11150_v7 = vld [vmem:[%s16224_s3 + $0x44c] sm:$0xf0] }
 0x266   : > { %1187 = vmatmul.bf16.gmra.mxu3 %v8321_v29  ;;  %1526 = vmatmul.bf16.gmra.mxu2 %v8481_v30  ;;  %v8968_v29 = vld [vmem:[%s16224_s3 + $0x420] sm:$0xf]  ;;  %v11146_v30 = vld [vmem:[%s16224_s3 + $0x42c] sm:$0xf0] }
 0x267   : > { %1945 = vmatpush.bf16.msra.mxu3 %v11762_v5  ;;  %1222 = vmatpush.bf16.msrb.mxu1 %v12121_v43  ;;  %v8969_v39 = vor.u32 %v11146_v30, %v8968_v29  ;;  %v11035_v29 = vld [vmem:[%s16224_s3 + $0xb4] sm:$0xf0]  ;;  %v11021_v30 = vld [vmem:[%s16224_s3 + $0x4c] sm:$0xf] }
 0x268   : > { %1659 = vmatpush.bf16.msra.mxu2 %v12121_v43  ;;  %v12140_v54 = vpop.f32.mrf.mxu0 }
 0x269   : > { %16247 = vst [vmem:[#allocation10_spill] sm:$0xff] %v12140_v54  ;;  %v1139_v49 = vpop.f32.mrf.mxu2  ;;  %v1090_v25 = vpop.f32.mrf.mxu1 }
 0x26a   : > { %v12191_v34 = vadd.f32 %v1139_v49, %v1090_v25  ;;  %v8368_v25 = vld [vmem:[%s16224_s3 + $0xa8] sm:$0xf] }
 0x26b   : > { %1946 = vmatpush.bf16.msra.mxu3 %v11769_v12  ;;  %1223 = vmatpush.bf16.msrb.mxu1 %v12136_v58  ;;  %v8369_v50 = vor.u32 %v11035_v29, %v8368_v25  ;;  %v11039_v29 = vld [vmem:[%s16224_s3 + $0xd4] sm:$0xf0] }
 0x26c   : > { %1660 = vmatpush.bf16.msra.mxu2 %v12136_v58  ;;  %2827 = vmatmul.bf16.vlgmr.msra.gmra.mxu0 %v8953_v60  ;;  %v11062_v60 = vld [vmem:[%s16224_s3 + $0x18c] sm:$0xf0] }
 0x26d   : > { %3693 = vmatpush.bf16.msra.mxu0 %v11762_v5  ;;  %v8513_v0 = vor.u32 %v11062_v60, %v8512_v57  ;;  %v8529_v60 = vor.u32 %v11066_v10, %v8528_v45  ;;  %v8544_v10 = vld [vmem:[%s16224_s3 + $0x1c0] sm:$0xf] }
 0x26f   : > { %1947 = vmatpush.bf16.msra.mxu3 %v11774_v16  ;;  %1224 = vmatpush.bf16.msrb.mxu1 %v12143_v63 }
 0x270   : > { %1661 = vmatpush.bf16.msra.mxu2 %v12143_v63  ;;  %v12167_v8 = vpop.f32.mrf.mxu0 }
 0x271   : > { %16248 = vst [vmem:[#allocation11_spill] sm:$0xff] %v12167_v8  ;;  %3694 = vmatpush.bf16.msra.mxu0 %v11769_v12  ;;  %v12176_v14 = vpop.f32.mrf.mxu2  ;;  %v12201_v42 = vpop.f32.mrf.mxu1  ;;  %v9048_v8 = vld [vmem:[%s16224_s3 + $0x4c0] sm:$0xf] }
 0x273   : > { %1948 = vmatpush.bf16.msra.mxu3 %v11779_v21  ;;  %1225 = vmatpush.bf16.msrb.mxu1 %v12154_v1 }
 0x274   : > { %1662 = vmatpush.bf16.msra.mxu2 %v12154_v1 }
 0x275   : > { %3695 = vmatpush.bf16.msra.mxu0 %v11774_v16 }
 0x276   : > { %1192 = vmatmul.bf16.gmra.mxu3 %v8337_v15  ;;  %8406 = vmatmul.msk.bf16.vlgmr.msrb.gmra.mxu1 %vm1046_vm0, %v8293_v17  ;;  %v8985_v15 = vor.u32 %v11150_v7, %v8984_v6 }
 0x277   : > { %1949 = vmatpush.bf16.msra.mxu3 %v11751_v48  ;;  %1606 = vmatpush.bf16.msra.mxu1 %v11998_v46 }
 0x278   : > { %2043 = vmatpush.bf16.msrb.mxu2 %v11998_v46  ;;  %v12196_v36 = vpop.f32.mrf.mxu0 }
 0x279   : > { %1531 = vmatmul.bf16.gmra.mxu2 %v8497_v20  ;;  %16249 = vst [vmem:[#allocation12_spill] sm:$0xff] %v12196_v36  ;;  %3696 = vmatpush.bf16.msra.mxu0 %v11779_v21  ;;  %v1144_v41 = vpop.f32.mrf.mxu2  ;;  %v1095_v4 = vpop.f32.mrf.mxu1 }
 0x27a   : > { %v12240_v9 = vadd.f32 %v1144_v41, %v1095_v4 }
 0x27b   : > { %1950 = vmatpush.bf16.msra.mxu3 %v11746_v40  ;;  %1607 = vmatpush.bf16.msra.mxu1 %v12006_v59 }
 0x27c   : > { %2044 = vmatpush.bf16.msrb.mxu2 %v12006_v59  ;;  %2832 = vmatmul.bf16.gmra.mxu0 %v8969_v39  ;;  %v8322_v39 = vld [vmem:[%s16224_s3 + $0x58] sm:$0xf0] }
 0x27d   : > { %3697 = vmatpush.bf16.msra.mxu0 %v11751_v48  ;;  %v8325_v57 = vor.u32 %v11021_v30, %v8322_v39  ;;  %v11025_v30 = vld [vmem:[%s16224_s3 + $0x6c] sm:$0xf]  ;;  %v8338_v39 = vld [vmem:[%s16224_s3 + $0x78] sm:$0xf0] }
 0x27f   : > { %1951 = vmatpush.bf16.msra.mxu3 %v11741_v32  ;;  %1608 = vmatpush.bf16.msra.mxu1 %v12011_v61 }
 0x280   : > { %2045 = vmatpush.bf16.msrb.mxu2 %v12011_v61  ;;  %v12219_v51 = vpop.f32.mrf.mxu0 }
 0x281   : > { %16250 = vst [vmem:[#allocation13_spill] sm:$0xff] %v12219_v51  ;;  %3698 = vmatpush.bf16.msra.mxu0 %v11746_v40  ;;  %v12229_v49 = vpop.f32.mrf.mxu2  ;;  %v12249_v20 = vpop.f32.mrf.mxu1 }
 0x283   : > { %1952 = vmatpush.bf16.msra.mxu3 %v11736_v24  ;;  %1609 = vmatpush.bf16.msra.mxu1 %v12022_v31 }
 0x284   : > { %2046 = vmatpush.bf16.msrb.mxu2 %v12022_v31 }
 0x285   : > { %3699 = vmatpush.bf16.msra.mxu0 %v11741_v32 }
 0x286   : > { %1197 = vmatmul.bf16.gmra.mxu3 %v8353_v56  ;;  %8407 = vmatmul.msk.bf16.gmra.mxu1 %vm1046_vm0, %v8309_v37  ;;  %v9000_v37 = vld [vmem:[%s16224_s3 + $0x460] sm:$0xf] }
 0x287   : > { %1610 = vmatpush.bf16.msra.mxu1 %v11907_v27 }
 0x288   : > { %2047 = vmatpush.bf16.msrb.mxu2 %v11907_v27  ;;  %v12244_v13 = vpop.f32.mrf.mxu0 }
 0x289   : > { %1536 = vmatmul.bf16.gmra.mxu2 %v8513_v0  ;;  %16251 = vst [vmem:[#allocation14_spill] sm:$0xff] %v12244_v13  ;;  %3700 = vmatpush.bf16.msra.mxu0 %v11736_v24  ;;  %v1149_v17 = vpop.f32.mrf.mxu2  ;;  %v1100_v56 = vpop.f32.mrf.mxu1  ;;  %v11154_v0 = vld [vmem:[%s16224_s3 + $0x46c] sm:$0xf0]  ;;  %v9032_v13 = vld [vmem:[%s16224_s3 + $0x4a0] sm:$0xf] }
 0x28a   : > { %v12284_v4 = vadd.f32 %v1149_v17, %v1100_v56  ;;  %v9001_v7 = vor.u32 %v11154_v0, %v9000_v37  ;;  %v8384_v17 = vld [vmem:[%s16224_s3 + $0xc8] sm:$0xf]  ;;  %v8341_v56 = vor.u32 %v11025_v30, %v8338_v39 }
 0x28b   : > { %1611 = vmatpush.bf16.msra.mxu1 %v11881_v2 }
 0x28c   : > { %2048 = vmatpush.bf16.msrb.mxu2 %v11881_v2  ;;  %2837 = vmatmul.bf16.gmra.mxu0 %v8985_v15 }
 0x28f   : > { %1612 = vmatpush.bf16.msra.mxu1 %v11860_v52 }
 0x290   : > { %2049 = vmatpush.bf16.msrb.mxu2 %v11860_v52  ;;  %v12265_v41 = vpop.f32.mrf.mxu0 }
 0x291   : > { %16252 = vst [vmem:[#allocation15_spill] sm:$0xff] %v12265_v41  ;;  %v12274_v19 = vpop.f32.mrf.mxu2  ;;  %v12290_v25 = vpop.f32.mrf.mxu1 }
 0x293   : > { %1613 = vmatpush.bf16.msra.mxu1 %v11844_v38 }
 0x294   : > { %2050 = vmatpush.bf16.msrb.mxu2 %v11844_v38 }
 0x296   : > { %1202 = vmatmul.bf16.gmra.mxu3 %v8369_v50  ;;  %8408 = vmatmul.msk.bf16.gmra.mxu1 %vm1046_vm0, %v8325_v57  ;;  %v11070_v50 = vld [vmem:[%s16224_s3 + $0x1cc] sm:$0xf0] }
 0x297   : > { %1994 = vmatpush.bf16.msrb.mxu1 %v11826_v11  ;;  %v8545_v37 = vor.u32 %v11070_v50, %v8544_v10  ;;  %v11043_v10 = vld [vmem:[%s16224_s3 + $0xf4] sm:$0xf0]  ;;  %v8354_v50 = vld [vmem:[%s16224_s3 + $0x98] sm:$0xf0] }
 0x298   : > { %v12287_v6 = vpop.f32.mrf.mxu0 }
 0x299   : > { %1541 = vmatmul.bf16.gmra.mxu2 %v8529_v60  ;;  %16253 = vst [vmem:[#allocation16_spill] sm:$0xff] %v12287_v6  ;;  %v1154_v15 = vpop.f32.mrf.mxu2  ;;  %v8385_v60 = vor.u32 %v11039_v29, %v8384_v17  ;;  %v1105_v0 = vpop.f32.mrf.mxu1 }
 0x29a   : > { %v12323_v6 = vadd.f32 %v1154_v15, %v1105_v0  ;;  %v8400_v15 = vld [vmem:[%s16224_s3 + $0xe8] sm:$0xf] }
 0x29b   : > { %1995 = vmatpush.bf16.msrb.mxu1 %v11832_v22 }
 0x29c   : > { %2842 = vmatmul.bf16.gmra.mxu0 %v9001_v7  ;;  %v9016_v7 = vld [vmem:[%s16224_s3 + $0x480] sm:$0xf] }
 0x29f   : > { %1996 = vmatpush.bf16.msrb.mxu1 %v11836_v28 }
 0x2a0   : > { %v12305_v45 = vpop.f32.mrf.mxu0 }
 0x2a1   : > { %16254 = vst [vmem:[#allocation17_spill] sm:$0xff] %v12305_v45  ;;  %v12313_v57 = vpop.f32.mrf.mxu2  ;;  %v11158_v45 = vld [vmem:[%s16224_s3 + $0x48c] sm:$0xf0]  ;;  %v12329_v39 = vpop.f32.mrf.mxu1 }
 0x2a2   : > { %v9017_v29 = vor.u32 %v11158_v45, %v9016_v7  ;;  %v11029_v45 = vld [vmem:[%s16224_s3 + $0x8c] sm:$0xf]  ;;  %v8401_v7 = vor.u32 %v11043_v10, %v8400_v15 }
 0x2a3   : > { %1997 = vmatpush.bf16.msrb.mxu1 %v11840_v33 }
 0x2a6   : > { %1207 = vmatmul.bf16.gmra.mxu3 %v8385_v60  ;;  %8409 = vmatmul.msk.bf16.gmra.mxu1 %vm1046_vm0, %v8341_v56  ;;  %v8560_v56 = vld [vmem:[%s16224_s3 + $0x1e0] sm:$0xf] }
 0x2a7   : > { %1998 = vmatpush.bf16.msrb.mxu1 %v11815_v53 }
 0x2a8   : > { %v12326_v17 = vpop.f32.mrf.mxu0 }
 0x2a9   : > { %1546 = vmatmul.bf16.gmra.mxu2 %v8545_v37  ;;  %16255 = vst [vmem:[#allocation18_spill] sm:$0xff] %v12326_v17  ;;  %v1159_v30 = vpop.f32.mrf.mxu2  ;;  %v11074_v37 = vld [vmem:[%s16224_s3 + $0x1ec] sm:$0xf0]  ;;  %v1110_v41 = vpop.f32.mrf.mxu1 }
 0x2aa   : > { %v8561_v17 = vor.u32 %v11074_v37, %v8560_v56  ;;  %v12360_v51 = vadd.f32 %v1159_v30, %v1110_v41  ;;  %v8370_v41 = vld [vmem:[%s16224_s3 + $0xb8] sm:$0xf0]  ;;  %v11044_v30 = vld [vmem:[%s16224_s3 + $0x104] sm:$0xf] }
 0x2ab   : > { %1999 = vmatpush.bf16.msrb.mxu1 %v11806_v44  ;;  %v8458_v56 = vld [vmem:[%s16224_s3 + $0x118] sm:$0xf0] }
 0x2ac   : > { %2847 = vmatmul.bf16.gmra.mxu0 %v9017_v29  ;;  %v8357_v29 = vor.u32 %v11029_v45, %v8354_v50  ;;  %v11033_v50 = vld [vmem:[%s16224_s3 + $0xac] sm:$0xf] }
 0x2af   : > { %2000 = vmatpush.bf16.msrb.mxu1 %v11797_v35 }
 0x2b0   : > { %v12344_v60 = vpop.f32.mrf.mxu0 }
 0x2b1   : > { %16256 = vst [vmem:[#allocation19_spill] sm:$0xff] %v12344_v60  ;;  %v12352_v0 = vpop.f32.mrf.mxu2  ;;  %v11162_v60 = vld [vmem:[%s16224_s3 + $0x4ac] sm:$0xf0]  ;;  %v12365_v45 = vpop.f32.mrf.mxu1 }
 0x2b2   : > { %v9033_v15 = vor.u32 %v11162_v60, %v9032_v13  ;;  %v8450_v13 = vld [vmem:[%s16224_s3 + $0x110] sm:$0xf0]  ;;  %v11045_v60 = vld [vmem:[%s16224_s3 + $0x10c] sm:$0xf] }
 0x2b3   : > { %2001 = vmatpush.bf16.msrb.mxu1 %v11784_v26 }
 0x2b6   : > { %1212 = vmatmul.bf16.gmra.mxu3 %v8401_v7  ;;  %8410 = vmatmul.msk.bf16.gmra.mxu1 %vm1046_vm0, %v8357_v29  ;;  %v8373_v7 = vor.u32 %v11033_v50, %v8370_v41  ;;  %v8453_v29 = vor.u32 %v11044_v30, %v8450_v13 }
 0x2b8   : > { %v12363_v36 = vpop.f32.mrf.mxu0 }
 0x2b9   : > { %1551 = vmatmul.bf16.gmra.mxu2 %v8561_v17  ;;  %16257 = vst [vmem:[#allocation20_spill] sm:$0xff] %v12363_v36  ;;  %v1164_v10 = vpop.f32.mrf.mxu2  ;;  %v1115_v36 = vpop.f32.mrf.mxu1 }
 0x2ba   : > { %v12395_v54 = vadd.f32 %v1164_v10, %v1115_v36  ;;  %v11037_v36 = vld [vmem:[%s16224_s3 + $0xcc] sm:$0xf]  ;;  %v8386_v10 = vld [vmem:[%s16224_s3 + $0xd8] sm:$0xf0] }
 0x2bc   : > { %2852 = vmatmul.bf16.gmra.mxu0 %v9033_v15  ;;  %v8461_v15 = vor.u32 %v11045_v60, %v8458_v56  ;;  %16260 = vst [vmem:[#allocation23_spill] sm:$0xff] %v12395_v54  ;;  %v11049_v56 = vld [vmem:[%s16224_s3 + $0x12c] sm:$0xf] }
 0x2c0   : > { %v12379_v17 = vpop.f32.mrf.mxu0 }
 0x2c1   : > { %16258 = vst [vmem:[#allocation21_spill] sm:$0xff] %v12379_v17  ;;  %v12387_v37 = vpop.f32.mrf.mxu2  ;;  %v11166_v17 = vld [vmem:[%s16224_s3 + $0x4cc] sm:$0xf0] }
 0x2c2   : > { %16259 = vst [vmem:[#allocation22_spill] sm:$0xff] %v12387_v37  ;;  %v9049_v41 = vor.u32 %v11166_v17, %v9048_v8  ;;  %v11048_v8 = vld [vmem:[%s16224_s3 + $0x124] sm:$0xf]  ;;  %v8466_v17 = vld [vmem:[%s16224_s3 + $0x130] sm:$0xf0] }
 0x2c3   : > { %v11170_v37 = vld [vmem:[%s16224_s3 + $0x4ec] sm:$0xf0] }
 0x2c6   : > { %8411 = vmatmul.msk.bf16.gmra.mxu1 %vm1046_vm0, %v8373_v7  ;;  %1565 = vmatmul.bf16.vlgmr.msrb.gmra.mxu3 %v8453_v29  ;;  %v8474_v7 = vld [vmem:[%s16224_s3 + $0x138] sm:$0xf0] }
 0x2c7   : > { %11588 = vmatpush.bf16.msrb.mxu3 %v11998_v46 }
 0x2c8   : > { %v12401_v50 = vpop.f32.mrf.mxu0 }
 0x2c9   : > { %8574 = vmatmul.msk.bf16.vlgmr.msra.gmra.mxu2 %vm1046_vm0, %v8461_v15  ;;  %16261 = vst [vmem:[#allocation24_spill] sm:$0xff] %v12401_v50  ;;  %v12403_v30 = vpop.f32.mrf.mxu3  ;;  %v12405_v13 = vpop.f32.mrf.mxu2  ;;  %v8469_v50 = vor.u32 %v11048_v8, %v8466_v17 }
 0x2ca   : > { %2480 = vmatpush.bf16.msra.mxu2 %v11998_v46  ;;  %16262 = vst [vmem:[#allocation25_spill] sm:$0xff] %v12405_v13  ;;  %v8477_v13 = vor.u32 %v11049_v56, %v8474_v7  ;;  %v11053_v7 = vld [vmem:[%s16224_s3 + $0x14c] sm:$0xf] }
 0x2cb   : > { %11589 = vmatpush.bf16.msrb.mxu3 %v12006_v59 }
 0x2cc   : > { %2857 = vmatmul.bf16.gmra.mxu0 %v9049_v41  ;;  %v8389_v41 = vor.u32 %v11037_v36, %v8386_v10 }
 0x2ce   : > { %2481 = vmatpush.bf16.msra.mxu2 %v12006_v59 }
 0x2cf   : > { %11590 = vmatpush.bf16.msrb.mxu3 %v12011_v61 }
 0x2d0   : > { %v12423_v60 = vpop.f32.mrf.mxu0 }
 0x2d1   : > { %16263 = vst [vmem:[#allocation26_spill] sm:$0xff] %v12423_v60  ;;  %v12431_v29 = vpop.f32.mrf.mxu3  ;;  %v12433_v15 = vpop.f32.mrf.mxu2  ;;  %v9064_v60 = vld [vmem:[%s16224_s3 + $0x4e0] sm:$0xf] }
 0x2d2   : > { %2482 = vmatpush.bf16.msra.mxu2 %v12011_v61  ;;  %16264 = vst [vmem:[#allocation27_spill] sm:$0xff] %v12433_v15  ;;  %v9065_v10 = vor.u32 %v11170_v37, %v9064_v60  ;;  %v11052_v37 = vld [vmem:[%s16224_s3 + $0x144] sm:$0xf]  ;;  %v8482_v60 = vld [vmem:[%s16224_s3 + $0x150] sm:$0xf0] }
 0x2d3   : > { %11591 = vmatpush.bf16.msrb.mxu3 %v12022_v31  ;;  %v8485_v15 = vor.u32 %v11052_v37, %v8482_v60 }
 0x2d6   : > { %2483 = vmatpush.bf16.msra.mxu2 %v12022_v31  ;;  %8412 = vmatmul.msk.bf16.gmra.mxu1 %vm1046_vm0, %v8389_v41  ;;  %v8490_v41 = vld [vmem:[%s16224_s3 + $0x158] sm:$0xf0] }
 0x2d7   : > { %1570 = vmatmul.bf16.gmra.mxu3 %v8469_v50  ;;  %v11041_v50 = vld [vmem:[%s16224_s3 + $0xec] sm:$0xf]  ;;  %v8493_v54 = vor.u32 %v11053_v7, %v8490_v41  ;;  %v11056_v41 = vld [vmem:[%s16224_s3 + $0x164] sm:$0xf] }
 0x2d8   : > { %11592 = vmatpush.bf16.msrb.mxu3 %v11907_v27  ;;  %v12447_v36 = vpop.f32.mrf.mxu0 }
 0x2d9   : > { %8575 = vmatmul.msk.bf16.gmra.mxu2 %vm1046_vm0, %v8477_v13  ;;  %16265 = vst [vmem:[#allocation28_spill] sm:$0xff] %v12447_v36  ;;  %v12449_v8 = vpop.f32.mrf.mxu3  ;;  %v12451_v17 = vpop.f32.mrf.mxu2  ;;  %v8402_v13 = vld [vmem:[%s16224_s3 + $0xf8] sm:$0xf0] }
 0x2da   : > { %2484 = vmatpush.bf16.msra.mxu2 %v11907_v27  ;;  %16266 = vst [vmem:[#allocation29_spill] sm:$0xff] %v12451_v17  ;;  %v8405_v17 = vor.u32 %v11041_v50, %v8402_v13  ;;  %v12491_v50 = vpop.f32.mrf.mxu1 }
 0x2db   : > { %16269 = vst [vmem:[#allocation32_spill] sm:$0xff] %v12491_v50 }
 0x2dc   : > { %11593 = vmatpush.bf16.msrb.mxu3 %v11881_v2  ;;  %2862 = vmatmul.bf16.gmra.mxu0 %v9065_v10 }
 0x2de   : > { %2485 = vmatpush.bf16.msra.mxu2 %v11881_v2 }
 0x2e0   : > { %11594 = vmatpush.bf16.msrb.mxu3 %v11860_v52  ;;  %v12469_v56 = vpop.f32.mrf.mxu0 }
 0x2e1   : > { %16267 = vst [vmem:[#allocation30_spill] sm:$0xff] %v12469_v56  ;;  %v12477_v10 = vpop.f32.mrf.mxu3  ;;  %v12479_v36 = vpop.f32.mrf.mxu2  ;;  %v9120_v56 = vld [vmem:[%s16224_s3 + $0x500] sm:$0xf] }
 0x2e2   : > { %2486 = vmatpush.bf16.msra.mxu2 %v11860_v52  ;;  %16268 = vst [vmem:[#allocation31_spill] sm:$0xff] %v12479_v36  ;;  %v11174_v52 = vld [vmem:[%s16224_s3 + $0x50c] sm:$0xf0] }
 0x2e3   : > { %v9121_v13 = vor.u32 %v11174_v52, %v9120_v56  ;;  %v8456_v52 = vld [vmem:[%s16224_s3 + $0x108] sm:$0xf]  ;;  %v8506_v56 = vld [vmem:[%s16224_s3 + $0x178] sm:$0xf0] }
 0x2e4   : > { %11595 = vmatpush.bf16.msrb.mxu3 %v11844_v38 }
 0x2e6   : > { %2487 = vmatpush.bf16.msra.mxu2 %v11844_v38  ;;  %8413 = vmatmul.msk.bf16.gmra.mxu1 %vm1046_vm0, %v8405_v17  ;;  %v11057_v17 = vld [vmem:[%s16224_s3 + $0x16c] sm:$0xf] }
 0x2e7   : > { %1575 = vmatmul.bf16.gmra.mxu3 %v8485_v15  ;;  %v11047_v15 = vld [vmem:[%s16224_s3 + $0x114] sm:$0xf0]  ;;  %v8509_v2 = vor.u32 %v11057_v17, %v8506_v56 }
 0x2e8   : > { %v8457_v50 = vor.u32 %v11047_v15, %v8456_v52  ;;  %v8522_v15 = vld [vmem:[%s16224_s3 + $0x198] sm:$0xf0] }
 0x2e9   : > { %8576 = vmatmul.msk.bf16.gmra.mxu2 %vm1046_vm0, %v8493_v54  ;;  %v12493_v37 = vpop.f32.mrf.mxu0  ;;  %v12495_v60 = vpop.f32.mrf.mxu3  ;;  %v8498_v54 = vld [vmem:[%s16224_s3 + $0x170] sm:$0xf0] }
 0x2ea   : > { %16270 = vst [vmem:[#allocation33_spill] sm:$0xff] %v12493_v37  ;;  %v12497_v7 = vpop.f32.mrf.mxu2 }
 0x2eb   : > { %16271 = vst [vmem:[#allocation34_spill] sm:$0xff] %v12497_v7  ;;  %v1179_v7 = vadd.f32 %v12403_v30, %v12092_v62  ;;  %v1132_v62 = vadd.f32 %v12083_v55, %v12096_v3  ;;  %v8514_v55 = vld [vmem:[%s16224_s3 + $0x190] sm:$0xf0]  ;;  %v8472_v3 = vld [vmem:[%s16224_s3 + $0x128] sm:$0xf] }
 0x2ec   : > { %3264 = vmatmul.bf16.vlgmr.msrb.gmra.mxu0 %v9121_v13 }
 0x2ed   : > { %4130 = vmatpush.bf16.msrb.mxu0 %v11762_v5  ;;  %v8501_v5 = vor.u32 %v11056_v41, %v8498_v54  ;;  %v1181_v54 = vadd.f32 %v12431_v29, %v1132_v62  ;;  %v11051_v29 = vld [vmem:[%s16224_s3 + $0x134] sm:$0xf0] }
 0x2f1   : > { %4131 = vmatpush.bf16.msrb.mxu0 %v11769_v12  ;;  %v12519_v13 = vpop.f32.mrf.mxu0  ;;  %v12521_v37 = vpop.f32.mrf.mxu3  ;;  %v9136_v12 = vld [vmem:[%s16224_s3 + $0x520] sm:$0xf] }
 0x2f2   : > { %16272 = vst [vmem:[#allocation35_spill] sm:$0xff] %v12519_v13  ;;  %v12525_v36 = vpop.f32.mrf.mxu2  ;;  %v11178_v13 = vld [vmem:[%s16224_s3 + $0x52c] sm:$0xf0] }
 0x2f3   : > { %v1227_v38 = vpop.f32.mrf.mxu1 }
 0x2f4   : > { %v1228_v27 = vadd.f32 %v1227_v38, %v1179_v7  ;;  %v9137_v38 = vor.u32 %v11178_v13, %v9136_v12  ;;  %v11060_v12 = vld [vmem:[%s16224_s3 + $0x184] sm:$0xf]  ;;  %v1184_v13 = vadd.f32 %v12449_v8, %v12130_v47  ;;  %v1137_v47 = vadd.f32 %v12115_v23, %v12147_v18 }
 0x2f5   : > { %4132 = vmatpush.bf16.msrb.mxu0 %v11774_v16 }
 0x2f6   : > { %v1267_v30 = vpack.c.bf16 %v1228_v27, %v1228_v27  ;;  %1614 = vmatmul.bf16.vlgmr.msra.gmra.mxu1 %v8457_v50  ;;  %v11061_v50 = vld [vmem:[%s16224_s3 + $0x18c] sm:$0xf] }
 0x2f7   : > { %1580 = vmatmul.bf16.gmra.mxu3 %v8501_v5  ;;  %2431 = vmatpush.bf16.msra.mxu1 %v11826_v11 }
 0x2f8   : > { %1283 = vst [vmem:[#allocation2] sm:$0xf] %v1267_v30  ;;  %v8517_v30 = vor.u32 %v11060_v12, %v8514_v55 }
 0x2f9   : > { %8577 = vmatmul.msk.bf16.gmra.mxu2 %vm1046_vm0, %v8509_v2  ;;  %4133 = vmatpush.bf16.msrb.mxu0 %v11779_v21  ;;  %v12539_v7 = vpop.f32.mrf.mxu0  ;;  %v12541_v41 = vpop.f32.mrf.mxu3 }
 0x2fa   : > { %16273 = vst [vmem:[#allocation36_spill] sm:$0xff] %v12539_v7  ;;  %v16294_v7 = vld [vmem:[#allocation22_spill] sm:$0xff] }
 0x2fb   : > { %2432 = vmatpush.bf16.msra.mxu1 %v11832_v22  ;;  %v1229_v5 = vpop.f32.mrf.mxu1 }
 0x2fc   : > { %v12544_v52 = vpop.f32.mrf.mxu2  ;;  %v1230_v27 = vadd.f32 %v1229_v5, %v1181_v54  ;;  %3269 = vmatmul.bf16.gmra.mxu0 %v9137_v38  ;;  %v8473_v38 = vor.u32 %v11051_v29, %v8472_v3  ;;  %v8525_v5 = vor.u32 %v11061_v50, %v8522_v15  ;;  %v1186_v29 = vadd.f32 %v12477_v10, %v1137_v47  ;;  %v8488_v10 = vld [vmem:[%s16224_s3 + $0x148] sm:$0xf] }
 0x2fd   : > { %4134 = vmatpush.bf16.msrb.mxu0 %v11751_v48 }
 0x2fe   : > { %v1268_v2 = vpack.c.bf16 %v1230_v27, %v1230_v27 }
 0x2ff   : > { %2433 = vmatpush.bf16.msra.mxu1 %v11836_v28 }
 0x300   : > { %1284 = vst [vmem:[#allocation2 + $0x24] sm:$0xf] %v1268_v2  ;;  %v9152_v2 = vld [vmem:[%s16224_s3 + $0x540] sm:$0xf] }
 0x301   : > { %4135 = vmatpush.bf16.msrb.mxu0 %v11746_v40  ;;  %v12568_v17 = vpop.f32.mrf.mxu0  ;;  %v12570_v56 = vpop.f32.mrf.mxu3 }
 0x302   : > { %16274 = vst [vmem:[#allocation37_spill] sm:$0xff] %v12568_v17  ;;  %v11182_v17 = vld [vmem:[%s16224_s3 + $0x54c] sm:$0xf0] }
 0x303   : > { %2434 = vmatpush.bf16.msra.mxu1 %v11840_v33  ;;  %v1232_v54 = vpop.f32.mrf.mxu1  ;;  %v9153_v12 = vor.u32 %v11182_v17, %v9152_v2  ;;  %v11064_v17 = vld [vmem:[%s16224_s3 + $0x1a4] sm:$0xf]  ;;  %v1189_v2 = vadd.f32 %v12495_v60, %v12191_v34  ;;  %v1142_v34 = vadd.f32 %v12176_v14, %v12201_v42  ;;  %v8546_v42 = vld [vmem:[%s16224_s3 + $0x1d0] sm:$0xf0] }
 0x304   : > { %v12574_v62 = vpop.f32.mrf.mxu2  ;;  %v1233_v27 = vadd.f32 %v1232_v54, %v1184_v13  ;;  %v8530_v13 = vld [vmem:[%s16224_s3 + $0x1b0] sm:$0xf0]  ;;  %v8538_v54 = vld [vmem:[%s16224_s3 + $0x1b8] sm:$0xf0]  ;;  %v11068_v14 = vld [vmem:[%s16224_s3 + $0x1c4] sm:$0xf] }
 0x305   : > { %4136 = vmatpush.bf16.msrb.mxu0 %v11741_v32 }
 0x306   : > { %v1269_v8 = vpack.c.bf16 %v1233_v27, %v1233_v27  ;;  %1619 = vmatmul.bf16.gmra.mxu1 %v8473_v38  ;;  %v11065_v38 = vld [vmem:[%s16224_s3 + $0x1ac] sm:$0xf] }
 0x307   : > { %1585 = vmatmul.bf16.gmra.mxu3 %v8517_v30  ;;  %2435 = vmatpush.bf16.msra.mxu1 %v11815_v53  ;;  %v11055_v30 = vld [vmem:[%s16224_s3 + $0x154] sm:$0xf0] }
 0x308   : > { %1285 = vst [vmem:[#allocation2 + $0x48] sm:$0xf] %v1269_v8  ;;  %v8533_v8 = vor.u32 %v11064_v17, %v8530_v13 }
 0x309   : > { %8578 = vmatmul.msk.bf16.gmra.mxu2 %vm1046_vm0, %v8525_v5  ;;  %4137 = vmatpush.bf16.msrb.mxu0 %v11736_v24  ;;  %v12589_v55 = vpop.f32.mrf.mxu0  ;;  %v12591_v3 = vpop.f32.mrf.mxu3 }
 0x30a   : > { %16275 = vst [vmem:[#allocation38_spill] sm:$0xff] %v12589_v55 }
 0x30b   : > { %2436 = vmatpush.bf16.msra.mxu1 %v11806_v44  ;;  %v1234_v23 = vpop.f32.mrf.mxu1 }
 0x30c   : > { %v12594_v50 = vpop.f32.mrf.mxu2  ;;  %v1235_v18 = vadd.f32 %v1234_v23, %v1186_v29  ;;  %3274 = vmatmul.bf16.gmra.mxu0 %v9153_v12  ;;  %v8489_v12 = vor.u32 %v11055_v30, %v8488_v10  ;;  %v8541_v23 = vor.u32 %v11065_v38, %v8538_v54  ;;  %v1191_v30 = vadd.f32 %v12521_v37, %v1142_v34  ;;  %v11059_v37 = vld [vmem:[%s16224_s3 + $0x174] sm:$0xf0] }
 0x30e   : > { %v1270_v15 = vpack.c.bf16 %v1235_v18, %v1235_v18 }
 0x30f   : > { %2437 = vmatpush.bf16.msra.mxu1 %v11797_v35 }
 0x310   : > { %1286 = vst [vmem:[#allocation2 + $0x6c] sm:$0xf] %v1270_v15  ;;  %v9168_v15 = vld [vmem:[%s16224_s3 + $0x560] sm:$0xf] }
 0x311   : > { %v12616_v5 = vpop.f32.mrf.mxu0  ;;  %v12618_v27 = vpop.f32.mrf.mxu3 }
 0x312   : > { %16276 = vst [vmem:[#allocation39_spill] sm:$0xff] %v12616_v5  ;;  %v11186_v5 = vld [vmem:[%s16224_s3 + $0x56c] sm:$0xf0] }
 0x313   : > { %2438 = vmatpush.bf16.msra.mxu1 %v11784_v26  ;;  %v1237_v29 = vpop.f32.mrf.mxu1  ;;  %v9169_v17 = vor.u32 %v11186_v5, %v9168_v15  ;;  %v8504_v5 = vld [vmem:[%s16224_s3 + $0x168] sm:$0xf]  ;;  %v1194_v15 = vadd.f32 %v12541_v41, %v12240_v9 }
 0x314   : > { %v12622_v47 = vpop.f32.mrf.mxu2  ;;  %v1238_v18 = vadd.f32 %v1237_v29, %v1189_v2 }
 0x316   : > { %v1271_v60 = vpack.c.bf16 %v1238_v18, %v1238_v18  ;;  %1624 = vmatmul.bf16.gmra.mxu1 %v8489_v12  ;;  %v8554_v12 = vld [vmem:[%s16224_s3 + $0x1d8] sm:$0xf0] }
 0x317   : > { %1590 = vmatmul.bf16.gmra.mxu3 %v8533_v8  ;;  %v11069_v8 = vld [vmem:[%s16224_s3 + $0x1cc] sm:$0xf] }
 0x318   : > { %1287 = vst [vmem:[#allocation2 + $0x90] sm:$0xf] %v1271_v60  ;;  %v8549_v60 = vor.u32 %v11068_v14, %v8546_v42 }
 0x319   : > { %8579 = vmatmul.msk.bf16.gmra.mxu2 %vm1046_vm0, %v8541_v23  ;;  %v12634_v13 = vpop.f32.mrf.mxu0  ;;  %v12636_v10 = vpop.f32.mrf.mxu3 }
 0x31a   : > { %16277 = vst [vmem:[#allocation40_spill] sm:$0xff] %v12634_v13  ;;  %v1147_v13 = vadd.f32 %v12229_v49, %v12249_v20  ;;  %v11072_v49 = vld [vmem:[%s16224_s3 + $0x1e4] sm:$0xf]  ;;  %v8562_v20 = vld [vmem:[%s16224_s3 + $0x1f0] sm:$0xf0] }
 0x31b   : > { %v1239_v54 = vpop.f32.mrf.mxu1 }
 0x31c   : > { %v12639_v38 = vpop.f32.mrf.mxu2  ;;  %v1240_v2 = vadd.f32 %v1239_v54, %v1191_v30  ;;  %3279 = vmatmul.bf16.gmra.mxu0 %v9169_v17  ;;  %v8505_v17 = vor.u32 %v11059_v37, %v8504_v5  ;;  %v8557_v54 = vor.u32 %v11069_v8, %v8554_v12  ;;  %v1196_v42 = vadd.f32 %v12570_v56, %v1147_v13  ;;  %v11063_v56 = vld [vmem:[%s16224_s3 + $0x194] sm:$0xf0]  ;;  %v11073_v13 = vld [vmem:[%s16224_s3 + $0x1ec] sm:$0xf] }
 0x31e   : > { %v1272_v29 = vpack.c.bf16 %v1240_v2, %v1240_v2 }
 0x320   : > { %1288 = vst [vmem:[#allocation2 + $0xb4] sm:$0xf] %v1272_v29  ;;  %v9184_v29 = vld [vmem:[%s16224_s3 + $0x580] sm:$0xf] }
 0x321   : > { %v12659_v23 = vpop.f32.mrf.mxu0  ;;  %v12661_v18 = vpop.f32.mrf.mxu3 }
 0x322   : > { %16278 = vst [vmem:[#allocation41_spill] sm:$0xff] %v12659_v23  ;;  %v11190_v23 = vld [vmem:[%s16224_s3 + $0x58c] sm:$0xf0] }
 0x323   : > { %v1242_v30 = vpop.f32.mrf.mxu1  ;;  %v9185_v9 = vor.u32 %v11190_v23, %v9184_v29  ;;  %v8570_v23 = vld [vmem:[%s16224_s3 + $0x1f8] sm:$0xf0] }
 0x324   : > { %v12665_v34 = vpop.f32.mrf.mxu2  ;;  %v1243_v2 = vadd.f32 %v1242_v30, %v1194_v15 }
 0x326   : > { %v1273_v55 = vpack.c.bf16 %v1243_v2, %v1243_v2  ;;  %1629 = vmatmul.bf16.gmra.mxu1 %v8505_v17  ;;  %v1199_v17 = vadd.f32 %v12591_v3, %v12284_v4 }
 0x327   : > { %1595 = vmatmul.bf16.gmra.mxu3 %v8549_v60 }
 0x328   : > { %1289 = vst [vmem:[#allocation2 + $0xd8] sm:$0xf] %v1273_v55  ;;  %v8520_v55 = vld [vmem:[%s16224_s3 + $0x188] sm:$0xf] }
 0x329   : > { %8580 = vmatmul.msk.bf16.gmra.mxu2 %vm1046_vm0, %v8557_v54  ;;  %v12676_v41 = vpop.f32.mrf.mxu0  ;;  %v12678_v14 = vpop.f32.mrf.mxu3  ;;  %v8565_v54 = vor.u32 %v11072_v49, %v8562_v20  ;;  %v8521_v2 = vor.u32 %v11063_v56, %v8520_v55 }
 0x32a   : > { %16279 = vst [vmem:[#allocation42_spill] sm:$0xff] %v12676_v41  ;;  %v16293_v41 = vld [vmem:[#allocation32_spill] sm:$0xff] }
 0x32b   : > { %v1244_v37 = vpop.f32.mrf.mxu1 }
 0x32c   : > { %v12681_v5 = vpop.f32.mrf.mxu2  ;;  %v1245_v8 = vadd.f32 %v1244_v37, %v1196_v42  ;;  %3284 = vmatmul.bf16.gmra.mxu0 %v9185_v9  ;;  %v8573_v9 = vor.u32 %v11073_v13, %v8570_v23  ;;  %v9200_v37 = vld [vmem:[%s16224_s3 + $0x5a0] sm:$0xf] }
 0x32e   : > { %v1274_v12 = vpack.c.bf16 %v1245_v8, %v1245_v8  ;;  %v11194_v8 = vld [vmem:[%s16224_s3 + $0x5ac] sm:$0xf0] }
 0x32f   : > { %v9201_v4 = vor.u32 %v11194_v8, %v9200_v37 }
 0x330   : > { %1290 = vst [vmem:[#allocation2 + $0xfc] sm:$0xf] %v1274_v12  ;;  %v1152_v12 = vadd.f32 %v12274_v19, %v12290_v25  ;;  %v8536_v19 = vld [vmem:[%s16224_s3 + $0x1a8] sm:$0xf]  ;;  %v11067_v25 = vld [vmem:[%s16224_s3 + $0x1b4] sm:$0xf0] }
 0x331   : > { %v12701_v15 = vpop.f32.mrf.mxu0  ;;  %v12703_v60 = vpop.f32.mrf.mxu3  ;;  %v8537_v37 = vor.u32 %v11067_v25, %v8536_v19 }
 0x332   : > { %16280 = vst [vmem:[#allocation43_spill] sm:$0xff] %v12701_v15  ;;  %v1201_v20 = vadd.f32 %v12618_v27, %v1152_v12  ;;  %v11078_v27 = vld [vmem:[%s16224_s3 + $0x20c] sm:$0xf0] }
 0x333   : > { %v1247_v29 = vpop.f32.mrf.mxu1 }
 0x334   : > { %v12707_v30 = vpop.f32.mrf.mxu2  ;;  %v1248_v42 = vadd.f32 %v1247_v29, %v1199_v17  ;;  %v8624_v17 = vld [vmem:[%s16224_s3 + $0x208] sm:$0xf] }
 0x336   : > { %v1275_v15 = vpack.c.bf16 %v1248_v42, %v1248_v42  ;;  %1634 = vmatmul.bf16.gmra.mxu1 %v8521_v2 }
 0x337   : > { %1600 = vmatmul.bf16.gmra.mxu3 %v8565_v54  ;;  %v11079_v54 = vld [vmem:[%s16224_s3 + $0x214] sm:$0xf0] }
 0x338   : > { %1291 = vst [vmem:[#allocation2 + $0x120] sm:$0xf] %v1275_v15  ;;  %v8616_v15 = vld [vmem:[%s16224_s3 + $0x200] sm:$0xf] }
 0x339   : > { %8581 = vmatmul.msk.bf16.gmra.mxu2 %vm1046_vm0, %v8573_v9  ;;  %v12718_v3 = vpop.f32.mrf.mxu0  ;;  %v12720_v49 = vpop.f32.mrf.mxu3  ;;  %v1204_v9 = vadd.f32 %v12636_v10, %v12323_v6  ;;  %v8617_v8 = vor.u32 %v11078_v27, %v8616_v15 }
 0x33a   : > { %16281 = vst [vmem:[#allocation44_spill] sm:$0xff] %v12718_v3  ;;  %v9288_v3 = vld [vmem:[%s16224_s3 + $0x600] sm:$0xf] }
 0x33b   : > { %v1249_v56 = vpop.f32.mrf.mxu1 }
 0x33c   : > { %v12723_v55 = vpop.f32.mrf.mxu2  ;;  %v1250_v13 = vadd.f32 %v1249_v56, %v1201_v20  ;;  %3289 = vmatmul.bf16.gmra.mxu0 %v9201_v4  ;;  %v8625_v4 = vor.u32 %v11079_v54, %v8624_v17  ;;  %v9216_v56 = vld [vmem:[%s16224_s3 + $0x5c0] sm:$0xf]  ;;  %v8552_v17 = vld [vmem:[%s16224_s3 + $0x1c8] sm:$0xf] }
 0x33d   : > { %v8632_v54 = vld [vmem:[%s16224_s3 + $0x220] sm:$0xf] }
 0x33e   : > { %v1276_v23 = vpack.c.bf16 %v1250_v13, %v1250_v13  ;;  %v11198_v13 = vld [vmem:[%s16224_s3 + $0x5cc] sm:$0xf0] }
 0x33f   : > { %v9217_v6 = vor.u32 %v11198_v13, %v9216_v56 }
 0x340   : > { %1292 = vst [vmem:[#allocation2 + $0x144] sm:$0xf] %v1276_v23  ;;  %v1157_v23 = vadd.f32 %v12313_v57, %v12329_v39 }
 0x341   : > { %v12743_v2 = vpop.f32.mrf.mxu0  ;;  %v12745_v29 = vpop.f32.mrf.mxu3 }
 0x342   : > { %16282 = vst [vmem:[#allocation45_spill] sm:$0xff] %v12743_v2  ;;  %v1206_v25 = vadd.f32 %v12661_v18, %v1157_v23  ;;  %v11071_v18 = vld [vmem:[%s16224_s3 + $0x1d4] sm:$0xf0] }
 0x343   : > { %v1252_v12 = vpop.f32.mrf.mxu1  ;;  %v8553_v56 = vor.u32 %v11071_v18, %v8552_v17 }
 0x344   : > { %v12749_v42 = vpop.f32.mrf.mxu2  ;;  %v1253_v20 = vadd.f32 %v1252_v12, %v1204_v9  ;;  %v8640_v9 = vld [vmem:[%s16224_s3 + $0x228] sm:$0xf] }
 0x345   : > { %16283 = vst [vmem:[#allocation46_spill] sm:$0xff] %v12749_v42 }
 0x346   : > { %v1277_v2 = vpack.c.bf16 %v1253_v20, %v1253_v20  ;;  %1639 = vmatmul.bf16.gmra.mxu1 %v8537_v37  ;;  %v11083_v37 = vld [vmem:[%s16224_s3 + $0x234] sm:$0xf0] }
 0x347   : > { %1953 = vmatmul.bf16.vlgmr.msra.gmra.mxu3 %v8617_v8 }
 0x348   : > { %2096 = vmatpush.bf16.msra.mxu3 %v12121_v43  ;;  %1293 = vst [vmem:[#allocation2 + $0x168] sm:$0xf] %v1277_v2  ;;  %v11082_v2 = vld [vmem:[%s16224_s3 + $0x22c] sm:$0xf0] }
 0x349   : > { %2051 = vmatmul.bf16.vlgmr.msrb.gmra.mxu2 %v8625_v4  ;;  %v12761_v10 = vpop.f32.mrf.mxu0  ;;  %v12763_v19 = vpop.f32.mrf.mxu3  ;;  %v1209_v4 = vadd.f32 %v12678_v14, %v12360_v51  ;;  %v8633_v13 = vor.u32 %v11082_v2, %v8632_v54  ;;  %v1162_v51 = vadd.f32 %v12352_v0, %v12365_v45 }
 0x34a   : > { %2917 = vmatpush.bf16.msrb.mxu2 %v11998_v46  ;;  %16284 = vst [vmem:[#allocation47_spill] sm:$0xff] %v12761_v10 }
 0x34b   : > { %v1254_v57 = vpop.f32.mrf.mxu1  ;;  %v1211_v2 = vadd.f32 %v12703_v60, %v1162_v51  ;;  %v8648_v60 = vld [vmem:[%s16224_s3 + $0x240] sm:$0xf] }
 0x34c   : > { %v12766_v15 = vpop.f32.mrf.mxu2  ;;  %2097 = vmatpush.bf16.msra.mxu3 %v12136_v58  ;;  %v1255_v39 = vadd.f32 %v1254_v57, %v1206_v25  ;;  %3294 = vmatmul.bf16.gmra.mxu0 %v9217_v6  ;;  %v8641_v6 = vor.u32 %v11083_v37, %v8640_v9  ;;  %v9232_v57 = vld [vmem:[%s16224_s3 + $0x5e0] sm:$0xf] }
 0x34e   : > { %2918 = vmatpush.bf16.msrb.mxu2 %v12006_v59  ;;  %v1278_v27 = vpack.c.bf16 %v1255_v39, %v1255_v39  ;;  %v11202_v39 = vld [vmem:[%s16224_s3 + $0x5ec] sm:$0xf0] }
 0x34f   : > { %v9233_v17 = vor.u32 %v11202_v39, %v9232_v57  ;;  %v11087_v57 = vld [vmem:[%s16224_s3 + $0x254] sm:$0xf0] }
 0x350   : > { %2098 = vmatpush.bf16.msra.mxu3 %v12143_v63  ;;  %1294 = vst [vmem:[#allocation2 + $0x18c] sm:$0xf] %v1278_v27  ;;  %v16286_v27 = vld [vmem:[#allocation9_spill] sm:$0xff] }
 0x351   : > { %v12790_v8 = vpop.f32.mrf.mxu0  ;;  %v12792_v12 = vpop.f32.mrf.mxu3 }
 0x352   : > { %2919 = vmatpush.bf16.msrb.mxu2 %v12011_v61  ;;  %16285 = vst [vmem:[#allocation48_spill] sm:$0xff] %v12790_v8  ;;  %v16292_v8 = vld [vmem:[#allocation6_spill] sm:$0xff] }
 0x353   : > { %v1257_v23 = vpop.f32.mrf.mxu1 }
 0x354   : > { %v12796_v20 = vpop.f32.mrf.mxu2  ;;  %2099 = vmatpush.bf16.msra.mxu3 %v12154_v1  ;;  %v1258_v25 = vadd.f32 %v1257_v23, %v1209_v4  ;;  %v16288_v4 = vld [vmem:[#allocation8_spill] sm:$0xff]  ;;  %v11086_v23 = vld [vmem:[%s16224_s3 + $0x24c] sm:$0xf0] }
 0x356   : > { %2920 = vmatpush.bf16.msrb.mxu2 %v12022_v31  ;;  %v1279_v14 = vpack.c.bf16 %v1258_v25, %v1258_v25  ;;  %1644 = vmatmul.bf16.gmra.mxu1 %v8553_v56  ;;  %v8568_v56 = vld [vmem:[%s16224_s3 + $0x1e8] sm:$0xf] }
 0x357   : > { %1958 = vmatmul.bf16.gmra.mxu3 %v8633_v13  ;;  %v11075_v13 = vld [vmem:[%s16224_s3 + $0x1f4] sm:$0xf0]  ;;  %v8656_v25 = vld [vmem:[%s16224_s3 + $0x248] sm:$0xf] }
 0x358   : > { %1295 = vst [vmem:[#allocation2 + $0x1b0] sm:$0xf] %v1279_v14  ;;  %v16291_v14 = vld [vmem:[#allocation23_spill] sm:$0xff] }
 0x359   : > { %2056 = vmatmul.bf16.gmra.mxu2 %v8641_v6  ;;  %v12809_v18 = vpop.f32.mrf.mxu0  ;;  %v16289_v6 = vld [vmem:[#allocation7_spill] sm:$0xff] }
 0x35a   : > { %2921 = vmatpush.bf16.msrb.mxu2 %v16286_v27  ;;  %16287 = vst [vmem:[#allocation9_spill] sm:$0xff] %v12809_v18  ;;  %v12811_v54 = vpop.f32.mrf.mxu3  ;;  %v8657_v18 = vor.u32 %v11087_v57, %v8656_v25 }
 0x35b   : > { %v1259_v37 = vpop.f32.mrf.mxu1 }
 0x35c   : > { %v12814_v9 = vpop.f32.mrf.mxu2  ;;  %v1260_v0 = vadd.f32 %v1259_v37, %v1211_v2  ;;  %3299 = vmatmul.bf16.gmra.mxu0 %v9233_v17  ;;  %v1214_v17 = vadd.f32 %v12720_v49, %v16291_v14  ;;  %v8569_v37 = vor.u32 %v11075_v13, %v8568_v56  ;;  %v1167_v49 = vadd.f32 %v16294_v7, %v16293_v41  ;;  %v8664_v41 = vld [vmem:[%s16224_s3 + $0x260] sm:$0xf] }
 0x35e   : > { %2922 = vmatpush.bf16.msrb.mxu2 %v16288_v4  ;;  %v1280_v45 = vpack.c.bf16 %v1260_v0, %v1260_v0  ;;  %v8649_v0 = vor.u32 %v11086_v23, %v8648_v60  ;;  %v1216_v23 = vadd.f32 %v12745_v29, %v1167_v49  ;;  %v11076_v29 = vld [vmem:[%s16224_s3 + $0x204] sm:$0xf] }
 0x360   : > { %1296 = vst [vmem:[#allocation2 + $0x1d4] sm:$0xf] %v1280_v45 }
 0x361   : > { %v12836_v39 = vpop.f32.mrf.mxu0 }
 0x362   : > { %2923 = vmatpush.bf16.msrb.mxu2 %v16289_v6  ;;  %16290 = vst [vmem:[#allocation8_spill] sm:$0xff] %v12836_v39  ;;  %v12838_v51 = vpop.f32.mrf.mxu3  ;;  %v11206_v39 = vld [vmem:[%s16224_s3 + $0x60c] sm:$0xf0] }
 0x363   : > { %v1262_v45 = vpop.f32.mrf.mxu1  ;;  %v9289_v56 = vor.u32 %v11206_v39, %v9288_v3  ;;  %v11090_v3 = vld [vmem:[%s16224_s3 + $0x26c] sm:$0xf0]  ;;  %v11091_v39 = vld [vmem:[%s16224_s3 + $0x274] sm:$0xf0] }
 0x364   : > { %v12842_v2 = vpop.f32.mrf.mxu2  ;;  %v1263_v10 = vadd.f32 %v1262_v45, %v1214_v17  ;;  %v16296_v45 = vld [vmem:[#allocation4_spill] sm:$0xff] }
 0x366   : > { %2924 = vmatpush.bf16.msrb.mxu2 %v16292_v8  ;;  %v1281_v14 = vpack.c.bf16 %v1263_v10, %v1263_v10  ;;  %1649 = vmatmul.bf16.gmra.mxu1 %v8569_v37  ;;  %v8618_v10 = vld [vmem:[%s16224_s3 + $0x210] sm:$0xf0]  ;;  %v16297_v37 = vld [vmem:[#allocation5_spill] sm:$0xff] }
 0x367   : > { %1963 = vmatmul.bf16.gmra.mxu3 %v8649_v0 }
 0x368   : > { %1297 = vst [vmem:[#allocation2 + $0x1f8] sm:$0xf] %v1281_v14  ;;  %v16299_v14 = vld [vmem:[#allocation25_spill] sm:$0xff] }
 0x369   : > { %2061 = vmatmul.bf16.gmra.mxu2 %v8657_v18  ;;  %v12853_v13 = vpop.f32.mrf.mxu0  ;;  %v8672_v18 = vld [vmem:[%s16224_s3 + $0x268] sm:$0xf] }
 0x36a   : > { %16295 = vst [vmem:[#allocation7_spill] sm:$0xff] %v12853_v13  ;;  %v12855_v60 = vpop.f32.mrf.mxu3 }
 0x36b   : > { %v1264_v57 = vpop.f32.mrf.mxu1 }
 0x36c   : > { %v12858_v25 = vpop.f32.mrf.mxu2  ;;  %v1265_v17 = vadd.f32 %v1264_v57, %v1216_v23  ;;  %3701 = vmatmul.bf16.vlgmr.msra.gmra.mxu0 %v9289_v56  ;;  %v1567_v56 = vadd.f32 %v12763_v19, %v16299_v14  ;;  %v8665_v57 = vor.u32 %v11090_v3, %v8664_v41  ;;  %v11095_v14 = vld [vmem:[%s16224_s3 + $0x294] sm:$0xf0] }
 0x36d   : > { %4567 = vmatpush.bf16.msra.mxu0 %v16296_v45 }
 0x36e   : > { %v1282_v7 = vpack.c.bf16 %v1265_v17, %v1265_v17  ;;  %v8621_v17 = vor.u32 %v11076_v29, %v8618_v10  ;;  %v16301_v29 = vld [vmem:[#allocation27_spill] sm:$0xff] }
 0x36f   : > { %v1569_v10 = vadd.f32 %v12792_v12, %v16301_v29  ;;  %v11094_v12 = vld [vmem:[%s16224_s3 + $0x28c] sm:$0xf0] }
 0x370   : > { %1298 = vst [vmem:[#allocation2 + $0x21c] sm:$0xf] %v1282_v7  ;;  %v8673_v7 = vor.u32 %v11091_v39, %v8672_v18  ;;  %v11080_v39 = vld [vmem:[%s16224_s3 + $0x224] sm:$0xf] }
 0x371   : > { %4568 = vmatpush.bf16.msra.mxu0 %v16297_v37  ;;  %v12880_v0 = vpop.f32.mrf.mxu0  ;;  %v9304_v37 = vld [vmem:[%s16224_s3 + $0x620] sm:$0xf] }
 0x372   : > { %16298 = vst [vmem:[#allocation23_spill] sm:$0xff] %v12880_v0  ;;  %v12882_v49 = vpop.f32.mrf.mxu3  ;;  %v11210_v0 = vld [vmem:[%s16224_s3 + $0x62c] sm:$0xf0] }
 0x373   : > { %v1615_v45 = vpop.f32.mrf.mxu1  ;;  %v9305_v41 = vor.u32 %v11210_v0, %v9304_v37 }
 0x374   : > { %v12886_v23 = vpop.f32.mrf.mxu2  ;;  %v1616_v13 = vadd.f32 %v1615_v45, %v1567_v56 }
 0x375   : > { %4569 = vmatpush.bf16.msra.mxu0 %v11774_v16 }
 0x376   : > { %v1665_v42 = vadd.f32 %v12766_v15, %v1616_v13  ;;  %2002 = vmatmul.bf16.vlgmr.msrb.gmra.mxu1 %v8621_v17  ;;  %v16303_v17 = vld [vmem:[#allocation29_spill] sm:$0xff] }
 0x377   : > { %1968 = vmatmul.bf16.gmra.mxu3 %v8665_v57  ;;  %2868 = vmatpush.bf16.msrb.mxu1 %v11826_v11  ;;  %v1572_v45 = vadd.f32 %v12811_v54, %v16303_v17  ;;  %v11214_v54 = vld [vmem:[%s16224_s3 + $0x64c] sm:$0xf0]  ;;  %v8650_v17 = vld [vmem:[%s16224_s3 + $0x250] sm:$0xf0] }
 0x378   : > { %v1704_v19 = vpack.c.bf16 %v1665_v42, %v1665_v42 }
 0x379   : > { %2066 = vmatmul.bf16.gmra.mxu2 %v8673_v7  ;;  %4570 = vmatpush.bf16.msra.mxu0 %v11779_v21  ;;  %v12898_v16 = vpop.f32.mrf.mxu0  ;;  %v8680_v21 = vld [vmem:[%s16224_s3 + $0x280] sm:$0xf] }
 0x37a   : > { %16300 = vst [vmem:[#allocation6_spill] sm:$0xff] %v12898_v16  ;;  %v12900_v3 = vpop.f32.mrf.mxu3  ;;  %v8681_v37 = vor.u32 %v11094_v12, %v8680_v21  ;;  %v16305_v12 = vld [vmem:[#allocation31_spill] sm:$0xff] }
 0x37b   : > { %1720 = vst [vmem:[#allocation2 + $0x4] sm:$0xf] %v1704_v19  ;;  %2869 = vmatpush.bf16.msrb.mxu1 %v11832_v22  ;;  %v1617_v15 = vpop.f32.mrf.mxu1 }
 0x37c   : > { %v12904_v18 = vpop.f32.mrf.mxu2  ;;  %v1618_v13 = vadd.f32 %v1617_v15, %v1569_v10  ;;  %3706 = vmatmul.bf16.gmra.mxu0 %v9305_v41 }
 0x37d   : > { %4571 = vmatpush.bf16.msra.mxu0 %v11751_v48  ;;  %v8634_v48 = vld [vmem:[%s16224_s3 + $0x230] sm:$0xf0] }
 0x37e   : > { %v1667_v42 = vadd.f32 %v12796_v20, %v1618_v13  ;;  %v8688_v20 = vld [vmem:[%s16224_s3 + $0x288] sm:$0xf]  ;;  %v8637_v19 = vor.u32 %v11080_v39, %v8634_v48  ;;  %v1574_v39 = vadd.f32 %v12838_v51, %v16305_v12  ;;  %v11098_v51 = vld [vmem:[%s16224_s3 + $0x2ac] sm:$0xf0] }
 0x37f   : > { %2870 = vmatpush.bf16.msrb.mxu1 %v11836_v28  ;;  %v8689_v29 = vor.u32 %v11095_v14, %v8688_v20  ;;  %v11084_v14 = vld [vmem:[%s16224_s3 + $0x244] sm:$0xf] }
 0x380   : > { %v1705_v0 = vpack.c.bf16 %v1667_v42, %v1667_v42 }
 0x381   : > { %4572 = vmatpush.bf16.msra.mxu0 %v11746_v40  ;;  %v12929_v56 = vpop.f32.mrf.mxu0  ;;  %v9320_v40 = vld [vmem:[%s16224_s3 + $0x640] sm:$0xf] }
 0x382   : > { %16302 = vst [vmem:[#allocation32_spill] sm:$0xff] %v12929_v56  ;;  %v12931_v57 = vpop.f32.mrf.mxu3  ;;  %v9321_v42 = vor.u32 %v11214_v54, %v9320_v40  ;;  %v11286_v56 = vld [vmem:[%s16224_s3 + $0x88c] sm:$0xf0] }
 0x383   : > { %1721 = vst [vmem:[#allocation2 + $0x28] sm:$0xf] %v1705_v0  ;;  %2871 = vmatpush.bf16.msrb.mxu1 %v11840_v33  ;;  %v1620_v41 = vpop.f32.mrf.mxu1 }
 0x384   : > { %v12935_v7 = vpop.f32.mrf.mxu2  ;;  %v1621_v10 = vadd.f32 %v1620_v41, %v1572_v45 }
 0x385   : > { %4573 = vmatpush.bf16.msra.mxu0 %v11741_v32 }
 0x386   : > { %v1670_v15 = vadd.f32 %v12814_v9, %v1621_v10  ;;  %2007 = vmatmul.bf16.gmra.mxu1 %v8637_v19 }
 0x387   : > { %1973 = vmatmul.bf16.gmra.mxu3 %v8681_v37  ;;  %2872 = vmatpush.bf16.msrb.mxu1 %v11815_v53  ;;  %v11099_v37 = vld [vmem:[%s16224_s3 + $0x2b4] sm:$0xf0] }
 0x388   : > { %v1706_v13 = vpack.c.bf16 %v1670_v15, %v1670_v15  ;;  %v8653_v15 = vor.u32 %v11084_v14, %v8650_v17  ;;  %v1579_v14 = vadd.f32 %v12882_v49, %v12525_v36  ;;  %v11088_v36 = vld [vmem:[%s16224_s3 + $0x264] sm:$0xf]  ;;  %v8666_v49 = vld [vmem:[%s16224_s3 + $0x270] sm:$0xf0] }
 0x389   : > { %2071 = vmatmul.bf16.gmra.mxu2 %v8689_v29  ;;  %4574 = vmatpush.bf16.msra.mxu0 %v11736_v24  ;;  %v12948_v32 = vpop.f32.mrf.mxu0  ;;  %v8696_v24 = vld [vmem:[%s16224_s3 + $0x2a0] sm:$0xf]  ;;  %v16307_v29 = vld [vmem:[#allocation34_spill] sm:$0xff] }
 0x38a   : > { %16304 = vst [vmem:[#allocation22_spill] sm:$0xff] %v12948_v32  ;;  %v12950_v21 = vpop.f32.mrf.mxu3  ;;  %v1577_v10 = vadd.f32 %v12855_v60, %v16307_v29  ;;  %v8697_v54 = vor.u32 %v11098_v51, %v8696_v24  ;;  %v11102_v29 = vld [vmem:[%s16224_s3 + $0x2cc] sm:$0xf0]  ;;  %v9688_v32 = vld [vmem:[%s16224_s3 + $0x880] sm:$0xf] }
 0x38b   : > { %1722 = vst [vmem:[#allocation2 + $0x4c] sm:$0xf] %v1706_v13  ;;  %2873 = vmatpush.bf16.msrb.mxu1 %v11806_v44  ;;  %v1622_v9 = vpop.f32.mrf.mxu1 }
 0x38c   : > { %v12954_v48 = vpop.f32.mrf.mxu2  ;;  %v1623_v0 = vadd.f32 %v1622_v9, %v1574_v39  ;;  %3711 = vmatmul.bf16.gmra.mxu0 %v9321_v42  ;;  %v9336_v39 = vld [vmem:[%s16224_s3 + $0x660] sm:$0xf]  ;;  %v11218_v9 = vld [vmem:[%s16224_s3 + $0x66c] sm:$0xf0] }
 0x38e   : > { %v1672_v20 = vadd.f32 %v12842_v2, %v1623_v0  ;;  %v8704_v2 = vld [vmem:[%s16224_s3 + $0x2a8] sm:$0xf] }
 0x38f   : > { %2874 = vmatpush.bf16.msrb.mxu1 %v11797_v35  ;;  %v8705_v42 = vor.u32 %v11099_v37, %v8704_v2  ;;  %v8712_v37 = vld [vmem:[%s16224_s3 + $0x2c0] sm:$0xf] }
 0x390   : > { %v1707_v45 = vpack.c.bf16 %v1672_v20, %v1672_v20  ;;  %v9337_v20 = vor.u32 %v11218_v9, %v9336_v39  ;;  %v8713_v39 = vor.u32 %v11102_v29, %v8712_v37  ;;  %v8669_v9 = vor.u32 %v11088_v36, %v8666_v49 }
 0x391   : > { %v12977_v19 = vpop.f32.mrf.mxu0  ;;  %v1584_v29 = vadd.f32 %v12931_v57, %v12574_v62  ;;  %v11092_v62 = vld [vmem:[%s16224_s3 + $0x284] sm:$0xf]  ;;  %v8682_v57 = vld [vmem:[%s16224_s3 + $0x290] sm:$0xf0] }
 0x392   : > { %16306 = vst [vmem:[#allocation4_spill] sm:$0xff] %v12977_v19  ;;  %v12979_v41 = vpop.f32.mrf.mxu3 }
 0x393   : > { %1723 = vst [vmem:[#allocation2 + $0x70] sm:$0xf] %v1707_v45  ;;  %2875 = vmatpush.bf16.msrb.mxu1 %v11784_v26  ;;  %v1625_v13 = vpop.f32.mrf.mxu1 }
 0x394   : > { %v12983_v40 = vpop.f32.mrf.mxu2  ;;  %v1626_v12 = vadd.f32 %v1625_v13, %v1577_v10 }
 0x396   : > { %v1675_v60 = vadd.f32 %v12858_v25, %v1626_v12  ;;  %2012 = vmatmul.bf16.gmra.mxu1 %v8653_v15 }
 0x397   : > { %1978 = vmatmul.bf16.gmra.mxu3 %v8697_v54  ;;  %v11103_v54 = vld [vmem:[%s16224_s3 + $0x2d4] sm:$0xf0] }
 0x398   : > { %v1708_v0 = vpack.c.bf16 %v1675_v60, %v1675_v60 }
 0x399   : > { %2076 = vmatmul.bf16.gmra.mxu2 %v8705_v42  ;;  %v12993_v24 = vpop.f32.mrf.mxu0  ;;  %v1582_v42 = vadd.f32 %v12900_v3, %v12544_v52 }
 0x39a   : > { %16308 = vst [vmem:[#allocation5_spill] sm:$0xff] %v12993_v24  ;;  %v12995_v51 = vpop.f32.mrf.mxu3  ;;  %v9672_v24 = vld [vmem:[%s16224_s3 + $0x860] sm:$0xf] }
 0x39b   : > { %1724 = vst [vmem:[#allocation2 + $0x94] sm:$0xf] %v1708_v0  ;;  %v1627_v45 = vpop.f32.mrf.mxu1 }
 0x39c   : > { %v12999_v17 = vpop.f32.mrf.mxu2  ;;  %v1628_v2 = vadd.f32 %v1627_v45, %v1579_v14  ;;  %3716 = vmatmul.bf16.gmra.mxu0 %v9337_v20  ;;  %v9352_v14 = vld [vmem:[%s16224_s3 + $0x680] sm:$0xf]  ;;  %v11222_v45 = vld [vmem:[%s16224_s3 + $0x68c] sm:$0xf0] }
 0x39d   : > { %v9353_v3 = vor.u32 %v11222_v45, %v9352_v14  ;;  %v8685_v45 = vor.u32 %v11092_v62, %v8682_v57 }
 0x39e   : > { %v1677_v25 = vadd.f32 %v12886_v23, %v1628_v2  ;;  %v8720_v23 = vld [vmem:[%s16224_s3 + $0x2c8] sm:$0xf] }
 0x39f   : > { %v8721_v0 = vor.u32 %v11103_v54, %v8720_v23  ;;  %v8728_v23 = vld [vmem:[%s16224_s3 + $0x2e0] sm:$0xf]  ;;  %v11106_v54 = vld [vmem:[%s16224_s3 + $0x2ec] sm:$0xf0] }
 0x3a0   : > { %v1709_v10 = vpack.c.bf16 %v1677_v25, %v1677_v25  ;;  %v8729_v14 = vor.u32 %v11106_v54, %v8728_v23  ;;  %v1589_v54 = vadd.f32 %v12979_v41, %v12622_v47  ;;  %v8736_v47 = vld [vmem:[%s16224_s3 + $0x2e8] sm:$0xf]  ;;  %v11107_v41 = vld [vmem:[%s16224_s3 + $0x2f4] sm:$0xf0] }
 0x3a1   : > { %v13020_v15 = vpop.f32.mrf.mxu0 }
 0x3a2   : > { %16309 = vst [vmem:[#allocation25_spill] sm:$0xff] %v13020_v15  ;;  %v13022_v13 = vpop.f32.mrf.mxu3  ;;  %v9624_v15 = vld [vmem:[%s16224_s3 + $0x800] sm:$0xf] }
 0x3a3   : > { %1725 = vst [vmem:[#allocation2 + $0xb8] sm:$0xf] %v1709_v10  ;;  %v1630_v60 = vpop.f32.mrf.mxu1 }
 0x3a4   : > { %v13026_v12 = vpop.f32.mrf.mxu2  ;;  %v1631_v20 = vadd.f32 %v1630_v60, %v1582_v42 }
 0x3a6   : > { %v1680_v2 = vadd.f32 %v12904_v18, %v1631_v20  ;;  %2017 = vmatmul.bf16.gmra.mxu1 %v8669_v9 }
 0x3a7   : > { %1983 = vmatmul.bf16.gmra.mxu3 %v8713_v39  ;;  %v11111_v39 = vld [vmem:[%s16224_s3 + $0x314] sm:$0xf0] }
 0x3a8   : > { %v1710_v52 = vpack.c.bf16 %v1680_v2, %v1680_v2 }
 0x3a9   : > { %2081 = vmatmul.bf16.gmra.mxu2 %v8721_v0  ;;  %v13035_v25 = vpop.f32.mrf.mxu0  ;;  %v1587_v0 = vadd.f32 %v12950_v21, %v12594_v50 }
 0x3aa   : > { %16310 = vst [vmem:[#allocation27_spill] sm:$0xff] %v13035_v25  ;;  %v13037_v37 = vpop.f32.mrf.mxu3 }
 0x3ab   : > { %1726 = vst [vmem:[#allocation2 + $0xdc] sm:$0xf] %v1710_v52  ;;  %v1632_v49 = vpop.f32.mrf.mxu1 }
 0x3ac   : > { %v13041_v36 = vpop.f32.mrf.mxu2  ;;  %v1633_v10 = vadd.f32 %v1632_v49, %v1584_v29  ;;  %3721 = vmatmul.bf16.gmra.mxu0 %v9353_v3  ;;  %v9368_v29 = vld [vmem:[%s16224_s3 + $0x6a0] sm:$0xf]  ;;  %v11226_v49 = vld [vmem:[%s16224_s3 + $0x6ac] sm:$0xf0] }
 0x3ad   : > { %v9369_v21 = vor.u32 %v11226_v49, %v9368_v29  ;;  %v8737_v49 = vor.u32 %v11107_v41, %v8736_v47 }
 0x3ae   : > { %v1682_v18 = vadd.f32 %v12935_v7, %v1633_v10  ;;  %v8792_v7 = vld [vmem:[%s16224_s3 + $0x308] sm:$0xf] }
 0x3af   : > { %v8793_v52 = vor.u32 %v11111_v39, %v8792_v7  ;;  %v11096_v7 = vld [vmem:[%s16224_s3 + $0x2a4] sm:$0xf]  ;;  %v8698_v39 = vld [vmem:[%s16224_s3 + $0x2b0] sm:$0xf0] }
 0x3b0   : > { %v1711_v42 = vpack.c.bf16 %v1682_v18, %v1682_v18  ;;  %v8701_v29 = vor.u32 %v11096_v7, %v8698_v39  ;;  %v1594_v39 = vadd.f32 %v13022_v13, %v12665_v34  ;;  %v8714_v34 = vld [vmem:[%s16224_s3 + $0x2d0] sm:$0xf0]  ;;  %v11077_v13 = vld [vmem:[%s16224_s3 + $0x20c] sm:$0xf] }
 0x3b1   : > { %v13062_v9 = vpop.f32.mrf.mxu0 }
 0x3b2   : > { %16311 = vst [vmem:[#allocation29_spill] sm:$0xff] %v13062_v9  ;;  %v13064_v60 = vpop.f32.mrf.mxu3  ;;  %v9568_v9 = vld [vmem:[%s16224_s3 + $0x7e0] sm:$0xf] }
 0x3b3   : > { %1727 = vst [vmem:[#allocation2 + $0x100] sm:$0xf] %v1711_v42  ;;  %v1635_v2 = vpop.f32.mrf.mxu1 }
 0x3b4   : > { %v13068_v20 = vpop.f32.mrf.mxu2  ;;  %v1636_v3 = vadd.f32 %v1635_v2, %v1587_v0 }
 0x3b6   : > { %v1685_v10 = vadd.f32 %v12954_v48, %v1636_v3  ;;  %2022 = vmatmul.bf16.gmra.mxu1 %v8685_v45 }
 0x3b7   : > { %1988 = vmatmul.bf16.gmra.mxu3 %v8729_v14  ;;  %v11115_v14 = vld [vmem:[%s16224_s3 + $0x334] sm:$0xf0] }
 0x3b8   : > { %v1712_v50 = vpack.c.bf16 %v1685_v10, %v1685_v10 }
 0x3b9   : > { %2488 = vmatmul.bf16.vlgmr.msra.gmra.mxu2 %v8793_v52  ;;  %v13078_v18 = vpop.f32.mrf.mxu0  ;;  %v1592_v52 = vadd.f32 %v12995_v51, %v12639_v38 }
 0x3ba   : > { %3354 = vmatpush.bf16.msra.mxu2 %v11998_v46  ;;  %16312 = vst [vmem:[#allocation31_spill] sm:$0xff] %v13078_v18  ;;  %v13080_v23 = vpop.f32.mrf.mxu3 }
 0x3bb   : > { %1728 = vst [vmem:[#allocation2 + $0x124] sm:$0xf] %v1712_v50  ;;  %v1637_v57 = vpop.f32.mrf.mxu1 }
 0x3bc   : > { %v13084_v62 = vpop.f32.mrf.mxu2  ;;  %v1638_v48 = vadd.f32 %v1637_v57, %v1589_v54  ;;  %3726 = vmatmul.bf16.gmra.mxu0 %v9369_v21  ;;  %v9384_v54 = vld [vmem:[%s16224_s3 + $0x6c0] sm:$0xf]  ;;  %v11230_v57 = vld [vmem:[%s16224_s3 + $0x6cc] sm:$0xf0] }
 0x3be   : > { %3355 = vmatpush.bf16.msra.mxu2 %v12006_v59  ;;  %v1687_v42 = vadd.f32 %v12983_v40, %v1638_v48  ;;  %v8808_v40 = vld [vmem:[%s16224_s3 + $0x328] sm:$0xf]  ;;  %v9385_v48 = vor.u32 %v11230_v57, %v9384_v54 }
 0x3bf   : > { %v8809_v50 = vor.u32 %v11115_v14, %v8808_v40  ;;  %v11100_v40 = vld [vmem:[%s16224_s3 + $0x2c4] sm:$0xf]  ;;  %v8626_v14 = vld [vmem:[%s16224_s3 + $0x218] sm:$0xf0] }
 0x3c0   : > { %v1713_v0 = vpack.c.bf16 %v1687_v42, %v1687_v42  ;;  %v8717_v54 = vor.u32 %v11100_v40, %v8714_v34  ;;  %v8629_v57 = vor.u32 %v11077_v13, %v8626_v14  ;;  %v1599_v34 = vadd.f32 %v13064_v60, %v12707_v30  ;;  %v8730_v30 = vld [vmem:[%s16224_s3 + $0x2f0] sm:$0xf0]  ;;  %v11081_v60 = vld [vmem:[%s16224_s3 + $0x22c] sm:$0xf] }
 0x3c1   : > { %v13107_v45 = vpop.f32.mrf.mxu0 }
 0x3c2   : > { %3356 = vmatpush.bf16.msra.mxu2 %v12011_v61  ;;  %16313 = vst [vmem:[#allocation34_spill] sm:$0xff] %v13107_v45  ;;  %v13109_v2 = vpop.f32.mrf.mxu3  ;;  %v9552_v45 = vld [vmem:[%s16224_s3 + $0x7c0] sm:$0xf] }
 0x3c3   : > { %1729 = vst [vmem:[#allocation2 + $0x148] sm:$0xf] %v1713_v0  ;;  %v1640_v10 = vpop.f32.mrf.mxu1 }
 0x3c4   : > { %v13113_v3 = vpop.f32.mrf.mxu2  ;;  %v1641_v21 = vadd.f32 %v1640_v10, %v1592_v52 }
 0x3c6   : > { %3357 = vmatpush.bf16.msra.mxu2 %v12022_v31  ;;  %v1690_v38 = vadd.f32 %v12999_v17, %v1641_v21  ;;  %2027 = vmatmul.bf16.gmra.mxu1 %v8701_v29  ;;  %v11119_v29 = vld [vmem:[%s16224_s3 + $0x354] sm:$0xf0] }
 0x3c7   : > { %2086 = vmatmul.bf16.vlgmr.msrb.gmra.mxu3 %v8737_v49 }
 0x3c8   : > { %2533 = vmatpush.bf16.msrb.mxu3 %v12121_v43  ;;  %v1714_v51 = vpack.c.bf16 %v1690_v38, %v1690_v38 }
 0x3c9   : > { %2493 = vmatmul.bf16.gmra.mxu2 %v8809_v50  ;;  %v13125_v42 = vpop.f32.mrf.mxu0  ;;  %v1597_v50 = vadd.f32 %v13037_v37, %v12681_v5  ;;  %v11234_v5 = vld [vmem:[%s16224_s3 + $0x6ec] sm:$0xf0] }
 0x3ca   : > { %3358 = vmatpush.bf16.msra.mxu2 %v16286_v27  ;;  %16314 = vst [vmem:[#allocation49_spill] sm:$0xff] %v13125_v42  ;;  %v13127_v7 = vpop.f32.mrf.mxu3  ;;  %v11258_v42 = vld [vmem:[%s16224_s3 + $0x7ac] sm:$0xf0] }
 0x3cb   : > { %1730 = vst [vmem:[#allocation2 + $0x16c] sm:$0xf] %v1714_v51  ;;  %v1642_v17 = vpop.f32.mrf.mxu1 }
 0x3cc   : > { %v13131_v47 = vpop.f32.mrf.mxu2  ;;  %2534 = vmatpush.bf16.msrb.mxu3 %v12136_v58  ;;  %v1643_v41 = vadd.f32 %v1642_v17, %v1594_v39  ;;  %3731 = vmatmul.bf16.gmra.mxu0 %v9385_v48  ;;  %v9400_v39 = vld [vmem:[%s16224_s3 + $0x6e0] sm:$0xf] }
 0x3ce   : > { %3359 = vmatpush.bf16.msra.mxu2 %v16288_v4  ;;  %v1692_v0 = vadd.f32 %v13026_v12, %v1643_v41  ;;  %v8824_v12 = vld [vmem:[%s16224_s3 + $0x348] sm:$0xf]  ;;  %v9401_v41 = vor.u32 %v11234_v5, %v9400_v39 }
 0x3cf   : > { %v8825_v51 = vor.u32 %v11119_v29, %v8824_v12  ;;  %v11104_v12 = vld [vmem:[%s16224_s3 + $0x2e4] sm:$0xf]  ;;  %v8642_v29 = vld [vmem:[%s16224_s3 + $0x238] sm:$0xf0] }
 0x3d0   : > { %2535 = vmatpush.bf16.msrb.mxu3 %v12143_v63  ;;  %v1715_v52 = vpack.c.bf16 %v1692_v0, %v1692_v0  ;;  %v8733_v39 = vor.u32 %v11104_v12, %v8730_v30  ;;  %v8645_v5 = vor.u32 %v11081_v60, %v8642_v29  ;;  %v16319_v30 = vld [vmem:[#allocation46_spill] sm:$0xff] }
 0x3d1   : > { %v13156_v49 = vpop.f32.mrf.mxu0  ;;  %v1604_v60 = vadd.f32 %v13109_v2, %v16319_v30  ;;  %v11108_v2 = vld [vmem:[%s16224_s3 + $0x304] sm:$0xf] }
 0x3d2   : > { %3360 = vmatpush.bf16.msra.mxu2 %v16289_v6  ;;  %16315 = vst [vmem:[#allocation50_spill] sm:$0xff] %v13156_v49  ;;  %v13158_v10 = vpop.f32.mrf.mxu3  ;;  %v9536_v49 = vld [vmem:[%s16224_s3 + $0x7a0] sm:$0xf] }
 0x3d3   : > { %1731 = vst [vmem:[#allocation2 + $0x190] sm:$0xf] %v1715_v52  ;;  %v1645_v38 = vpop.f32.mrf.mxu1 }
 0x3d4   : > { %v13162_v21 = vpop.f32.mrf.mxu2  ;;  %2536 = vmatpush.bf16.msrb.mxu3 %v12154_v1  ;;  %v1646_v48 = vadd.f32 %v1645_v38, %v1597_v50 }
 0x3d6   : > { %3361 = vmatpush.bf16.msra.mxu2 %v16292_v8  ;;  %v1695_v37 = vadd.f32 %v13041_v36, %v1646_v48  ;;  %2032 = vmatmul.bf16.gmra.mxu1 %v8717_v54  ;;  %v11123_v54 = vld [vmem:[%s16224_s3 + $0x374] sm:$0xf0] }
 0x3d7   : > { %8742 = vmatmul.msk.bf16.vlgmr.msra.gmra.mxu3 %vm1046_vm0, %v8629_v57 }
 0x3d8   : > { %2970 = vmatpush.bf16.msra.mxu3 %v12121_v43  ;;  %v1716_v17 = vpack.c.bf16 %v1695_v37, %v1695_v37 }
 0x3d9   : > { %2498 = vmatmul.bf16.gmra.mxu2 %v8825_v51  ;;  %v13175_v0 = vpop.f32.mrf.mxu0  ;;  %v1602_v51 = vadd.f32 %v13080_v23, %v12723_v55 }
 0x3da   : > { %16316 = vst [vmem:[#allocation51_spill] sm:$0xff] %v13175_v0  ;;  %v13177_v40 = vpop.f32.mrf.mxu3  ;;  %v11254_v0 = vld [vmem:[%s16224_s3 + $0x78c] sm:$0xf0] }
 0x3db   : > { %1732 = vst [vmem:[#allocation2 + $0x1b4] sm:$0xf] %v1716_v17  ;;  %v1647_v36 = vpop.f32.mrf.mxu1 }
 0x3dc   : > { %v13181_v13 = vpop.f32.mrf.mxu2  ;;  %2971 = vmatpush.bf16.msra.mxu3 %v12136_v58  ;;  %v1648_v14 = vadd.f32 %v1647_v36, %v1599_v34  ;;  %3736 = vmatmul.bf16.gmra.mxu0 %v9401_v41  ;;  %v9456_v34 = vld [vmem:[%s16224_s3 + $0x700] sm:$0xf]  ;;  %v11238_v36 = vld [vmem:[%s16224_s3 + $0x70c] sm:$0xf0] }
 0x3de   : > { %v1697_v52 = vadd.f32 %v13068_v20, %v1648_v14  ;;  %v8840_v20 = vld [vmem:[%s16224_s3 + $0x368] sm:$0xf]  ;;  %v9457_v14 = vor.u32 %v11238_v36, %v9456_v34 }
 0x3df   : > { %v8841_v17 = vor.u32 %v11123_v54, %v8840_v20  ;;  %v11085_v54 = vld [vmem:[%s16224_s3 + $0x24c] sm:$0xf] }
 0x3e0   : > { %2972 = vmatpush.bf16.msra.mxu3 %v12143_v63  ;;  %v1717_v50 = vpack.c.bf16 %v1697_v52, %v1697_v52 }
 0x3e1   : > { %v13204_v57 = vpop.f32.mrf.mxu0 }
 0x3e2   : > { %16317 = vst [vmem:[#allocation52_spill] sm:$0xff] %v13204_v57  ;;  %v13206_v38 = vpop.f32.mrf.mxu3  ;;  %v9520_v57 = vld [vmem:[%s16224_s3 + $0x780] sm:$0xf] }
 0x3e3   : > { %1733 = vst [vmem:[#allocation2 + $0x1d8] sm:$0xf] %v1717_v50  ;;  %v1650_v37 = vpop.f32.mrf.mxu1 }
 0x3e4   : > { %v13210_v48 = vpop.f32.mrf.mxu2  ;;  %2973 = vmatpush.bf16.msra.mxu3 %v12154_v1  ;;  %v1651_v41 = vadd.f32 %v1650_v37, %v1602_v51  ;;  %v8658_v51 = vld [vmem:[%s16224_s3 + $0x258] sm:$0xf0]  ;;  %v11127_v37 = vld [vmem:[%s16224_s3 + $0x394] sm:$0xf0] }
 0x3e5   : > { %v8661_v36 = vor.u32 %v11085_v54, %v8658_v51 }
 0x3e6   : > { %v1700_v55 = vadd.f32 %v13084_v62, %v1651_v41  ;;  %2037 = vmatmul.bf16.gmra.mxu1 %v8733_v39  ;;  %v8786_v39 = vld [vmem:[%s16224_s3 + $0x310] sm:$0xf0] }
 0x3e7   : > { %8743 = vmatmul.msk.bf16.gmra.mxu3 %vm1046_vm0, %v8645_v5 }
 0x3e8   : > { %v1718_v23 = vpack.c.bf16 %v1700_v55, %v1700_v55  ;;  %v8789_v55 = vor.u32 %v11108_v2, %v8786_v39 }
 0x3e9   : > { %2503 = vmatmul.bf16.gmra.mxu2 %v8841_v17  ;;  %v13221_v52 = vpop.f32.mrf.mxu0 }
 0x3ea   : > { %16318 = vst [vmem:[#allocation53_spill] sm:$0xff] %v13221_v52  ;;  %v13223_v12 = vpop.f32.mrf.mxu3 }
 0x3eb   : > { %1734 = vst [vmem:[#allocation2 + $0x1fc] sm:$0xf] %v1718_v23  ;;  %v1652_v50 = vpop.f32.mrf.mxu1 }
 0x3ec   : > { %v13227_v29 = vpop.f32.mrf.mxu2  ;;  %v1653_v20 = vadd.f32 %v1652_v50, %v1604_v60  ;;  %4138 = vmatmul.bf16.vlgmr.msrb.gmra.mxu0 %v9457_v14  ;;  %v9472_v60 = vld [vmem:[%s16224_s3 + $0x720] sm:$0xf]  ;;  %v11242_v50 = vld [vmem:[%s16224_s3 + $0x72c] sm:$0xf0] }
 0x3ee   : > { %v1702_v62 = vadd.f32 %v13113_v3, %v1653_v20  ;;  %v8856_v3 = vld [vmem:[%s16224_s3 + $0x388] sm:$0xf] }
 0x3ef   : > { %v8857_v14 = vor.u32 %v11127_v37, %v8856_v3  ;;  %v8674_v3 = vld [vmem:[%s16224_s3 + $0x278] sm:$0xf0]  ;;  %v11112_v37 = vld [vmem:[%s16224_s3 + $0x324] sm:$0xf] }
 0x3f0   : > { %v1719_v5 = vpack.c.bf16 %v1702_v62, %v1702_v62  ;;  %v9473_v62 = vor.u32 %v11242_v50, %v9472_v60 }
 0x3f1   : > { %v13248_v17 = vpop.f32.mrf.mxu0 }
 0x3f2   : > { %16320 = vst [vmem:[#allocation46_spill] sm:$0xff] %v13248_v17  ;;  %v13250_v41 = vpop.f32.mrf.mxu3  ;;  %v9504_v17 = vld [vmem:[%s16224_s3 + $0x760] sm:$0xf] }
 0x3f3   : > { %1735 = vst [vmem:[#allocation2 + $0x220] sm:$0xf] %v1719_v5  ;;  %v2003_v23 = vpop.f32.mrf.mxu1 }
 0x3f4   : > { %v13252_v34 = vpop.f32.mrf.mxu2  ;;  %v2004_v30 = vadd.f32 %v2003_v23, %v13127_v7 }
 0x3f6   : > { %2439 = vmatmul.bf16.vlgmr.msra.gmra.mxu1 %v8789_v55  ;;  %v13263_v20 = vadd.f32 %v13131_v47, %v2004_v30  ;;  %v11089_v47 = vld [vmem:[%s16224_s3 + $0x26c] sm:$0xf] }
 0x3f7   : > { %8744 = vmatmul.msk.bf16.gmra.mxu3 %vm1046_vm0, %v8661_v36  ;;  %3305 = vmatpush.bf16.msra.mxu1 %v11826_v11  ;;  %v8872_v36 = vld [vmem:[%s16224_s3 + $0x3a8] sm:$0xf]  ;;  %v8677_v30 = vor.u32 %v11089_v47, %v8674_v3 }
 0x3f9   : > { %2508 = vmatmul.bf16.gmra.mxu2 %v8857_v14  ;;  %v13266_v54 = vpop.f32.mrf.mxu0 }
 0x3fa   : > { %16321 = vst [vmem:[#allocation54_spill] sm:$0xff] %v13266_v54  ;;  %v13268_v7 = vpop.f32.mrf.mxu3 }
 0x3fb   : > { %3306 = vmatpush.bf16.msra.mxu1 %v11832_v22  ;;  %v2005_v2 = vpop.f32.mrf.mxu1 }
 0x3fc   : > { %v13270_v51 = vpop.f32.mrf.mxu2  ;;  %v2006_v39 = vadd.f32 %v2005_v2, %v13158_v10  ;;  %4143 = vmatmul.bf16.gmra.mxu0 %v9473_v62  ;;  %v8802_v10 = vld [vmem:[%s16224_s3 + $0x330] sm:$0xf0] }
 0x3fd   : > { %v8805_v60 = vor.u32 %v11112_v37, %v8802_v10 }
 0x3fe   : > { %v13278_v5 = vadd.f32 %v13162_v21, %v2006_v39  ;;  %v11131_v21 = vld [vmem:[%s16224_s3 + $0x3b4] sm:$0xf0]  ;;  %v9488_v39 = vld [vmem:[%s16224_s3 + $0x740] sm:$0xf] }
 0x3ff   : > { %3307 = vmatpush.bf16.msra.mxu1 %v11836_v28  ;;  %v8873_v62 = vor.u32 %v11131_v21, %v8872_v36 }
 0x401   : > { %v13296_v55 = vpop.f32.mrf.mxu0 }
 0x402   : > { %16322 = vst [vmem:[#allocation55_spill] sm:$0xff] %v13296_v55  ;;  %v13298_v23 = vpop.f32.mrf.mxu3  ;;  %v11246_v55 = vld [vmem:[%s16224_s3 + $0x74c] sm:$0xf0] }
 0x403   : > { %3308 = vmatpush.bf16.msra.mxu1 %v11840_v33  ;;  %v2008_v50 = vpop.f32.mrf.mxu1  ;;  %v9489_v3 = vor.u32 %v11246_v55, %v9488_v39  ;;  %v8690_v55 = vld [vmem:[%s16224_s3 + $0x298] sm:$0xf0] }
 0x404   : > { %v13300_v14 = vpop.f32.mrf.mxu2  ;;  %v2009_v2 = vadd.f32 %v2008_v50, %v13177_v40  ;;  %v8888_v50 = vld [vmem:[%s16224_s3 + $0x3c8] sm:$0xf] }
 0x406   : > { %2444 = vmatmul.bf16.gmra.mxu1 %v8805_v60  ;;  %v13312_v47 = vadd.f32 %v13181_v13, %v2009_v2  ;;  %v11093_v13 = vld [vmem:[%s16224_s3 + $0x28c] sm:$0xf]  ;;  %v11116_v60 = vld [vmem:[%s16224_s3 + $0x344] sm:$0xf] }
 0x407   : > { %8745 = vmatmul.msk.bf16.gmra.mxu3 %vm1046_vm0, %v8677_v30  ;;  %3309 = vmatpush.bf16.msra.mxu1 %v11815_v53 }
 0x409   : > { %2513 = vmatmul.bf16.gmra.mxu2 %v8873_v62  ;;  %v13315_v37 = vpop.f32.mrf.mxu0 }
 0x40a   : > { %16323 = vst [vmem:[#allocation56_spill] sm:$0xff] %v13315_v37  ;;  %v13317_v40 = vpop.f32.mrf.mxu3 }
 0x40b   : > { %3310 = vmatpush.bf16.msra.mxu1 %v11806_v44  ;;  %v2010_v36 = vpop.f32.mrf.mxu1 }
 0x40c   : > { %v13319_v10 = vpop.f32.mrf.mxu2  ;;  %v2011_v21 = vadd.f32 %v2010_v36, %v13206_v38  ;;  %4148 = vmatmul.bf16.gmra.mxu0 %v9489_v3  ;;  %v8818_v38 = vld [vmem:[%s16224_s3 + $0x350] sm:$0xf0]  ;;  %v8693_v3 = vor.u32 %v11093_v13, %v8690_v55 }
 0x40d   : > { %v8821_v36 = vor.u32 %v11116_v60, %v8818_v38 }
 0x40e   : > { %v13327_v30 = vadd.f32 %v13210_v48, %v2011_v21  ;;  %v11135_v48 = vld [vmem:[%s16224_s3 + $0x3d4] sm:$0xf0] }
 0x40f   : > { %3311 = vmatpush.bf16.msra.mxu1 %v11797_v35  ;;  %v8889_v37 = vor.u32 %v11135_v48, %v8888_v50 }
 0x411   : > { %v13345_v62 = vpop.f32.mrf.mxu0 }
 0x412   : > { %16324 = vst [vmem:[#allocation57_spill] sm:$0xff] %v13345_v62  ;;  %v13347_v2 = vpop.f32.mrf.mxu3  ;;  %v11250_v62 = vld [vmem:[%s16224_s3 + $0x76c] sm:$0xf0] }
 0x413   : > { %3312 = vmatpush.bf16.msra.mxu1 %v11784_v26  ;;  %v2013_v21 = vpop.f32.mrf.mxu1  ;;  %v9505_v55 = vor.u32 %v11250_v62, %v9504_v17  ;;  %v11120_v17 = vld [vmem:[%s16224_s3 + $0x364] sm:$0xf] }
 0x414   : > { %v13349_v39 = vpop.f32.mrf.mxu2  ;;  %v2014_v54 = vadd.f32 %v2013_v21, %v13223_v12 }
 0x416   : > { %2449 = vmatmul.bf16.gmra.mxu1 %v8821_v36  ;;  %v13361_v13 = vadd.f32 %v13227_v29, %v2014_v54  ;;  %v8706_v29 = vld [vmem:[%s16224_s3 + $0x2b8] sm:$0xf0]  ;;  %v8904_v54 = vld [vmem:[%s16224_s3 + $0x3e8] sm:$0xf] }
 0x417   : > { %8746 = vmatmul.msk.bf16.gmra.mxu3 %vm1046_vm0, %v8693_v3  ;;  %v11097_v3 = vld [vmem:[%s16224_s3 + $0x2ac] sm:$0xf] }
 0x419   : > { %2518 = vmatmul.bf16.gmra.mxu2 %v8889_v37  ;;  %v13363_v60 = vpop.f32.mrf.mxu0 }
 0x41a   : > { %16325 = vst [vmem:[#allocation58_spill] sm:$0xff] %v13363_v60  ;;  %v13365_v38 = vpop.f32.mrf.mxu3 }
 0x41b   : > { %v2015_v50 = vpop.f32.mrf.mxu1 }
 0x41c   : > { %v13367_v12 = vpop.f32.mrf.mxu2  ;;  %v2016_v48 = vadd.f32 %v2015_v50, %v13250_v41  ;;  %4153 = vmatmul.bf16.gmra.mxu0 %v9505_v55  ;;  %v8834_v41 = vld [vmem:[%s16224_s3 + $0x370] sm:$0xf0]  ;;  %v8709_v55 = vor.u32 %v11097_v3, %v8706_v29  ;;  %v9521_v3 = vor.u32 %v11254_v0, %v9520_v57  ;;  %v8722_v0 = vld [vmem:[%s16224_s3 + $0x2d8] sm:$0xf0]  ;;  %v11124_v57 = vld [vmem:[%s16224_s3 + $0x384] sm:$0xf] }
 0x41d   : > { %v8837_v50 = vor.u32 %v11120_v17, %v8834_v41 }
 0x41e   : > { %v13374_v36 = vadd.f32 %v13252_v34, %v2016_v48  ;;  %v11139_v34 = vld [vmem:[%s16224_s3 + $0x3f4] sm:$0xf0] }
 0x41f   : > { %v8905_v60 = vor.u32 %v11139_v34, %v8904_v54  ;;  %v11101_v34 = vld [vmem:[%s16224_s3 + $0x2cc] sm:$0xf] }
 0x421   : > { %v13391_v37 = vpop.f32.mrf.mxu0 }
 0x422   : > { %16326 = vst [vmem:[#allocation59_spill] sm:$0xff] %v13391_v37  ;;  %v13393_v62 = vpop.f32.mrf.mxu3 }
 0x423   : > { %v2018_v48 = vpop.f32.mrf.mxu1 }
 0x424   : > { %v13395_v21 = vpop.f32.mrf.mxu2  ;;  %v2019_v52 = vadd.f32 %v2018_v48, %v13268_v7  ;;  %v8725_v48 = vor.u32 %v11101_v34, %v8722_v0  ;;  %v9537_v34 = vor.u32 %v11258_v42, %v9536_v49  ;;  %v8738_v42 = vld [vmem:[%s16224_s3 + $0x2f8] sm:$0xf0]  ;;  %v11128_v49 = vld [vmem:[%s16224_s3 + $0x3a4] sm:$0xf] }
 0x426   : > { %2454 = vmatmul.bf16.gmra.mxu1 %v8837_v50  ;;  %v13406_v37 = vadd.f32 %v13270_v51, %v2019_v52  ;;  %v8850_v52 = vld [vmem:[%s16224_s3 + $0x390] sm:$0xf0]  ;;  %v8960_v51 = vld [vmem:[%s16224_s3 + $0x408] sm:$0xf] }
 0x427   : > { %8747 = vmatmul.msk.bf16.gmra.mxu3 %vm1046_vm0, %v8709_v55 }
 0x429   : > { %2523 = vmatmul.bf16.gmra.mxu2 %v8905_v60  ;;  %v13408_v29 = vpop.f32.mrf.mxu0 }
 0x42a   : > { %16327 = vst [vmem:[#allocation60_spill] sm:$0xff] %v13408_v29  ;;  %v13410_v17 = vpop.f32.mrf.mxu3 }
 0x42b   : > { %v2020_v41 = vpop.f32.mrf.mxu1 }
 0x42c   : > { %v13412_v7 = vpop.f32.mrf.mxu2  ;;  %v2021_v54 = vadd.f32 %v2020_v41, %v13298_v23  ;;  %4158 = vmatmul.bf16.gmra.mxu0 %v9521_v3  ;;  %v11143_v23 = vld [vmem:[%s16224_s3 + $0x414] sm:$0xf0]  ;;  %v8853_v3 = vor.u32 %v11124_v57, %v8850_v52 }
 0x42e   : > { %v13419_v55 = vadd.f32 %v13300_v14, %v2021_v54  ;;  %v8961_v54 = vor.u32 %v11143_v23, %v8960_v51  ;;  %v8976_v23 = vld [vmem:[%s16224_s3 + $0x428] sm:$0xf] }
 0x431   : > { %v13436_v14 = vpop.f32.mrf.mxu0 }
 0x432   : > { %16328 = vst [vmem:[#allocation61_spill] sm:$0xff] %v13436_v14  ;;  %v13438_v60 = vpop.f32.mrf.mxu3 }
 0x433   : > { %v2023_v41 = vpop.f32.mrf.mxu1 }
 0x434   : > { %v13440_v50 = vpop.f32.mrf.mxu2  ;;  %v2024_v29 = vadd.f32 %v2023_v41, %v13317_v40 }
 0x436   : > { %2459 = vmatmul.bf16.gmra.mxu1 %v8853_v3  ;;  %v13451_v14 = vadd.f32 %v13319_v10, %v2024_v29  ;;  %v11105_v10 = vld [vmem:[%s16224_s3 + $0x2ec] sm:$0xf] }
 0x437   : > { %8748 = vmatmul.msk.bf16.gmra.mxu3 %vm1046_vm0, %v8725_v48 }
 0x439   : > { %2925 = vmatmul.bf16.vlgmr.msrb.gmra.mxu2 %v8961_v54  ;;  %v13454_v0 = vpop.f32.mrf.mxu0  ;;  %v8741_v54 = vor.u32 %v11105_v10, %v8738_v42 }
 0x43a   : > { %3791 = vmatpush.bf16.msrb.mxu2 %v11998_v46  ;;  %16329 = vst [vmem:[#allocation62_spill] sm:$0xff] %v13454_v0  ;;  %v13456_v40 = vpop.f32.mrf.mxu3 }
 0x43b   : > { %v2025_v52 = vpop.f32.mrf.mxu1 }
 0x43c   : > { %v13458_v57 = vpop.f32.mrf.mxu2  ;;  %v2026_v51 = vadd.f32 %v2025_v52, %v13347_v2  ;;  %4163 = vmatmul.bf16.gmra.mxu0 %v9537_v34  ;;  %v8866_v2 = vld [vmem:[%s16224_s3 + $0x3b0] sm:$0xf0] }
 0x43d   : > { %v8869_v34 = vor.u32 %v11128_v49, %v8866_v2 }
 0x43e   : > { %3792 = vmatpush.bf16.msrb.mxu2 %v12006_v59  ;;  %v13466_v29 = vadd.f32 %v13349_v39, %v2026_v51  ;;  %v11147_v39 = vld [vmem:[%s16224_s3 + $0x434] sm:$0xf0] }
 0x43f   : > { %v8977_v51 = vor.u32 %v11147_v39, %v8976_v23 }
 0x441   : > { %v13484_v48 = vpop.f32.mrf.mxu0 }
 0x442   : > { %3793 = vmatpush.bf16.msrb.mxu2 %v12011_v61  ;;  %16330 = vst [vmem:[#allocation63_spill] sm:$0xff] %v13484_v48  ;;  %v13486_v3 = vpop.f32.mrf.mxu3  ;;  %v11262_v48 = vld [vmem:[%s16224_s3 + $0x7cc] sm:$0xf0] }
 0x443   : > { %v2028_v52 = vpop.f32.mrf.mxu1  ;;  %v9553_v42 = vor.u32 %v11262_v48, %v9552_v45  ;;  %v8882_v45 = vld [vmem:[%s16224_s3 + $0x3d0] sm:$0xf0]  ;;  %v11109_v48 = vld [vmem:[%s16224_s3 + $0x30c] sm:$0xf] }
 0x444   : > { %v13488_v41 = vpop.f32.mrf.mxu2  ;;  %v2029_v0 = vadd.f32 %v2028_v52, %v13365_v38 }
 0x446   : > { %3794 = vmatpush.bf16.msrb.mxu2 %v12022_v31  ;;  %2464 = vmatmul.bf16.gmra.mxu1 %v8869_v34  ;;  %v13500_v10 = vadd.f32 %v13367_v12, %v2029_v0  ;;  %v11132_v12 = vld [vmem:[%s16224_s3 + $0x3c4] sm:$0xf] }
 0x447   : > { %8749 = vmatmul.msk.bf16.gmra.mxu3 %vm1046_vm0, %v8741_v54  ;;  %v8992_v54 = vld [vmem:[%s16224_s3 + $0x448] sm:$0xf] }
 0x449   : > { %2930 = vmatmul.bf16.gmra.mxu2 %v8977_v51  ;;  %v13503_v49 = vpop.f32.mrf.mxu0 }
 0x44a   : > { %3795 = vmatpush.bf16.msrb.mxu2 %v16286_v27  ;;  %16331 = vst [vmem:[#allocation64_spill] sm:$0xff] %v13503_v49  ;;  %v13505_v38 = vpop.f32.mrf.mxu3 }
 0x44b   : > { %v2030_v23 = vpop.f32.mrf.mxu1 }
 0x44c   : > { %v13507_v2 = vpop.f32.mrf.mxu2  ;;  %v2031_v39 = vadd.f32 %v2030_v23, %v13393_v62  ;;  %4168 = vmatmul.bf16.gmra.mxu0 %v9553_v42  ;;  %v8794_v62 = vld [vmem:[%s16224_s3 + $0x318] sm:$0xf0]  ;;  %v8885_v42 = vor.u32 %v11132_v12, %v8882_v45 }
 0x44d   : > { %v8797_v23 = vor.u32 %v11109_v48, %v8794_v62 }
 0x44e   : > { %3796 = vmatpush.bf16.msrb.mxu2 %v16288_v4  ;;  %v13515_v0 = vadd.f32 %v13395_v21, %v2031_v39  ;;  %v11151_v21 = vld [vmem:[%s16224_s3 + $0x454] sm:$0xf0] }
 0x44f   : > { %v8993_v49 = vor.u32 %v11151_v21, %v8992_v54 }
 0x451   : > { %v13533_v34 = vpop.f32.mrf.mxu0 }
 0x452   : > { %3797 = vmatpush.bf16.msrb.mxu2 %v16289_v6  ;;  %16332 = vst [vmem:[#allocation65_spill] sm:$0xff] %v13533_v34  ;;  %v13535_v52 = vpop.f32.mrf.mxu3  ;;  %v11266_v34 = vld [vmem:[%s16224_s3 + $0x7ec] sm:$0xf0] }
 0x453   : > { %v2033_v39 = vpop.f32.mrf.mxu1  ;;  %v9569_v45 = vor.u32 %v11266_v34, %v9568_v9 }
 0x454   : > { %v13537_v51 = vpop.f32.mrf.mxu2  ;;  %v2034_v18 = vadd.f32 %v2033_v39, %v13410_v17 }
 0x456   : > { %3798 = vmatpush.bf16.msrb.mxu2 %v16292_v8  ;;  %2469 = vmatmul.bf16.gmra.mxu1 %v8885_v42  ;;  %v13549_v12 = vadd.f32 %v13412_v7, %v2034_v18  ;;  %v11136_v18 = vld [vmem:[%s16224_s3 + $0x3e4] sm:$0xf]  ;;  %v11113_v7 = vld [vmem:[%s16224_s3 + $0x32c] sm:$0xf] }
 0x457   : > { %8910 = vmatmul.msk.bf16.vlgmr.msrb.gmra.mxu3 %vm1046_vm0, %v8797_v23 }
 0x458   : > { %3407 = vmatpush.bf16.msrb.mxu3 %v12121_v43 }
 0x459   : > { %2935 = vmatmul.bf16.gmra.mxu2 %v8993_v49  ;;  %v13552_v48 = vpop.f32.mrf.mxu0  ;;  %v9008_v49 = vld [vmem:[%s16224_s3 + $0x468] sm:$0xf] }
 0x45a   : > { %16333 = vst [vmem:[#allocation66_spill] sm:$0xff] %v13552_v48  ;;  %v2101_v17 = vpop.f32.mrf.mxu3 }
 0x45b   : > { %v2102_v62 = vadd.f32 %v2101_v17, %v13263_v20  ;;  %v2035_v21 = vpop.f32.mrf.mxu1  ;;  %v8898_v20 = vld [vmem:[%s16224_s3 + $0x3f0] sm:$0xf0] }
 0x45c   : > { %v13555_v54 = vpop.f32.mrf.mxu2  ;;  %3408 = vmatpush.bf16.msrb.mxu3 %v12136_v58  ;;  %v2036_v23 = vadd.f32 %v2035_v21, %v13438_v60  ;;  %4173 = vmatmul.bf16.gmra.mxu0 %v9569_v45  ;;  %v8810_v60 = vld [vmem:[%s16224_s3 + $0x338] sm:$0xf0] }
 0x45d   : > { %v2141_v42 = vpack.c.bf16 %v2102_v62, %v2102_v62  ;;  %v8901_v62 = vor.u32 %v11136_v18, %v8898_v20  ;;  %v8813_v21 = vor.u32 %v11113_v7, %v8810_v60 }
 0x45e   : > { %v13563_v9 = vadd.f32 %v13440_v50, %v2036_v23  ;;  %v11155_v50 = vld [vmem:[%s16224_s3 + $0x474] sm:$0xf0] }
 0x45f   : > { %2157 = vst [vmem:[#allocation2 + $0x8] sm:$0xf] %v2141_v42  ;;  %v9009_v23 = vor.u32 %v11155_v50, %v9008_v49 }
 0x460   : > { %3409 = vmatpush.bf16.msrb.mxu3 %v12143_v63 }
 0x461   : > { %v13581_v34 = vpop.f32.mrf.mxu0 }
 0x462   : > { %16334 = vst [vmem:[#allocation67_spill] sm:$0xff] %v13581_v34  ;;  %v2103_v39 = vpop.f32.mrf.mxu3  ;;  %v11270_v34 = vld [vmem:[%s16224_s3 + $0x80c] sm:$0xf0] }
 0x463   : > { %v2104_v45 = vadd.f32 %v2103_v39, %v13278_v5  ;;  %v2038_v42 = vpop.f32.mrf.mxu1  ;;  %v9625_v18 = vor.u32 %v11270_v34, %v9624_v15  ;;  %v8826_v15 = vld [vmem:[%s16224_s3 + $0x358] sm:$0xf0] }
 0x464   : > { %v13584_v17 = vpop.f32.mrf.mxu2  ;;  %3410 = vmatpush.bf16.msrb.mxu3 %v12154_v1  ;;  %v2039_v25 = vadd.f32 %v2038_v42, %v13456_v40 }
 0x465   : > { %v2142_v48 = vpack.c.bf16 %v2104_v45, %v2104_v45 }
 0x466   : > { %2474 = vmatmul.bf16.gmra.mxu1 %v8901_v62  ;;  %v13596_v5 = vadd.f32 %v13505_v38, %v2039_v25  ;;  %v11117_v25 = vld [vmem:[%s16224_s3 + $0x34c] sm:$0xf] }
 0x467   : > { %2158 = vst [vmem:[#allocation2 + $0x2c] sm:$0xf] %v2142_v48  ;;  %8911 = vmatmul.msk.bf16.gmra.mxu3 %vm1046_vm0, %v8813_v21  ;;  %v9024_v48 = vld [vmem:[%s16224_s3 + $0x488] sm:$0xf]  ;;  %v8829_v42 = vor.u32 %v11117_v25, %v8826_v15 }
 0x469   : > { %2940 = vmatmul.bf16.gmra.mxu2 %v9009_v23  ;;  %v13598_v20 = vpop.f32.mrf.mxu0 }
 0x46a   : > { %16335 = vst [vmem:[#allocation68_spill] sm:$0xff] %v13598_v20  ;;  %v2106_v40 = vpop.f32.mrf.mxu3 }
 0x46b   : > { %v2107_v7 = vadd.f32 %v2106_v40, %v13312_v47  ;;  %v2040_v49 = vpop.f32.mrf.mxu1  ;;  %v11140_v47 = vld [vmem:[%s16224_s3 + $0x404] sm:$0xf] }
 0x46c   : > { %v13601_v60 = vpop.f32.mrf.mxu2  ;;  %v2041_v39 = vadd.f32 %v2040_v49, %v13486_v3  ;;  %4575 = vmatmul.bf16.vlgmr.msra.gmra.mxu0 %v9625_v18  ;;  %v8954_v3 = vld [vmem:[%s16224_s3 + $0x410] sm:$0xf0]  ;;  %v9640_v49 = vld [vmem:[%s16224_s3 + $0x820] sm:$0xf] }
 0x46d   : > { %v2143_v50 = vpack.c.bf16 %v2107_v7, %v2107_v7  ;;  %v8957_v23 = vor.u32 %v11140_v47, %v8954_v3 }
 0x46e   : > { %v13608_v38 = vadd.f32 %v13535_v52, %v2041_v39  ;;  %v11159_v52 = vld [vmem:[%s16224_s3 + $0x494] sm:$0xf0] }
 0x46f   : > { %2159 = vst [vmem:[#allocation2 + $0x50] sm:$0xf] %v2143_v50  ;;  %v9025_v40 = vor.u32 %v11159_v52, %v9024_v48  ;;  %v11274_v50 = vld [vmem:[%s16224_s3 + $0x82c] sm:$0xf0]  ;;  %v11121_v52 = vld [vmem:[%s16224_s3 + $0x36c] sm:$0xf] }
 0x471   : > { %v13625_v34 = vpop.f32.mrf.mxu0 }
 0x472   : > { %16336 = vst [vmem:[#allocation69_spill] sm:$0xff] %v13625_v34  ;;  %v2108_v45 = vpop.f32.mrf.mxu3  ;;  %v9656_v34 = vld [vmem:[%s16224_s3 + $0x840] sm:$0xf] }
 0x473   : > { %v2109_v62 = vadd.f32 %v2108_v45, %v13327_v30  ;;  %v13630_v18 = vpop.f32.mrf.mxu1  ;;  %v9641_v30 = vor.u32 %v11274_v50, %v9640_v49  ;;  %v8842_v45 = vld [vmem:[%s16224_s3 + $0x378] sm:$0xf0] }
 0x474   : > { %v13628_v21 = vpop.f32.mrf.mxu2 }
 0x475   : > { %v2144_v7 = vpack.c.bf16 %v2109_v62, %v2109_v62  ;;  %v8970_v62 = vld [vmem:[%s16224_s3 + $0x430] sm:$0xf0] }
 0x476   : > { %2876 = vmatmul.bf16.vlgmr.msrb.gmra.mxu1 %v8957_v23  ;;  %v11163_v23 = vld [vmem:[%s16224_s3 + $0x4b4] sm:$0xf0] }
 0x477   : > { %2160 = vst [vmem:[#allocation2 + $0x74] sm:$0xf] %v2144_v7  ;;  %8912 = vmatmul.msk.bf16.gmra.mxu3 %vm1046_vm0, %v8829_v42  ;;  %3742 = vmatpush.bf16.msrb.mxu1 %v11826_v11  ;;  %v9040_v42 = vld [vmem:[%s16224_s3 + $0x4a8] sm:$0xf] }
 0x479   : > { %2945 = vmatmul.bf16.gmra.mxu2 %v9025_v40  ;;  %v13640_v39 = vpop.f32.mrf.mxu0 }
 0x47a   : > { %16337 = vst [vmem:[#allocation70_spill] sm:$0xff] %v13640_v39  ;;  %v2111_v25 = vpop.f32.mrf.mxu3 }
 0x47b   : > { %v2112_v15 = vadd.f32 %v2111_v25, %v13361_v13  ;;  %3743 = vmatpush.bf16.msrb.mxu1 %v11832_v22  ;;  %v13646_v3 = vpop.f32.mrf.mxu1  ;;  %v11144_v13 = vld [vmem:[%s16224_s3 + $0x424] sm:$0xf] }
 0x47c   : > { %v13643_v47 = vpop.f32.mrf.mxu2  ;;  %4580 = vmatmul.bf16.gmra.mxu0 %v9641_v30  ;;  %v8845_v30 = vor.u32 %v11121_v52, %v8842_v45  ;;  %v8973_v25 = vor.u32 %v11144_v13, %v8970_v62 }
 0x47d   : > { %v2145_v48 = vpack.c.bf16 %v2112_v15, %v2112_v15 }
 0x47f   : > { %2161 = vst [vmem:[#allocation2 + $0x98] sm:$0xf] %v2145_v48  ;;  %3744 = vmatpush.bf16.msrb.mxu1 %v11836_v28  ;;  %v9041_v48 = vor.u32 %v11163_v23, %v9040_v42 }
 0x481   : > { %v13667_v40 = vpop.f32.mrf.mxu0 }
 0x482   : > { %16338 = vst [vmem:[#allocation71_spill] sm:$0xff] %v13667_v40  ;;  %v2113_v7 = vpop.f32.mrf.mxu3  ;;  %v11278_v40 = vld [vmem:[%s16224_s3 + $0x84c] sm:$0xf0] }
 0x483   : > { %v2114_v49 = vadd.f32 %v2113_v7, %v13374_v36  ;;  %3745 = vmatpush.bf16.msrb.mxu1 %v11840_v33  ;;  %v13673_v15 = vpop.f32.mrf.mxu1  ;;  %v9657_v36 = vor.u32 %v11278_v40, %v9656_v34  ;;  %v8858_v34 = vld [vmem:[%s16224_s3 + $0x398] sm:$0xf0]  ;;  %v8986_v40 = vld [vmem:[%s16224_s3 + $0x450] sm:$0xf0]  ;;  %v9056_v7 = vld [vmem:[%s16224_s3 + $0x4c8] sm:$0xf] }
 0x484   : > { %v13670_v50 = vpop.f32.mrf.mxu2 }
 0x485   : > { %v2146_v39 = vpack.c.bf16 %v2114_v49, %v2114_v49  ;;  %v11167_v49 = vld [vmem:[%s16224_s3 + $0x4d4] sm:$0xf0] }
 0x486   : > { %2881 = vmatmul.bf16.gmra.mxu1 %v8973_v25 }
 0x487   : > { %2162 = vst [vmem:[#allocation2 + $0xbc] sm:$0xf] %v2146_v39  ;;  %8913 = vmatmul.msk.bf16.gmra.mxu3 %vm1046_vm0, %v8845_v30  ;;  %3746 = vmatpush.bf16.msrb.mxu1 %v11815_v53  ;;  %v11125_v39 = vld [vmem:[%s16224_s3 + $0x38c] sm:$0xf] }
 0x489   : > { %2950 = vmatmul.bf16.gmra.mxu2 %v9041_v48  ;;  %v13683_v52 = vpop.f32.mrf.mxu0 }
 0x48a   : > { %16339 = vst [vmem:[#allocation72_spill] sm:$0xff] %v13683_v52  ;;  %v2116_v45 = vpop.f32.mrf.mxu3  ;;  %v9057_v52 = vor.u32 %v11167_v49, %v9056_v7 }
 0x48b   : > { %v2117_v13 = vadd.f32 %v2116_v45, %v13406_v37  ;;  %3747 = vmatpush.bf16.msrb.mxu1 %v11806_v44  ;;  %v13689_v42 = vpop.f32.mrf.mxu1  ;;  %v11148_v37 = vld [vmem:[%s16224_s3 + $0x444] sm:$0xf]  ;;  %v8861_v45 = vor.u32 %v11125_v39, %v8858_v34 }
 0x48c   : > { %v13686_v62 = vpop.f32.mrf.mxu2  ;;  %4585 = vmatmul.bf16.gmra.mxu0 %v9657_v36 }
 0x48d   : > { %v2147_v23 = vpack.c.bf16 %v2117_v13, %v2117_v13  ;;  %v8989_v13 = vor.u32 %v11148_v37, %v8986_v40 }
 0x48f   : > { %2163 = vst [vmem:[#allocation2 + $0xe0] sm:$0xf] %v2147_v23  ;;  %3748 = vmatpush.bf16.msrb.mxu1 %v11797_v35 }
 0x491   : > { %v13710_v30 = vpop.f32.mrf.mxu0 }
 0x492   : > { %16340 = vst [vmem:[#allocation73_spill] sm:$0xff] %v13710_v30  ;;  %v2118_v25 = vpop.f32.mrf.mxu3  ;;  %v11282_v30 = vld [vmem:[%s16224_s3 + $0x86c] sm:$0xf0] }
 0x493   : > { %v2119_v48 = vadd.f32 %v2118_v25, %v13419_v55  ;;  %3749 = vmatpush.bf16.msrb.mxu1 %v11784_v26  ;;  %v13716_v23 = vpop.f32.mrf.mxu1  ;;  %v9673_v55 = vor.u32 %v11282_v30, %v9672_v24  ;;  %v8874_v24 = vld [vmem:[%s16224_s3 + $0x3b8] sm:$0xf0]  ;;  %v9072_v30 = vld [vmem:[%s16224_s3 + $0x4e8] sm:$0xf]  ;;  %v11171_v25 = vld [vmem:[%s16224_s3 + $0x4f4] sm:$0xf0] }
 0x494   : > { %v13713_v36 = vpop.f32.mrf.mxu2 }
 0x495   : > { %v2148_v20 = vpack.c.bf16 %v2119_v48, %v2119_v48 }
 0x496   : > { %2886 = vmatmul.bf16.gmra.mxu1 %v8989_v13 }
 0x497   : > { %2164 = vst [vmem:[#allocation2 + $0x104] sm:$0xf] %v2148_v20  ;;  %8914 = vmatmul.msk.bf16.gmra.mxu3 %vm1046_vm0, %v8861_v45  ;;  %v11129_v20 = vld [vmem:[%s16224_s3 + $0x3ac] sm:$0xf] }
 0x499   : > { %2955 = vmatmul.bf16.gmra.mxu2 %v9057_v52  ;;  %v13725_v39 = vpop.f32.mrf.mxu0  ;;  %v11152_v52 = vld [vmem:[%s16224_s3 + $0x464] sm:$0xf] }
 0x49a   : > { %16341 = vst [vmem:[#allocation74_spill] sm:$0xff] %v13725_v39  ;;  %v2121_v34 = vpop.f32.mrf.mxu3  ;;  %v9073_v39 = vor.u32 %v11171_v25, %v9072_v30 }
 0x49b   : > { %v2122_v37 = vadd.f32 %v2121_v34, %v13451_v14  ;;  %v13730_v7 = vpop.f32.mrf.mxu1  ;;  %v9002_v14 = vld [vmem:[%s16224_s3 + $0x470] sm:$0xf0]  ;;  %v8877_v34 = vor.u32 %v11129_v20, %v8874_v24 }
 0x49c   : > { %v13728_v40 = vpop.f32.mrf.mxu2  ;;  %4590 = vmatmul.bf16.gmra.mxu0 %v9673_v55 }
 0x49d   : > { %v2149_v49 = vpack.c.bf16 %v2122_v37, %v2122_v37  ;;  %v9005_v37 = vor.u32 %v11152_v52, %v9002_v14 }
 0x49f   : > { %2165 = vst [vmem:[#allocation2 + $0x128] sm:$0xf] %v2149_v49 }
 0x4a1   : > { %v13750_v48 = vpop.f32.mrf.mxu0 }
 0x4a2   : > { %16342 = vst [vmem:[#allocation75_spill] sm:$0xff] %v13750_v48  ;;  %v2123_v45 = vpop.f32.mrf.mxu3 }
 0x4a3   : > { %v2124_v13 = vadd.f32 %v2123_v45, %v13466_v29  ;;  %v13755_v49 = vpop.f32.mrf.mxu1  ;;  %v9689_v29 = vor.u32 %v11286_v56, %v9688_v32  ;;  %v11133_v56 = vld [vmem:[%s16224_s3 + $0x3cc] sm:$0xf]  ;;  %v8890_v32 = vld [vmem:[%s16224_s3 + $0x3d8] sm:$0xf0]  ;;  %v9128_v45 = vld [vmem:[%s16224_s3 + $0x508] sm:$0xf] }
 0x4a4   : > { %v13753_v55 = vpop.f32.mrf.mxu2 }
 0x4a5   : > { %16343 = vst [vmem:[#allocation76_spill] sm:$0xff] %v13753_v55  ;;  %v2150_v19 = vpack.c.bf16 %v2124_v13, %v2124_v13  ;;  %v11175_v13 = vld [vmem:[%s16224_s3 + $0x514] sm:$0xf0]  ;;  %v9704_v55 = vld [vmem:[%s16224_s3 + $0x8a0] sm:$0xf] }
 0x4a6   : > { %2891 = vmatmul.bf16.gmra.mxu1 %v9005_v37 }
 0x4a7   : > { %2166 = vst [vmem:[#allocation2 + $0x14c] sm:$0xf] %v2150_v19  ;;  %8915 = vmatmul.msk.bf16.gmra.mxu3 %vm1046_vm0, %v8877_v34  ;;  %v11379_v19 = vld [vmem:[%s16225_s4 + $0x38] sm:$0xff]  ;;  %v11378_v34 = vld [vmem:[%s16225_s4 + $0x30] sm:$0xff] }
 0x4a8   : > { %5823 = vmatpush.bf16.msrb.mxu0 %v11379_v19 }
 0x4a9   : > { %2960 = vmatmul.bf16.gmra.mxu2 %v9073_v39  ;;  %v13764_v24 = vpop.f32.mrf.mxu0  ;;  %v9018_v39 = vld [vmem:[%s16224_s3 + $0x490] sm:$0xf0] }
 0x4aa   : > { %v2126_v20 = vpop.f32.mrf.mxu3  ;;  %16344 = vst [vmem:[#allocation77_spill] sm:$0xff] %v13764_v24  ;;  %v9129_v24 = vor.u32 %v11175_v13, %v9128_v45 }
 0x4ab   : > { %v2127_v52 = vadd.f32 %v2126_v20, %v13500_v10  ;;  %v13769_v30 = vpop.f32.mrf.mxu1  ;;  %v11156_v10 = vld [vmem:[%s16224_s3 + $0x484] sm:$0xf] }
 0x4ac   : > { %v13767_v14 = vpop.f32.mrf.mxu2  ;;  %4595 = vmatmul.bf16.gmra.mxu0 %v9689_v29 }
 0x4ad   : > { %16345 = vst [vmem:[#allocation78_spill] sm:$0xff] %v13767_v14  ;;  %v2151_v25 = vpack.c.bf16 %v2127_v52, %v2127_v52  ;;  %v8893_v52 = vor.u32 %v11133_v56, %v8890_v32  ;;  %5824 = vmatpush.bf16.msrb.mxu0 %v11378_v34  ;;  %v11377_v14 = vld [vmem:[%s16225_s4 + $0x28] sm:$0xff]  ;;  %v11376_v32 = vld [vmem:[%s16225_s4 + $0x20] sm:$0xff] }
 0x4ae   : > { %v11160_v34 = vld [vmem:[%s16224_s3 + $0x4a4] sm:$0xf] }
 0x4af   : > { %2167 = vst [vmem:[#allocation2 + $0x170] sm:$0xf] %v2151_v25  ;;  %v9021_v25 = vor.u32 %v11156_v10, %v9018_v39 }
 0x4b1   : > { %v13800_v48 = vpop.f32.mrf.mxu0  ;;  %5825 = vmatpush.bf16.msrb.mxu0 %v11377_v14  ;;  %v8906_v14 = vld [vmem:[%s16224_s3 + $0x3f8] sm:$0xf0] }
 0x4b2   : > { %v2128_v37 = vpop.f32.mrf.mxu3  ;;  %16347 = vst [vmem:[#allocation80_spill] sm:$0xff] %v13800_v48  ;;  %v11373_v48 = vld [vmem:[%s16225_s4 + $0x8] sm:$0xff] }
 0x4b3   : > { %v2129_v29 = vadd.f32 %v2128_v37, %v13515_v0  ;;  %v13798_v19 = vpop.f32.mrf.mxu1  ;;  %v11290_v0 = vld [vmem:[%s16224_s3 + $0x8ac] sm:$0xf0]  ;;  %v9034_v37 = vld [vmem:[%s16224_s3 + $0x4b0] sm:$0xf0] }
 0x4b4   : > { %v13796_v20 = vpop.f32.mrf.mxu2  ;;  %v9705_v56 = vor.u32 %v11290_v0, %v9704_v55  ;;  %v11375_v55 = vld [vmem:[%s16225_s4 + $0x18] sm:$0xff] }
 0x4b5   : > { %16346 = vst [vmem:[#allocation79_spill] sm:$0xff] %v13796_v20  ;;  %v2152_v16 = vpack.c.bf16 %v2129_v29, %v2129_v29  ;;  %5826 = vmatpush.bf16.msrb.mxu0 %v11376_v32  ;;  %v9144_v29 = vld [vmem:[%s16224_s3 + $0x528] sm:$0xf]  ;;  %v9736_v20 = vld [vmem:[%s16224_s3 + $0x8e0] sm:$0xf] }
 0x4b6   : > { %2896 = vmatmul.bf16.gmra.mxu1 %v9021_v25  ;;  %v11374_v25 = vld [vmem:[%s16225_s4 + $0x10] sm:$0xff] }
 0x4b7   : > { %2168 = vst [vmem:[#allocation2 + $0x194] sm:$0xf] %v2152_v16  ;;  %8916 = vmatmul.msk.bf16.gmra.mxu3 %vm1046_vm0, %v8893_v52  ;;  %v11179_v52 = vld [vmem:[%s16224_s3 + $0x534] sm:$0xf0] }
 0x4b9   : > { %3362 = vmatmul.bf16.vlgmr.msra.gmra.mxu2 %v9129_v24  ;;  %v13825_v24 = vpop.f32.mrf.mxu0  ;;  %5827 = vmatpush.bf16.msrb.mxu0 %v11375_v55  ;;  %v9145_v55 = vor.u32 %v11179_v52, %v9144_v29 }
 0x4ba   : > { %4228 = vmatpush.bf16.msra.mxu2 %v11998_v46  ;;  %v2131_v10 = vpop.f32.mrf.mxu3  ;;  %16349 = vst [vmem:[#allocation82_spill] sm:$0xff] %v13825_v24 }
 0x4bb   : > { %v2132_v39 = vadd.f32 %v2131_v10, %v13549_v12  ;;  %v13819_v13 = vpop.f32.mrf.mxu1  ;;  %v11137_v12 = vld [vmem:[%s16224_s3 + $0x3ec] sm:$0xf] }
 0x4bc   : > { %v13817_v45 = vpop.f32.mrf.mxu2  ;;  %4600 = vmatmul.bf16.gmra.mxu0 %v9705_v56  ;;  %v8909_v10 = vor.u32 %v11137_v12, %v8906_v14 }
 0x4bd   : > { %16348 = vst [vmem:[#allocation81_spill] sm:$0xff] %v13817_v45  ;;  %v2153_v16 = vpack.c.bf16 %v2132_v39, %v2132_v39  ;;  %v9037_v39 = vor.u32 %v11160_v34, %v9034_v37  ;;  %5828 = vmatpush.bf16.msrb.mxu0 %v11374_v25  ;;  %v9720_v45 = vld [vmem:[%s16224_s3 + $0x8c0] sm:$0xf] }
 0x4be   : > { %4229 = vmatpush.bf16.msra.mxu2 %v12006_v59  ;;  %v11372_v34 = vld [vmem:[%s16225_s4] sm:$0xff] }
 0x4bf   : > { %2169 = vst [vmem:[#allocation2 + $0x1b8] sm:$0xf] %v2153_v16 }
 0x4c1   : > { %5829 = vmatpush.bf16.msrb.mxu0 %v11373_v48  ;;  %v13865_v12 = vpop.f32.mrf.mxu0  ;;  %v11164_v48 = vld [vmem:[%s16224_s3 + $0x4c4] sm:$0xf] }
 0x4c2   : > { %4230 = vmatpush.bf16.msra.mxu2 %v12011_v61  ;;  %v2133_v0 = vpop.f32.mrf.mxu3  ;;  %16351 = vst [vmem:[#allocation84_spill] sm:$0xff] %v13865_v12  ;;  %v16354_v12 = vld [vmem:[#allocation10_spill] sm:$0xff] }
 0x4c3   : > { %v2134_v56 = vadd.f32 %v2133_v0, %v13563_v9  ;;  %v13852_v16 = vpop.f32.mrf.mxu1  ;;  %v11294_v9 = vld [vmem:[%s16224_s3 + $0x8cc] sm:$0xf0]  ;;  %v8962_v0 = vld [vmem:[%s16224_s3 + $0x418] sm:$0xf0] }
 0x4c4   : > { %v13850_v32 = vpop.f32.mrf.mxu2  ;;  %v9721_v14 = vor.u32 %v11294_v9, %v9720_v45  ;;  %v9050_v45 = vld [vmem:[%s16224_s3 + $0x4d0] sm:$0xf0] }
 0x4c5   : > { %16350 = vst [vmem:[#allocation83_spill] sm:$0xff] %v13850_v32  ;;  %v2154_v24 = vpack.c.bf16 %v2134_v56, %v2134_v56  ;;  %5830 = vmatpush.bf16.msrb.mxu0 %v11372_v34  ;;  %v9160_v56 = vld [vmem:[%s16224_s3 + $0x548] sm:$0xf]  ;;  %v9053_v34 = vor.u32 %v11164_v48, %v9050_v45 }
 0x4c6   : > { %4231 = vmatpush.bf16.msra.mxu2 %v12022_v31  ;;  %2901 = vmatmul.bf16.gmra.mxu1 %v9037_v39 }
 0x4c7   : > { %2170 = vst [vmem:[#allocation2 + $0x1dc] sm:$0xf] %v2154_v24  ;;  %8917 = vmatmul.msk.bf16.gmra.mxu3 %vm1046_vm0, %v8909_v10  ;;  %v11183_v10 = vld [vmem:[%s16224_s3 + $0x554] sm:$0xf0] }
 0x4c9   : > { %3367 = vmatmul.bf16.gmra.mxu2 %v9145_v55  ;;  %v13896_v55 = vpop.f32.mrf.mxu0 }
 0x4ca   : > { %4232 = vmatpush.bf16.msra.mxu2 %v16286_v27  ;;  %v2136_v37 = vpop.f32.mrf.mxu3  ;;  %16353 = vst [vmem:[#allocation86_spill] sm:$0xff] %v13896_v55  ;;  %v11340_v55 = vld [vmem:[#allocation2 + $0x140] sm:$0xf0] }
 0x4cb   : > { %v2137_v29 = vadd.f32 %v2136_v37, %v13596_v5  ;;  %v13874_v24 = vpop.f32.mrf.mxu1  ;;  %v11141_v5 = vld [vmem:[%s16224_s3 + $0x40c] sm:$0xf] }
 0x4cc   : > { %v13872_v52 = vpop.f32.mrf.mxu2  ;;  %4605 = vmatmul.bf16.gmra.mxu0 %v9721_v14  ;;  %v8965_v37 = vor.u32 %v11141_v5, %v8962_v0 }
 0x4cd   : > { %16352 = vst [vmem:[#allocation85_spill] sm:$0xff] %v13872_v52  ;;  %v2155_v25 = vpack.c.bf16 %v2137_v29, %v2137_v29  ;;  %v2441_v52 = vadd.f32 %v13630_v18, %v16354_v12 }
 0x4ce   : > { %4233 = vmatpush.bf16.msra.mxu2 %v16288_v4 }
 0x4cf   : > { %2171 = vst [vmem:[#allocation2 + $0x200] sm:$0xf] %v2155_v25  ;;  %v9161_v25 = vor.u32 %v11183_v10, %v9160_v56  ;;  %v2490_v18 = vadd.f32 %v13458_v57, %v2441_v52  ;;  %v16355_v56 = vld [vmem:[#allocation11_spill] sm:$0xff]  ;;  %v11168_v57 = vld [vmem:[%s16224_s3 + $0x4e4] sm:$0xf] }
 0x4d0   : > { %v11145_v52 = vld [vmem:[%s16224_s3 + $0x42c] sm:$0xf] }
 0x4d1   : > { %v13922_v10 = vpop.f32.mrf.mxu0 }
 0x4d2   : > { %4234 = vmatpush.bf16.msra.mxu2 %v16289_v6  ;;  %v2138_v39 = vpop.f32.mrf.mxu3  ;;  %16356 = vst [vmem:[#allocation10_spill] sm:$0xff] %v13922_v10 }
 0x4d3   : > { %v2139_v9 = vadd.f32 %v2138_v39, %v13608_v38  ;;  %v13901_v29 = vpop.f32.mrf.mxu1  ;;  %v11298_v38 = vld [vmem:[%s16224_s3 + $0x8ec] sm:$0xf0] }
 0x4d4   : > { %v13899_v14 = vpop.f32.mrf.mxu2  ;;  %v9737_v12 = vor.u32 %v11298_v38, %v9736_v20  ;;  %v9066_v20 = vld [vmem:[%s16224_s3 + $0x4f0] sm:$0xf0] }
 0x4d5   : > { %v2156_v32 = vpack.c.bf16 %v2139_v9, %v2139_v9 }
 0x4d6   : > { %4235 = vmatpush.bf16.msra.mxu2 %v16292_v8  ;;  %2906 = vmatmul.bf16.gmra.mxu1 %v9053_v34  ;;  %v9176_v34 = vld [vmem:[%s16224_s3 + $0x568] sm:$0xf] }
 0x4d7   : > { %2172 = vst [vmem:[#allocation2 + $0x224] sm:$0xf] %v2156_v32  ;;  %9078 = vmatmul.msk.bf16.vlgmr.msra.gmra.mxu3 %vm1046_vm0, %v8965_v37  ;;  %v2443_v32 = vadd.f32 %v13646_v3, %v16355_v56  ;;  %v8978_v3 = vld [vmem:[%s16224_s3 + $0x438] sm:$0xf0]  ;;  %v11187_v37 = vld [vmem:[%s16224_s3 + $0x574] sm:$0xf0] }
 0x4d8   : > { %3844 = vmatpush.bf16.msra.mxu3 %v12121_v43  ;;  %v9177_v56 = vor.u32 %v11187_v37, %v9176_v34 }
 0x4d9   : > { %3372 = vmatmul.bf16.gmra.mxu2 %v9161_v25  ;;  %v2492_v9 = vadd.f32 %v13488_v41, %v2443_v32  ;;  %v16357_v41 = vld [vmem:[#allocation12_spill] sm:$0xff]  ;;  %v13951_v10 = vpop.f32.mrf.mxu0 }
 0x4da   : > { %v2538_v48 = vpop.f32.mrf.mxu3  ;;  %v2446_v32 = vadd.f32 %v13673_v15, %v16357_v41  ;;  %16358 = vst [vmem:[#allocation11_spill] sm:$0xff] %v13951_v10  ;;  %v16359_v15 = vld [vmem:[#allocation13_spill] sm:$0xff] }
 0x4db   : > { %v2539_v45 = vadd.f32 %v2538_v48, %v2490_v18  ;;  %v13918_v0 = vpop.f32.mrf.mxu1  ;;  %v8981_v48 = vor.u32 %v11145_v52, %v8978_v3  ;;  %v9760_v52 = vld [vmem:[#allocation2] sm:$0xf]  ;;  %v11313_v10 = vld [vmem:[#allocation2 + $0x68] sm:$0xf0] }
 0x4dc   : > { %v13915_v5 = vpop.f32.mrf.mxu2  ;;  %3845 = vmatpush.bf16.msra.mxu3 %v12136_v58  ;;  %4610 = vmatmul.bf16.gmra.mxu0 %v9737_v12  ;;  %v9069_v12 = vor.u32 %v11168_v57, %v9066_v20  ;;  %v2495_v57 = vadd.f32 %v13507_v2, %v2446_v32  ;;  %v8994_v2 = vld [vmem:[%s16224_s3 + $0x458] sm:$0xf0] }
 0x4dd   : > { %v2578_v39 = vpack.c.bf16 %v2539_v45, %v2539_v45 }
 0x4df   : > { %2594 = vst [vmem:[#allocation2 + $0xc] sm:$0xf] %v2578_v39 }
 0x4e0   : > { %3846 = vmatpush.bf16.msra.mxu3 %v12143_v63 }
 0x4e2   : > { %v2540_v25 = vpop.f32.mrf.mxu3 }
 0x4e3   : > { %v2541_v38 = vadd.f32 %v2540_v25, %v2492_v9  ;;  %v13947_v45 = vpop.f32.mrf.mxu1  ;;  %v11304_v9 = vld [vmem:[#allocation2 + $0x20] sm:$0xf0] }
 0x4e4   : > { %v13944_v18 = vpop.f32.mrf.mxu2  ;;  %3847 = vmatpush.bf16.msra.mxu3 %v12154_v1  ;;  %v9761_v34 = vor.u32 %v11304_v9, %v9760_v52  ;;  %v11191_v9 = vld [vmem:[%s16224_s3 + $0x594] sm:$0xf0] }
 0x4e5   : > { %v2579_v39 = vpack.c.bf16 %v2541_v38, %v2541_v38  ;;  %v2448_v38 = vadd.f32 %v13689_v42, %v16359_v15  ;;  %v13973_v42 = vpop.f32.mrf.mxu0 }
 0x4e6   : > { %2911 = vmatmul.bf16.gmra.mxu1 %v9069_v12  ;;  %v11149_v12 = vld [vmem:[%s16224_s3 + $0x44c] sm:$0xf]  ;;  %16360 = vst [vmem:[#allocation12_spill] sm:$0xff] %v13973_v42  ;;  %v16361_v42 = vld [vmem:[#allocation14_spill] sm:$0xff] }
 0x4e7   : > { %2595 = vst [vmem:[#allocation2 + $0x30] sm:$0xf] %v2579_v39  ;;  %9079 = vmatmul.msk.bf16.gmra.mxu3 %vm1046_vm0, %v8981_v48  ;;  %v11172_v48 = vld [vmem:[%s16224_s3 + $0x504] sm:$0xf]  ;;  %v2497_v32 = vadd.f32 %v13537_v51, %v2448_v38  ;;  %v9192_v39 = vld [vmem:[%s16224_s3 + $0x588] sm:$0xf]  ;;  %v2451_v51 = vadd.f32 %v13716_v23, %v16361_v42 }
 0x4e8   : > { %v16363_v42 = vld [vmem:[#allocation15_spill] sm:$0xff] }
 0x4e9   : > { %3377 = vmatmul.bf16.gmra.mxu2 %v9177_v56  ;;  %v9122_v56 = vld [vmem:[%s16224_s3 + $0x510] sm:$0xf0] }
 0x4ea   : > { %v2543_v20 = vpop.f32.mrf.mxu3 }
 0x4eb   : > { %v2544_v3 = vadd.f32 %v2543_v20, %v2495_v57  ;;  %v13957_v37 = vpop.f32.mrf.mxu1 }
 0x4ec   : > { %v13955_v25 = vpop.f32.mrf.mxu2  ;;  %5831 = vmatmul.bf16.vlgmr.msrb.gmra.mxu0 %v9761_v34  ;;  %v9125_v34 = vor.u32 %v11172_v48, %v9122_v56 }
 0x4ed   : > { %v2580_v41 = vpack.c.bf16 %v2544_v3, %v2544_v3  ;;  %v8997_v3 = vor.u32 %v11149_v12, %v8994_v2  ;;  %v9796_v12 = vld [vmem:[#allocation2 + $0x48] sm:$0xf]  ;;  %v13991_v2 = vpop.f32.mrf.mxu0 }
 0x4ee   : > { %16362 = vst [vmem:[#allocation13_spill] sm:$0xff] %v13991_v2 }
 0x4ef   : > { %2596 = vst [vmem:[#allocation2 + $0x54] sm:$0xf] %v2580_v41  ;;  %v9193_v41 = vor.u32 %v11191_v9, %v9192_v39  ;;  %v9797_v39 = vor.u32 %v11313_v10, %v9796_v12  ;;  %v2453_v9 = vadd.f32 %v13730_v7, %v16363_v42  ;;  %v9010_v10 = vld [vmem:[%s16224_s3 + $0x478] sm:$0xf0]  ;;  %v9138_v7 = vld [vmem:[%s16224_s3 + $0x530] sm:$0xf0] }
 0x4f2   : > { %v2545_v57 = vpop.f32.mrf.mxu3 }
 0x4f3   : > { %v2546_v20 = vadd.f32 %v2545_v57, %v2497_v32  ;;  %v13984_v15 = vpop.f32.mrf.mxu1  ;;  %v2500_v32 = vadd.f32 %v13555_v54, %v2451_v51  ;;  %v11153_v54 = vld [vmem:[%s16224_s3 + $0x46c] sm:$0xf]  ;;  %v11195_v51 = vld [vmem:[%s16224_s3 + $0x5b4] sm:$0xf0] }
 0x4f4   : > { %v13982_v52 = vpop.f32.mrf.mxu2  ;;  %v9013_v12 = vor.u32 %v11153_v54, %v9010_v10  ;;  %v11322_v54 = vld [vmem:[#allocation2 + $0xb0] sm:$0xf0] }
 0x4f5   : > { %v2581_v38 = vpack.c.bf16 %v2546_v20, %v2546_v20 }
 0x4f6   : > { %3313 = vmatmul.bf16.vlgmr.msra.gmra.mxu1 %v9125_v34  ;;  %v2502_v34 = vadd.f32 %v13584_v17, %v2453_v9  ;;  %v16364_v17 = vld [vmem:[#allocation16_spill] sm:$0xff] }
 0x4f7   : > { %2597 = vst [vmem:[#allocation2 + $0x78] sm:$0xf] %v2581_v38  ;;  %9080 = vmatmul.msk.bf16.gmra.mxu3 %vm1046_vm0, %v8997_v3  ;;  %4179 = vmatpush.bf16.msra.mxu1 %v11826_v11  ;;  %v11176_v3 = vld [vmem:[%s16224_s3 + $0x524] sm:$0xf]  ;;  %v2456_v9 = vadd.f32 %v13755_v49, %v16364_v17 }
 0x4f9   : > { %3382 = vmatmul.bf16.gmra.mxu2 %v9193_v41  ;;  %v9208_v41 = vld [vmem:[%s16224_s3 + $0x5a8] sm:$0xf]  ;;  %v2505_v10 = vadd.f32 %v13601_v60, %v2456_v9  ;;  %v11157_v60 = vld [vmem:[%s16224_s3 + $0x48c] sm:$0xf] }
 0x4fa   : > { %v2548_v57 = vpop.f32.mrf.mxu3  ;;  %v9209_v42 = vor.u32 %v11195_v51, %v9208_v41  ;;  %v9224_v9 = vld [vmem:[%s16224_s3 + $0x5c8] sm:$0xf] }
 0x4fb   : > { %v2549_v48 = vadd.f32 %v2548_v57, %v2500_v32  ;;  %4180 = vmatpush.bf16.msra.mxu1 %v11832_v22  ;;  %v13996_v23 = vpop.f32.mrf.mxu1 }
 0x4fc   : > { %v13993_v56 = vpop.f32.mrf.mxu2  ;;  %5836 = vmatmul.bf16.gmra.mxu0 %v9797_v39 }
 0x4fd   : > { %v2582_v20 = vpack.c.bf16 %v2549_v48, %v2549_v48  ;;  %v9141_v48 = vor.u32 %v11176_v3, %v9138_v7  ;;  %v9832_v7 = vld [vmem:[#allocation2 + $0x90] sm:$0xf] }
 0x4fe   : > { %v9833_v51 = vor.u32 %v11322_v54, %v9832_v7  ;;  %v11199_v54 = vld [vmem:[%s16224_s3 + $0x5d4] sm:$0xf0] }
 0x4ff   : > { %2598 = vst [vmem:[#allocation2 + $0x9c] sm:$0xf] %v2582_v20  ;;  %4181 = vmatpush.bf16.msra.mxu1 %v11836_v28  ;;  %v14027_v20 = vpop.f32.mrf.mxu0 }
 0x500   : > { %16365 = vst [vmem:[#allocation14_spill] sm:$0xff] %v14027_v20  ;;  %v11331_v20 = vld [vmem:[#allocation2 + $0xf8] sm:$0xf0] }
 0x502   : > { %v2550_v38 = vpop.f32.mrf.mxu3 }
 0x503   : > { %v2551_v32 = vadd.f32 %v2550_v38, %v2502_v34  ;;  %4182 = vmatpush.bf16.msra.mxu1 %v11840_v33  ;;  %v14023_v39 = vpop.f32.mrf.mxu1 }
 0x504   : > { %v14020_v57 = vpop.f32.mrf.mxu2 }
 0x505   : > { %v2583_v2 = vpack.c.bf16 %v2551_v32, %v2551_v32 }
 0x506   : > { %3318 = vmatmul.bf16.gmra.mxu1 %v9141_v48  ;;  %v9026_v48 = vld [vmem:[%s16224_s3 + $0x498] sm:$0xf0] }
 0x507   : > { %2599 = vst [vmem:[#allocation2 + $0xc0] sm:$0xf] %v2583_v2  ;;  %9081 = vmatmul.msk.bf16.gmra.mxu3 %vm1046_vm0, %v9013_v12  ;;  %4183 = vmatpush.bf16.msra.mxu1 %v11815_v53  ;;  %v16366_v2 = vld [vmem:[#allocation17_spill] sm:$0xff]  ;;  %v14039_v12 = vpop.f32.mrf.mxu0 }
 0x508   : > { %v2458_v38 = vadd.f32 %v13769_v30, %v16366_v2  ;;  %16367 = vst [vmem:[#allocation15_spill] sm:$0xff] %v14039_v12  ;;  %v9154_v30 = vld [vmem:[%s16224_s3 + $0x550] sm:$0xf0] }
 0x509   : > { %3387 = vmatmul.bf16.gmra.mxu2 %v9209_v42  ;;  %v11180_v42 = vld [vmem:[%s16224_s3 + $0x544] sm:$0xf] }
 0x50a   : > { %v2553_v3 = vpop.f32.mrf.mxu3  ;;  %v2507_v17 = vadd.f32 %v13628_v21, %v2458_v38  ;;  %v16368_v21 = vld [vmem:[#allocation18_spill] sm:$0xff] }
 0x50b   : > { %v2554_v34 = vadd.f32 %v2553_v3, %v2505_v10  ;;  %4184 = vmatpush.bf16.msra.mxu1 %v11806_v44  ;;  %v14035_v49 = vpop.f32.mrf.mxu1  ;;  %v2461_v38 = vadd.f32 %v13798_v19, %v16368_v21  ;;  %v16370_v19 = vld [vmem:[#allocation19_spill] sm:$0xff] }
 0x50c   : > { %v14032_v41 = vpop.f32.mrf.mxu2  ;;  %5841 = vmatmul.bf16.gmra.mxu0 %v9833_v51  ;;  %v9157_v51 = vor.u32 %v11180_v42, %v9154_v30  ;;  %v9868_v42 = vld [vmem:[#allocation2 + $0xd8] sm:$0xf] }
 0x50d   : > { %v2584_v32 = vpack.c.bf16 %v2554_v34, %v2554_v34  ;;  %v9029_v34 = vor.u32 %v11157_v60, %v9026_v48  ;;  %v2510_v60 = vadd.f32 %v13643_v47, %v2461_v38  ;;  %v9042_v47 = vld [vmem:[%s16224_s3 + $0x4b8] sm:$0xf0]  ;;  %v11203_v21 = vld [vmem:[%s16224_s3 + $0x5f4] sm:$0xf0] }
 0x50f   : > { %2600 = vst [vmem:[#allocation2 + $0xe4] sm:$0xf] %v2584_v32  ;;  %4185 = vmatpush.bf16.msra.mxu1 %v11797_v35  ;;  %v9225_v32 = vor.u32 %v11199_v54, %v9224_v9  ;;  %v9869_v9 = vor.u32 %v11331_v20, %v9868_v42  ;;  %v11184_v20 = vld [vmem:[%s16224_s3 + $0x564] sm:$0xf] }
 0x512   : > { %v2555_v10 = vpop.f32.mrf.mxu3 }
 0x513   : > { %v2556_v3 = vadd.f32 %v2555_v10, %v2507_v17  ;;  %4186 = vmatpush.bf16.msra.mxu1 %v11784_v26  ;;  %v14064_v2 = vpop.f32.mrf.mxu1  ;;  %v14069_v17 = vpop.f32.mrf.mxu0 }
 0x514   : > { %v14061_v7 = vpop.f32.mrf.mxu2  ;;  %16369 = vst [vmem:[#allocation16_spill] sm:$0xff] %v14069_v17 }
 0x515   : > { %v2585_v12 = vpack.c.bf16 %v2556_v3, %v2556_v3 }
 0x516   : > { %3323 = vmatmul.bf16.gmra.mxu1 %v9157_v51  ;;  %v9170_v51 = vld [vmem:[%s16224_s3 + $0x570] sm:$0xf0] }
 0x517   : > { %2601 = vst [vmem:[#allocation2 + $0x108] sm:$0xf] %v2585_v12  ;;  %9082 = vmatmul.msk.bf16.gmra.mxu3 %vm1046_vm0, %v9029_v34  ;;  %v2463_v12 = vadd.f32 %v13819_v13, %v16370_v19  ;;  %v11161_v34 = vld [vmem:[%s16224_s3 + $0x4ac] sm:$0xf] }
 0x519   : > { %3392 = vmatmul.bf16.gmra.mxu2 %v9225_v32  ;;  %v2512_v13 = vadd.f32 %v13670_v50, %v2463_v12  ;;  %v9240_v32 = vld [vmem:[%s16224_s3 + $0x5e8] sm:$0xf]  ;;  %v16373_v50 = vld [vmem:[#allocation20_spill] sm:$0xff] }
 0x51a   : > { %v2558_v48 = vpop.f32.mrf.mxu3  ;;  %v2466_v12 = vadd.f32 %v13852_v16, %v16373_v50 }
 0x51b   : > { %v2559_v30 = vadd.f32 %v2558_v48, %v2510_v60  ;;  %v14074_v54 = vpop.f32.mrf.mxu1  ;;  %v14097_v60 = vpop.f32.mrf.mxu0 }
 0x51c   : > { %v14072_v10 = vpop.f32.mrf.mxu2  ;;  %5846 = vmatmul.bf16.gmra.mxu0 %v9869_v9  ;;  %16371 = vst [vmem:[#allocation17_spill] sm:$0xff] %v14097_v60  ;;  %v9173_v9 = vor.u32 %v11184_v20, %v9170_v51  ;;  %v2515_v60 = vadd.f32 %v13686_v62, %v2466_v12  ;;  %v16374_v51 = vld [vmem:[#allocation21_spill] sm:$0xff] }
 0x51d   : > { %v2586_v3 = vpack.c.bf16 %v2559_v30, %v2559_v30  ;;  %v9045_v30 = vor.u32 %v11161_v34, %v9042_v47  ;;  %v2468_v16 = vadd.f32 %v13874_v24, %v16374_v51  ;;  %v11165_v62 = vld [vmem:[%s16224_s3 + $0x4cc] sm:$0xf]  ;;  %v9186_v24 = vld [vmem:[%s16224_s3 + $0x590] sm:$0xf0] }
 0x51f   : > { %2602 = vst [vmem:[#allocation2 + $0x12c] sm:$0xf] %v2586_v3  ;;  %v9241_v3 = vor.u32 %v11203_v21, %v9240_v32  ;;  %v9058_v21 = vld [vmem:[%s16224_s3 + $0x4d8] sm:$0xf0] }
 0x520   : > { %v9061_v12 = vor.u32 %v11165_v62, %v9058_v21  ;;  %v11349_v62 = vld [vmem:[#allocation2 + $0x188] sm:$0xf0] }
 0x522   : > { %v2560_v38 = vpop.f32.mrf.mxu3 }
 0x523   : > { %v2561_v48 = vadd.f32 %v2560_v38, %v2512_v13  ;;  %v14101_v19 = vpop.f32.mrf.mxu1  ;;  %v9904_v38 = vld [vmem:[#allocation2 + $0x120] sm:$0xf]  ;;  %v14113_v32 = vpop.f32.mrf.mxu0 }
 0x524   : > { %v14099_v42 = vpop.f32.mrf.mxu2  ;;  %v9905_v47 = vor.u32 %v11340_v55, %v9904_v38  ;;  %16375 = vst [vmem:[#allocation19_spill] sm:$0xff] %v14113_v32  ;;  %v11188_v55 = vld [vmem:[%s16224_s3 + $0x584] sm:$0xf] }
 0x525   : > { %16372 = vst [vmem:[#allocation18_spill] sm:$0xff] %v14099_v42  ;;  %v2587_v17 = vpack.c.bf16 %v2561_v48, %v2561_v48  ;;  %v9296_v48 = vld [vmem:[%s16224_s3 + $0x608] sm:$0xf] }
 0x526   : > { %3328 = vmatmul.bf16.gmra.mxu1 %v9173_v9  ;;  %v11411_v9 = vld [vmem:[%s16225_s4 + $0x138] sm:$0xff] }
 0x527   : > { %2603 = vst [vmem:[#allocation2 + $0x150] sm:$0xf] %v2587_v17  ;;  %9083 = vmatmul.msk.bf16.gmra.mxu3 %vm1046_vm0, %v9045_v30  ;;  %6019 = vmatpush.bf16.msra.mxu0 %v11411_v9  ;;  %v16377_v9 = vld [vmem:[#allocation26_spill] sm:$0xff] }
 0x529   : > { %3397 = vmatmul.bf16.gmra.mxu2 %v9241_v3 }
 0x52a   : > { %v2563_v13 = vpop.f32.mrf.mxu3 }
 0x52b   : > { %v2564_v42 = vadd.f32 %v2563_v13, %v2515_v60  ;;  %v14109_v20 = vpop.f32.mrf.mxu1  ;;  %v2517_v60 = vadd.f32 %v13713_v36, %v2468_v16  ;;  %v9189_v13 = vor.u32 %v11188_v55, %v9186_v24  ;;  %v14146_v32 = vpop.f32.mrf.mxu0  ;;  %v11409_v24 = vld [vmem:[%s16225_s4 + $0x128] sm:$0xff] }
 0x52c   : > { %v14107_v34 = vpop.f32.mrf.mxu2  ;;  %5851 = vmatmul.bf16.gmra.mxu0 %v9905_v47  ;;  %v16376_v47 = vld [vmem:[#allocation24_spill] sm:$0xff] }
 0x52d   : > { %v2588_v17 = vpack.c.bf16 %v2564_v42, %v2564_v42  ;;  %v11207_v42 = vld [vmem:[%s16224_s3 + $0x614] sm:$0xf0]  ;;  %v2471_v51 = vadd.f32 %v13901_v29, %v16376_v47  ;;  %v9940_v29 = vld [vmem:[#allocation2 + $0x168] sm:$0xf]  ;;  %v16378_v47 = vld [vmem:[#allocation76_spill] sm:$0xff] }
 0x52e   : > { %v9297_v36 = vor.u32 %v11207_v42, %v9296_v48  ;;  %v9941_v42 = vor.u32 %v11349_v62, %v9940_v29 }
 0x52f   : > { %2604 = vst [vmem:[#allocation2 + $0x174] sm:$0xf] %v2588_v17  ;;  %v11410_v17 = vld [vmem:[%s16225_s4 + $0x130] sm:$0xff]  ;;  %v2520_v21 = vadd.f32 %v13728_v40, %v2471_v51  ;;  %v11169_v40 = vld [vmem:[%s16224_s3 + $0x4ec] sm:$0xf] }
 0x530   : > { %6020 = vmatpush.bf16.msra.mxu0 %v11410_v17  ;;  %v11211_v17 = vld [vmem:[%s16224_s3 + $0x634] sm:$0xf0] }
 0x532   : > { %v2565_v30 = vpop.f32.mrf.mxu3 }
 0x533   : > { %v2566_v3 = vadd.f32 %v2565_v30, %v2517_v60  ;;  %v14139_v38 = vpop.f32.mrf.mxu1 }
 0x534   : > { %v14137_v50 = vpop.f32.mrf.mxu2  ;;  %6021 = vmatpush.bf16.msra.mxu0 %v11409_v24 }
 0x535   : > { %v2589_v16 = vpack.c.bf16 %v2566_v3, %v2566_v3  ;;  %v2473_v3 = vadd.f32 %v13918_v0, %v16377_v9  ;;  %v11192_v0 = vld [vmem:[%s16224_s3 + $0x5a4] sm:$0xf] }
 0x536   : > { %3333 = vmatmul.bf16.gmra.mxu1 %v9189_v13  ;;  %v9074_v13 = vld [vmem:[%s16224_s3 + $0x4f8] sm:$0xf0]  ;;  %v16379_v9 = vld [vmem:[#allocation28_spill] sm:$0xff] }
 0x537   : > { %2605 = vst [vmem:[#allocation2 + $0x198] sm:$0xf] %v2589_v16  ;;  %9084 = vmatmul.msk.bf16.gmra.mxu3 %vm1046_vm0, %v9061_v12  ;;  %v2522_v51 = vadd.f32 %v16378_v47, %v2473_v3  ;;  %v9312_v16 = vld [vmem:[%s16224_s3 + $0x628] sm:$0xf]  ;;  %v9077_v24 = vor.u32 %v11169_v40, %v9074_v13  ;;  %v2476_v3 = vadd.f32 %v13947_v45, %v16379_v9  ;;  %v11358_v40 = vld [vmem:[#allocation2 + $0x1d0] sm:$0xf0] }
 0x538   : > { %v16380_v13 = vld [vmem:[#allocation78_spill] sm:$0xff]  ;;  %v16382_v9 = vld [vmem:[#allocation79_spill] sm:$0xff] }
 0x539   : > { %3799 = vmatmul.bf16.vlgmr.msrb.gmra.mxu2 %v9297_v36  ;;  %v14176_v36 = vpop.f32.mrf.mxu0  ;;  %v9976_v45 = vld [vmem:[#allocation2 + $0x1b0] sm:$0xf] }
 0x53a   : > { %4665 = vmatpush.bf16.msrb.mxu2 %v11998_v46  ;;  %v2568_v55 = vpop.f32.mrf.mxu3  ;;  %v11408_v46 = vld [vmem:[%s16225_s4 + $0x120] sm:$0xff] }
 0x53b   : > { %v2569_v60 = vadd.f32 %v2568_v55, %v2520_v21  ;;  %v14156_v30 = vpop.f32.mrf.mxu1  ;;  %6022 = vmatpush.bf16.msra.mxu0 %v11408_v46  ;;  %v11407_v21 = vld [vmem:[%s16225_s4 + $0x118] sm:$0xff]  ;;  %v11406_v46 = vld [vmem:[%s16225_s4 + $0x110] sm:$0xff] }
 0x53c   : > { %v14154_v48 = vpop.f32.mrf.mxu2  ;;  %5856 = vmatmul.bf16.gmra.mxu0 %v9941_v42  ;;  %v9313_v42 = vor.u32 %v11211_v17, %v9312_v16  ;;  %v9977_v17 = vor.u32 %v11358_v40, %v9976_v45 }
 0x53d   : > { %v2590_v12 = vpack.c.bf16 %v2569_v60, %v2569_v60 }
 0x53e   : > { %4666 = vmatpush.bf16.msrb.mxu2 %v12006_v59  ;;  %v9202_v59 = vld [vmem:[%s16224_s3 + $0x5b0] sm:$0xf0] }
 0x53f   : > { %2606 = vst [vmem:[#allocation2 + $0x1bc] sm:$0xf] %v2590_v12  ;;  %6023 = vmatpush.bf16.msra.mxu0 %v11407_v21  ;;  %v16381_v21 = vld [vmem:[#allocation30_spill] sm:$0xff] }
 0x541   : > { %v14205_v47 = vpop.f32.mrf.mxu0 }
 0x542   : > { %4667 = vmatpush.bf16.msrb.mxu2 %v12011_v61  ;;  %v2570_v62 = vpop.f32.mrf.mxu3  ;;  %v9205_v61 = vor.u32 %v11192_v0, %v9202_v59  ;;  %v2525_v0 = vadd.f32 %v16380_v13, %v2476_v3 }
 0x543   : > { %v2571_v55 = vadd.f32 %v2570_v62, %v2522_v51  ;;  %v14191_v60 = vpop.f32.mrf.mxu1  ;;  %6024 = vmatpush.bf16.msra.mxu0 %v11406_v46  ;;  %v11215_v46 = vld [vmem:[%s16224_s3 + $0x654] sm:$0xf0] }
 0x544   : > { %v14189_v29 = vpop.f32.mrf.mxu2 }
 0x545   : > { %v2591_v12 = vpack.c.bf16 %v2571_v55, %v2571_v55 }
 0x546   : > { %4668 = vmatpush.bf16.msrb.mxu2 %v12022_v31  ;;  %3338 = vmatmul.bf16.gmra.mxu1 %v9205_v61  ;;  %v11405_v31 = vld [vmem:[%s16225_s4 + $0x108] sm:$0xff]  ;;  %v11196_v61 = vld [vmem:[%s16224_s3 + $0x5c4] sm:$0xf] }
 0x547   : > { %2607 = vst [vmem:[#allocation2 + $0x1e0] sm:$0xf] %v2591_v12  ;;  %9085 = vmatmul.msk.bf16.gmra.mxu3 %vm1046_vm0, %v9077_v24  ;;  %6025 = vmatpush.bf16.msra.mxu0 %v11405_v31  ;;  %v11404_v24 = vld [vmem:[%s16225_s4 + $0x100] sm:$0xff]  ;;  %v9328_v12 = vld [vmem:[%s16224_s3 + $0x648] sm:$0xf] }
 0x549   : > { %3804 = vmatmul.bf16.gmra.mxu2 %v9313_v42  ;;  %v9218_v42 = vld [vmem:[%s16224_s3 + $0x5d0] sm:$0xf0] }
 0x54a   : > { %4669 = vmatpush.bf16.msrb.mxu2 %v16286_v27  ;;  %v2573_v59 = vpop.f32.mrf.mxu3  ;;  %v2478_v27 = vadd.f32 %v13957_v37, %v16381_v21  ;;  %v11173_v37 = vld [vmem:[%s16224_s3 + $0x50c] sm:$0xf]  ;;  %v14243_v21 = vpop.f32.mrf.mxu0 }
 0x54b   : > { %v2574_v51 = vadd.f32 %v2573_v59, %v2525_v0  ;;  %v14209_v62 = vpop.f32.mrf.mxu1  ;;  %6026 = vmatpush.bf16.msra.mxu0 %v11404_v24  ;;  %v9221_v59 = vor.u32 %v11196_v61, %v9218_v42  ;;  %v16384_v24 = vld [vmem:[#allocation81_spill] sm:$0xff] }
 0x54c   : > { %v14207_v16 = vpop.f32.mrf.mxu2  ;;  %5861 = vmatmul.bf16.gmra.mxu0 %v9977_v17  ;;  %v2527_v3 = vadd.f32 %v16382_v9, %v2478_v27 }
 0x54d   : > { %v2592_v55 = vpack.c.bf16 %v2574_v51, %v2574_v51  ;;  %v9329_v51 = vor.u32 %v11215_v46, %v9328_v12 }
 0x54e   : > { %4670 = vmatpush.bf16.msrb.mxu2 %v16288_v4  ;;  %v9130_v4 = vld [vmem:[%s16224_s3 + $0x518] sm:$0xf0] }
 0x54f   : > { %2608 = vst [vmem:[#allocation2 + $0x204] sm:$0xf] %v2592_v55  ;;  %v9133_v45 = vor.u32 %v11173_v37, %v9130_v4  ;;  %v11367_v55 = vld [vmem:[#allocation2 + $0x218] sm:$0xf0]  ;;  %v10012_v37 = vld [vmem:[#allocation2 + $0x1f8] sm:$0xf] }
 0x552   : > { %4671 = vmatpush.bf16.msrb.mxu2 %v16289_v6  ;;  %v2575_v40 = vpop.f32.mrf.mxu3  ;;  %v16383_v6 = vld [vmem:[#allocation33_spill] sm:$0xff] }
 0x553   : > { %v2576_v13 = vadd.f32 %v2575_v40, %v2527_v3  ;;  %v14239_v31 = vpop.f32.mrf.mxu1  ;;  %v2878_v17 = vadd.f32 %v13984_v15, %v16383_v6  ;;  %v10013_v15 = vor.u32 %v11367_v55, %v10012_v37  ;;  %v14256_v40 = vpop.f32.mrf.mxu0 }
 0x554   : > { %v14237_v0 = vpop.f32.mrf.mxu2  ;;  %16386 = vst [vmem:[#allocation20_spill] sm:$0xff] %v14256_v40 }
 0x555   : > { %v2593_v27 = vpack.c.bf16 %v2576_v13, %v2576_v13  ;;  %v2927_v61 = vadd.f32 %v16384_v24, %v2878_v17  ;;  %v11200_v13 = vld [vmem:[%s16224_s3 + $0x5e4] sm:$0xf]  ;;  %v9344_v17 = vld [vmem:[%s16224_s3 + $0x668] sm:$0xf] }
 0x556   : > { %4672 = vmatpush.bf16.msrb.mxu2 %v16292_v8  ;;  %3343 = vmatmul.bf16.gmra.mxu1 %v9221_v59  ;;  %v16385_v8 = vld [vmem:[#allocation35_spill] sm:$0xff]  ;;  %v9234_v59 = vld [vmem:[%s16224_s3 + $0x5f0] sm:$0xf0] }
 0x557   : > { %2609 = vst [vmem:[#allocation2 + $0x228] sm:$0xf] %v2593_v27  ;;  %9246 = vmatmul.msk.bf16.vlgmr.msrb.gmra.mxu3 %vm1046_vm0, %v9133_v45  ;;  %v2880_v12 = vadd.f32 %v13996_v23, %v16385_v8  ;;  %v11177_v45 = vld [vmem:[%s16224_s3 + $0x52c] sm:$0xf]  ;;  %v9146_v23 = vld [vmem:[%s16224_s3 + $0x538] sm:$0xf0] }
 0x558   : > { %4281 = vmatpush.bf16.msrb.mxu3 %v12121_v43  ;;  %v11219_v27 = vld [vmem:[%s16224_s3 + $0x674] sm:$0xf0]  ;;  %v9149_v37 = vor.u32 %v11177_v45, %v9146_v23  ;;  %v16388_v8 = vld [vmem:[#allocation36_spill] sm:$0xff] }
 0x559   : > { %3809 = vmatmul.bf16.gmra.mxu2 %v9329_v51  ;;  %v16387_v51 = vld [vmem:[#allocation83_spill] sm:$0xff] }
 0x55a   : > { %v2975_v42 = vpop.f32.mrf.mxu3  ;;  %v2929_v6 = vadd.f32 %v16387_v51, %v2880_v12  ;;  %v2883_v12 = vadd.f32 %v14023_v39, %v16388_v8 }
 0x55b   : > { %v2976_v4 = vadd.f32 %v2975_v42, %v2927_v61  ;;  %v14252_v3 = vpop.f32.mrf.mxu1  ;;  %v9237_v42 = vor.u32 %v11200_v13, %v9234_v59  ;;  %v14286_v51 = vpop.f32.mrf.mxu0 }
 0x55c   : > { %v14249_v9 = vpop.f32.mrf.mxu2  ;;  %4282 = vmatpush.bf16.msrb.mxu3 %v12136_v58  ;;  %5866 = vmatmul.bf16.gmra.mxu0 %v10013_v15  ;;  %v9345_v15 = vor.u32 %v11219_v27, %v9344_v17  ;;  %16389 = vst [vmem:[#allocation21_spill] sm:$0xff] %v14286_v51  ;;  %v16391_v17 = vld [vmem:[#allocation37_spill] sm:$0xff] }
 0x55d   : > { %v3015_v46 = vpack.c.bf16 %v2976_v4, %v2976_v4  ;;  %v2885_v27 = vadd.f32 %v14035_v49, %v16391_v17  ;;  %v9290_v49 = vld [vmem:[%s16224_s3 + $0x610] sm:$0xf0] }
 0x55f   : > { %3031 = vst [vmem:[#allocation2 + $0x10] sm:$0xf] %v3015_v46 }
 0x560   : > { %4283 = vmatpush.bf16.msrb.mxu3 %v12143_v63 }
 0x562   : > { %v2977_v55 = vpop.f32.mrf.mxu3 }
 0x563   : > { %v2978_v24 = vadd.f32 %v2977_v55, %v2929_v6  ;;  %v14281_v4 = vpop.f32.mrf.mxu1  ;;  %v16390_v6 = vld [vmem:[#allocation85_spill] sm:$0xff] }
 0x564   : > { %v14278_v61 = vpop.f32.mrf.mxu2  ;;  %4284 = vmatpush.bf16.msrb.mxu3 %v12154_v1  ;;  %v2932_v55 = vadd.f32 %v16390_v6, %v2883_v12  ;;  %v11204_v12 = vld [vmem:[%s16224_s3 + $0x604] sm:$0xf]  ;;  %v9360_v6 = vld [vmem:[%s16224_s3 + $0x688] sm:$0xf] }
 0x565   : > { %v3016_v46 = vpack.c.bf16 %v2978_v24, %v2978_v24 }
 0x566   : > { %3348 = vmatmul.bf16.gmra.mxu1 %v9237_v42  ;;  %v9776_v24 = vld [vmem:[#allocation2 + $0x10] sm:$0xf] }
 0x567   : > { %3032 = vst [vmem:[#allocation2 + $0x34] sm:$0xf] %v3016_v46  ;;  %9247 = vmatmul.msk.bf16.gmra.mxu3 %vm1046_vm0, %v9149_v37  ;;  %v11181_v37 = vld [vmem:[%s16224_s3 + $0x54c] sm:$0xf]  ;;  %v2934_v46 = vadd.f32 %v13899_v14, %v2885_v27  ;;  %v16393_v14 = vld [vmem:[#allocation38_spill] sm:$0xff] }
 0x568   : > { %v2888_v27 = vadd.f32 %v14064_v2, %v16393_v14 }
 0x569   : > { %3814 = vmatmul.bf16.gmra.mxu2 %v9345_v15  ;;  %v9162_v15 = vld [vmem:[%s16224_s3 + $0x558] sm:$0xf0] }
 0x56a   : > { %v2980_v13 = vpop.f32.mrf.mxu3 }
 0x56b   : > { %v2981_v59 = vadd.f32 %v2980_v13, %v2932_v55  ;;  %v14291_v23 = vpop.f32.mrf.mxu1  ;;  %v11223_v55 = vld [vmem:[%s16224_s3 + $0x694] sm:$0xf0] }
 0x56c   : > { %v14289_v45 = vpop.f32.mrf.mxu2 }
 0x56d   : > { %v3017_v39 = vpack.c.bf16 %v2981_v59, %v2981_v59  ;;  %v14314_v59 = vpop.f32.mrf.mxu0 }
 0x56e   : > { %v11306_v8 = vld [vmem:[#allocation2 + $0x30] sm:$0xf0]  ;;  %16392 = vst [vmem:[#allocation24_spill] sm:$0xff] %v14314_v59 }
 0x56f   : > { %3033 = vst [vmem:[#allocation2 + $0x58] sm:$0xf] %v3017_v39  ;;  %v9777_v42 = vor.u32 %v11306_v8, %v9776_v24  ;;  %v9165_v24 = vor.u32 %v11181_v37, %v9162_v15  ;;  %v9293_v8 = vor.u32 %v11204_v12, %v9290_v49  ;;  %v16394_v12 = vld [vmem:[#allocation39_spill] sm:$0xff] }
 0x570   : > { %v2890_v2 = vadd.f32 %v14074_v54, %v16394_v12  ;;  %v11208_v54 = vld [vmem:[%s16224_s3 + $0x624] sm:$0xf] }
 0x571   : > { %6027 = vmatmul.bf16.vlgmr.msra.gmra.mxu0 %v9777_v42  ;;  %v9361_v42 = vor.u32 %v11223_v55, %v9360_v6 }
 0x572   : > { %v2982_v13 = vpop.f32.mrf.mxu3 }
 0x573   : > { %v2983_v17 = vadd.f32 %v2982_v13, %v2934_v46  ;;  %v14318_v51 = vpop.f32.mrf.mxu1  ;;  %v2937_v46 = vadd.f32 %v13915_v5, %v2888_v27  ;;  %v11185_v5 = vld [vmem:[%s16224_s3 + $0x56c] sm:$0xf] }
 0x574   : > { %v14316_v39 = vpop.f32.mrf.mxu2 }
 0x575   : > { %v3018_v40 = vpack.c.bf16 %v2983_v17, %v2983_v17  ;;  %v2939_v17 = vadd.f32 %v13944_v18, %v2890_v2  ;;  %v16395_v18 = vld [vmem:[#allocation40_spill] sm:$0xff] }
 0x576   : > { %3750 = vmatmul.bf16.vlgmr.msrb.gmra.mxu1 %v9293_v8  ;;  %v9812_v6 = vld [vmem:[#allocation2 + $0x58] sm:$0xf]  ;;  %v2893_v2 = vadd.f32 %v14101_v19, %v16395_v18  ;;  %v16397_v19 = vld [vmem:[#allocation41_spill] sm:$0xff] }
 0x577   : > { %3034 = vst [vmem:[#allocation2 + $0x7c] sm:$0xf] %v3018_v40  ;;  %9248 = vmatmul.msk.bf16.gmra.mxu3 %vm1046_vm0, %v9165_v24  ;;  %4616 = vmatpush.bf16.msrb.mxu1 %v11826_v11  ;;  %v14332_v40 = vpop.f32.mrf.mxu0  ;;  %v9376_v24 = vld [vmem:[%s16224_s3 + $0x6a8] sm:$0xf] }
 0x579   : > { %3819 = vmatmul.bf16.gmra.mxu2 %v9361_v42 }
 0x57a   : > { %v2985_v13 = vpop.f32.mrf.mxu3 }
 0x57b   : > { %v2986_v59 = vadd.f32 %v2985_v13, %v2937_v46  ;;  %4617 = vmatpush.bf16.msrb.mxu1 %v11832_v22  ;;  %v14328_v15 = vpop.f32.mrf.mxu1  ;;  %v9178_v22 = vld [vmem:[%s16224_s3 + $0x578] sm:$0xf0] }
 0x57c   : > { %v14325_v37 = vpop.f32.mrf.mxu2  ;;  %v9181_v27 = vor.u32 %v11185_v5, %v9178_v22 }
 0x57d   : > { %v3019_v49 = vpack.c.bf16 %v2986_v59, %v2986_v59  ;;  %v9306_v59 = vld [vmem:[%s16224_s3 + $0x630] sm:$0xf0] }
 0x57e   : > { %v11315_v55 = vld [vmem:[#allocation2 + $0x78] sm:$0xf0]  ;;  %v9309_v46 = vor.u32 %v11208_v54, %v9306_v59  ;;  %v2895_v54 = vadd.f32 %v14109_v20, %v16397_v19  ;;  %v9322_v20 = vld [vmem:[%s16224_s3 + $0x650] sm:$0xf0] }
 0x57f   : > { %3035 = vst [vmem:[#allocation2 + $0xa0] sm:$0xf] %v3019_v49  ;;  %v9813_v11 = vor.u32 %v11315_v55, %v9812_v6  ;;  %4618 = vmatpush.bf16.msrb.mxu1 %v11836_v28  ;;  %v11227_v28 = vld [vmem:[%s16224_s3 + $0x6b4] sm:$0xf0]  ;;  %v14361_v6 = vpop.f32.mrf.mxu0  ;;  %v2942_v55 = vadd.f32 %v13955_v25, %v2893_v2  ;;  %v11212_v25 = vld [vmem:[%s16224_s3 + $0x644] sm:$0xf] }
 0x580   : > { %v9377_v12 = vor.u32 %v11227_v28, %v9376_v24  ;;  %16396 = vst [vmem:[#allocation26_spill] sm:$0xff] %v14361_v6 }
 0x581   : > { %6032 = vmatmul.bf16.gmra.mxu0 %v9813_v11 }
 0x582   : > { %v2987_v8 = vpop.f32.mrf.mxu3 }
 0x583   : > { %v2988_v42 = vadd.f32 %v2987_v8, %v2939_v17  ;;  %4619 = vmatpush.bf16.msrb.mxu1 %v11840_v33  ;;  %v14357_v13 = vpop.f32.mrf.mxu1 }
 0x584   : > { %v14354_v14 = vpop.f32.mrf.mxu2 }
 0x585   : > { %v3020_v49 = vpack.c.bf16 %v2988_v42, %v2988_v42  ;;  %v2944_v42 = vadd.f32 %v13982_v52, %v2895_v54  ;;  %v16399_v52 = vld [vmem:[#allocation42_spill] sm:$0xff] }
 0x586   : > { %3755 = vmatmul.bf16.gmra.mxu1 %v9309_v46  ;;  %v9848_v17 = vld [vmem:[#allocation2 + $0xa0] sm:$0xf] }
 0x587   : > { %3036 = vst [vmem:[#allocation2 + $0xc4] sm:$0xf] %v3020_v49  ;;  %9249 = vmatmul.msk.bf16.gmra.mxu3 %vm1046_vm0, %v9181_v27  ;;  %4620 = vmatpush.bf16.msrb.mxu1 %v11815_v53  ;;  %v11189_v53 = vld [vmem:[%s16224_s3 + $0x58c] sm:$0xf]  ;;  %v14386_v8 = vpop.f32.mrf.mxu0  ;;  %v11231_v27 = vld [vmem:[%s16224_s3 + $0x6d4] sm:$0xf0]  ;;  %v9325_v49 = vor.u32 %v11212_v25, %v9322_v20 }
 0x588   : > { %16398 = vst [vmem:[#allocation76_spill] sm:$0xff] %v14386_v8 }
 0x589   : > { %3824 = vmatmul.bf16.gmra.mxu2 %v9377_v12 }
 0x58a   : > { %v2990_v11 = vpop.f32.mrf.mxu3 }
 0x58b   : > { %v2991_v33 = vadd.f32 %v2990_v11, %v2942_v55  ;;  %4621 = vmatpush.bf16.msrb.mxu1 %v11806_v44  ;;  %v14369_v22 = vpop.f32.mrf.mxu1  ;;  %v9194_v44 = vld [vmem:[%s16224_s3 + $0x598] sm:$0xf0] }
 0x58c   : > { %v14366_v5 = vpop.f32.mrf.mxu2  ;;  %v9197_v2 = vor.u32 %v11189_v53, %v9194_v44  ;;  %v16400_v53 = vld [vmem:[#allocation43_spill] sm:$0xff] }
 0x58d   : > { %v3021_v59 = vpack.c.bf16 %v2991_v33, %v2991_v33  ;;  %v2898_v33 = vadd.f32 %v14139_v38, %v16399_v52  ;;  %v2900_v44 = vadd.f32 %v14156_v30, %v16400_v53  ;;  %v9338_v30 = vld [vmem:[%s16224_s3 + $0x670] sm:$0xf0] }
 0x58e   : > { %v11324_v24 = vld [vmem:[#allocation2 + $0xc0] sm:$0xf0] }
 0x58f   : > { %3037 = vst [vmem:[#allocation2 + $0xe8] sm:$0xf] %v3021_v59  ;;  %v9849_v28 = vor.u32 %v11324_v24, %v9848_v17  ;;  %4622 = vmatpush.bf16.msrb.mxu1 %v11797_v35  ;;  %v9392_v35 = vld [vmem:[%s16224_s3 + $0x6c8] sm:$0xf]  ;;  %v2947_v54 = vadd.f32 %v13993_v56, %v2898_v33  ;;  %v14404_v17 = vpop.f32.mrf.mxu0  ;;  %v11193_v56 = vld [vmem:[%s16224_s3 + $0x5ac] sm:$0xf] }
 0x590   : > { %v9393_v11 = vor.u32 %v11231_v27, %v9392_v35  ;;  %v9210_v35 = vld [vmem:[%s16224_s3 + $0x5b8] sm:$0xf0]  ;;  %v11216_v27 = vld [vmem:[%s16224_s3 + $0x664] sm:$0xf] }
 0x591   : > { %6037 = vmatmul.bf16.gmra.mxu0 %v9849_v28  ;;  %v9213_v33 = vor.u32 %v11193_v56, %v9210_v35  ;;  %v16402_v35 = vld [vmem:[#allocation45_spill] sm:$0xff] }
 0x592   : > { %v2992_v46 = vpop.f32.mrf.mxu3 }
 0x593   : > { %v2993_v12 = vadd.f32 %v2992_v46, %v2944_v42  ;;  %4623 = vmatpush.bf16.msrb.mxu1 %v11784_v26  ;;  %v14398_v55 = vpop.f32.mrf.mxu1  ;;  %v2949_v46 = vadd.f32 %v14020_v57, %v2900_v44 }
 0x594   : > { %v14395_v18 = vpop.f32.mrf.mxu2 }
 0x595   : > { %v3022_v19 = vpack.c.bf16 %v2993_v12, %v2993_v12  ;;  %v9408_v12 = vld [vmem:[%s16224_s3 + $0x6e8] sm:$0xf] }
 0x596   : > { %3760 = vmatmul.bf16.gmra.mxu1 %v9325_v49  ;;  %v9884_v25 = vld [vmem:[#allocation2 + $0xe8] sm:$0xf] }
 0x597   : > { %3038 = vst [vmem:[#allocation2 + $0x10c] sm:$0xf] %v3022_v19  ;;  %9250 = vmatmul.msk.bf16.gmra.mxu3 %vm1046_vm0, %v9197_v2  ;;  %v11235_v2 = vld [vmem:[%s16224_s3 + $0x6f4] sm:$0xf0]  ;;  %v9341_v19 = vor.u32 %v11216_v27, %v9338_v30  ;;  %v14437_v53 = vpop.f32.mrf.mxu0  ;;  %v2905_v27 = vadd.f32 %v14209_v62, %v16402_v35  ;;  %v9354_v62 = vld [vmem:[%s16224_s3 + $0x690] sm:$0xf0] }
 0x599   : > { %3829 = vmatmul.bf16.gmra.mxu2 %v9393_v11 }
 0x59a   : > { %v2995_v59 = vpop.f32.mrf.mxu3 }
 0x59b   : > { %v2996_v24 = vadd.f32 %v2995_v59, %v2947_v54  ;;  %v14408_v26 = vpop.f32.mrf.mxu1  ;;  %v9409_v59 = vor.u32 %v11235_v2, %v9408_v12 }
 0x59c   : > { %v14406_v28 = vpop.f32.mrf.mxu2 }
 0x59d   : > { %v3023_v38 = vpack.c.bf16 %v2996_v24, %v2996_v24  ;;  %v16401_v24 = vld [vmem:[#allocation44_spill] sm:$0xff] }
 0x59e   : > { %v11333_v20 = vld [vmem:[#allocation2 + $0x108] sm:$0xf0]  ;;  %v2903_v57 = vadd.f32 %v14191_v60, %v16401_v24 }
 0x59f   : > { %3039 = vst [vmem:[#allocation2 + $0x130] sm:$0xf] %v3023_v38  ;;  %v9885_v42 = vor.u32 %v11333_v20, %v9884_v25  ;;  %v14447_v12 = vpop.f32.mrf.mxu0 }
 0x5a0   : > { %v2952_v38 = vadd.f32 %v14032_v41, %v2903_v57  ;;  %v11197_v41 = vld [vmem:[%s16224_s3 + $0x5cc] sm:$0xf] }
 0x5a1   : > { %6042 = vmatmul.bf16.gmra.mxu0 %v9885_v42 }
 0x5a2   : > { %v2997_v49 = vpop.f32.mrf.mxu3 }
 0x5a3   : > { %v2998_v11 = vadd.f32 %v2997_v49, %v2949_v46  ;;  %v14433_v54 = vpop.f32.mrf.mxu1  ;;  %v9226_v49 = vld [vmem:[%s16224_s3 + $0x5d8] sm:$0xf0] }
 0x5a4   : > { %v14431_v52 = vpop.f32.mrf.mxu2 }
 0x5a5   : > { %v3024_v44 = vpack.c.bf16 %v2998_v11, %v2998_v11  ;;  %v11220_v11 = vld [vmem:[%s16224_s3 + $0x684] sm:$0xf] }
 0x5a6   : > { %3765 = vmatmul.bf16.gmra.mxu1 %v9341_v19  ;;  %v9920_v30 = vld [vmem:[#allocation2 + $0x130] sm:$0xf]  ;;  %v9464_v19 = vld [vmem:[%s16224_s3 + $0x708] sm:$0xf] }
 0x5a7   : > { %3040 = vst [vmem:[#allocation2 + $0x154] sm:$0xf] %v3024_v44  ;;  %9251 = vmatmul.msk.bf16.gmra.mxu3 %vm1046_vm0, %v9213_v33  ;;  %v2954_v33 = vadd.f32 %v14061_v7, %v2905_v27 }
 0x5a9   : > { %3834 = vmatmul.bf16.gmra.mxu2 %v9409_v59  ;;  %v11239_v59 = vld [vmem:[%s16224_s3 + $0x714] sm:$0xf0] }
 0x5aa   : > { %v3000_v25 = vpop.f32.mrf.mxu3  ;;  %v9465_v35 = vor.u32 %v11239_v59, %v9464_v19 }
 0x5ab   : > { %v3001_v20 = vadd.f32 %v3000_v25, %v2952_v38  ;;  %v14443_v56 = vpop.f32.mrf.mxu1  ;;  %v9229_v38 = vor.u32 %v11197_v41, %v9226_v49  ;;  %v9357_v25 = vor.u32 %v11220_v11, %v9354_v62  ;;  %v16404_v11 = vld [vmem:[#allocation48_spill] sm:$0xff] }
 0x5ac   : > { %v14441_v42 = vpop.f32.mrf.mxu2  ;;  %v2910_v62 = vadd.f32 %v14252_v3, %v16404_v11  ;;  %v9370_v3 = vld [vmem:[%s16224_s3 + $0x6b0] sm:$0xf0] }
 0x5ad   : > { %v3025_v60 = vpack.c.bf16 %v3001_v20, %v3001_v20 }
 0x5ae   : > { %v11342_v46 = vld [vmem:[#allocation2 + $0x150] sm:$0xf0] }
 0x5af   : > { %3041 = vst [vmem:[#allocation2 + $0x178] sm:$0xf] %v3025_v60  ;;  %v9921_v2 = vor.u32 %v11342_v46, %v9920_v30  ;;  %v16403_v60 = vld [vmem:[#allocation47_spill] sm:$0xff]  ;;  %v14475_v30 = vpop.f32.mrf.mxu0 }
 0x5b0   : > { %v2908_v7 = vadd.f32 %v14239_v31, %v16403_v60  ;;  %v9480_v60 = vld [vmem:[%s16224_s3 + $0x728] sm:$0xf] }
 0x5b1   : > { %6047 = vmatmul.bf16.gmra.mxu0 %v9921_v2 }
 0x5b2   : > { %v3002_v24 = vpop.f32.mrf.mxu3  ;;  %v2957_v46 = vadd.f32 %v14072_v10, %v2908_v7  ;;  %v9242_v10 = vld [vmem:[%s16224_s3 + $0x5f8] sm:$0xf0]  ;;  %v11243_v7 = vld [vmem:[%s16224_s3 + $0x734] sm:$0xf0] }
 0x5b3   : > { %v3003_v57 = vadd.f32 %v3002_v24, %v2954_v33  ;;  %v14470_v20 = vpop.f32.mrf.mxu1 }
 0x5b4   : > { %v14468_v44 = vpop.f32.mrf.mxu2 }
 0x5b5   : > { %v3026_v27 = vpack.c.bf16 %v3003_v57, %v3003_v57  ;;  %v11201_v57 = vld [vmem:[%s16224_s3 + $0x5ec] sm:$0xf] }
 0x5b6   : > { %3770 = vmatmul.bf16.gmra.mxu1 %v9357_v25  ;;  %v9956_v19 = vld [vmem:[#allocation2 + $0x178] sm:$0xf]  ;;  %v16405_v25 = vld [vmem:[#allocation18_spill] sm:$0xff]  ;;  %v9245_v11 = vor.u32 %v11201_v57, %v9242_v10  ;;  %v16407_v10 = vld [vmem:[#allocation8_spill] sm:$0xff] }
 0x5b7   : > { %3042 = vst [vmem:[#allocation2 + $0x19c] sm:$0xf] %v3026_v27  ;;  %9252 = vmatmul.msk.bf16.gmra.mxu3 %vm1046_vm0, %v9229_v38  ;;  %v11224_v38 = vld [vmem:[%s16224_s3 + $0x6a4] sm:$0xf] }
 0x5b9   : > { %4236 = vmatmul.bf16.vlgmr.msra.gmra.mxu2 %v9465_v35  ;;  %v2959_v35 = vadd.f32 %v16405_v25, %v2910_v62  ;;  %v16406_v62 = vld [vmem:[#allocation9_spill] sm:$0xff] }
 0x5ba   : > { %v3005_v2 = vpop.f32.mrf.mxu3 }
 0x5bb   : > { %v3006_v33 = vadd.f32 %v3005_v2, %v2957_v46  ;;  %v14480_v49 = vpop.f32.mrf.mxu1  ;;  %v14503_v46 = vpop.f32.mrf.mxu0 }
 0x5bc   : > { %v14478_v41 = vpop.f32.mrf.mxu2 }
 0x5bd   : > { %v3027_v31 = vpack.c.bf16 %v3006_v33, %v3006_v33 }
 0x5be   : > { %v11351_v59 = vld [vmem:[#allocation2 + $0x198] sm:$0xf0] }
 0x5bf   : > { %3043 = vst [vmem:[#allocation2 + $0x1c0] sm:$0xf] %v3027_v31  ;;  %v9957_v24 = vor.u32 %v11351_v59, %v9956_v19  ;;  %v9373_v31 = vor.u32 %v11224_v38, %v9370_v3  ;;  %v9481_v59 = vor.u32 %v11243_v7, %v9480_v60  ;;  %v2915_v38 = vadd.f32 %v14291_v23, %v16407_v10  ;;  %v9298_v23 = vld [vmem:[%s16224_s3 + $0x618] sm:$0xf0] }
 0x5c1   : > { %6052 = vmatmul.bf16.gmra.mxu0 %v9957_v24  ;;  %v2913_v24 = vadd.f32 %v14281_v4, %v16406_v62 }
 0x5c2   : > { %v3007_v27 = vpop.f32.mrf.mxu3 }
 0x5c3   : > { %v3008_v2 = vadd.f32 %v3007_v27, %v2959_v35  ;;  %v14507_v19 = vpop.f32.mrf.mxu1  ;;  %v2962_v8 = vadd.f32 %v14107_v34, %v2913_v24  ;;  %v14519_v3 = vpop.f32.mrf.mxu0  ;;  %v11228_v34 = vld [vmem:[%s16224_s3 + $0x6c4] sm:$0xf] }
 0x5c4   : > { %v14505_v33 = vpop.f32.mrf.mxu2 }
 0x5c5   : > { %v3028_v25 = vpack.c.bf16 %v3008_v2, %v3008_v2 }
 0x5c6   : > { %3775 = vmatmul.bf16.gmra.mxu1 %v9373_v31  ;;  %v9992_v60 = vld [vmem:[#allocation2 + $0x1c0] sm:$0xf]  ;;  %v9496_v31 = vld [vmem:[%s16224_s3 + $0x748] sm:$0xf] }
 0x5c7   : > { %3044 = vst [vmem:[#allocation2 + $0x1e4] sm:$0xf] %v3028_v25  ;;  %9253 = vmatmul.msk.bf16.gmra.mxu3 %vm1046_vm0, %v9245_v11  ;;  %v2964_v11 = vadd.f32 %v14137_v50, %v2915_v38 }
 0x5c9   : > { %4241 = vmatmul.bf16.gmra.mxu2 %v9481_v59  ;;  %v11247_v59 = vld [vmem:[%s16224_s3 + $0x754] sm:$0xf0] }
 0x5ca   : > { %v3010_v6 = vpop.f32.mrf.mxu3 }
 0x5cb   : > { %v3011_v35 = vadd.f32 %v3010_v6, %v2962_v8  ;;  %v14515_v57 = vpop.f32.mrf.mxu1  ;;  %v9386_v6 = vld [vmem:[%s16224_s3 + $0x6d0] sm:$0xf0]  ;;  %v11205_v8 = vld [vmem:[%s16224_s3 + $0x60c] sm:$0xf] }
 0x5cc   : > { %v14513_v27 = vpop.f32.mrf.mxu2  ;;  %v9301_v10 = vor.u32 %v11205_v8, %v9298_v23 }
 0x5cd   : > { %v3029_v4 = vpack.c.bf16 %v3011_v35, %v3011_v35  ;;  %v9389_v35 = vor.u32 %v11228_v34, %v9386_v6 }
 0x5ce   : > { %v11360_v7 = vld [vmem:[#allocation2 + $0x1e0] sm:$0xf0] }
 0x5cf   : > { %3045 = vst [vmem:[#allocation2 + $0x208] sm:$0xf] %v3029_v4  ;;  %v9993_v2 = vor.u32 %v11360_v7, %v9992_v60  ;;  %v9497_v60 = vor.u32 %v11247_v59, %v9496_v31  ;;  %v16408_v7 = vld [vmem:[#allocation7_spill] sm:$0xff] }
 0x5d0   : > { %v3315_v50 = vadd.f32 %v14318_v51, %v16408_v7  ;;  %v16409_v51 = vld [vmem:[#allocation23_spill] sm:$0xff] }
 0x5d1   : > { %6057 = vmatmul.bf16.gmra.mxu0 %v9993_v2  ;;  %v14546_v2 = vpop.f32.mrf.mxu0  ;;  %v3317_v31 = vadd.f32 %v14328_v15, %v16409_v51  ;;  %v9314_v15 = vld [vmem:[%s16224_s3 + $0x638] sm:$0xf0]  ;;  %v11251_v7 = vld [vmem:[%s16224_s3 + $0x774] sm:$0xf0] }
 0x5d2   : > { %v3012_v62 = vpop.f32.mrf.mxu3 }
 0x5d3   : > { %v3013_v24 = vadd.f32 %v3012_v62, %v2964_v11  ;;  %v14542_v4 = vpop.f32.mrf.mxu1  ;;  %v3364_v11 = vadd.f32 %v14154_v48, %v3315_v50  ;;  %v11209_v48 = vld [vmem:[%s16224_s3 + $0x62c] sm:$0xf] }
 0x5d4   : > { %v14540_v25 = vpop.f32.mrf.mxu2 }
 0x5d5   : > { %v3030_v38 = vpack.c.bf16 %v3013_v24, %v3013_v24 }
 0x5d6   : > { %3780 = vmatmul.bf16.gmra.mxu1 %v9389_v35  ;;  %v10028_v62 = vld [vmem:[#allocation2 + $0x208] sm:$0xf] }
 0x5d7   : > { %3046 = vst [vmem:[#allocation2 + $0x22c] sm:$0xf] %v3030_v38  ;;  %9414 = vmatmul.msk.bf16.vlgmr.msra.gmra.mxu3 %vm1046_vm0, %v9301_v10 }
 0x5d8   : > { %4718 = vmatpush.bf16.msra.mxu3 %v12121_v43  ;;  %v11232_v43 = vld [vmem:[%s16224_s3 + $0x6e4] sm:$0xf] }
 0x5d9   : > { %4246 = vmatmul.bf16.gmra.mxu2 %v9497_v60  ;;  %v14571_v10 = vpop.f32.mrf.mxu0  ;;  %v3366_v60 = vadd.f32 %v14189_v29, %v3317_v31  ;;  %v16410_v29 = vld [vmem:[#allocation6_spill] sm:$0xff] }
 0x5da   : > { %v3412_v34 = vpop.f32.mrf.mxu3  ;;  %v3320_v31 = vadd.f32 %v14357_v13, %v16410_v29  ;;  %v11213_v13 = vld [vmem:[%s16224_s3 + $0x64c] sm:$0xf] }
 0x5db   : > { %v3413_v6 = vadd.f32 %v3412_v34, %v3364_v11  ;;  %v14554_v23 = vpop.f32.mrf.mxu1 }
 0x5dc   : > { %v14551_v8 = vpop.f32.mrf.mxu2  ;;  %4719 = vmatpush.bf16.msra.mxu3 %v12136_v58  ;;  %v9402_v58 = vld [vmem:[%s16224_s3 + $0x6f0] sm:$0xf0] }
 0x5dd   : > { %v3452_v59 = vpack.c.bf16 %v3413_v6, %v3413_v6  ;;  %v9405_v34 = vor.u32 %v11232_v43, %v9402_v58  ;;  %v9317_v6 = vor.u32 %v11209_v48, %v9314_v15 }
 0x5de   : > { %v11369_v24 = vld [vmem:[#allocation2 + $0x228] sm:$0xf0] }
 0x5df   : > { %3468 = vst [vmem:[#allocation2 + $0x14] sm:$0xf] %v3452_v59  ;;  %v10029_v35 = vor.u32 %v11369_v24, %v10028_v62  ;;  %v3369_v24 = vadd.f32 %v14207_v16, %v3320_v31  ;;  %v11236_v16 = vld [vmem:[%s16224_s3 + $0x704] sm:$0xf] }
 0x5e0   : > { %4720 = vmatpush.bf16.msra.mxu3 %v12143_v63  ;;  %v9512_v63 = vld [vmem:[%s16224_s3 + $0x768] sm:$0xf] }
 0x5e1   : > { %6062 = vmatmul.bf16.gmra.mxu0 %v10029_v35  ;;  %v9513_v59 = vor.u32 %v11251_v7, %v9512_v63  ;;  %v9330_v63 = vld [vmem:[%s16224_s3 + $0x658] sm:$0xf0]  ;;  %v9458_v7 = vld [vmem:[%s16224_s3 + $0x710] sm:$0xf0] }
 0x5e2   : > { %v3414_v50 = vpop.f32.mrf.mxu3  ;;  %v9333_v29 = vor.u32 %v11213_v13, %v9330_v63  ;;  %v9461_v31 = vor.u32 %v11236_v16, %v9458_v7  ;;  %v16413_v63 = vld [vmem:[#allocation4_spill] sm:$0xff] }
 0x5e3   : > { %v3415_v38 = vadd.f32 %v3414_v50, %v3366_v60  ;;  %v14583_v51 = vpop.f32.mrf.mxu1  ;;  %v9528_v50 = vld [vmem:[%s16224_s3 + $0x788] sm:$0xf]  ;;  %v3327_v16 = vadd.f32 %v14408_v26, %v16413_v63 }
 0x5e4   : > { %v14580_v11 = vpop.f32.mrf.mxu2  ;;  %4721 = vmatpush.bf16.msra.mxu3 %v12154_v1  ;;  %v16411_v1 = vld [vmem:[#allocation32_spill] sm:$0xff] }
 0x5e5   : > { %v3453_v62 = vpack.c.bf16 %v3415_v38, %v3415_v38  ;;  %v3322_v48 = vadd.f32 %v14369_v22, %v16411_v1  ;;  %v11255_v38 = vld [vmem:[%s16224_s3 + $0x794] sm:$0xf0]  ;;  %v3376_v26 = vadd.f32 %v14278_v61, %v3327_v16 }
 0x5e6   : > { %3785 = vmatmul.bf16.gmra.mxu1 %v9405_v34 }
 0x5e7   : > { %3469 = vst [vmem:[#allocation2 + $0x38] sm:$0xf] %v3453_v62  ;;  %9415 = vmatmul.msk.bf16.gmra.mxu3 %vm1046_vm0, %v9317_v6  ;;  %v3371_v22 = vadd.f32 %v14237_v0, %v3322_v48 }
 0x5e9   : > { %4251 = vmatmul.bf16.gmra.mxu2 %v9513_v59 }
 0x5ea   : > { %v3417_v35 = vpop.f32.mrf.mxu3 }
 0x5eb   : > { %v3418_v60 = vadd.f32 %v3417_v35, %v3369_v24  ;;  %v14591_v58 = vpop.f32.mrf.mxu1  ;;  %v9529_v24 = vor.u32 %v11255_v38, %v9528_v50  ;;  %v16412_v35 = vld [vmem:[#allocation22_spill] sm:$0xff]  ;;  %v9346_v50 = vld [vmem:[%s16224_s3 + $0x678] sm:$0xf0] }
 0x5ec   : > { %v14589_v43 = vpop.f32.mrf.mxu2  ;;  %v3325_v0 = vadd.f32 %v14398_v55, %v16412_v35  ;;  %v11217_v55 = vld [vmem:[%s16224_s3 + $0x66c] sm:$0xf]  ;;  %v9474_v38 = vld [vmem:[%s16224_s3 + $0x730] sm:$0xf0] }
 0x5ed   : > { %v3454_v15 = vpack.c.bf16 %v3418_v60, %v3418_v60  ;;  %v9349_v35 = vor.u32 %v11217_v55, %v9346_v50  ;;  %v16415_v50 = vld [vmem:[#allocation25_spill] sm:$0xff] }
 0x5ee   : > { %v3374_v1 = vadd.f32 %v14249_v9, %v3325_v0  ;;  %v11240_v9 = vld [vmem:[%s16224_s3 + $0x724] sm:$0xf] }
 0x5ef   : > { %3470 = vst [vmem:[#allocation2 + $0x5c] sm:$0xf] %v3454_v15  ;;  %v9477_v0 = vor.u32 %v11240_v9, %v9474_v38  ;;  %v3332_v9 = vadd.f32 %v14443_v56, %v16415_v50 }
 0x5f1   : > { %v3381_v56 = vadd.f32 %v14316_v39, %v3332_v9 }
 0x5f2   : > { %v3419_v34 = vpop.f32.mrf.mxu3 }
 0x5f3   : > { %v3420_v6 = vadd.f32 %v3419_v34, %v3371_v22  ;;  %v14616_v62 = vpop.f32.mrf.mxu1  ;;  %v9544_v34 = vld [vmem:[%s16224_s3 + $0x7a8] sm:$0xf] }
 0x5f4   : > { %v14614_v59 = vpop.f32.mrf.mxu2 }
 0x5f5   : > { %v3455_v60 = vpack.c.bf16 %v3420_v6, %v3420_v6  ;;  %v11259_v6 = vld [vmem:[%s16224_s3 + $0x7b4] sm:$0xf0] }
 0x5f6   : > { %4187 = vmatmul.bf16.vlgmr.msra.gmra.mxu1 %v9461_v31 }
 0x5f7   : > { %3471 = vst [vmem:[#allocation2 + $0x80] sm:$0xf] %v3455_v60  ;;  %9416 = vmatmul.msk.bf16.gmra.mxu3 %vm1046_vm0, %v9333_v29 }
 0x5f9   : > { %4256 = vmatmul.bf16.gmra.mxu2 %v9529_v24 }
 0x5fa   : > { %v3422_v48 = vpop.f32.mrf.mxu3 }
 0x5fb   : > { %v3423_v15 = vadd.f32 %v3422_v48, %v3374_v1  ;;  %v14624_v13 = vpop.f32.mrf.mxu1  ;;  %v9545_v1 = vor.u32 %v11259_v6, %v9544_v34  ;;  %v16414_v48 = vld [vmem:[#allocation5_spill] sm:$0xff]  ;;  %v9362_v34 = vld [vmem:[%s16224_s3 + $0x698] sm:$0xf0]  ;;  %v9490_v6 = vld [vmem:[%s16224_s3 + $0x750] sm:$0xf0] }
 0x5fc   : > { %v14622_v22 = vpop.f32.mrf.mxu2  ;;  %v3330_v61 = vadd.f32 %v14433_v54, %v16414_v48  ;;  %v11221_v54 = vld [vmem:[%s16224_s3 + $0x68c] sm:$0xf] }
 0x5fd   : > { %v3456_v7 = vpack.c.bf16 %v3423_v15, %v3423_v15  ;;  %v9365_v48 = vor.u32 %v11221_v54, %v9362_v34  ;;  %v16417_v34 = vld [vmem:[#allocation29_spill] sm:$0xff] }
 0x5fe   : > { %v3379_v63 = vadd.f32 %v14289_v45, %v3330_v61  ;;  %v11244_v45 = vld [vmem:[%s16224_s3 + $0x744] sm:$0xf] }
 0x5ff   : > { %3472 = vst [vmem:[#allocation2 + $0xa4] sm:$0xf] %v3456_v7  ;;  %v9493_v61 = vor.u32 %v11244_v45, %v9490_v6  ;;  %v3337_v45 = vadd.f32 %v14480_v49, %v16417_v34 }
 0x601   : > { %v3386_v49 = vadd.f32 %v14354_v14, %v3337_v45 }
 0x602   : > { %v3424_v29 = vpop.f32.mrf.mxu3 }
 0x603   : > { %v3425_v31 = vadd.f32 %v3424_v29, %v3376_v26  ;;  %v14649_v60 = vpop.f32.mrf.mxu1  ;;  %v9560_v29 = vld [vmem:[%s16224_s3 + $0x7c8] sm:$0xf] }
 0x604   : > { %v14647_v24 = vpop.f32.mrf.mxu2 }
 0x605   : > { %v3457_v15 = vpack.c.bf16 %v3425_v31, %v3425_v31  ;;  %v11263_v31 = vld [vmem:[%s16224_s3 + $0x7d4] sm:$0xf0] }
 0x606   : > { %4192 = vmatmul.bf16.gmra.mxu1 %v9477_v0 }
 0x607   : > { %3473 = vst [vmem:[#allocation2 + $0xc8] sm:$0xf] %v3457_v15  ;;  %9417 = vmatmul.msk.bf16.gmra.mxu3 %vm1046_vm0, %v9349_v35 }
 0x609   : > { %4261 = vmatmul.bf16.gmra.mxu2 %v9545_v1 }
 0x60a   : > { %v3427_v16 = vpop.f32.mrf.mxu3 }
 0x60b   : > { %v3428_v7 = vadd.f32 %v3427_v16, %v3379_v63  ;;  %v14657_v55 = vpop.f32.mrf.mxu1  ;;  %v9561_v63 = vor.u32 %v11263_v31, %v9560_v29  ;;  %v16416_v16 = vld [vmem:[#allocation27_spill] sm:$0xff]  ;;  %v9506_v31 = vld [vmem:[%s16224_s3 + $0x770] sm:$0xf0] }
 0x60c   : > { %v14655_v26 = vpop.f32.mrf.mxu2  ;;  %v3335_v39 = vadd.f32 %v14470_v20, %v16416_v16  ;;  %v11225_v20 = vld [vmem:[%s16224_s3 + $0x6ac] sm:$0xf]  ;;  %v9378_v29 = vld [vmem:[%s16224_s3 + $0x6b8] sm:$0xf0] }
 0x60d   : > { %v3458_v38 = vpack.c.bf16 %v3428_v7, %v3428_v7  ;;  %v9381_v16 = vor.u32 %v11225_v20, %v9378_v29  ;;  %v16419_v29 = vld [vmem:[#allocation34_spill] sm:$0xff] }
 0x60e   : > { %v3384_v50 = vadd.f32 %v14325_v37, %v3335_v39  ;;  %v11248_v37 = vld [vmem:[%s16224_s3 + $0x764] sm:$0xf] }
 0x60f   : > { %3474 = vst [vmem:[#allocation2 + $0xec] sm:$0xf] %v3458_v38  ;;  %v9509_v39 = vor.u32 %v11248_v37, %v9506_v31  ;;  %v3342_v37 = vadd.f32 %v14515_v57, %v16419_v29 }
 0x611   : > { %v3391_v57 = vadd.f32 %v14395_v18, %v3342_v37 }
 0x612   : > { %v3429_v35 = vpop.f32.mrf.mxu3 }
 0x613   : > { %v3430_v0 = vadd.f32 %v3429_v35, %v3381_v56  ;;  %v14682_v15 = vpop.f32.mrf.mxu1  ;;  %v9576_v35 = vld [vmem:[%s16224_s3 + $0x7e8] sm:$0xf] }
 0x614   : > { %v14680_v1 = vpop.f32.mrf.mxu2 }
 0x615   : > { %v3459_v7 = vpack.c.bf16 %v3430_v0, %v3430_v0  ;;  %v11267_v0 = vld [vmem:[%s16224_s3 + $0x7f4] sm:$0xf0] }
 0x616   : > { %4197 = vmatmul.bf16.gmra.mxu1 %v9493_v61 }
 0x617   : > { %3475 = vst [vmem:[#allocation2 + $0x110] sm:$0xf] %v3459_v7  ;;  %9418 = vmatmul.msk.bf16.gmra.mxu3 %vm1046_vm0, %v9365_v48 }
 0x619   : > { %4266 = vmatmul.bf16.gmra.mxu2 %v9561_v63 }
 0x61a   : > { %v3432_v9 = vpop.f32.mrf.mxu3 }
 0x61b   : > { %v3433_v38 = vadd.f32 %v3432_v9, %v3384_v50  ;;  %v14690_v54 = vpop.f32.mrf.mxu1  ;;  %v9577_v50 = vor.u32 %v11267_v0, %v9576_v35  ;;  %v16418_v9 = vld [vmem:[#allocation31_spill] sm:$0xff]  ;;  %v9522_v0 = vld [vmem:[%s16224_s3 + $0x790] sm:$0xf0] }
 0x61c   : > { %v14688_v56 = vpop.f32.mrf.mxu2  ;;  %v3340_v14 = vadd.f32 %v14507_v19, %v16418_v9  ;;  %v11229_v19 = vld [vmem:[%s16224_s3 + $0x6cc] sm:$0xf]  ;;  %v9394_v35 = vld [vmem:[%s16224_s3 + $0x6d8] sm:$0xf0] }
 0x61d   : > { %v3460_v6 = vpack.c.bf16 %v3433_v38, %v3433_v38  ;;  %v9397_v9 = vor.u32 %v11229_v19, %v9394_v35  ;;  %v16421_v35 = vld [vmem:[#allocation50_spill] sm:$0xff] }
 0x61e   : > { %v3389_v34 = vadd.f32 %v14366_v5, %v3340_v14  ;;  %v11252_v5 = vld [vmem:[%s16224_s3 + $0x784] sm:$0xf] }
 0x61f   : > { %3476 = vst [vmem:[#allocation2 + $0x134] sm:$0xf] %v3460_v6  ;;  %v9525_v14 = vor.u32 %v11252_v5, %v9522_v0  ;;  %v3347_v5 = vadd.f32 %v14554_v23, %v16421_v35 }
 0x621   : > { %v3396_v23 = vadd.f32 %v14431_v52, %v3347_v5 }
 0x622   : > { %v3434_v48 = vpop.f32.mrf.mxu3 }
 0x623   : > { %v3435_v61 = vadd.f32 %v3434_v48, %v3386_v49  ;;  %v14715_v7 = vpop.f32.mrf.mxu1  ;;  %v9632_v48 = vld [vmem:[%s16224_s3 + $0x808] sm:$0xf] }
 0x624   : > { %v14713_v63 = vpop.f32.mrf.mxu2 }
 0x625   : > { %v3461_v38 = vpack.c.bf16 %v3435_v61, %v3435_v61  ;;  %v11271_v61 = vld [vmem:[%s16224_s3 + $0x814] sm:$0xf0] }
 0x626   : > { %4202 = vmatmul.bf16.gmra.mxu1 %v9509_v39 }
 0x627   : > { %3477 = vst [vmem:[#allocation2 + $0x158] sm:$0xf] %v3461_v38  ;;  %9419 = vmatmul.msk.bf16.gmra.mxu3 %vm1046_vm0, %v9381_v16 }
 0x629   : > { %4271 = vmatmul.bf16.gmra.mxu2 %v9577_v50 }
 0x62a   : > { %v3437_v45 = vpop.f32.mrf.mxu3 }
 0x62b   : > { %v3438_v6 = vadd.f32 %v3437_v45, %v3389_v34  ;;  %v14723_v20 = vpop.f32.mrf.mxu1  ;;  %v9633_v34 = vor.u32 %v11271_v61, %v9632_v48  ;;  %v16420_v45 = vld [vmem:[#allocation49_spill] sm:$0xff]  ;;  %v9410_v48 = vld [vmem:[%s16224_s3 + $0x6f8] sm:$0xf0]  ;;  %v9538_v61 = vld [vmem:[%s16224_s3 + $0x7b0] sm:$0xf0] }
 0x62c   : > { %v14721_v49 = vpop.f32.mrf.mxu2  ;;  %v3345_v18 = vadd.f32 %v14542_v4, %v16420_v45  ;;  %v11233_v4 = vld [vmem:[%s16224_s3 + $0x6ec] sm:$0xf] }
 0x62d   : > { %v3462_v31 = vpack.c.bf16 %v3438_v6, %v3438_v6  ;;  %v9413_v45 = vor.u32 %v11233_v4, %v9410_v48  ;;  %v16423_v48 = vld [vmem:[#allocation52_spill] sm:$0xff] }
 0x62e   : > { %v3394_v29 = vadd.f32 %v14406_v28, %v3345_v18  ;;  %v11256_v28 = vld [vmem:[%s16224_s3 + $0x7a4] sm:$0xf] }
 0x62f   : > { %3478 = vst [vmem:[#allocation2 + $0x17c] sm:$0xf] %v3462_v31  ;;  %v9541_v18 = vor.u32 %v11256_v28, %v9538_v61  ;;  %v3352_v28 = vadd.f32 %v14591_v58, %v16423_v48 }
 0x631   : > { %v3401_v58 = vadd.f32 %v14468_v44, %v3352_v28 }
 0x632   : > { %v3439_v16 = vpop.f32.mrf.mxu3 }
 0x633   : > { %v3440_v39 = vadd.f32 %v3439_v16, %v3391_v57  ;;  %v14748_v38 = vpop.f32.mrf.mxu1  ;;  %v9648_v16 = vld [vmem:[%s16224_s3 + $0x828] sm:$0xf] }
 0x634   : > { %v14746_v50 = vpop.f32.mrf.mxu2 }
 0x635   : > { %v3463_v6 = vpack.c.bf16 %v3440_v39, %v3440_v39  ;;  %v11275_v39 = vld [vmem:[%s16224_s3 + $0x834] sm:$0xf0] }
 0x636   : > { %4207 = vmatmul.bf16.gmra.mxu1 %v9525_v14 }
 0x637   : > { %3479 = vst [vmem:[#allocation2 + $0x1a0] sm:$0xf] %v3463_v6  ;;  %9420 = vmatmul.msk.bf16.gmra.mxu3 %vm1046_vm0, %v9397_v9 }
 0x639   : > { %4673 = vmatmul.bf16.vlgmr.msrb.gmra.mxu2 %v9633_v34 }
 0x63a   : > { %v3442_v37 = vpop.f32.mrf.mxu3 }
 0x63b   : > { %v3443_v31 = vadd.f32 %v3442_v37, %v3394_v29  ;;  %v14756_v19 = vpop.f32.mrf.mxu1  ;;  %v9649_v29 = vor.u32 %v11275_v39, %v9648_v16  ;;  %v16422_v37 = vld [vmem:[#allocation51_spill] sm:$0xff]  ;;  %v9554_v16 = vld [vmem:[%s16224_s3 + $0x7d0] sm:$0xf0] }
 0x63c   : > { %v14754_v57 = vpop.f32.mrf.mxu2  ;;  %v3350_v52 = vadd.f32 %v14583_v51, %v16422_v37  ;;  %v11260_v51 = vld [vmem:[%s16224_s3 + $0x7c4] sm:$0xf]  ;;  %v9466_v39 = vld [vmem:[%s16224_s3 + $0x718] sm:$0xf0] }
 0x63d   : > { %v3464_v0 = vpack.c.bf16 %v3443_v31, %v3443_v31  ;;  %v9557_v37 = vor.u32 %v11260_v51, %v9554_v16  ;;  %v16425_v16 = vld [vmem:[#allocation46_spill] sm:$0xff] }
 0x63e   : > { %v3399_v35 = vadd.f32 %v14441_v42, %v3350_v52  ;;  %v11237_v42 = vld [vmem:[%s16224_s3 + $0x70c] sm:$0xf] }
 0x63f   : > { %3480 = vst [vmem:[#allocation2 + $0x1c4] sm:$0xf] %v3464_v0  ;;  %v9469_v52 = vor.u32 %v11237_v42, %v9466_v39  ;;  %v3754_v42 = vadd.f32 %v14624_v13, %v16425_v16 }
 0x641   : > { %v3803_v13 = vadd.f32 %v14505_v33, %v3754_v42 }
 0x642   : > { %v3444_v9 = vpop.f32.mrf.mxu3 }
 0x643   : > { %v3445_v14 = vadd.f32 %v3444_v9, %v3396_v23  ;;  %v14781_v6 = vpop.f32.mrf.mxu1  ;;  %v9664_v9 = vld [vmem:[%s16224_s3 + $0x848] sm:$0xf] }
 0x644   : > { %v14779_v34 = vpop.f32.mrf.mxu2 }
 0x645   : > { %v3465_v31 = vpack.c.bf16 %v3445_v14, %v3445_v14  ;;  %v11279_v14 = vld [vmem:[%s16224_s3 + $0x854] sm:$0xf0] }
 0x646   : > { %4212 = vmatmul.bf16.gmra.mxu1 %v9541_v18 }
 0x647   : > { %3481 = vst [vmem:[#allocation2 + $0x1e8] sm:$0xf] %v3465_v31  ;;  %9421 = vmatmul.msk.bf16.gmra.mxu3 %vm1046_vm0, %v9413_v45 }
 0x649   : > { %4678 = vmatmul.bf16.gmra.mxu2 %v9649_v29 }
 0x64a   : > { %v3447_v5 = vpop.f32.mrf.mxu3 }
 0x64b   : > { %v3448_v0 = vadd.f32 %v3447_v5, %v3399_v35  ;;  %v14789_v4 = vpop.f32.mrf.mxu1  ;;  %v9665_v35 = vor.u32 %v11279_v14, %v9664_v9  ;;  %v16424_v5 = vld [vmem:[#allocation53_spill] sm:$0xff]  ;;  %v9570_v9 = vld [vmem:[%s16224_s3 + $0x7f0] sm:$0xf0]  ;;  %v9482_v14 = vld [vmem:[%s16224_s3 + $0x738] sm:$0xf0] }
 0x64c   : > { %v14787_v23 = vpop.f32.mrf.mxu2  ;;  %v3752_v44 = vadd.f32 %v14616_v62, %v16424_v5  ;;  %v11264_v62 = vld [vmem:[%s16224_s3 + $0x7e4] sm:$0xf] }
 0x64d   : > { %v3466_v61 = vpack.c.bf16 %v3448_v0, %v3448_v0  ;;  %v9573_v5 = vor.u32 %v11264_v62, %v9570_v9  ;;  %v16427_v9 = vld [vmem:[#allocation55_spill] sm:$0xff] }
 0x64e   : > { %v3801_v48 = vadd.f32 %v14478_v41, %v3752_v44  ;;  %v11241_v41 = vld [vmem:[%s16224_s3 + $0x72c] sm:$0xf] }
 0x64f   : > { %3482 = vst [vmem:[#allocation2 + $0x20c] sm:$0xf] %v3466_v61  ;;  %v9485_v44 = vor.u32 %v11241_v41, %v9482_v14  ;;  %v3759_v41 = vadd.f32 %v14657_v55, %v16427_v9  ;;  %v11395_v9 = vld [vmem:[%s16225_s4 + $0xb8] sm:$0xff] }
 0x650   : > { %5921 = vmatpush.bf16.msra.mxu2 %v11395_v9 }
 0x651   : > { %v3808_v55 = vadd.f32 %v14540_v25, %v3759_v41 }
 0x652   : > { %v3449_v45 = vpop.f32.mrf.mxu3 }
 0x653   : > { %v3450_v18 = vadd.f32 %v3449_v45, %v3401_v58  ;;  %v14814_v31 = vpop.f32.mrf.mxu1  ;;  %v9680_v45 = vld [vmem:[%s16224_s3 + $0x868] sm:$0xf] }
 0x654   : > { %v14812_v29 = vpop.f32.mrf.mxu2 }
 0x655   : > { %v3467_v0 = vpack.c.bf16 %v3450_v18, %v3450_v18  ;;  %v11283_v18 = vld [vmem:[%s16224_s3 + $0x874] sm:$0xf0] }
 0x656   : > { %4217 = vmatmul.bf16.gmra.mxu1 %v9557_v37 }
 0x657   : > { %3483 = vst [vmem:[#allocation2 + $0x230] sm:$0xf] %v3467_v0  ;;  %9582 = vmatmul.msk.bf16.vlgmr.msrb.gmra.mxu3 %vm1046_vm0, %v9469_v52 }
 0x659   : > { %4683 = vmatmul.bf16.gmra.mxu2 %v9665_v35 }
 0x65a   : > { %v3849_v28 = vpop.f32.mrf.mxu3 }
 0x65b   : > { %v3850_v61 = vadd.f32 %v3849_v28, %v3801_v48  ;;  %v14822_v51 = vpop.f32.mrf.mxu1  ;;  %v9681_v48 = vor.u32 %v11283_v18, %v9680_v45  ;;  %v16426_v28 = vld [vmem:[#allocation54_spill] sm:$0xff]  ;;  %v9498_v45 = vld [vmem:[%s16224_s3 + $0x758] sm:$0xf0] }
 0x65c   : > { %v14820_v58 = vpop.f32.mrf.mxu2  ;;  %v3757_v33 = vadd.f32 %v14649_v60, %v16426_v28  ;;  %v11245_v60 = vld [vmem:[%s16224_s3 + $0x74c] sm:$0xf]  ;;  %v9626_v18 = vld [vmem:[%s16224_s3 + $0x810] sm:$0xf0] }
 0x65d   : > { %v3889_v39 = vpack.c.bf16 %v3850_v61, %v3850_v61  ;;  %v9501_v28 = vor.u32 %v11245_v60, %v9498_v45 }
 0x65e   : > { %v3806_v16 = vadd.f32 %v14513_v27, %v3757_v33  ;;  %v11268_v27 = vld [vmem:[%s16224_s3 + $0x804] sm:$0xf] }
 0x65f   : > { %3905 = vst [vmem:[#allocation2 + $0x18] sm:$0xf] %v3889_v39  ;;  %v9629_v33 = vor.u32 %v11268_v27, %v9626_v18  ;;  %v16429_v18 = vld [vmem:[#allocation57_spill] sm:$0xff] }
 0x662   : > { %v3851_v37 = vpop.f32.mrf.mxu3 }
 0x663   : > { %v3852_v52 = vadd.f32 %v3851_v37, %v3803_v13  ;;  %v14847_v0 = vpop.f32.mrf.mxu1  ;;  %v9696_v37 = vld [vmem:[%s16224_s3 + $0x888] sm:$0xf] }
 0x664   : > { %v14845_v35 = vpop.f32.mrf.mxu2 }
 0x665   : > { %v3890_v61 = vpack.c.bf16 %v3852_v52, %v3852_v52  ;;  %v11287_v52 = vld [vmem:[%s16224_s3 + $0x894] sm:$0xf0] }
 0x666   : > { %4222 = vmatmul.bf16.gmra.mxu1 %v9573_v5 }
 0x667   : > { %3906 = vst [vmem:[#allocation2 + $0x3c] sm:$0xf] %v3890_v61  ;;  %9583 = vmatmul.msk.bf16.gmra.mxu3 %vm1046_vm0, %v9485_v44 }
 0x669   : > { %4688 = vmatmul.bf16.gmra.mxu2 %v9681_v48 }
 0x66a   : > { %v3854_v42 = vpop.f32.mrf.mxu3 }
 0x66b   : > { %v3855_v39 = vadd.f32 %v3854_v42, %v3806_v16  ;;  %v14855_v62 = vpop.f32.mrf.mxu1  ;;  %v9697_v16 = vor.u32 %v11287_v52, %v9696_v37  ;;  %v16428_v42 = vld [vmem:[#allocation56_spill] sm:$0xff]  ;;  %v11393_v52 = vld [vmem:[%s16225_s4 + $0xa8] sm:$0xff] }
 0x66c   : > { %v14853_v13 = vpop.f32.mrf.mxu2  ;;  %v3762_v25 = vadd.f32 %v14682_v15, %v16428_v42  ;;  %v11394_v15 = vld [vmem:[%s16225_s4 + $0xb0] sm:$0xff] }
 0x66d   : > { %v3891_v14 = vpack.c.bf16 %v3855_v39, %v3855_v39  ;;  %5922 = vmatpush.bf16.msra.mxu2 %v11394_v15  ;;  %v16430_v15 = vld [vmem:[#allocation58_spill] sm:$0xff] }
 0x66e   : > { %v3811_v41 = vadd.f32 %v14551_v8, %v3762_v25  ;;  %v11249_v8 = vld [vmem:[%s16224_s3 + $0x76c] sm:$0xf] }
 0x66f   : > { %3907 = vst [vmem:[#allocation2 + $0x60] sm:$0xf] %v3891_v14 }
 0x671   : > { %5923 = vmatpush.bf16.msra.mxu2 %v11393_v52 }
 0x672   : > { %v3856_v5 = vpop.f32.mrf.mxu3 }
 0x673   : > { %v3857_v44 = vadd.f32 %v3856_v5, %v3808_v55  ;;  %v14880_v61 = vpop.f32.mrf.mxu1  ;;  %v3764_v55 = vadd.f32 %v14690_v54, %v16429_v18  ;;  %v9514_v5 = vld [vmem:[%s16224_s3 + $0x778] sm:$0xf0]  ;;  %v9642_v54 = vld [vmem:[%s16224_s3 + $0x830] sm:$0xf0]  ;;  %v3767_v18 = vadd.f32 %v14715_v7, %v16430_v15 }
 0x674   : > { %v14878_v48 = vpop.f32.mrf.mxu2  ;;  %v9517_v9 = vor.u32 %v11249_v8, %v9514_v5  ;;  %v11390_v7 = vld [vmem:[%s16225_s4 + $0x90] sm:$0xff] }
 0x675   : > { %v3892_v39 = vpack.c.bf16 %v3857_v44, %v3857_v44  ;;  %v11272_v44 = vld [vmem:[%s16224_s3 + $0x824] sm:$0xf]  ;;  %v3816_v8 = vadd.f32 %v14589_v43, %v3767_v18  ;;  %v11253_v43 = vld [vmem:[%s16224_s3 + $0x78c] sm:$0xf] }
 0x676   : > { %4624 = vmatmul.bf16.vlgmr.msrb.gmra.mxu1 %v9629_v33  ;;  %v9712_v33 = vld [vmem:[%s16224_s3 + $0x8a8] sm:$0xf] }
 0x677   : > { %3908 = vst [vmem:[#allocation2 + $0x84] sm:$0xf] %v3892_v39  ;;  %9584 = vmatmul.msk.bf16.gmra.mxu3 %vm1046_vm0, %v9501_v28  ;;  %v3813_v28 = vadd.f32 %v14580_v11, %v3764_v55  ;;  %v11392_v11 = vld [vmem:[%s16225_s4 + $0xa0] sm:$0xff] }
 0x678   : > { %5924 = vmatpush.bf16.msra.mxu2 %v11392_v11  ;;  %v11295_v11 = vld [vmem:[%s16224_s3 + $0x8d4] sm:$0xf0] }
 0x679   : > { %4693 = vmatmul.bf16.gmra.mxu2 %v9697_v16  ;;  %v11291_v16 = vld [vmem:[%s16224_s3 + $0x8b4] sm:$0xf0] }
 0x67a   : > { %v3859_v14 = vpop.f32.mrf.mxu3 }
 0x67b   : > { %v3860_v60 = vadd.f32 %v3859_v14, %v3811_v41  ;;  %v14891_v27 = vpop.f32.mrf.mxu1  ;;  %v9645_v41 = vor.u32 %v11272_v44, %v9642_v54 }
 0x67c   : > { %v14889_v45 = vpop.f32.mrf.mxu2 }
 0x67d   : > { %v3893_v37 = vpack.c.bf16 %v3860_v60, %v3860_v60  ;;  %v9713_v60 = vor.u32 %v11291_v16, %v9712_v33 }
 0x67f   : > { %3909 = vst [vmem:[#allocation2 + $0xa8] sm:$0xf] %v3893_v37  ;;  %v11391_v37 = vld [vmem:[%s16225_s4 + $0x98] sm:$0xff] }
 0x680   : > { %5925 = vmatpush.bf16.msra.mxu2 %v11391_v37 }
 0x682   : > { %v3861_v42 = vpop.f32.mrf.mxu3 }
 0x683   : > { %v3862_v25 = vadd.f32 %v3861_v42, %v3813_v28  ;;  %v14922_v14 = vpop.f32.mrf.mxu1  ;;  %v16431_v28 = vld [vmem:[#allocation59_spill] sm:$0xff]  ;;  %v11389_v42 = vld [vmem:[%s16225_s4 + $0x88] sm:$0xff] }
 0x684   : > { %v14920_v39 = vpop.f32.mrf.mxu2  ;;  %v3769_v33 = vadd.f32 %v14723_v20, %v16431_v28  ;;  %5926 = vmatpush.bf16.msra.mxu2 %v11390_v7  ;;  %v9658_v20 = vld [vmem:[%s16224_s3 + $0x850] sm:$0xf0]  ;;  %v16432_v7 = vld [vmem:[#allocation60_spill] sm:$0xff] }
 0x685   : > { %v3894_v55 = vpack.c.bf16 %v3862_v25, %v3862_v25  ;;  %v9530_v25 = vld [vmem:[%s16224_s3 + $0x798] sm:$0xf0]  ;;  %v3772_v28 = vadd.f32 %v14748_v38, %v16432_v7  ;;  %v11257_v38 = vld [vmem:[%s16224_s3 + $0x7ac] sm:$0xf] }
 0x686   : > { %4629 = vmatmul.bf16.gmra.mxu1 %v9645_v41  ;;  %v3818_v41 = vadd.f32 %v14614_v59, %v3769_v33  ;;  %v9533_v37 = vor.u32 %v11253_v43, %v9530_v25  ;;  %v11388_v59 = vld [vmem:[%s16225_s4 + $0x80] sm:$0xff] }
 0x687   : > { %3910 = vst [vmem:[#allocation2 + $0xcc] sm:$0xf] %v3894_v55  ;;  %9585 = vmatmul.msk.bf16.gmra.mxu3 %vm1046_vm0, %v9517_v9  ;;  %v11276_v9 = vld [vmem:[%s16224_s3 + $0x844] sm:$0xf] }
 0x688   : > { %5927 = vmatpush.bf16.msra.mxu2 %v11389_v42 }
 0x689   : > { %4698 = vmatmul.bf16.gmra.mxu2 %v9713_v60  ;;  %v9728_v60 = vld [vmem:[%s16224_s3 + $0x8c8] sm:$0xf] }
 0x68a   : > { %v3864_v52 = vpop.f32.mrf.mxu3 }
 0x68b   : > { %v3865_v5 = vadd.f32 %v3864_v52, %v3816_v8  ;;  %v14936_v54 = vpop.f32.mrf.mxu1  ;;  %v9661_v8 = vor.u32 %v11276_v9, %v9658_v20  ;;  %v16433_v20 = vld [vmem:[#allocation61_spill] sm:$0xff] }
 0x68c   : > { %v14934_v44 = vpop.f32.mrf.mxu2  ;;  %5928 = vmatpush.bf16.msra.mxu2 %v11388_v59 }
 0x68d   : > { %v3895_v16 = vpack.c.bf16 %v3865_v5, %v3865_v5  ;;  %v9729_v5 = vor.u32 %v11295_v11, %v9728_v60  ;;  %v9546_v11 = vld [vmem:[%s16224_s3 + $0x7b8] sm:$0xf0] }
 0x68e   : > { %v9549_v7 = vor.u32 %v11257_v38, %v9546_v11  ;;  %v16435_v11 = vld [vmem:[#allocation63_spill] sm:$0xff] }
 0x68f   : > { %3911 = vst [vmem:[#allocation2 + $0xf0] sm:$0xf] %v3895_v16  ;;  %v3821_v16 = vadd.f32 %v14622_v22, %v3772_v28  ;;  %v11280_v22 = vld [vmem:[%s16224_s3 + $0x864] sm:$0xf] }
 0x692   : > { %v3866_v15 = vpop.f32.mrf.mxu3 }
 0x693   : > { %v3867_v18 = vadd.f32 %v3866_v15, %v3818_v41  ;;  %v14967_v52 = vpop.f32.mrf.mxu1  ;;  %v3774_v41 = vadd.f32 %v14756_v19, %v16433_v20  ;;  %v9674_v15 = vld [vmem:[%s16224_s3 + $0x870] sm:$0xf0] }
 0x694   : > { %v14965_v55 = vpop.f32.mrf.mxu2  ;;  %v9677_v28 = vor.u32 %v11280_v22, %v9674_v15  ;;  %v3779_v22 = vadd.f32 %v14789_v4, %v16435_v11 }
 0x695   : > { %v3896_v33 = vpack.c.bf16 %v3867_v18, %v3867_v18  ;;  %v3823_v19 = vadd.f32 %v14647_v24, %v3774_v41  ;;  %v9744_v18 = vld [vmem:[%s16224_s3 + $0x8e8] sm:$0xf] }
 0x696   : > { %4634 = vmatmul.bf16.gmra.mxu1 %v9661_v8  ;;  %v3828_v4 = vadd.f32 %v14680_v1, %v3779_v22  ;;  %v11387_v1 = vld [vmem:[%s16225_s4 + $0x78] sm:$0xff] }
 0x697   : > { %3912 = vst [vmem:[#allocation2 + $0x114] sm:$0xf] %v3896_v33  ;;  %9586 = vmatmul.msk.bf16.gmra.mxu3 %vm1046_vm0, %v9533_v37  ;;  %v11299_v37 = vld [vmem:[%s16224_s3 + $0x8f4] sm:$0xf0]  ;;  %5872 = vmatpush.bf16.msra.mxu1 %v11387_v1  ;;  %v11314_v1 = vld [vmem:[#allocation2 + $0x70] sm:$0xf0] }
 0x699   : > { %4703 = vmatmul.bf16.gmra.mxu2 %v9729_v5 }
 0x69a   : > { %v3869_v43 = vpop.f32.mrf.mxu3 }
 0x69b   : > { %v3870_v42 = vadd.f32 %v3869_v43, %v3821_v16  ;;  %v14978_v9 = vpop.f32.mrf.mxu1  ;;  %v9745_v16 = vor.u32 %v11299_v37, %v9744_v18  ;;  %v16434_v43 = vld [vmem:[#allocation62_spill] sm:$0xff]  ;;  %v9562_v18 = vld [vmem:[%s16224_s3 + $0x7d8] sm:$0xf0] }
 0x69c   : > { %v14976_v25 = vpop.f32.mrf.mxu2  ;;  %v3777_v24 = vadd.f32 %v14781_v6, %v16434_v43  ;;  %v11261_v6 = vld [vmem:[%s16224_s3 + $0x7cc] sm:$0xf]  ;;  %v9690_v37 = vld [vmem:[%s16224_s3 + $0x890] sm:$0xf0] }
 0x69d   : > { %v3897_v60 = vpack.c.bf16 %v3870_v42, %v3870_v42  ;;  %v11305_v43 = vld [vmem:[#allocation2 + $0x28] sm:$0xf0] }
 0x69e   : > { %v3826_v20 = vadd.f32 %v14655_v26, %v3777_v24  ;;  %v11284_v26 = vld [vmem:[%s16224_s3 + $0x884] sm:$0xf] }
 0x69f   : > { %3913 = vst [vmem:[#allocation2 + $0x138] sm:$0xf] %v3897_v60 }
 0x6a2   : > { %v3871_v8 = vpop.f32.mrf.mxu3 }
 0x6a3   : > { %v3872_v5 = vadd.f32 %v3871_v8, %v3823_v19  ;;  %v15003_v33 = vpop.f32.mrf.mxu1 }
 0x6a4   : > { %v15001_v59 = vpop.f32.mrf.mxu2 }
 0x6a5   : > { %v3898_v42 = vpack.c.bf16 %v3872_v5, %v3872_v5 }
 0x6a6   : > { %4639 = vmatmul.bf16.gmra.mxu1 %v9677_v28  ;;  %v9565_v28 = vor.u32 %v11261_v6, %v9562_v18 }
 0x6a7   : > { %3914 = vst [vmem:[#allocation2 + $0x15c] sm:$0xf] %v3898_v42  ;;  %9587 = vmatmul.msk.bf16.gmra.mxu3 %vm1046_vm0, %v9549_v7  ;;  %v16436_v42 = vld [vmem:[#allocation64_spill] sm:$0xff] }
 0x6a9   : > { %4708 = vmatmul.bf16.gmra.mxu2 %v9745_v16  ;;  %v9693_v16 = vor.u32 %v11284_v26, %v9690_v37  ;;  %v11386_v26 = vld [vmem:[%s16225_s4 + $0x70] sm:$0xff]  ;;  %v16437_v37 = vld [vmem:[#allocation65_spill] sm:$0xff] }
 0x6aa   : > { %v3874_v41 = vpop.f32.mrf.mxu3  ;;  %5873 = vmatpush.bf16.msra.mxu1 %v11386_v26 }
 0x6ab   : > { %v3875_v60 = vadd.f32 %v3874_v41, %v3826_v20  ;;  %v15011_v38 = vpop.f32.mrf.mxu1  ;;  %v3782_v20 = vadd.f32 %v14814_v31, %v16436_v42 }
 0x6ac   : > { %v15009_v19 = vpop.f32.mrf.mxu2 }
 0x6ad   : > { %v3899_v15 = vpack.c.bf16 %v3875_v60, %v3875_v60  ;;  %v9768_v60 = vld [vmem:[#allocation2 + $0x8] sm:$0xf]  ;;  %v3831_v22 = vadd.f32 %v14688_v56, %v3782_v20  ;;  %v11265_v56 = vld [vmem:[%s16224_s3 + $0x7ec] sm:$0xf] }
 0x6ae   : > { %v9769_v11 = vor.u32 %v11305_v43, %v9768_v60 }
 0x6af   : > { %3915 = vst [vmem:[#allocation2 + $0x180] sm:$0xf] %v3899_v15 }
 0x6b2   : > { %v3876_v8 = vpop.f32.mrf.mxu3 }
 0x6b3   : > { %v3877_v5 = vadd.f32 %v3876_v8, %v3828_v4  ;;  %v15030_v24 = vpop.f32.mrf.mxu1  ;;  %v3784_v4 = vadd.f32 %v14822_v51, %v16437_v37  ;;  %v9706_v51 = vld [vmem:[%s16224_s3 + $0x8b0] sm:$0xf0] }
 0x6b4   : > { %v15028_v7 = vpop.f32.mrf.mxu2 }
 0x6b5   : > { %v3900_v41 = vpack.c.bf16 %v3877_v5, %v3877_v5  ;;  %v11385_v5 = vld [vmem:[%s16225_s4 + $0x68] sm:$0xff]  ;;  %v3833_v43 = vadd.f32 %v14713_v63, %v3784_v4  ;;  %v11383_v4 = vld [vmem:[%s16225_s4 + $0x58] sm:$0xff] }
 0x6b6   : > { %4644 = vmatmul.bf16.gmra.mxu1 %v9693_v16  ;;  %v11288_v16 = vld [vmem:[%s16224_s3 + $0x8a4] sm:$0xf] }
 0x6b7   : > { %3916 = vst [vmem:[#allocation2 + $0x1a4] sm:$0xf] %v3900_v41  ;;  %9588 = vmatmul.msk.bf16.gmra.mxu3 %vm1046_vm0, %v9565_v28  ;;  %v9578_v28 = vld [vmem:[%s16224_s3 + $0x7f8] sm:$0xf0]  ;;  %5874 = vmatpush.bf16.msra.mxu1 %v11385_v5 }
 0x6b8   : > { %v9581_v60 = vor.u32 %v11265_v56, %v9578_v28 }
 0x6b9   : > { %5929 = vmatmul.bf16.vlgmr.msra.gmra.mxu2 %v9769_v11  ;;  %v9709_v11 = vor.u32 %v11288_v16, %v9706_v51  ;;  %v11382_v51 = vld [vmem:[%s16225_s4 + $0x50] sm:$0xff] }
 0x6ba   : > { %v3879_v15 = vpop.f32.mrf.mxu3 }
 0x6bb   : > { %v3880_v6 = vadd.f32 %v3879_v15, %v3831_v22  ;;  %v15041_v31 = vpop.f32.mrf.mxu1  ;;  %v11384_v15 = vld [vmem:[%s16225_s4 + $0x60] sm:$0xff] }
 0x6bc   : > { %v15039_v18 = vpop.f32.mrf.mxu2  ;;  %5875 = vmatpush.bf16.msra.mxu1 %v11384_v15 }
 0x6bd   : > { %v3901_v8 = vpack.c.bf16 %v3880_v6, %v3880_v6  ;;  %v16438_v6 = vld [vmem:[#allocation66_spill] sm:$0xff] }
 0x6be   : > { %v3787_v26 = vadd.f32 %v14847_v0, %v16438_v6 }
 0x6bf   : > { %3917 = vst [vmem:[#allocation2 + $0x1c8] sm:$0xf] %v3901_v8  ;;  %v9804_v8 = vld [vmem:[#allocation2 + $0x50] sm:$0xf] }
 0x6c0   : > { %v9805_v63 = vor.u32 %v11314_v1, %v9804_v8  ;;  %v3836_v56 = vadd.f32 %v14721_v49, %v3787_v26  ;;  %5876 = vmatpush.bf16.msra.mxu1 %v11383_v4  ;;  %v11292_v49 = vld [vmem:[%s16224_s3 + $0x8c4] sm:$0xf]  ;;  %v11269_v1 = vld [vmem:[%s16224_s3 + $0x80c] sm:$0xf]  ;;  %v11323_v4 = vld [vmem:[#allocation2 + $0xb8] sm:$0xf0] }
 0x6c2   : > { %v3881_v42 = vpop.f32.mrf.mxu3 }
 0x6c3   : > { %v3882_v20 = vadd.f32 %v3881_v42, %v3833_v43  ;;  %v15066_v22 = vpop.f32.mrf.mxu1  ;;  %v16439_v43 = vld [vmem:[#allocation67_spill] sm:$0xff] }
 0x6c4   : > { %v15064_v41 = vpop.f32.mrf.mxu2  ;;  %v3789_v42 = vadd.f32 %v14855_v62, %v16439_v43  ;;  %5877 = vmatpush.bf16.msra.mxu1 %v11382_v51  ;;  %v9634_v62 = vld [vmem:[%s16224_s3 + $0x818] sm:$0xf0] }
 0x6c5   : > { %v3902_v37 = vpack.c.bf16 %v3882_v20, %v3882_v20 }
 0x6c6   : > { %4649 = vmatmul.bf16.gmra.mxu1 %v9709_v11  ;;  %v9722_v11 = vld [vmem:[%s16224_s3 + $0x8d0] sm:$0xf0]  ;;  %v3838_v15 = vadd.f32 %v14746_v50, %v3789_v42 }
 0x6c7   : > { %3918 = vst [vmem:[#allocation2 + $0x1ec] sm:$0xf] %v3902_v37  ;;  %9589 = vmatmul.msk.bf16.gmra.mxu3 %vm1046_vm0, %v9581_v60  ;;  %v11381_v60 = vld [vmem:[%s16225_s4 + $0x48] sm:$0xff]  ;;  %v9725_v8 = vor.u32 %v11292_v49, %v9722_v11 }
 0x6c8   : > { %5878 = vmatpush.bf16.msra.mxu1 %v11381_v60 }
 0x6c9   : > { %5934 = vmatmul.bf16.gmra.mxu2 %v9805_v63  ;;  %v9637_v63 = vor.u32 %v11269_v1, %v9634_v62  ;;  %v16441_v62 = vld [vmem:[#allocation69_spill] sm:$0xff] }
 0x6ca   : > { %v3884_v5 = vpop.f32.mrf.mxu3 }
 0x6cb   : > { %v3885_v28 = vadd.f32 %v3884_v5, %v3836_v56  ;;  %v15080_v0 = vpop.f32.mrf.mxu1  ;;  %v11380_v5 = vld [vmem:[%s16225_s4 + $0x40] sm:$0xff] }
 0x6cc   : > { %v15078_v16 = vpop.f32.mrf.mxu2  ;;  %5879 = vmatpush.bf16.msra.mxu1 %v11380_v5 }
 0x6cd   : > { %v3903_v20 = vpack.c.bf16 %v3885_v28, %v3885_v28  ;;  %v16440_v28 = vld [vmem:[#allocation68_spill] sm:$0xff] }
 0x6ce   : > { %v4189_v51 = vadd.f32 %v14880_v61, %v16440_v28  ;;  %v4191_v61 = vadd.f32 %v14891_v27, %v16441_v62 }
 0x6cf   : > { %3919 = vst [vmem:[#allocation2 + $0x210] sm:$0xf] %v3903_v20  ;;  %v9840_v20 = vld [vmem:[#allocation2 + $0x98] sm:$0xf] }
 0x6d0   : > { %v9841_v50 = vor.u32 %v11323_v4, %v9840_v20  ;;  %v4238_v42 = vadd.f32 %v14754_v57, %v4189_v51  ;;  %v11273_v57 = vld [vmem:[%s16224_s3 + $0x82c] sm:$0xf]  ;;  %v4240_v27 = vadd.f32 %v14779_v34, %v4191_v61 }
 0x6d2   : > { %v3886_v6 = vpop.f32.mrf.mxu3 }
 0x6d3   : > { %v3887_v26 = vadd.f32 %v3886_v6, %v3838_v15  ;;  %v15105_v56 = vpop.f32.mrf.mxu1  ;;  %v11296_v6 = vld [vmem:[%s16224_s3 + $0x8e4] sm:$0xf] }
 0x6d4   : > { %v15103_v37 = vpop.f32.mrf.mxu2 }
 0x6d5   : > { %v3904_v43 = vpack.c.bf16 %v3887_v26, %v3887_v26  ;;  %v9738_v26 = vld [vmem:[%s16224_s3 + $0x8f0] sm:$0xf0] }
 0x6d6   : > { %4654 = vmatmul.bf16.gmra.mxu1 %v9725_v8  ;;  %v9650_v8 = vld [vmem:[%s16224_s3 + $0x838] sm:$0xf0]  ;;  %v9741_v28 = vor.u32 %v11296_v6, %v9738_v26 }
 0x6d7   : > { %3920 = vst [vmem:[#allocation2 + $0x234] sm:$0xf] %v3904_v43  ;;  %9750 = vmatmul.msk.bf16.vlgmr.msra.gmra.mxu3 %vm1046_vm0, %v9637_v63  ;;  %v9653_v51 = vor.u32 %v11273_v57, %v9650_v8  ;;  %v11332_v43 = vld [vmem:[#allocation2 + $0x100] sm:$0xf0]  ;;  %v16443_v57 = vld [vmem:[#allocation71_spill] sm:$0xff] }
 0x6d8   : > { %v4196_v8 = vadd.f32 %v14936_v54, %v16443_v57 }
 0x6d9   : > { %5939 = vmatmul.bf16.gmra.mxu2 %v9841_v50  ;;  %v16442_v50 = vld [vmem:[#allocation70_spill] sm:$0xff] }
 0x6da   : > { %v4286_v49 = vpop.f32.mrf.mxu3 }
 0x6db   : > { %v4287_v60 = vadd.f32 %v4286_v49, %v4238_v42  ;;  %v15116_v1 = vpop.f32.mrf.mxu1  ;;  %v4194_v42 = vadd.f32 %v14922_v14, %v16442_v50 }
 0x6dc   : > { %v15114_v11 = vpop.f32.mrf.mxu2 }
 0x6dd   : > { %v4326_v15 = vpack.c.bf16 %v4287_v60, %v4287_v60  ;;  %v9876_v60 = vld [vmem:[#allocation2 + $0xe0] sm:$0xf]  ;;  %v4243_v34 = vadd.f32 %v14787_v23, %v4194_v42  ;;  %v4245_v23 = vadd.f32 %v14812_v29, %v4196_v8  ;;  %v11341_v42 = vld [vmem:[#allocation2 + $0x148] sm:$0xf0]  ;;  %v11427_v29 = vld [vmem:[%s16225_s4 + $0x1b8] sm:$0xff] }
 0x6de   : > { %v9877_v62 = vor.u32 %v11332_v43, %v9876_v60  ;;  %v16444_v60 = vld [vmem:[#allocation72_spill] sm:$0xff]  ;;  %6117 = vmatpush.bf16.msrb.mxu2 %v11427_v29  ;;  %v11309_v29 = vld [vmem:[#allocation2 + $0x4c] sm:$0xf] }
 0x6df   : > { %4342 = vst [vmem:[#allocation2 + $0x1c] sm:$0xf] %v4326_v15 }
 0x6e2   : > { %v4288_v63 = vpop.f32.mrf.mxu3 }
 0x6e3   : > { %v4289_v4 = vadd.f32 %v4288_v63, %v4240_v27  ;;  %v15135_v20 = vpop.f32.mrf.mxu1  ;;  %v11277_v27 = vld [vmem:[%s16224_s3 + $0x84c] sm:$0xf]  ;;  %v9666_v63 = vld [vmem:[%s16224_s3 + $0x858] sm:$0xf0] }
 0x6e4   : > { %v15133_v5 = vpop.f32.mrf.mxu2  ;;  %v9669_v50 = vor.u32 %v11277_v27, %v9666_v63 }
 0x6e5   : > { %v4327_v49 = vpack.c.bf16 %v4289_v4, %v4289_v4 }
 0x6e6   : > { %4659 = vmatmul.bf16.gmra.mxu1 %v9741_v28  ;;  %v9762_v28 = vld [vmem:[#allocation2 + $0x24] sm:$0xf0] }
 0x6e7   : > { %4343 = vst [vmem:[#allocation2 + $0x40] sm:$0xf] %v4327_v49  ;;  %9751 = vmatmul.msk.bf16.gmra.mxu3 %vm1046_vm0, %v9653_v51  ;;  %v11300_v49 = vld [vmem:[#allocation2 + $0x4] sm:$0xf] }
 0x6e9   : > { %5944 = vmatmul.bf16.gmra.mxu2 %v9877_v62  ;;  %v4199_v62 = vadd.f32 %v14967_v52, %v16444_v60 }
 0x6ea   : > { %v4291_v61 = vpop.f32.mrf.mxu3 }
 0x6eb   : > { %v4292_v15 = vadd.f32 %v4291_v61, %v4243_v34  ;;  %v15143_v26 = vpop.f32.mrf.mxu1  ;;  %v9765_v61 = vor.u32 %v11300_v49, %v9762_v28  ;;  %v4248_v8 = vadd.f32 %v14820_v58, %v4199_v62  ;;  %v11425_v58 = vld [vmem:[%s16225_s4 + $0x1a8] sm:$0xff]  ;;  %v9798_v62 = vld [vmem:[#allocation2 + $0x6c] sm:$0xf0] }
 0x6ec   : > { %v15141_v6 = vpop.f32.mrf.mxu2 }
 0x6ed   : > { %v4328_v14 = vpack.c.bf16 %v4292_v15, %v4292_v15  ;;  %v9912_v15 = vld [vmem:[#allocation2 + $0x128] sm:$0xf] }
 0x6ee   : > { %v9913_v57 = vor.u32 %v11341_v42, %v9912_v15  ;;  %v9682_v42 = vld [vmem:[%s16224_s3 + $0x878] sm:$0xf0]  ;;  %v11350_v15 = vld [vmem:[#allocation2 + $0x190] sm:$0xf0] }
 0x6ef   : > { %4344 = vst [vmem:[#allocation2 + $0x64] sm:$0xf] %v4328_v14 }
 0x6f2   : > { %v4293_v4 = vpop.f32.mrf.mxu3 }
 0x6f3   : > { %v4294_v51 = vadd.f32 %v4293_v4, %v4245_v23  ;;  %v15156_v54 = vpop.f32.mrf.mxu1  ;;  %v11426_v23 = vld [vmem:[%s16225_s4 + $0x1b0] sm:$0xff]  ;;  %v16445_v4 = vld [vmem:[#allocation73_spill] sm:$0xff] }
 0x6f4   : > { %v15154_v43 = vpop.f32.mrf.mxu2  ;;  %v4201_v28 = vadd.f32 %v14978_v9, %v16445_v4  ;;  %6118 = vmatpush.bf16.msrb.mxu2 %v11426_v23  ;;  %v9948_v4 = vld [vmem:[#allocation2 + $0x170] sm:$0xf] }
 0x6f5   : > { %v4329_v34 = vpack.c.bf16 %v4294_v51, %v4294_v51 }
 0x6f6   : > { %5880 = vmatmul.bf16.vlgmr.msra.gmra.mxu1 %v9765_v61  ;;  %v4250_v49 = vadd.f32 %v14845_v35, %v4201_v28  ;;  %v9801_v35 = vor.u32 %v11309_v29, %v9798_v62  ;;  %v9949_v28 = vor.u32 %v11350_v15, %v9948_v4  ;;  %v16447_v62 = vld [vmem:[#allocation75_spill] sm:$0xff]  ;;  %v11285_v15 = vld [vmem:[%s16224_s3 + $0x88c] sm:$0xf] }
 0x6f7   : > { %4345 = vst [vmem:[#allocation2 + $0x88] sm:$0xf] %v4329_v34  ;;  %9752 = vmatmul.msk.bf16.gmra.mxu3 %vm1046_vm0, %v9669_v50  ;;  %v11281_v50 = vld [vmem:[%s16224_s3 + $0x86c] sm:$0xf]  ;;  %v9698_v29 = vld [vmem:[%s16224_s3 + $0x898] sm:$0xf0] }
 0x6f8   : > { %6119 = vmatpush.bf16.msrb.mxu2 %v11425_v58  ;;  %v9685_v61 = vor.u32 %v11281_v50, %v9682_v42 }
 0x6f9   : > { %5949 = vmatmul.bf16.gmra.mxu2 %v9913_v57 }
 0x6fa   : > { %v4296_v14 = vpop.f32.mrf.mxu3 }
 0x6fb   : > { %v4297_v27 = vadd.f32 %v4296_v14, %v4248_v8  ;;  %v15167_v52 = vpop.f32.mrf.mxu1  ;;  %v11424_v8 = vld [vmem:[%s16225_s4 + $0x1a0] sm:$0xff]  ;;  %v16446_v14 = vld [vmem:[#allocation74_spill] sm:$0xff] }
 0x6fc   : > { %v15165_v63 = vpop.f32.mrf.mxu2  ;;  %6120 = vmatpush.bf16.msrb.mxu2 %v11424_v8 }
 0x6fd   : > { %v4330_v51 = vpack.c.bf16 %v4297_v27, %v4297_v27  ;;  %v4204_v27 = vadd.f32 %v15003_v33, %v16446_v14 }
 0x6ff   : > { %4346 = vst [vmem:[#allocation2 + $0xac] sm:$0xf] %v4330_v51  ;;  %v11423_v51 = vld [vmem:[%s16225_s4 + $0x198] sm:$0xff]  ;;  %v4253_v58 = vadd.f32 %v14853_v13, %v4204_v27  ;;  %v11421_v13 = vld [vmem:[%s16225_s4 + $0x188] sm:$0xff] }
 0x700   : > { %6121 = vmatpush.bf16.msrb.mxu2 %v11423_v51  ;;  %v9834_v27 = vld [vmem:[#allocation2 + $0xb4] sm:$0xf0]  ;;  %v11318_v51 = vld [vmem:[#allocation2 + $0x94] sm:$0xf] }
 0x702   : > { %v4298_v60 = vpop.f32.mrf.mxu3 }
 0x703   : > { %v4299_v9 = vadd.f32 %v4298_v60, %v4250_v49  ;;  %v15186_v57 = vpop.f32.mrf.mxu1  ;;  %v11422_v60 = vld [vmem:[%s16225_s4 + $0x190] sm:$0xff] }
 0x704   : > { %v15184_v34 = vpop.f32.mrf.mxu2  ;;  %6122 = vmatpush.bf16.msrb.mxu2 %v11422_v60 }
 0x705   : > { %v4331_v23 = vpack.c.bf16 %v4299_v9, %v4299_v9  ;;  %v4206_v9 = vadd.f32 %v15011_v38, %v16447_v62  ;;  %v9984_v62 = vld [vmem:[#allocation2 + $0x1b8] sm:$0xf] }
 0x706   : > { %5885 = vmatmul.bf16.gmra.mxu1 %v9801_v35  ;;  %v11359_v35 = vld [vmem:[#allocation2 + $0x1d8] sm:$0xf0] }
 0x707   : > { %4347 = vst [vmem:[#allocation2 + $0xd0] sm:$0xf] %v4331_v23  ;;  %9753 = vmatmul.msk.bf16.gmra.mxu3 %vm1046_vm0, %v9685_v61  ;;  %v4255_v8 = vadd.f32 %v14878_v48, %v4206_v9  ;;  %v9701_v23 = vor.u32 %v11285_v15, %v9698_v29  ;;  %v9837_v48 = vor.u32 %v11318_v51, %v9834_v27  ;;  %v9714_v51 = vld [vmem:[%s16224_s3 + $0x8b8] sm:$0xf0] }
 0x708   : > { %6123 = vmatpush.bf16.msrb.mxu2 %v11421_v13  ;;  %v9985_v9 = vor.u32 %v11359_v35, %v9984_v62  ;;  %v11289_v35 = vld [vmem:[%s16224_s3 + $0x8ac] sm:$0xf] }
 0x709   : > { %5954 = vmatmul.bf16.gmra.mxu2 %v9949_v28 }
 0x70a   : > { %v4301_v50 = vpop.f32.mrf.mxu3 }
 0x70b   : > { %v4302_v42 = vadd.f32 %v4301_v50, %v4253_v58  ;;  %v15200_v49 = vpop.f32.mrf.mxu1  ;;  %v11420_v58 = vld [vmem:[%s16225_s4 + $0x180] sm:$0xff]  ;;  %v16448_v50 = vld [vmem:[#allocation77_spill] sm:$0xff] }
 0x70c   : > { %v15198_v33 = vpop.f32.mrf.mxu2  ;;  %6124 = vmatpush.bf16.msrb.mxu2 %v11420_v58 }
 0x70d   : > { %v4332_v61 = vpack.c.bf16 %v4302_v42, %v4302_v42  ;;  %v4209_v42 = vadd.f32 %v15030_v24, %v16448_v50  ;;  %v9870_v50 = vld [vmem:[#allocation2 + $0xfc] sm:$0xf0] }
 0x70f   : > { %4348 = vst [vmem:[#allocation2 + $0xf4] sm:$0xf] %v4332_v61  ;;  %v11403_v61 = vld [vmem:[%s16225_s4 + $0xf8] sm:$0xff]  ;;  %v4258_v13 = vadd.f32 %v14889_v45, %v4209_v42  ;;  %v11401_v45 = vld [vmem:[%s16225_s4 + $0xe8] sm:$0xff] }
 0x710   : > { %5970 = vmatpush.bf16.msrb.mxu3 %v11403_v61  ;;  %v11400_v61 = vld [vmem:[%s16225_s4 + $0xe0] sm:$0xff] }
 0x712   : > { %v4303_v14 = vpop.f32.mrf.mxu3 }
 0x713   : > { %v4304_v38 = vadd.f32 %v4303_v14, %v4255_v8  ;;  %v15219_v28 = vpop.f32.mrf.mxu1  ;;  %v11402_v8 = vld [vmem:[%s16225_s4 + $0xf0] sm:$0xff]  ;;  %v16449_v14 = vld [vmem:[#allocation80_spill] sm:$0xff] }
 0x714   : > { %v15217_v4 = vpop.f32.mrf.mxu2  ;;  %v4211_v27 = vadd.f32 %v15041_v31, %v16449_v14  ;;  %5971 = vmatpush.bf16.msrb.mxu3 %v11402_v8  ;;  %v10020_v14 = vld [vmem:[#allocation2 + $0x200] sm:$0xf] }
 0x715   : > { %v4333_v60 = vpack.c.bf16 %v4304_v38, %v4304_v38 }
 0x716   : > { %5890 = vmatmul.bf16.gmra.mxu1 %v9837_v48  ;;  %v4260_v58 = vadd.f32 %v14920_v39, %v4211_v27  ;;  %v11368_v48 = vld [vmem:[#allocation2 + $0x220] sm:$0xf0] }
 0x717   : > { %4349 = vst [vmem:[#allocation2 + $0x118] sm:$0xf] %v4333_v60  ;;  %9754 = vmatmul.msk.bf16.gmra.mxu3 %vm1046_vm0, %v9701_v23  ;;  %v9717_v60 = vor.u32 %v11289_v35, %v9714_v51  ;;  %v10021_v39 = vor.u32 %v11368_v48, %v10020_v14  ;;  %v9730_v48 = vld [vmem:[%s16224_s3 + $0x8d8] sm:$0xf0] }
 0x718   : > { %5972 = vmatpush.bf16.msrb.mxu3 %v11401_v45  ;;  %v11307_v14 = vld [vmem:[#allocation2 + $0x38] sm:$0xf0] }
 0x719   : > { %5959 = vmatmul.bf16.gmra.mxu2 %v9985_v9  ;;  %v11327_v9 = vld [vmem:[#allocation2 + $0xdc] sm:$0xf] }
 0x71a   : > { %v4306_v15 = vpop.f32.mrf.mxu3  ;;  %v9873_v8 = vor.u32 %v11327_v9, %v9870_v50 }
 0x71b   : > { %v4307_v29 = vadd.f32 %v4306_v15, %v4258_v13  ;;  %v15231_v24 = vpop.f32.mrf.mxu1  ;;  %v16450_v13 = vld [vmem:[#allocation82_spill] sm:$0xff] }
 0x71c   : > { %v15238_v23 = vpop.f32.mrf.mxu2  ;;  %v4214_v15 = vadd.f32 %v15066_v22, %v16450_v13  ;;  %5973 = vmatpush.bf16.msrb.mxu3 %v11400_v61  ;;  %v9906_v13 = vld [vmem:[#allocation2 + $0x144] sm:$0xf0] }
 0x71d   : > { %v4334_v38 = vpack.c.bf16 %v4307_v29, %v4307_v29 }
 0x71e   : > { %v4263_v45 = vadd.f32 %v14934_v44, %v4214_v15  ;;  %v11293_v44 = vld [vmem:[%s16224_s3 + $0x8cc] sm:$0xf]  ;;  %v11443_v15 = vld [vmem:[%s16225_s4 + $0x238] sm:$0xff] }
 0x71f   : > { %4350 = vst [vmem:[#allocation2 + $0x13c] sm:$0xf] %v4334_v38  ;;  %v11399_v38 = vld [vmem:[%s16225_s4 + $0xd8] sm:$0xff]  ;;  %6215 = vmatpush.bf16.msrb.mxu0 %v11443_v15  ;;  %v11418_v15 = vld [vmem:[%s16225_s4 + $0x170] sm:$0xff] }
 0x720   : > { %5974 = vmatpush.bf16.msrb.mxu3 %v11399_v38  ;;  %v11336_v38 = vld [vmem:[#allocation2 + $0x124] sm:$0xf] }
 0x722   : > { %v4308_v31 = vpop.f32.mrf.mxu3 }
 0x723   : > { %v4309_v42 = vadd.f32 %v4308_v31, %v4260_v58  ;;  %v15250_v62 = vpop.f32.mrf.mxu1  ;;  %v11398_v58 = vld [vmem:[%s16225_s4 + $0xd0] sm:$0xff]  ;;  %v16451_v31 = vld [vmem:[#allocation84_spill] sm:$0xff] }
 0x724   : > { %v15258_v27 = vpop.f32.mrf.mxu2  ;;  %v4216_v50 = vadd.f32 %v15080_v0, %v16451_v31  ;;  %5975 = vmatpush.bf16.msrb.mxu3 %v11398_v58  ;;  %v9909_v58 = vor.u32 %v11336_v38, %v9906_v13  ;;  %v9784_v31 = vld [vmem:[#allocation2 + $0x18] sm:$0xf]  ;;  %v11417_v38 = vld [vmem:[%s16225_s4 + $0x168] sm:$0xff] }
 0x725   : > { %v4335_v29 = vpack.c.bf16 %v4309_v42, %v4309_v42 }
 0x726   : > { %5895 = vmatmul.bf16.gmra.mxu1 %v9873_v8  ;;  %v4265_v9 = vadd.f32 %v14965_v55, %v4216_v50  ;;  %v9733_v8 = vor.u32 %v11293_v44, %v9730_v48  ;;  %v11396_v55 = vld [vmem:[%s16225_s4 + $0xc0] sm:$0xff]  ;;  %v9785_v50 = vor.u32 %v11307_v14, %v9784_v31  ;;  %v11441_v48 = vld [vmem:[%s16225_s4 + $0x228] sm:$0xff] }
 0x727   : > { %4351 = vst [vmem:[#allocation2 + $0x160] sm:$0xf] %v4335_v29  ;;  %9755 = vmatmul.msk.bf16.gmra.mxu3 %vm1046_vm0, %v9717_v60  ;;  %v11397_v60 = vld [vmem:[%s16225_s4 + $0xc8] sm:$0xff]  ;;  %v11440_v14 = vld [vmem:[%s16225_s4 + $0x220] sm:$0xff] }
 0x728   : > { %5976 = vmatpush.bf16.msrb.mxu3 %v11397_v60  ;;  %v11419_v60 = vld [vmem:[%s16225_s4 + $0x178] sm:$0xff] }
 0x729   : > { %5964 = vmatmul.bf16.gmra.mxu2 %v10021_v39  ;;  %6068 = vmatpush.bf16.msrb.mxu1 %v11419_v60 }
 0x72a   : > { %v4311_v35 = vpop.f32.mrf.mxu3 }
 0x72b   : > { %v4312_v22 = vadd.f32 %v4311_v35, %v4263_v45  ;;  %v15264_v51 = vpop.f32.mrf.mxu1  ;;  %v16452_v45 = vld [vmem:[#allocation86_spill] sm:$0xff] }
 0x72c   : > { %v15281_v61 = vpop.f32.mrf.mxu2  ;;  %v4219_v35 = vadd.f32 %v15105_v56, %v16452_v45  ;;  %5977 = vmatpush.bf16.msrb.mxu3 %v11396_v55  ;;  %v11297_v55 = vld [vmem:[%s16224_s3 + $0x8ec] sm:$0xf]  ;;  %v9746_v45 = vld [vmem:[%s16224_s3 + $0x8f8] sm:$0xf0] }
 0x72d   : > { %v4336_v42 = vpack.c.bf16 %v4312_v22, %v4312_v22  ;;  %6069 = vmatpush.bf16.msrb.mxu1 %v11418_v15 }
 0x72e   : > { %v4268_v56 = vadd.f32 %v14976_v25, %v4219_v35 }
 0x72f   : > { %4352 = vst [vmem:[#allocation2 + $0x184] sm:$0xf] %v4336_v42  ;;  %v11442_v42 = vld [vmem:[%s16225_s4 + $0x230] sm:$0xff] }
 0x730   : > { %6216 = vmatpush.bf16.msrb.mxu0 %v11442_v42  ;;  %v11316_v42 = vld [vmem:[#allocation2 + $0x80] sm:$0xf0] }
 0x731   : > { %6070 = vmatpush.bf16.msrb.mxu1 %v11417_v38 }
 0x732   : > { %v4313_v0 = vpop.f32.mrf.mxu3 }
 0x733   : > { %v4314_v29 = vadd.f32 %v4313_v0, %v4265_v9  ;;  %v15286_v39 = vpop.f32.mrf.mxu1 }
 0x734   : > { %v15304_v0 = vpop.f32.mrf.mxu2  ;;  %6217 = vmatpush.bf16.msrb.mxu0 %v11441_v48  ;;  %v16455_v48 = vld [vmem:[#allocation11_spill] sm:$0xff] }
 0x735   : > { %v4337_v22 = vpack.c.bf16 %v4314_v29, %v4314_v29  ;;  %16453 = vst [vmem:[#allocation28_spill] sm:$0xff] %v15304_v0  ;;  %v16454_v29 = vld [vmem:[#allocation10_spill] sm:$0xff] }
 0x736   : > { %5900 = vmatmul.bf16.gmra.mxu1 %v9909_v58  ;;  %v11439_v58 = vld [vmem:[%s16225_s4 + $0x218] sm:$0xff] }
 0x737   : > { %4353 = vst [vmem:[#allocation2 + $0x1a8] sm:$0xf] %v4337_v22  ;;  %9756 = vmatmul.msk.bf16.gmra.mxu3 %vm1046_vm0, %v9733_v8  ;;  %v4221_v8 = vadd.f32 %v15116_v1, %v16454_v29  ;;  %v9942_v22 = vld [vmem:[#allocation2 + $0x18c] sm:$0xf0]  ;;  %v9820_v29 = vld [vmem:[#allocation2 + $0x60] sm:$0xf] }
 0x738   : > { %6218 = vmatpush.bf16.msrb.mxu0 %v11440_v14  ;;  %v11438_v14 = vld [vmem:[%s16225_s4 + $0x210] sm:$0xff] }
 0x739   : > { %6125 = vmatmul.bf16.vlgmr.msrb.gmra.mxu2 %v9785_v50  ;;  %v4270_v1 = vadd.f32 %v15001_v59, %v4221_v8  ;;  %v9749_v50 = vor.u32 %v11297_v55, %v9746_v45  ;;  %v4224_v59 = vadd.f32 %v15135_v20, %v16455_v48  ;;  %v11415_v20 = vld [vmem:[%s16225_s4 + $0x158] sm:$0xff]  ;;  %v11437_v45 = vld [vmem:[%s16225_s4 + $0x208] sm:$0xff] }
 0x73a   : > { %v4316_v44 = vpop.f32.mrf.mxu3 }
 0x73b   : > { %v4317_v9 = vadd.f32 %v4316_v44, %v4268_v56  ;;  %v15306_v13 = vpop.f32.mrf.mxu1  ;;  %v11345_v56 = vld [vmem:[#allocation2 + $0x16c] sm:$0xf]  ;;  %v11416_v44 = vld [vmem:[%s16225_s4 + $0x160] sm:$0xff]  ;;  %v4273_v38 = vadd.f32 %v15009_v19, %v4224_v59 }
 0x73c   : > { %6219 = vmatpush.bf16.msrb.mxu0 %v11439_v58  ;;  %v9945_v15 = vor.u32 %v11345_v56, %v9942_v22  ;;  %v15336_v8 = vpop.f32.mrf.mxu2  ;;  %6071 = vmatpush.bf16.msrb.mxu1 %v11416_v44  ;;  %v11414_v22 = vld [vmem:[%s16225_s4 + $0x150] sm:$0xff]  ;;  %v15354_v58 = vpop.f32.mrf.mxu0  ;;  %v11413_v56 = vld [vmem:[%s16225_s4 + $0x148] sm:$0xff] }
 0x73d   : > { %v4338_v25 = vpack.c.bf16 %v4317_v9, %v4317_v9 }
 0x73f   : > { %4354 = vst [vmem:[#allocation2 + $0x1cc] sm:$0xf] %v4338_v25  ;;  %v9821_v25 = vor.u32 %v11316_v42, %v9820_v29  ;;  %v11436_v42 = vld [vmem:[%s16225_s4 + $0x200] sm:$0xff]  ;;  %v11325_v29 = vld [vmem:[#allocation2 + $0xc8] sm:$0xf0] }
 0x740   : > { %6220 = vmatpush.bf16.msrb.mxu0 %v11438_v14  ;;  %6072 = vmatpush.bf16.msrb.mxu1 %v11415_v20  ;;  %v11354_v14 = vld [vmem:[#allocation2 + $0x1b4] sm:$0xf]  ;;  %v11301_v20 = vld [vmem:[#allocation2 + $0xc] sm:$0xf] }
 0x742   : > { %v4318_v35 = vpop.f32.mrf.mxu3 }
 0x743   : > { %v4319_v31 = vadd.f32 %v4318_v35, %v4270_v1  ;;  %v15329_v60 = vpop.f32.mrf.mxu1 }
 0x744   : > { %6221 = vmatpush.bf16.msrb.mxu0 %v11437_v45  ;;  %6073 = vmatpush.bf16.msrb.mxu1 %v11414_v22  ;;  %v15364_v44 = vpop.f32.mrf.mxu2 }
 0x745   : > { %v4339_v9 = vpack.c.bf16 %v4319_v31, %v4319_v31  ;;  %v16456_v31 = vld [vmem:[#allocation12_spill] sm:$0xff] }
 0x746   : > { %5905 = vmatmul.bf16.gmra.mxu1 %v9945_v15  ;;  %v9770_v15 = vld [vmem:[#allocation2 + $0x2c] sm:$0xf0] }
 0x747   : > { %4355 = vst [vmem:[#allocation2 + $0x1f0] sm:$0xf] %v4339_v9  ;;  %9757 = vmatmul.msk.bf16.gmra.mxu3 %vm1046_vm0, %v9749_v50  ;;  %v4226_v50 = vadd.f32 %v15143_v26, %v16456_v31  ;;  %v9978_v9 = vld [vmem:[#allocation2 + $0x1d4] sm:$0xf0]  ;;  %v9856_v31 = vld [vmem:[#allocation2 + $0xa8] sm:$0xf] }
 0x748   : > { %6222 = vmatpush.bf16.msrb.mxu0 %v11436_v42  ;;  %6074 = vmatpush.bf16.msrb.mxu1 %v11413_v56  ;;  %v9981_v22 = vor.u32 %v11354_v14, %v9978_v9 }
 0x749   : > { %6130 = vmatmul.bf16.gmra.mxu2 %v9821_v25  ;;  %v4275_v48 = vadd.f32 %v15028_v7, %v4226_v50  ;;  %v9773_v7 = vor.u32 %v11301_v20, %v9770_v15  ;;  %v9857_v50 = vor.u32 %v11325_v29, %v9856_v31  ;;  %v10014_v20 = vld [vmem:[#allocation2 + $0x21c] sm:$0xf0]  ;;  %v16460_v31 = vld [vmem:[#allocation15_spill] sm:$0xff] }
 0x74a   : > { %v4321_v55 = vpop.f32.mrf.mxu3 }
 0x74b   : > { %v4322_v1 = vadd.f32 %v4321_v55, %v4273_v38  ;;  %v15349_v35 = vpop.f32.mrf.mxu1  ;;  %v11412_v38 = vld [vmem:[%s16225_s4 + $0x140] sm:$0xff]  ;;  %v16457_v55 = vld [vmem:[#allocation13_spill] sm:$0xff] }
 0x74c   : > { %v4626_v45 = vadd.f32 %v15156_v54, %v16457_v55  ;;  %6075 = vmatpush.bf16.msrb.mxu1 %v11412_v38  ;;  %v15377_v56 = vpop.f32.mrf.mxu2  ;;  %v16459_v54 = vld [vmem:[#allocation14_spill] sm:$0xff]  ;;  %v9806_v38 = vld [vmem:[#allocation2 + $0x74] sm:$0xf0] }
 0x74d   : > { %v4340_v19 = vpack.c.bf16 %v4322_v1, %v4322_v1  ;;  %v4628_v9 = vadd.f32 %v15167_v52, %v16459_v54  ;;  %v4631_v52 = vadd.f32 %v15186_v57, %v16460_v31  ;;  %v9842_v31 = vld [vmem:[#allocation2 + $0xbc] sm:$0xf0] }
 0x74e   : > { %v4675_v42 = vadd.f32 %v15039_v18, %v4626_v45  ;;  %v11334_v18 = vld [vmem:[#allocation2 + $0x110] sm:$0xf0] }
 0x74f   : > { %4356 = vst [vmem:[#allocation2 + $0x214] sm:$0xf] %v4340_v19  ;;  %v15374_v19 = vpop.f32.mrf.mxu0  ;;  %v4677_v29 = vadd.f32 %v15064_v41, %v4628_v9  ;;  %v4680_v41 = vadd.f32 %v15078_v16, %v4631_v52 }
 0x750   : > { %16458 = vst [vmem:[#allocation78_spill] sm:$0xff] %v15374_v19  ;;  %v16461_v19 = vld [vmem:[#allocation16_spill] sm:$0xff] }
 0x751   : > { %v4633_v57 = vadd.f32 %v15200_v49, %v16461_v19 }
 0x752   : > { %v4323_v59 = vpop.f32.mrf.mxu3 }
 0x753   : > { %v4324_v26 = vadd.f32 %v4323_v59, %v4275_v48  ;;  %v15367_v25 = vpop.f32.mrf.mxu1 }
 0x754   : > { %v15386_v45 = vpop.f32.mrf.mxu2 }
 0x755   : > { %v4341_v1 = vpack.c.bf16 %v4324_v26, %v4324_v26 }
 0x756   : > { %5910 = vmatmul.bf16.gmra.mxu1 %v9981_v22  ;;  %v11363_v22 = vld [vmem:[#allocation2 + $0x1fc] sm:$0xf] }
 0x757   : > { %4357 = vst [vmem:[#allocation2 + $0x238] sm:$0xf] %v4341_v1  ;;  %5978 = vmatmul.bf16.vlgmr.msrb.gmra.mxu3 %v9773_v7  ;;  %v15383_v26 = vpop.f32.mrf.mxu0  ;;  %v11310_v7 = vld [vmem:[#allocation2 + $0x54] sm:$0xf] }
 0x759   : > { %6135 = vmatmul.bf16.gmra.mxu2 %v9857_v50 }
 0x75a   : > { %v4723_v48 = vpop.f32.mrf.mxu3 }
 0x75b   : > { %v4724_v59 = vadd.f32 %v4723_v48, %v4675_v42  ;;  %v15379_v0 = vpop.f32.mrf.mxu1  ;;  %v10017_v42 = vor.u32 %v11363_v22, %v10014_v20  ;;  %v9809_v48 = vor.u32 %v11310_v7, %v9806_v38  ;;  %v15404_v22 = vld [vmem:[%s16226_s5] ss:$0 sm:$0xff]  ;;  %v4682_v7 = vadd.f32 %v15103_v37, %v4633_v57  ;;  %v9928_v57 = vld [vmem:[#allocation2 + $0x138] sm:$0xf] }
 0x75c   : > { %v15399_v20 = vpop.f32.mrf.mxu2  ;;  %v5833_v49 = vadd.f32 %v15404_v22, %v14404_v17 }
 0x75d   : > { %v4763_v15 = vpack.c.bf16 %v4724_v59, %v4724_v59  ;;  %v9892_v59 = vld [vmem:[#allocation2 + $0xf0] sm:$0xf] }
 0x75e   : > { %v9893_v54 = vor.u32 %v11334_v18, %v9892_v59 }
 0x75f   : > { %4779 = vst [vmem:[#allocation2 + $0x20] sm:$0xf] %v4763_v15  ;;  %v15393_v15 = vpop.f32.mrf.mxu0 }
 0x762   : > { %v4725_v14 = vpop.f32.mrf.mxu3 }
 0x763   : > { %v4726_v55 = vadd.f32 %v4725_v14, %v4677_v29  ;;  %v15388_v1 = vpop.f32.mrf.mxu1 }
 0x765   : > { %v4764_v50 = vpack.c.bf16 %v4726_v55, %v4726_v55 }
 0x766   : > { %5915 = vmatmul.bf16.gmra.mxu1 %v10017_v42  ;;  %v9792_v38 = vld [vmem:[#allocation2 + $0x20] sm:$0xf]  ;;  %v11319_v42 = vld [vmem:[#allocation2 + $0x9c] sm:$0xf] }
 0x767   : > { %4780 = vst [vmem:[#allocation2 + $0x44] sm:$0xf] %v4764_v50  ;;  %5983 = vmatmul.bf16.gmra.mxu3 %v9809_v48  ;;  %v9778_v50 = vld [vmem:[#allocation2 + $0x34] sm:$0xf0]  ;;  %v11343_v48 = vld [vmem:[#allocation2 + $0x158] sm:$0xf0] }
 0x769   : > { %6140 = vmatmul.bf16.gmra.mxu2 %v9893_v54  ;;  %v9845_v54 = vor.u32 %v11319_v42, %v9842_v31 }
 0x76a   : > { %v4728_v9 = vpop.f32.mrf.mxu3 }
 0x76b   : > { %v4729_v29 = vadd.f32 %v4728_v9, %v4680_v41  ;;  %v15395_v14 = vpop.f32.mrf.mxu1  ;;  %v11302_v41 = vld [vmem:[#allocation2 + $0x14] sm:$0xf]  ;;  %v15409_v9 = vpop.f32.mrf.mxu0 }
 0x76c   : > { %v9781_v37 = vor.u32 %v11302_v41, %v9778_v50  ;;  %v16463_v50 = vld [vmem:[#allocation19_spill] sm:$0xff] }
 0x76d   : > { %v4765_v55 = vpack.c.bf16 %v4729_v29, %v4729_v29  ;;  %v16462_v29 = vld [vmem:[#allocation17_spill] sm:$0xff]  ;;  %v4638_v42 = vadd.f32 %v15231_v24, %v16463_v50  ;;  %v5838_v24 = vadd.f32 %v15404_v22, %v14447_v12 }
 0x76e   : > { %v11308_v18 = vld [vmem:[#allocation2 + $0x40] sm:$0xf0] }
 0x76f   : > { %4781 = vst [vmem:[#allocation2 + $0x68] sm:$0xf] %v4765_v55  ;;  %v9793_v16 = vor.u32 %v11308_v18, %v9792_v38  ;;  %v4636_v55 = vadd.f32 %v15219_v28, %v16462_v29  ;;  %v5835_v28 = vadd.f32 %v15404_v22, %v14437_v53  ;;  %v9878_v53 = vld [vmem:[#allocation2 + $0x104] sm:$0xf0] }
 0x771   : > { %6223 = vmatmul.bf16.vlgmr.msrb.gmra.mxu0 %v9793_v16  ;;  %v9929_v16 = vor.u32 %v11343_v48, %v9928_v57  ;;  %v4685_v31 = vadd.f32 %v15114_v11, %v4636_v55  ;;  %v4687_v11 = vadd.f32 %v15133_v5, %v4638_v42  ;;  %v9964_v42 = vld [vmem:[#allocation2 + $0x180] sm:$0xf] }
 0x772   : > { %v4730_v52 = vpop.f32.mrf.mxu3 }
 0x773   : > { %v4731_v19 = vadd.f32 %v4730_v52, %v4682_v7  ;;  %v5881_v59 = vpop.f32.mrf.mxu1  ;;  %v15416_v7 = vpop.f32.mrf.mxu2 }
 0x774   : > { %v5882_v18 = vadd.f32 %v5881_v59, %v5833_v49 }
 0x775   : > { %v4766_v38 = vpack.c.bf16 %v4731_v19, %v4731_v19 }
 0x776   : > { %6076 = vmatmul.bf16.vlgmr.msrb.gmra.mxu1 %v9781_v37  ;;  %v15414_v17 = vadd.f32 %v15336_v8, %v5882_v18  ;;  %v15423_v8 = vpop.f32.mrf.mxu0  ;;  %v9814_v37 = vld [vmem:[#allocation2 + $0x7c] sm:$0xf0] }
 0x777   : > { %4782 = vst [vmem:[#allocation2 + $0x8c] sm:$0xf] %v4766_v38  ;;  %5988 = vmatmul.bf16.gmra.mxu3 %v9845_v54  ;;  %v9828_v54 = vld [vmem:[#allocation2 + $0x68] sm:$0xf] }
 0x779   : > { %6145 = vmatmul.bf16.gmra.mxu2 %v9929_v16  ;;  %v11328_v16 = vld [vmem:[#allocation2 + $0xe4] sm:$0xf] }
 0x77a   : > { %v4733_v52 = vpop.f32.mrf.mxu3 }
 0x77b   : > { %v4734_v19 = vadd.f32 %v4733_v52, %v4685_v31  ;;  %v5883_v49 = vpop.f32.mrf.mxu1  ;;  %v15429_v55 = vpop.f32.mrf.mxu2  ;;  %v11352_v31 = vld [vmem:[#allocation2 + $0x1a0] sm:$0xf0] }
 0x77c   : > { %v5884_v59 = vadd.f32 %v5883_v49, %v5835_v28  ;;  %v9881_v28 = vor.u32 %v11328_v16, %v9878_v53  ;;  %v4643_v53 = vadd.f32 %v15264_v51, %v14176_v36  ;;  %v11337_v51 = vld [vmem:[#allocation2 + $0x12c] sm:$0xf] }
 0x77d   : > { %v4767_v48 = vpack.c.bf16 %v4734_v19, %v4734_v19  ;;  %v11311_v19 = vld [vmem:[#allocation2 + $0x5c] sm:$0xf] }
 0x77e   : > { %v11317_v41 = vld [vmem:[#allocation2 + $0x88] sm:$0xf0]  ;;  %v15426_v38 = vadd.f32 %v15364_v44, %v5884_v59  ;;  %v4641_v44 = vadd.f32 %v15250_v62, %v14146_v32  ;;  %v9817_v5 = vor.u32 %v11311_v19, %v9814_v37  ;;  %v15438_v12 = vpop.f32.mrf.mxu0  ;;  %v5840_v32 = vadd.f32 %v15404_v22, %v14475_v30  ;;  %v9914_v30 = vld [vmem:[#allocation2 + $0x14c] sm:$0xf0] }
 0x77f   : > { %4783 = vst [vmem:[#allocation2 + $0xb0] sm:$0xf] %v4767_v48  ;;  %v9829_v29 = vor.u32 %v11317_v41, %v9828_v54  ;;  %v9965_v48 = vor.u32 %v11352_v31, %v9964_v42 }
 0x780   : > { %v4690_v54 = vadd.f32 %v15141_v6, %v4641_v44  ;;  %v4692_v6 = vadd.f32 %v15154_v43, %v4643_v53  ;;  %v11361_v44 = vld [vmem:[#allocation2 + $0x1e8] sm:$0xf0] }
 0x781   : > { %6228 = vmatmul.bf16.gmra.mxu0 %v9829_v29 }
 0x782   : > { %v4735_v18 = vpop.f32.mrf.mxu3 }
 0x783   : > { %v4736_v57 = vadd.f32 %v4735_v18, %v4687_v11  ;;  %v5886_v52 = vpop.f32.mrf.mxu1  ;;  %v15443_v29 = vpop.f32.mrf.mxu2 }
 0x784   : > { %v5887_v50 = vadd.f32 %v5886_v52, %v5838_v24  ;;  %v9850_v52 = vld [vmem:[#allocation2 + $0xc4] sm:$0xf0] }
 0x785   : > { %v4768_v49 = vpack.c.bf16 %v4736_v57, %v4736_v57 }
 0x786   : > { %6081 = vmatmul.bf16.gmra.mxu1 %v9817_v5  ;;  %v15436_v59 = vadd.f32 %v15377_v56, %v5887_v50  ;;  %v9864_v56 = vld [vmem:[#allocation2 + $0xb0] sm:$0xf]  ;;  %v15453_v19 = vpop.f32.mrf.mxu0  ;;  %v9917_v50 = vor.u32 %v11337_v51, %v9914_v30  ;;  %v11320_v5 = vld [vmem:[#allocation2 + $0xa4] sm:$0xf]  ;;  %v5848_v51 = vadd.f32 %v15404_v22, %v14546_v2 }
 0x787   : > { %4784 = vst [vmem:[#allocation2 + $0xd4] sm:$0xf] %v4768_v49  ;;  %5993 = vmatmul.bf16.gmra.mxu3 %v9881_v28  ;;  %v5843_v28 = vadd.f32 %v15404_v22, %v14503_v46  ;;  %v9853_v43 = vor.u32 %v11320_v5, %v9850_v52  ;;  %v11435_v46 = vld [vmem:[%s16225_s4 + $0x1f8] sm:$0xff]  ;;  %v11432_v2 = vld [vmem:[%s16225_s4 + $0x1e0] sm:$0xff] }
 0x788   : > { %6166 = vmatpush.bf16.msra.mxu3 %v11435_v46  ;;  %v10036_v46 = vld [vmem:[#allocation2 + $0x210] sm:$0xf] }
 0x789   : > { %6150 = vmatmul.bf16.gmra.mxu2 %v9965_v48 }
 0x78a   : > { %v4738_v41 = vpop.f32.mrf.mxu3 }
 0x78b   : > { %v4739_v62 = vadd.f32 %v4738_v41, %v4690_v54  ;;  %v5888_v11 = vpop.f32.mrf.mxu1  ;;  %v10000_v54 = vld [vmem:[#allocation2 + $0x1c8] sm:$0xf]  ;;  %v15457_v41 = vpop.f32.mrf.mxu2 }
 0x78c   : > { %v5889_v37 = vadd.f32 %v5888_v11, %v5840_v32  ;;  %v10001_v32 = vor.u32 %v11361_v44, %v10000_v54  ;;  %v5845_v11 = vadd.f32 %v15404_v22, %v14519_v3  ;;  %v11433_v3 = vld [vmem:[%s16225_s4 + $0x1e8] sm:$0xff] }
 0x78d   : > { %v4769_v18 = vpack.c.bf16 %v4739_v62, %v4739_v62 }
 0x78e   : > { %v11326_v24 = vld [vmem:[#allocation2 + $0xd0] sm:$0xf0]  ;;  %v15448_v16 = vadd.f32 %v15386_v45, %v5889_v37  ;;  %v4646_v45 = vadd.f32 %v15286_v39, %v14205_v47  ;;  %v15468_v53 = vpop.f32.mrf.mxu0 }
 0x78f   : > { %4785 = vst [vmem:[#allocation2 + $0xf8] sm:$0xf] %v4769_v18  ;;  %v9865_v57 = vor.u32 %v11326_v24, %v9864_v56  ;;  %v4648_v56 = vadd.f32 %v15306_v13, %v14243_v21  ;;  %v9950_v13 = vld [vmem:[#allocation2 + $0x194] sm:$0xf0] }
 0x790   : > { %v4695_v47 = vadd.f32 %v15165_v63, %v4646_v45 }
 0x791   : > { %6233 = vmatmul.bf16.gmra.mxu0 %v9865_v57  ;;  %v4697_v21 = vadd.f32 %v15184_v34, %v4648_v56  ;;  %v5850_v56 = vadd.f32 %v15404_v22, %v14571_v10 }
 0x792   : > { %v4740_v31 = vpop.f32.mrf.mxu3 }
 0x793   : > { %v4741_v36 = vadd.f32 %v4740_v31, %v4692_v6  ;;  %v5891_v49 = vpop.f32.mrf.mxu1  ;;  %v15481_v52 = vpop.f32.mrf.mxu2 }
 0x794   : > { %v5892_v48 = vadd.f32 %v5891_v49, %v5843_v28  ;;  %v11346_v49 = vld [vmem:[#allocation2 + $0x174] sm:$0xf] }
 0x795   : > { %v4770_v42 = vpack.c.bf16 %v4741_v36, %v4741_v36  ;;  %v9886_v36 = vld [vmem:[#allocation2 + $0x10c] sm:$0xf0]  ;;  %v9953_v45 = vor.u32 %v11346_v49, %v9950_v13  ;;  %v5853_v49 = vadd.f32 %v15404_v22, %v15354_v58 }
 0x796   : > { %6086 = vmatmul.bf16.gmra.mxu1 %v9853_v43  ;;  %v15463_v62 = vadd.f32 %v15399_v20, %v5892_v48  ;;  %v11434_v20 = vld [vmem:[%s16225_s4 + $0x1f0] sm:$0xff]  ;;  %v9900_v6 = vld [vmem:[#allocation2 + $0xf8] sm:$0xf]  ;;  %v16464_v48 = vld [vmem:[#allocation20_spill] sm:$0xff] }
 0x797   : > { %4786 = vst [vmem:[#allocation2 + $0x11c] sm:$0xf] %v4770_v42  ;;  %5998 = vmatmul.bf16.gmra.mxu3 %v9917_v50  ;;  %v11370_v50 = vld [vmem:[#allocation2 + $0x230] sm:$0xf0]  ;;  %v11329_v42 = vld [vmem:[#allocation2 + $0xec] sm:$0xf]  ;;  %v4651_v43 = vadd.f32 %v15329_v60, %v16464_v48 }
 0x798   : > { %6167 = vmatpush.bf16.msra.mxu3 %v11434_v20  ;;  %v11431_v60 = vld [vmem:[%s16225_s4 + $0x1d8] sm:$0xff]  ;;  %v16465_v20 = vld [vmem:[#allocation21_spill] sm:$0xff]  ;;  %v11338_v48 = vld [vmem:[#allocation2 + $0x134] sm:$0xf] }
 0x799   : > { %6155 = vmatmul.bf16.gmra.mxu2 %v10001_v32  ;;  %v9889_v32 = vor.u32 %v11329_v42, %v9886_v36  ;;  %v9986_v36 = vld [vmem:[#allocation2 + $0x1dc] sm:$0xf0] }
 0x79a   : > { %v4743_v39 = vpop.f32.mrf.mxu3 }
 0x79b   : > { %v4744_v18 = vadd.f32 %v4743_v39, %v4695_v47  ;;  %v5893_v37 = vpop.f32.mrf.mxu1  ;;  %v10037_v47 = vor.u32 %v11370_v50, %v10036_v46  ;;  %v11428_v46 = vld [vmem:[%s16225_s4 + $0x1c0] sm:$0xff] }
 0x79c   : > { %v5894_v57 = vadd.f32 %v5893_v37, %v5845_v11  ;;  %6168 = vmatpush.bf16.msra.mxu3 %v11433_v3  ;;  %v4700_v11 = vadd.f32 %v15198_v33, %v4651_v43  ;;  %v16466_v43 = vld [vmem:[#allocation24_spill] sm:$0xff] }
 0x79d   : > { %v4771_v24 = vpack.c.bf16 %v4744_v18, %v4744_v18  ;;  %v15500_v18 = vpop.f32.mrf.mxu2 }
 0x79e   : > { %v11335_v63 = vld [vmem:[#allocation2 + $0x118] sm:$0xf0]  ;;  %v15479_v31 = vadd.f32 %v15416_v7, %v5894_v57  ;;  %v15486_v7 = vpop.f32.mrf.mxu0 }
 0x79f   : > { %4787 = vst [vmem:[#allocation2 + $0x140] sm:$0xf] %v4771_v24  ;;  %v9901_v30 = vor.u32 %v11335_v63, %v9900_v6 }
 0x7a0   : > { %6169 = vmatpush.bf16.msra.mxu3 %v11432_v2 }
 0x7a1   : > { %6238 = vmatmul.bf16.gmra.mxu0 %v9901_v30  ;;  %v11430_v30 = vld [vmem:[%s16225_s4 + $0x1d0] sm:$0xff] }
 0x7a2   : > { %v4745_v28 = vpop.f32.mrf.mxu3 }
 0x7a3   : > { %v4746_v44 = vadd.f32 %v4745_v28, %v4697_v21  ;;  %v5896_v5 = vpop.f32.mrf.mxu1 }
 0x7a4   : > { %v5897_v34 = vadd.f32 %v5896_v5, %v5848_v51  ;;  %6170 = vmatpush.bf16.msra.mxu3 %v11431_v60  ;;  %v11355_v5 = vld [vmem:[#allocation2 + $0x1bc] sm:$0xf] }
 0x7a5   : > { %v4772_v54 = vpack.c.bf16 %v4746_v44, %v4746_v44  ;;  %v9922_v44 = vld [vmem:[#allocation2 + $0x154] sm:$0xf0]  ;;  %v9989_v42 = vor.u32 %v11355_v5, %v9986_v36 }
 0x7a6   : > { %6091 = vmatmul.bf16.gmra.mxu1 %v9889_v32  ;;  %v15494_v39 = vadd.f32 %v15429_v55, %v5897_v34  ;;  %v4653_v55 = vadd.f32 %v15349_v35, %v16465_v20  ;;  %v9936_v3 = vld [vmem:[#allocation2 + $0x140] sm:$0xf]  ;;  %v15509_v21 = vpop.f32.mrf.mxu0  ;;  %v11429_v35 = vld [vmem:[%s16225_s4 + $0x1c8] sm:$0xff] }
 0x7a7   : > { %4788 = vst [vmem:[#allocation2 + $0x164] sm:$0xf] %v4772_v54  ;;  %6003 = vmatmul.bf16.gmra.mxu3 %v9953_v45  ;;  %v15520_v45 = vpop.f32.mrf.mxu2  ;;  %v4656_v54 = vadd.f32 %v15367_v25, %v16466_v43 }
 0x7a8   : > { %6171 = vmatpush.bf16.msra.mxu3 %v11430_v30  ;;  %v4702_v28 = vadd.f32 %v15217_v4, %v4653_v55  ;;  %v9925_v4 = vor.u32 %v11338_v48, %v9922_v44  ;;  %v9958_v30 = vld [vmem:[#allocation2 + $0x19c] sm:$0xf0] }
 0x7a9   : > { %6160 = vmatmul.bf16.gmra.mxu2 %v10037_v47  ;;  %v4705_v47 = vadd.f32 %v15238_v23, %v4656_v54  ;;  %v5858_v23 = vadd.f32 %v15404_v22, %v15383_v26 }
 0x7aa   : > { %v4748_v37 = vpop.f32.mrf.mxu3 }
 0x7ab   : > { %v4749_v24 = vadd.f32 %v4748_v37, %v4700_v11  ;;  %v5898_v57 = vpop.f32.mrf.mxu1  ;;  %v4658_v37 = vadd.f32 %v15379_v0, %v14332_v40 }
 0x7ac   : > { %v5899_v63 = vadd.f32 %v5898_v57, %v5850_v56  ;;  %6172 = vmatpush.bf16.msra.mxu3 %v11429_v35  ;;  %v11347_v35 = vld [vmem:[#allocation2 + $0x17c] sm:$0xf] }
 0x7ad   : > { %v4773_v6 = vpack.c.bf16 %v4749_v24, %v4749_v24 }
 0x7ae   : > { %v11344_v33 = vld [vmem:[#allocation2 + $0x160] sm:$0xf0]  ;;  %v15512_v10 = vadd.f32 %v15443_v29, %v5899_v63  ;;  %v15530_v2 = vpop.f32.mrf.mxu0 }
 0x7af   : > { %4789 = vst [vmem:[#allocation2 + $0x188] sm:$0xf] %v4773_v6  ;;  %v9937_v13 = vor.u32 %v11344_v33, %v9936_v3  ;;  %v5960_v24 = vpop.f32.mrf.mxu2  ;;  %v10022_v6 = vld [vmem:[#allocation2 + $0x224] sm:$0xf0] }
 0x7b0   : > { %6173 = vmatpush.bf16.msra.mxu3 %v11428_v46 }
 0x7b1   : > { %6243 = vmatmul.bf16.gmra.mxu0 %v9937_v13  ;;  %v11364_v13 = vld [vmem:[#allocation2 + $0x204] sm:$0xf] }
 0x7b2   : > { %v4750_v51 = vpop.f32.mrf.mxu3  ;;  %v10025_v0 = vor.u32 %v11364_v13, %v10022_v6 }
 0x7b3   : > { %v4751_v50 = vadd.f32 %v4750_v51, %v4702_v28  ;;  %v5901_v29 = vpop.f32.mrf.mxu1  ;;  %v16467_v28 = vld [vmem:[#allocation26_spill] sm:$0xff] }
 0x7b4   : > { %v5902_v32 = vadd.f32 %v5901_v29, %v5853_v49  ;;  %v4661_v36 = vadd.f32 %v15388_v1, %v16467_v28  ;;  %v9961_v49 = vor.u32 %v11347_v35, %v9958_v30  ;;  %v16468_v1 = vld [vmem:[#allocation76_spill] sm:$0xff] }
 0x7b5   : > { %v4774_v34 = vpack.c.bf16 %v4751_v50, %v4751_v50  ;;  %v4663_v43 = vadd.f32 %v15395_v14, %v16468_v1 }
 0x7b6   : > { %6096 = vmatmul.bf16.gmra.mxu1 %v9925_v4  ;;  %v15528_v58 = vadd.f32 %v15457_v41, %v5902_v32  ;;  %v9972_v57 = vld [vmem:[#allocation2 + $0x188] sm:$0xf]  ;;  %v4707_v41 = vadd.f32 %v15258_v27, %v4658_v37  ;;  %v15540_v3 = vpop.f32.mrf.mxu0  ;;  %v4710_v50 = vadd.f32 %v15281_v61, %v4661_v36  ;;  %v5863_v37 = vadd.f32 %v15404_v22, %v15409_v9 }
 0x7b7   : > { %4790 = vst [vmem:[#allocation2 + $0x1ac] sm:$0xf] %v4774_v34  ;;  %6008 = vmatmul.bf16.gmra.mxu3 %v9989_v42  ;;  %v15547_v26 = vpop.f32.mrf.mxu2  ;;  %v9994_v61 = vld [vmem:[#allocation2 + $0x1e4] sm:$0xf0] }
 0x7ba   : > { %v4753_v60 = vpop.f32.mrf.mxu3 }
 0x7bb   : > { %v4754_v25 = vadd.f32 %v4753_v60, %v4705_v47  ;;  %v15533_v11 = vpop.f32.mrf.mxu1 }
 0x7bd   : > { %v4775_v56 = vpack.c.bf16 %v4754_v25, %v4754_v25  ;;  %v9786_v25 = vld [vmem:[#allocation2 + $0x3c] sm:$0xf0] }
 0x7be   : > { %v11353_v20 = vld [vmem:[#allocation2 + $0x1a8] sm:$0xf0]  ;;  %v15552_v48 = vpop.f32.mrf.mxu0 }
 0x7bf   : > { %4791 = vst [vmem:[#allocation2 + $0x1d0] sm:$0xf] %v4775_v56  ;;  %v9973_v55 = vor.u32 %v11353_v20, %v9972_v57  ;;  %v5965_v47 = vpop.f32.mrf.mxu2  ;;  %v11356_v20 = vld [vmem:[#allocation2 + $0x1c4] sm:$0xf] }
 0x7c0   : > { %v9997_v6 = vor.u32 %v11356_v20, %v9994_v61  ;;  %v9858_v61 = vld [vmem:[#allocation2 + $0xcc] sm:$0xf0] }
 0x7c1   : > { %6248 = vmatmul.bf16.gmra.mxu0 %v9973_v55  ;;  %v11303_v55 = vld [vmem:[#allocation2 + $0x1c] sm:$0xf] }
 0x7c2   : > { %v4755_v63 = vpop.f32.mrf.mxu3 }
 0x7c3   : > { %v4756_v33 = vadd.f32 %v4755_v63, %v4707_v41  ;;  %v5906_v40 = vpop.f32.mrf.mxu1  ;;  %v9789_v63 = vor.u32 %v11303_v55, %v9786_v25 }
 0x7c4   : > { %v5907_v44 = vadd.f32 %v5906_v40, %v5858_v23 }
 0x7c5   : > { %v4776_v51 = vpack.c.bf16 %v4756_v33, %v4756_v33 }
 0x7c6   : > { %6101 = vmatmul.bf16.gmra.mxu1 %v9961_v49  ;;  %v15545_v27 = vadd.f32 %v15500_v18, %v5907_v44  ;;  %v10008_v34 = vld [vmem:[#allocation2 + $0x1d0] sm:$0xf]  ;;  %v16469_v18 = vld [vmem:[#allocation28_spill] sm:$0xff]  ;;  %v15559_v30 = vpop.f32.mrf.mxu0  ;;  %v9822_v49 = vld [vmem:[#allocation2 + $0x84] sm:$0xf0] }
 0x7c7   : > { %4792 = vst [vmem:[#allocation2 + $0x1f4] sm:$0xf] %v4776_v51  ;;  %6013 = vmatmul.bf16.gmra.mxu3 %v10025_v0  ;;  %v4712_v46 = vadd.f32 %v16469_v18, %v4663_v43  ;;  %v15564_v40 = vpop.f32.mrf.mxu2  ;;  %v10030_v44 = vld [vmem:[#allocation2 + $0x22c] sm:$0xf0] }
 0x7ca   : > { %v4758_v5 = vpop.f32.mrf.mxu3 }
 0x7cb   : > { %v4759_v29 = vadd.f32 %v4758_v5, %v4710_v50  ;;  %v15550_v42 = vpop.f32.mrf.mxu1  ;;  %v11365_v5 = vld [vmem:[#allocation2 + $0x20c] sm:$0xf] }
 0x7cc   : > { %v10033_v43 = vor.u32 %v11365_v5, %v10030_v44 }
 0x7cd   : > { %v4777_v54 = vpack.c.bf16 %v4759_v29, %v4759_v29  ;;  %v11312_v29 = vld [vmem:[#allocation2 + $0x64] sm:$0xf] }
 0x7ce   : > { %v11362_v32 = vld [vmem:[#allocation2 + $0x1f0] sm:$0xf0]  ;;  %v15568_v36 = vpop.f32.mrf.mxu0 }
 0x7cf   : > { %4793 = vst [vmem:[#allocation2 + $0x218] sm:$0xf] %v4777_v54  ;;  %v10009_v4 = vor.u32 %v11362_v32, %v10008_v34  ;;  %v9825_v54 = vor.u32 %v11312_v29, %v9822_v49  ;;  %v6126_v34 = vpop.f32.mrf.mxu2 }
 0x7d1   : > { %6253 = vmatmul.bf16.gmra.mxu0 %v10009_v4 }
 0x7d2   : > { %v4760_v60 = vpop.f32.mrf.mxu3 }
 0x7d3   : > { %v4761_v56 = vadd.f32 %v4760_v60, %v4712_v46  ;;  %v5911_v57 = vpop.f32.mrf.mxu1 }
 0x7d4   : > { %v5912_v41 = vadd.f32 %v5911_v57, %v5863_v37  ;;  %v11321_v57 = vld [vmem:[#allocation2 + $0xac] sm:$0xf] }
 0x7d5   : > { %v4778_v14 = vpack.c.bf16 %v4761_v56, %v4761_v56  ;;  %v9861_v20 = vor.u32 %v11321_v57, %v9858_v61 }
 0x7d6   : > { %6106 = vmatmul.bf16.gmra.mxu1 %v9997_v6  ;;  %v15561_v23 = vadd.f32 %v5960_v24, %v5912_v41  ;;  %v10044_v0 = vld [vmem:[#allocation2 + $0x218] sm:$0xf]  ;;  %v5868_v24 = vadd.f32 %v15404_v22, %v15438_v12  ;;  %v15580_v12 = vpop.f32.mrf.mxu0 }
 0x7d7   : > { %4794 = vst [vmem:[#allocation2 + $0x23c] sm:$0xf] %v4778_v14  ;;  %6174 = vmatmul.bf16.vlgmr.msra.gmra.mxu3 %v9789_v63 }
 0x7da   : > { %v5979_v33 = vpop.f32.mrf.mxu3 }
 0x7db   : > { %v5980_v13 = vadd.f32 %v5979_v33, %v15414_v17  ;;  %v15566_v9 = vpop.f32.mrf.mxu1 }
 0x7dd   : > { %v6029_v37 = vadd.f32 %v15468_v53, %v5980_v13 }
 0x7de   : > { %v11371_v35 = vld [vmem:[#allocation2 + $0x238] sm:$0xf0] }
 0x7df   : > { %v10045_v28 = vor.u32 %v11371_v35, %v10044_v0 }
 0x7e1   : > { %6258 = vmatmul.bf16.gmra.mxu0 %v10045_v28 }
 0x7e2   : > { %v5981_v51 = vpop.f32.mrf.mxu3 }
 0x7e3   : > { %v15573_v50 = vadd.f32 %v5981_v51, %v15426_v38  ;;  %v5916_v17 = vpop.f32.mrf.mxu1  ;;  %v15582_v38 = vpop.f32.mrf.mxu2  ;;  %v11330_v51 = vld [vmem:[#allocation2 + $0xf4] sm:$0xf] }
 0x7e4   : > { %v5917_v1 = vadd.f32 %v5916_v17, %v5868_v24 }
 0x7e6   : > { %6111 = vmatmul.bf16.gmra.mxu1 %v10033_v43  ;;  %v15575_v32 = vadd.f32 %v5965_v47, %v5917_v1  ;;  %v9930_v43 = vld [vmem:[#allocation2 + $0x15c] sm:$0xf0] }
 0x7e7   : > { %6179 = vmatmul.bf16.gmra.mxu3 %v9825_v54 }
 0x7ea   : > { %v5984_v4 = vpop.f32.mrf.mxu3 }
 0x7eb   : > { %v5985_v18 = vadd.f32 %v5984_v4, %v15436_v59  ;;  %v15578_v46 = vpop.f32.mrf.mxu1  ;;  %v15590_v59 = vpop.f32.mrf.mxu0  ;;  %v11339_v4 = vld [vmem:[#allocation2 + $0x13c] sm:$0xf] }
 0x7ec   : > { %16470 = vst [vmem:[#allocation30_spill] sm:$0xff] %v15590_v59  ;;  %v6131_v14 = vpop.f32.mrf.mxu2 }
 0x7ed   : > { %v6034_v13 = vadd.f32 %v15509_v21, %v5985_v18 }
 0x7f2   : > { %v5986_v60 = vpop.f32.mrf.mxu3 }
 0x7f3   : > { %v15585_v25 = vadd.f32 %v5986_v60, %v15448_v16  ;;  %v6077_v56 = vpop.f32.mrf.mxu1  ;;  %v9894_v16 = vld [vmem:[#allocation2 + $0x114] sm:$0xf0]  ;;  %v15595_v0 = vpop.f32.mrf.mxu0  ;;  %v9933_v60 = vor.u32 %v11339_v4, %v9930_v43  ;;  %v11357_v43 = vld [vmem:[#allocation2 + $0x1cc] sm:$0xf] }
 0x7f4   : > { %v6078_v47 = vadd.f32 %v6077_v56, %v6029_v37  ;;  %v15601_v35 = vpop.f32.mrf.mxu2  ;;  %v9897_v49 = vor.u32 %v11330_v51, %v9894_v16 }
 0x7f6   : > { %v15588_v55 = vadd.f32 %v6126_v34, %v6078_v47 }
 0x7f7   : > { %6184 = vmatmul.bf16.gmra.mxu3 %v9861_v20 }
 0x7fa   : > { %v5989_v41 = vpop.f32.mrf.mxu3 }
 0x7fb   : > { %v5990_v6 = vadd.f32 %v5989_v41, %v15463_v62  ;;  %v15593_v63 = vpop.f32.mrf.mxu1  ;;  %v15608_v29 = vpop.f32.mrf.mxu0 }
 0x7fd   : > { %v6039_v54 = vadd.f32 %v15540_v3, %v5990_v6 }
 0x802   : > { %v5991_v33 = vpop.f32.mrf.mxu3 }
 0x803   : > { %v15598_v53 = vadd.f32 %v5991_v33, %v15479_v31  ;;  %v6082_v28 = vpop.f32.mrf.mxu1  ;;  %v6136_v31 = vpop.f32.mrf.mxu2  ;;  %v11348_v33 = vld [vmem:[#allocation2 + $0x184] sm:$0xf] }
 0x804   : > { %v6083_v44 = vadd.f32 %v6082_v28, %v6034_v13  ;;  %v15614_v61 = vpop.f32.mrf.mxu0 }
 0x806   : > { %v15603_v24 = vadd.f32 %v6131_v14, %v6083_v44  ;;  %v9966_v14 = vld [vmem:[#allocation2 + $0x1a4] sm:$0xf0] }
 0x807   : > { %6189 = vmatmul.bf16.gmra.mxu3 %v9897_v49  ;;  %v9969_v13 = vor.u32 %v11348_v33, %v9966_v14 }
 0x80a   : > { %v5994_v62 = vpop.f32.mrf.mxu3 }
 0x80b   : > { %v5995_v17 = vadd.f32 %v5994_v62, %v15494_v39  ;;  %v15606_v5 = vpop.f32.mrf.mxu1  ;;  %v15618_v37 = vpop.f32.mrf.mxu2 }
 0x80d   : > { %v6044_v41 = vadd.f32 %v15559_v30, %v5995_v17  ;;  %v10002_v30 = vld [vmem:[#allocation2 + $0x1ec] sm:$0xf0] }
 0x80e   : > { %v10005_v4 = vor.u32 %v11357_v43, %v10002_v30 }
 0x812   : > { %v5996_v1 = vpop.f32.mrf.mxu3 }
 0x813   : > { %v15611_v21 = vadd.f32 %v5996_v1, %v15512_v10  ;;  %v6087_v34 = vpop.f32.mrf.mxu1  ;;  %v15623_v10 = vpop.f32.mrf.mxu0 }
 0x814   : > { %v6088_v18 = vadd.f32 %v6087_v34, %v6039_v54  ;;  %v6141_v20 = vpop.f32.mrf.mxu2 }
 0x816   : > { %v15616_v39 = vadd.f32 %v6136_v31, %v6088_v18 }
 0x817   : > { %6194 = vmatmul.bf16.gmra.mxu3 %v9933_v60 }
 0x81a   : > { %v5999_v56 = vpop.f32.mrf.mxu3 }
 0x81b   : > { %v6000_v57 = vadd.f32 %v5999_v56, %v15528_v58  ;;  %v15621_v47 = vpop.f32.mrf.mxu1  ;;  %v15630_v44 = vpop.f32.mrf.mxu0 }
 0x81c   : > { %v15635_v49 = vpop.f32.mrf.mxu2 }
 0x81d   : > { %v6049_v17 = vadd.f32 %v15580_v12, %v6000_v57 }
 0x822   : > { %v15625_v3 = vpop.f32.mrf.mxu3 }
 0x823   : > { %v6092_v6 = vpop.f32.mrf.mxu1  ;;  %v15642_v54 = vpop.f32.mrf.mxu0 }
 0x824   : > { %v6093_v16 = vadd.f32 %v6092_v6, %v6044_v41  ;;  %v6146_v18 = vpop.f32.mrf.mxu2  ;;  %v10038_v41 = vld [vmem:[#allocation2 + $0x234] sm:$0xf0]  ;;  %v11366_v6 = vld [vmem:[#allocation2 + $0x214] sm:$0xf] }
 0x825   : > { %v10041_v12 = vor.u32 %v11366_v6, %v10038_v41 }
 0x826   : > { %v15628_v28 = vadd.f32 %v6141_v20, %v6093_v16 }
 0x827   : > { %6199 = vmatmul.bf16.gmra.mxu3 %v9969_v13 }
 0x82a   : > { %v6004_v51 = vpop.f32.mrf.mxu3 }
 0x82b   : > { %v15633_v58 = vadd.f32 %v6004_v51, %v15545_v27  ;;  %v15637_v62 = vpop.f32.mrf.mxu1  ;;  %v6224_v20 = vpop.f32.mrf.mxu0 }
 0x832   : > { %v15639_v31 = vpop.f32.mrf.mxu3 }
 0x833   : > { %v6097_v1 = vpop.f32.mrf.mxu1  ;;  %v6226_v57 = vpop.f32.mrf.mxu0 }
 0x834   : > { %v6098_v34 = vadd.f32 %v6097_v1, %v6049_v17 }
 0x836   : > { %v15644_v60 = vadd.f32 %v6146_v18, %v6098_v34 }
 0x837   : > { %6204 = vmatmul.bf16.gmra.mxu3 %v10005_v4 }
 0x83a   : > { %v6009_v27 = vpop.f32.mrf.mxu3 }
 0x83b   : > { %v15647_v56 = vadd.f32 %v6009_v27, %v15561_v23  ;;  %v6229_v13 = vpop.f32.mrf.mxu0  ;;  %v6031_v23 = vadd.f32 %v15486_v7, %v15573_v50  ;;  %v6036_v7 = vadd.f32 %v15530_v2, %v15585_v25  ;;  %v6041_v2 = vadd.f32 %v15552_v48, %v15598_v53 }
 0x83d   : > { %v6080_v43 = vadd.f32 %v15593_v63, %v6031_v23 }
 0x83f   : > { %v6129_v34 = vadd.f32 %v15582_v38, %v6080_v43 }
 0x842   : > { %v15649_v14 = vpop.f32.mrf.mxu3 }
 0x843   : > { %v6231_v17 = vpop.f32.mrf.mxu0 }
 0x847   : > { %6209 = vmatmul.bf16.gmra.mxu3 %v10041_v12 }
 0x84a   : > { %v6014_v33 = vpop.f32.mrf.mxu3 }
 0x84b   : > { %v15652_v16 = vadd.f32 %v6014_v33, %v15575_v32  ;;  %v6234_v41 = vpop.f32.mrf.mxu0 }
 0x852   : > { %v15654_v51 = vpop.f32.mrf.mxu3 }
 0x853   : > { %v6236_v63 = vpop.f32.mrf.mxu0 }
 0x85a   : > { %v6175_v30 = vpop.f32.mrf.mxu3 }
 0x85b   : > { %v6176_v1 = vadd.f32 %v6175_v30, %v15588_v55  ;;  %v6085_v55 = vadd.f32 %v15606_v5, %v6036_v7 }
 0x85d   : > { %v6225_v18 = vadd.f32 %v6224_v20, %v6176_v1  ;;  %v6134_v38 = vadd.f32 %v15601_v35, %v6085_v55 }
 0x85f   : > { %v6264_v6 = vmax.f32 %v6225_v18, 0.0 }
 0x862   : > { %v6177_v4 = vpop.f32.mrf.mxu3 }
 0x863   : > { %v6178_v27 = vadd.f32 %v6177_v4, %v6129_v34  ;;  %v6239_v34 = vpop.f32.mrf.mxu0 }
 0x865   : > { %v6227_v32 = vadd.f32 %v6226_v57, %v6178_v27 }
 0x867   : > { %v6265_v12 = vmax.f32 %v6227_v32, 0.0 }
 0x869   : > { %v15661_v33 = vpack.c.bf16 %v6265_v12, %v6264_v6 }
 0x86a   : > { %v6180_v59 = vpop.f32.mrf.mxu3 }
 0x86b   : > { %v6181_v50 = vadd.f32 %v6180_v59, %v15603_v24  ;;  %v6090_v59 = vadd.f32 %v15621_v47, %v6041_v2  ;;  %v6241_v5 = vpop.f32.mrf.mxu0  ;;  %v15681_v47 = vpop.f32.mrf.mxu1 }
 0x86d   : > { %v6230_v20 = vadd.f32 %v6229_v13, %v6181_v50  ;;  %v6139_v24 = vadd.f32 %v15618_v37, %v6090_v59  ;;  %v6046_v50 = vadd.f32 %v15568_v36, %v15611_v21 }
 0x86f   : > { %v6266_v57 = vmax.f32 %v6230_v20, 0.0  ;;  %v6095_v53 = vadd.f32 %v15637_v62, %v6046_v50 }
 0x871   : > { %v6144_v37 = vadd.f32 %v15635_v49, %v6095_v53  ;;  %v5860_v53 = vadd.f32 %v15404_v22, %v15393_v15 }
 0x872   : > { %v6182_v30 = vpop.f32.mrf.mxu3 }
 0x873   : > { %v6183_v23 = vadd.f32 %v6182_v30, %v6134_v38  ;;  %v15684_v38 = vpop.f32.mrf.mxu2  ;;  %v6102_v36 = vpop.f32.mrf.mxu1 }
 0x875   : > { %v6232_v1 = vadd.f32 %v6231_v17, %v6183_v23 }
 0x877   : > { %v6267_v43 = vmax.f32 %v6232_v1, 0.0 }
 0x879   : > { %v15668_v4 = vpack.c.bf16 %v6267_v43, %v6266_v57 }
 0x87a   : > { %v6185_v18 = vpop.f32.mrf.mxu3 }
 0x87b   : > { %v6186_v25 = vadd.f32 %v6185_v18, %v15616_v39  ;;  %v6244_v39 = vpop.f32.mrf.mxu0  ;;  %v15693_v43 = vpop.f32.mrf.mxu2 }
 0x87d   : > { %v6235_v13 = vadd.f32 %v6234_v41, %v6186_v25 }
 0x87f   : > { %v6268_v32 = vmax.f32 %v6235_v13, 0.0 }
 0x882   : > { %v6187_v35 = vpop.f32.mrf.mxu3 }
 0x883   : > { %v6188_v27 = vadd.f32 %v6187_v35, %v6139_v24  ;;  %v15686_v20 = vpop.f32.mrf.mxu0  ;;  %v6153_v2 = vpop.f32.mrf.mxu2 }
 0x885   : > { %v6237_v17 = vadd.f32 %v6236_v63, %v6188_v27 }
 0x887   : > { %v6269_v6 = vmax.f32 %v6237_v17, 0.0 }
 0x889   : > { %v15675_v12 = vpack.c.bf16 %v6269_v6, %v6268_v32  ;;  %v5865_v32 = vadd.f32 %v15404_v22, %v15423_v8  ;;  %v5870_v6 = vadd.f32 %v15404_v22, %v15453_v19 }
 0x88a   : > { %v6190_v7 = vpop.f32.mrf.mxu3 }
 0x88b   : > { %v6191_v48 = vadd.f32 %v6190_v7, %v15628_v28  ;;  %v15695_v49 = vpop.f32.mrf.mxu0  ;;  %v6156_v35 = vpop.f32.mrf.mxu2  ;;  %v5914_v7 = vadd.f32 %v15566_v9, %v5865_v32 }
 0x88d   : > { %v6240_v55 = vadd.f32 %v6239_v34, %v6191_v48  ;;  %v6104_v34 = vpop.f32.mrf.mxu1 }
 0x88f   : > { %v6270_v23 = vmax.f32 %v6240_v55, 0.0  ;;  %v5963_v55 = vadd.f32 %v15547_v26, %v5914_v7 }
 0x892   : > { %v6192_v41 = vpop.f32.mrf.mxu3 }
 0x893   : > { %v6193_v63 = vadd.f32 %v6192_v41, %v6144_v37  ;;  %v15701_v59 = vpop.f32.mrf.mxu0  ;;  %v6158_v17 = vpop.f32.mrf.mxu2  ;;  %v5909_v41 = vadd.f32 %v15550_v42, %v5860_v53 }
 0x895   : > { %v6242_v30 = vadd.f32 %v6241_v5, %v6193_v63  ;;  %v6107_v24 = vpop.f32.mrf.mxu1  ;;  %v16471_v63 = vld [vmem:[#allocation78_spill] sm:$0xff] }
 0x896   : > { %v5855_v8 = vadd.f32 %v15404_v22, %v16471_v63 }
 0x897   : > { %v6271_v1 = vmax.f32 %v6242_v30, 0.0  ;;  %v6012_v30 = vadd.f32 %v15649_v14, %v5963_v55 }
 0x898   : > { %v5904_v9 = vadd.f32 %v15533_v11, %v5855_v8  ;;  %v6059_v11 = vadd.f32 %v15614_v61, %v15647_v56 }
 0x899   : > { %v15688_v21 = vpack.c.bf16 %v6271_v1, %v6270_v23  ;;  %v5958_v1 = vadd.f32 %v15520_v45, %v5909_v41  ;;  %v6061_v26 = vadd.f32 %v15623_v10, %v6012_v30  ;;  %v6054_v10 = vadd.f32 %v15595_v0, %v15633_v58 }
 0x89a   : > { %v6195_v28 = vpop.f32.mrf.mxu3  ;;  %v5953_v14 = vadd.f32 %v15481_v52, %v5904_v9 }
 0x89b   : > { %v6196_v62 = vadd.f32 %v6195_v28, %v15644_v60  ;;  %v6254_v13 = vpop.f32.mrf.mxu0  ;;  %v6161_v23 = vpop.f32.mrf.mxu2  ;;  %v6007_v42 = vadd.f32 %v15639_v31, %v5958_v1  ;;  %v6103_v61 = vadd.f32 %v6102_v36, %v6054_v10  ;;  %v11522_v10 = vld [vmem:[%s16228_s7 + $0x30] sm:$0xff] }
 0x89d   : > { %v15691_v57 = vadd.f32 %v6244_v39, %v6196_v62  ;;  %v6109_v27 = vpop.f32.mrf.mxu1  ;;  %v5919_v39 = vadd.f32 %v15578_v46, %v5870_v6  ;;  %v6064_v46 = vadd.f32 %v15630_v44, %v15652_v16  ;;  %v6056_v44 = vadd.f32 %v15608_v29, %v6007_v42  ;;  %v11453_v42 = vld [vmem:[%s16227_s6 + $0x48] sm:$0xff] }
 0x89e   : > { %v6110_v32 = vadd.f32 %v6109_v27, %v6061_v26  ;;  %v6108_v16 = vadd.f32 %v6107_v24, %v6059_v11  ;;  %v6152_v0 = vadd.f32 %v15693_v43, %v6103_v61  ;;  %v11449_v26 = vld [vmem:[%s16227_s6 + $0x28] sm:$0xff]  ;;  %v11447_v11 = vld [vmem:[%s16227_s6 + $0x18] sm:$0xff]  ;;  %v11466_v61 = vld [vmem:[%s16227_s6 + $0xb0] sm:$0xff] }
 0x89f   : > { %v5968_v19 = vadd.f32 %v15564_v40, %v5919_v39  ;;  %v6105_v7 = vadd.f32 %v6104_v34, %v6056_v44  ;;  %v16472_v39 = vld [vmem:[#allocation30_spill] sm:$0xff]  ;;  %v11459_v44 = vld [vmem:[%s16227_s6 + $0x78] sm:$0xff] }
 0x8a0   : > { %v6159_v52 = vadd.f32 %v6158_v17, %v6110_v32  ;;  %v6157_v56 = vadd.f32 %v6156_v35, %v6108_v16  ;;  %v11455_v32 = vld [vmem:[%s16227_s6 + $0x58] sm:$0xff]  ;;  %v11461_v16 = vld [vmem:[%s16227_s6 + $0x88] sm:$0xff] }
 0x8a1   : > { %v6017_v15 = vadd.f32 %v15654_v51, %v5968_v19  ;;  %v6002_v51 = vadd.f32 %v15625_v3, %v5953_v14  ;;  %v6154_v29 = vadd.f32 %v6153_v2, %v6105_v7  ;;  %v11454_v14 = vld [vmem:[%s16227_s6 + $0x50] sm:$0xff]  ;;  %v11521_v7 = vld [vmem:[%s16228_s7 + $0x28] sm:$0xff] }
 0x8a2   : > { %v15697_v18 = vpop.f32.mrf.mxu3 }
 0x8a3   : > { %v6256_v50 = vpop.f32.mrf.mxu0  ;;  %v6066_v45 = vadd.f32 %v15642_v54, %v6017_v15  ;;  %v6163_v53 = vpop.f32.mrf.mxu2  ;;  %v6051_v41 = vadd.f32 %v16472_v39, %v6002_v51  ;;  %v11448_v15 = vld [vmem:[%s16227_s6 + $0x20] sm:$0xff] }
 0x8a4   : > { %v11460_v51 = vld [vmem:[%s16227_s6 + $0x80] sm:$0xff] }
 0x8a5   : > { %v6112_v48 = vpop.f32.mrf.mxu1  ;;  %v6100_v3 = vadd.f32 %v15681_v47, %v6051_v41  ;;  %v11468_v39 = vld [vmem:[%s16227_s6 + $0xc0] sm:$0xff]  ;;  %v11538_v41 = vld [vmem:[%s16228_s7 + $0xb0] sm:$0xff] }
 0x8a6   : > { %v6113_v22 = vadd.f32 %v6112_v48, %v6064_v46  ;;  %v11445_v46 = vld [vmem:[%s16227_s6 + $0x8] sm:$0xff] }
 0x8a7   : > { %v6149_v19 = vadd.f32 %v15684_v38, %v6100_v3  ;;  %v11519_v3 = vld [vmem:[%s16228_s7 + $0x18] sm:$0xff] }
 0x8a8   : > { %v6162_v6 = vadd.f32 %v6161_v23, %v6113_v22  ;;  %v11446_v22 = vld [vmem:[%s16227_s6 + $0x10] sm:$0xff] }
 0x8a9   : > { %v6198_v47 = vadd.f32 %v15697_v18, %v6149_v19  ;;  %v11534_v19 = vld [vmem:[%s16228_s7 + $0x90] sm:$0xff] }
 0x8aa   : > { %v15699_v25 = vpop.f32.mrf.mxu3 }
 0x8ab   : > { %v6259_v28 = vpop.f32.mrf.mxu0  ;;  %v6201_v36 = vadd.f32 %v15699_v25, %v6152_v0  ;;  %v6247_v38 = vadd.f32 %v15686_v20, %v6198_v47  ;;  %v11517_v0 = vld [vmem:[%s16228_s7 + $0x8] sm:$0xff]  ;;  %v11526_v47 = vld [vmem:[%s16228_s7 + $0x50] sm:$0xff] }
 0x8ad   : > { %v6114_v62 = vpop.f32.mrf.mxu1  ;;  %v6250_v1 = vadd.f32 %v15695_v49, %v6201_v36  ;;  %v6273_v49 = vmax.f32 %v6247_v38, 0.0  ;;  %v11467_v36 = vld [vmem:[%s16227_s6 + $0xb8] sm:$0xff]  ;;  %v11524_v38 = vld [vmem:[%s16228_s7 + $0x40] sm:$0xff] }
 0x8ae   : > { %v6115_v31 = vadd.f32 %v6114_v62, %v6066_v45  ;;  %v11450_v62 = vld [vmem:[%s16227_s6 + $0x30] sm:$0xff]  ;;  %v11451_v45 = vld [vmem:[%s16227_s6 + $0x38] sm:$0xff] }
 0x8b0   : > { %v6164_v54 = vadd.f32 %v6163_v53, %v6115_v31  ;;  %v11465_v31 = vld [vmem:[%s16227_s6 + $0xa8] sm:$0xff]  ;;  %v11462_v53 = vld [vmem:[%s16227_s6 + $0x90] sm:$0xff] }
 0x8b2   : > { %v6202_v5 = vpop.f32.mrf.mxu3 }
 0x8b3   : > { %v6261_v30 = vpop.f32.mrf.mxu0  ;;  %v6203_v58 = vadd.f32 %v6202_v5, %v6154_v29  ;;  %v11536_v29 = vld [vmem:[%s16228_s7 + $0xa0] sm:$0xff] }
 0x8b5   : > { %v6252_v2 = vadd.f32 %v15701_v59, %v6203_v58  ;;  %v6274_v59 = vmax.f32 %v6250_v1, 0.0  ;;  %v11463_v58 = vld [vmem:[%s16227_s6 + $0x98] sm:$0xff]  ;;  %v11470_v1 = vld [vmem:[%s16227_s6 + $0xd0] sm:$0xff] }
 0x8b7   : > { %v6275_v25 = vmax.f32 %v6252_v2, 0.0  ;;  %v11532_v2 = vld [vmem:[%s16228_s7 + $0x80] sm:$0xff] }
 0x8b9   : > { %v15753_v5 = vpack.c.bf16 %v6275_v25, %v6274_v59 }
 0x8ba   : > { %v6205_v60 = vpop.f32.mrf.mxu3 }
 0x8bb   : > { %v6206_v24 = vadd.f32 %v6205_v60, %v6157_v56  ;;  %v11520_v56 = vld [vmem:[%s16228_s7 + $0x20] sm:$0xff] }
 0x8bd   : > { %v6255_v35 = vadd.f32 %v6254_v13, %v6206_v24  ;;  %v6272_v13 = vmax.f32 %v15691_v57, 0.0  ;;  %v11444_v57 = vld [vmem:[%s16227_s6] sm:$0xff]  ;;  %v11518_v24 = vld [vmem:[%s16228_s7 + $0x10] sm:$0xff] }
 0x8bf   : > { %v6276_v43 = vmax.f32 %v6255_v35, 0.0  ;;  %v15760_v20 = vpack.c.bf16 %v6273_v49, %v6272_v13  ;;  %v11516_v35 = vld [vmem:[%s16228_s7] sm:$0xff] }
 0x8c2   : > { %v6207_v37 = vpop.f32.mrf.mxu3 }
 0x8c3   : > { %v6208_v27 = vadd.f32 %v6207_v37, %v6159_v52  ;;  %v11474_v52 = vld [vmem:[%s16227_s6 + $0xf0] sm:$0xff] }
 0x8c5   : > { %v6257_v34 = vadd.f32 %v6256_v50, %v6208_v27  ;;  %v11452_v50 = vld [vmem:[%s16227_s6 + $0x40] sm:$0xff]  ;;  %v11531_v27 = vld [vmem:[%s16228_s7 + $0x78] sm:$0xff] }
 0x8c7   : > { %v6277_v60 = vmax.f32 %v6257_v34, 0.0  ;;  %v11469_v34 = vld [vmem:[%s16227_s6 + $0xc8] sm:$0xff] }
 0x8c9   : > { %v15747_v18 = vpack.c.bf16 %v6277_v60, %v6276_v43  ;;  %v11525_v60 = vld [vmem:[%s16228_s7 + $0x48] sm:$0xff]  ;;  %v11476_v43 = vld [vmem:[%s16227_s6 + $0x100] sm:$0xff] }
 0x8ca   : > { %v6210_v40 = vpop.f32.mrf.mxu3 }
 0x8cb   : > { %v6211_v48 = vadd.f32 %v6210_v40, %v6162_v6  ;;  %v11457_v40 = vld [vmem:[%s16227_s6 + $0x68] sm:$0xff]  ;;  %v11523_v6 = vld [vmem:[%s16228_s7 + $0x38] sm:$0xff] }
 0x8cd   : > { %v6260_v63 = vadd.f32 %v6259_v28, %v6211_v48  ;;  %v11456_v28 = vld [vmem:[%s16227_s6 + $0x60] sm:$0xff]  ;;  %v11539_v48 = vld [vmem:[%s16228_s7 + $0xb8] sm:$0xff] }
 0x8cf   : > { %v6278_v37 = vmax.f32 %v6260_v63, 0.0  ;;  %v11475_v63 = vld [vmem:[%s16227_s6 + $0xf8] sm:$0xff] }
 0x8d2   : > { %v6212_v55 = vpop.f32.mrf.mxu3 }
 0x8d3   : > { %v6213_v8 = vadd.f32 %v6212_v55, %v6164_v54  ;;  %v11537_v54 = vld [vmem:[%s16228_s7 + $0xa8] sm:$0xff]  ;;  %v11530_v55 = vld [vmem:[%s16228_s7 + $0x70] sm:$0xff] }
 0x8d5   : > { %v6262_v17 = vadd.f32 %v6261_v30, %v6213_v8  ;;  %v11529_v8 = vld [vmem:[%s16228_s7 + $0x68] sm:$0xff]  ;;  %v11535_v30 = vld [vmem:[%s16228_s7 + $0x98] sm:$0xff] }
 0x8d7   : > { %v6279_v9 = vmax.f32 %v6262_v17, 0.0  ;;  %v11528_v17 = vld [vmem:[%s16228_s7 + $0x60] sm:$0xff] }
 0x8d9   : > { %v15739_v23 = vpack.c.bf16 %v6279_v9, %v6278_v37  ;;  %v11527_v37 = vld [vmem:[%s16228_s7 + $0x58] sm:$0xff]  ;;  %v11533_v9 = vld [vmem:[%s16228_s7 + $0x88] sm:$0xff] }
 0x8db   : > { %6320 = vmatpush.bf16.msra.mxu1 %v15739_v23  ;;  %6398 = vmatpush.bf16.msra.mxu2 %v15739_v23 }
 0x8dc   : > { %6476 = vmatpush.bf16.msrb.mxu3 %v15739_v23  ;;  %6554 = vmatpush.bf16.msra.mxu0 %v15739_v23 }
 0x8df   : > { %6321 = vmatpush.bf16.msra.mxu1 %v15747_v18  ;;  %6399 = vmatpush.bf16.msra.mxu2 %v15747_v18 }
 0x8e0   : > { %6477 = vmatpush.bf16.msrb.mxu3 %v15747_v18  ;;  %6555 = vmatpush.bf16.msra.mxu0 %v15747_v18 }
 0x8e3   : > { %6322 = vmatpush.bf16.msra.mxu1 %v15753_v5  ;;  %6400 = vmatpush.bf16.msra.mxu2 %v15753_v5 }
 0x8e4   : > { %6478 = vmatpush.bf16.msrb.mxu3 %v15753_v5  ;;  %6556 = vmatpush.bf16.msra.mxu0 %v15753_v5 }
 0x8e7   : > { %6323 = vmatpush.bf16.msra.mxu1 %v15760_v20  ;;  %6401 = vmatpush.bf16.msra.mxu2 %v15760_v20 }
 0x8e8   : > { %6479 = vmatpush.bf16.msrb.mxu3 %v15760_v20  ;;  %6557 = vmatpush.bf16.msra.mxu0 %v15760_v20 }
 0x8eb   : > { %6324 = vmatpush.bf16.msra.mxu1 %v15688_v21  ;;  %6402 = vmatpush.bf16.msra.mxu2 %v15688_v21 }
 0x8ec   : > { %6480 = vmatpush.bf16.msrb.mxu3 %v15688_v21  ;;  %6558 = vmatpush.bf16.msra.mxu0 %v15688_v21 }
 0x8ef   : > { %6325 = vmatpush.bf16.msra.mxu1 %v15675_v12  ;;  %6403 = vmatpush.bf16.msra.mxu2 %v15675_v12 }
 0x8f0   : > { %6481 = vmatpush.bf16.msrb.mxu3 %v15675_v12  ;;  %6559 = vmatpush.bf16.msra.mxu0 %v15675_v12 }
 0x8f3   : > { %6326 = vmatpush.bf16.msra.mxu1 %v15668_v4  ;;  %6404 = vmatpush.bf16.msra.mxu2 %v15668_v4 }
 0x8f4   : > { %6482 = vmatpush.bf16.msrb.mxu3 %v15668_v4  ;;  %6560 = vmatpush.bf16.msra.mxu0 %v15668_v4 }
 0x8f7   : > { %6327 = vmatpush.bf16.msra.mxu1 %v15661_v33  ;;  %6405 = vmatpush.bf16.msra.mxu2 %v15661_v33 }
 0x8f8   : > { %6483 = vmatpush.bf16.msrb.mxu3 %v15661_v33  ;;  %6561 = vmatpush.bf16.msra.mxu0 %v15661_v33 }
 0x8fa   : > { %6328 = vmatmul.bf16.vlgmr.msra.gmra.mxu1 %v11444_v57  ;;  %6406 = vmatmul.bf16.vlgmr.msra.gmra.mxu2 %v11448_v15  ;;  %v11546_v57 = vld [vmem:[%s16228_s7 + $0xf0] sm:$0xff]  ;;  %v11545_v15 = vld [vmem:[%s16228_s7 + $0xe8] sm:$0xff] }
 0x8fb   : > { %6632 = vmatpush.bf16.msrb.mxu1 %v15739_v23  ;;  %6710 = vmatpush.bf16.msrb.mxu2 %v15739_v23 }
 0x8fc   : > { %11596 = vmatpush.bf16.msra.mxu3 %v15739_v23  ;;  %6866 = vmatpush.bf16.msrb.mxu0 %v15739_v23 }
 0x8fd   : > { %6484 = vmatmul.bf16.vlgmr.msrb.gmra.mxu3 %v11452_v50  ;;  %6562 = vmatmul.bf16.vlgmr.msra.gmra.mxu0 %v11456_v28 }
 0x8ff   : > { %6633 = vmatpush.bf16.msrb.mxu1 %v15747_v18  ;;  %6711 = vmatpush.bf16.msrb.mxu2 %v15747_v18 }
 0x900   : > { %11597 = vmatpush.bf16.msra.mxu3 %v15747_v18  ;;  %6867 = vmatpush.bf16.msrb.mxu0 %v15747_v18 }
 0x903   : > { %6634 = vmatpush.bf16.msrb.mxu1 %v15753_v5  ;;  %6712 = vmatpush.bf16.msrb.mxu2 %v15753_v5 }
 0x904   : > { %11598 = vmatpush.bf16.msra.mxu3 %v15753_v5  ;;  %6868 = vmatpush.bf16.msrb.mxu0 %v15753_v5 }
 0x907   : > { %6635 = vmatpush.bf16.msrb.mxu1 %v15760_v20  ;;  %6713 = vmatpush.bf16.msrb.mxu2 %v15760_v20 }
 0x908   : > { %11599 = vmatpush.bf16.msra.mxu3 %v15760_v20  ;;  %6869 = vmatpush.bf16.msrb.mxu0 %v15760_v20 }
 0x90a   : > { %6333 = vmatmul.bf16.gmra.mxu1 %v11445_v46  ;;  %6411 = vmatmul.bf16.gmra.mxu2 %v11449_v26 }
 0x90b   : > { %6636 = vmatpush.bf16.msrb.mxu1 %v15688_v21  ;;  %6714 = vmatpush.bf16.msrb.mxu2 %v15688_v21 }
 0x90c   : > { %11600 = vmatpush.bf16.msra.mxu3 %v15688_v21  ;;  %6870 = vmatpush.bf16.msrb.mxu0 %v15688_v21 }
 0x90d   : > { %6489 = vmatmul.bf16.gmra.mxu3 %v11453_v42  ;;  %6567 = vmatmul.bf16.gmra.mxu0 %v11457_v40  ;;  %v11544_v40 = vld [vmem:[%s16228_s7 + $0xe0] sm:$0xff] }
 0x90f   : > { %6637 = vmatpush.bf16.msrb.mxu1 %v15675_v12  ;;  %6715 = vmatpush.bf16.msrb.mxu2 %v15675_v12 }
 0x910   : > { %11601 = vmatpush.bf16.msra.mxu3 %v15675_v12  ;;  %6871 = vmatpush.bf16.msrb.mxu0 %v15675_v12 }
 0x913   : > { %6638 = vmatpush.bf16.msrb.mxu1 %v15668_v4  ;;  %6716 = vmatpush.bf16.msrb.mxu2 %v15668_v4 }
 0x914   : > { %11602 = vmatpush.bf16.msra.mxu3 %v15668_v4  ;;  %6872 = vmatpush.bf16.msrb.mxu0 %v15668_v4 }
 0x917   : > { %6639 = vmatpush.bf16.msrb.mxu1 %v15661_v33  ;;  %6717 = vmatpush.bf16.msrb.mxu2 %v15661_v33 }
 0x918   : > { %11603 = vmatpush.bf16.msra.mxu3 %v15661_v33  ;;  %6873 = vmatpush.bf16.msrb.mxu0 %v15661_v33 }
 0x91a   : > { %6338 = vmatmul.bf16.gmra.mxu1 %v11446_v22  ;;  %6416 = vmatmul.bf16.gmra.mxu2 %v11450_v62  ;;  %v11471_v22 = vld [vmem:[%s16227_s6 + $0xd8] sm:$0xff] }
 0x91b   : > { %6944 = vmatpush.bf16.msra.mxu1 %v15739_v23  ;;  %7793 = vmatpush.bf16.msra.mxu2 %v11523_v6 }
 0x91c   : > { %6788 = vmatpush.bf16.msrb.mxu3 %v15739_v23  ;;  %7851 = vmatpush.bf16.msra.mxu0 %v11539_v48 }
 0x91d   : > { %6494 = vmatmul.bf16.gmra.mxu3 %v11454_v14  ;;  %v11477_v14 = vld [vmem:[%s16227_s6 + $0x108] sm:$0xff] }
 0x91f   : > { %6945 = vmatpush.bf16.msra.mxu1 %v15747_v18  ;;  %7794 = vmatpush.bf16.msra.mxu2 %v11522_v10 }
 0x920   : > { %6789 = vmatpush.bf16.msrb.mxu3 %v15747_v18  ;;  %7852 = vmatpush.bf16.msra.mxu0 %v11538_v41  ;;  %v11547_v18 = vld [vmem:[%s16228_s7 + $0xf8] sm:$0xff] }
 0x923   : > { %6946 = vmatpush.bf16.msra.mxu1 %v15753_v5  ;;  %7795 = vmatpush.bf16.msra.mxu2 %v11521_v7 }
 0x924   : > { %6790 = vmatpush.bf16.msrb.mxu3 %v15753_v5  ;;  %7853 = vmatpush.bf16.msra.mxu0 %v11537_v54 }
 0x927   : > { %6947 = vmatpush.bf16.msra.mxu1 %v15760_v20  ;;  %7796 = vmatpush.bf16.msra.mxu2 %v11520_v56 }
 0x928   : > { %6791 = vmatpush.bf16.msrb.mxu3 %v15760_v20  ;;  %7854 = vmatpush.bf16.msra.mxu0 %v11536_v29  ;;  %v11553_v29 = vld [vmem:[%s16228_s7 + $0x128] sm:$0xff] }
 0x92a   : > { %6343 = vmatmul.bf16.gmra.mxu1 %v11447_v11  ;;  %6421 = vmatmul.bf16.gmra.mxu2 %v11451_v45 }
 0x92b   : > { %6948 = vmatpush.bf16.msra.mxu1 %v15688_v21  ;;  %7797 = vmatpush.bf16.msra.mxu2 %v11519_v3 }
 0x92c   : > { %6792 = vmatpush.bf16.msrb.mxu3 %v15688_v21  ;;  %v11472_v21 = vld [vmem:[%s16227_s6 + $0xe0] sm:$0xff]  ;;  %7855 = vmatpush.bf16.msra.mxu0 %v11535_v30 }
 0x92d   : > { %6499 = vmatmul.bf16.gmra.mxu3 %v11455_v32  ;;  %6874 = vmatmul.bf16.vlgmr.msrb.gmra.mxu0 %v11472_v21 }
 0x92f   : > { %6949 = vmatpush.bf16.msra.mxu1 %v15675_v12  ;;  %7798 = vmatpush.bf16.msra.mxu2 %v11518_v24 }
 0x930   : > { %6793 = vmatpush.bf16.msrb.mxu3 %v15675_v12  ;;  %v11458_v12 = vld [vmem:[%s16227_s6 + $0x70] sm:$0xff]  ;;  %7856 = vmatpush.bf16.msra.mxu0 %v11534_v19 }
 0x933   : > { %6950 = vmatpush.bf16.msra.mxu1 %v15668_v4  ;;  %7799 = vmatpush.bf16.msra.mxu2 %v11517_v0 }
 0x934   : > { %6794 = vmatpush.bf16.msrb.mxu3 %v15668_v4  ;;  %v11464_v4 = vld [vmem:[%s16227_s6 + $0xa0] sm:$0xff]  ;;  %7857 = vmatpush.bf16.msra.mxu0 %v11533_v9 }
 0x937   : > { %6951 = vmatpush.bf16.msra.mxu1 %v15661_v33  ;;  %7800 = vmatpush.bf16.msra.mxu2 %v11516_v35  ;;  %v11552_v35 = vld [vmem:[%s16228_s7 + $0x120] sm:$0xff] }
 0x938   : > { %6795 = vmatpush.bf16.msrb.mxu3 %v15661_v33  ;;  %v11473_v33 = vld [vmem:[%s16227_s6 + $0xe8] sm:$0xff]  ;;  %7858 = vmatpush.bf16.msra.mxu0 %v11532_v2  ;;  %v11551_v2 = vld [vmem:[%s16228_s7 + $0x118] sm:$0xff] }
 0x93a   : > { %6640 = vmatmul.bf16.vlgmr.msrb.gmra.mxu1 %v11460_v51  ;;  %6718 = vmatmul.bf16.vlgmr.msrb.gmra.mxu2 %v11464_v4  ;;  %v11543_v51 = vld [vmem:[%s16228_s7 + $0xd8] sm:$0xff] }
 0x93b   : > { %7880 = vmatpush.bf16.msrb.mxu1 %v11547_v18 }
 0x93d   : > { %6572 = vmatmul.bf16.vlgmr.msra.gmra.mxu3 %v11458_v12  ;;  %6879 = vmatmul.bf16.gmra.mxu0 %v11473_v33  ;;  %v11555_v33 = vld [vmem:[%s16228_s7 + $0x138] sm:$0xff] }
 0x93e   : > { %7822 = vmatpush.bf16.msra.mxu3 %v11531_v27  ;;  %7909 = vmatpush.bf16.msrb.mxu2 %v11555_v33  ;;  %v11541_v27 = vld [vmem:[%s16228_s7 + $0xc8] sm:$0xff] }
 0x93f   : > { %7881 = vmatpush.bf16.msrb.mxu1 %v11546_v57 }
 0x942   : > { %7823 = vmatpush.bf16.msra.mxu3 %v11530_v55 }
 0x943   : > { %7882 = vmatpush.bf16.msrb.mxu1 %v11545_v15  ;;  %v11561_v15 = vld [vmem:[%s16228_s7 + $0x168] sm:$0xff] }
 0x946   : > { %7824 = vmatpush.bf16.msra.mxu3 %v11529_v8  ;;  %v11478_v8 = vld [vmem:[%s16227_s6 + $0x110] sm:$0xff] }
 0x947   : > { %7883 = vmatpush.bf16.msrb.mxu1 %v11544_v40 }
 0x94a   : > { %6645 = vmatmul.bf16.gmra.mxu1 %v11461_v16  ;;  %6723 = vmatmul.bf16.gmra.mxu2 %v11465_v31 }
 0x94b   : > { %7825 = vmatpush.bf16.msra.mxu3 %v11528_v17  ;;  %7884 = vmatpush.bf16.msrb.mxu1 %v11543_v51 }
 0x94d   : > { %6577 = vmatmul.bf16.gmra.mxu3 %v11459_v44  ;;  %6884 = vmatmul.bf16.gmra.mxu0 %v11474_v52  ;;  %v11542_v52 = vld [vmem:[%s16228_s7 + $0xd0] sm:$0xff] }
 0x94f   : > { %7826 = vmatpush.bf16.msra.mxu3 %v11527_v37  ;;  %7885 = vmatpush.bf16.msrb.mxu1 %v11542_v52 }
 0x953   : > { %7827 = vmatpush.bf16.msra.mxu3 %v11526_v47  ;;  %7886 = vmatpush.bf16.msrb.mxu1 %v11541_v27  ;;  %v11563_v47 = vld [vmem:[%s16228_s7 + $0x178] sm:$0xff] }
 0x954   : > { %v11571_v27 = vld [vmem:[%s16228_s7 + $0x1b8] sm:$0xff] }
 0x955   : > { %7967 = vmatpush.bf16.msrb.mxu0 %v11571_v27  ;;  %v11586_v27 = vld [vmem:[%s16228_s7 + $0x230] sm:$0xff] }
 0x957   : > { %7828 = vmatpush.bf16.msra.mxu3 %v11525_v60 }
 0x95a   : > { %6650 = vmatmul.bf16.gmra.mxu1 %v11462_v53  ;;  %6728 = vmatmul.bf16.gmra.mxu2 %v11466_v61  ;;  %v11554_v61 = vld [vmem:[%s16228_s7 + $0x130] sm:$0xff] }
 0x95b   : > { %7829 = vmatpush.bf16.msra.mxu3 %v11524_v38  ;;  %7910 = vmatpush.bf16.msrb.mxu2 %v11554_v61 }
 0x95d   : > { %6796 = vmatmul.bf16.vlgmr.msrb.gmra.mxu3 %v11468_v39  ;;  %6889 = vmatmul.bf16.gmra.mxu0 %v11475_v63 }
 0x95f   : > { %7911 = vmatpush.bf16.msrb.mxu2 %v11553_v29  ;;  %7938 = vmatpush.bf16.msrb.mxu3 %v11563_v47  ;;  %v11569_v47 = vld [vmem:[%s16228_s7 + $0x1a8] sm:$0xff] }
 0x963   : > { %7912 = vmatpush.bf16.msrb.mxu2 %v11552_v35 }
 0x967   : > { %7913 = vmatpush.bf16.msrb.mxu2 %v11551_v2 }
 0x96a   : > { %6655 = vmatmul.bf16.gmra.mxu1 %v11463_v58  ;;  %6733 = vmatmul.bf16.gmra.mxu2 %v11467_v36  ;;  %v11540_v58 = vld [vmem:[%s16228_s7 + $0xc0] sm:$0xff] }
 0x96b   : > { %7887 = vmatpush.bf16.msrb.mxu1 %v11540_v58  ;;  %v11570_v58 = vld [vmem:[%s16228_s7 + $0x1b0] sm:$0xff] }
 0x96c   : > { %7968 = vmatpush.bf16.msrb.mxu0 %v11570_v58 }
 0x96d   : > { %6801 = vmatmul.bf16.gmra.mxu3 %v11469_v34 }
 0x970   : > { %7969 = vmatpush.bf16.msrb.mxu0 %v11569_v47  ;;  %v11584_v47 = vld [vmem:[%s16228_s7 + $0x220] sm:$0xff] }
 0x977   : > { %v6329_v23 = vpop.f32.mrf.mxu1 }
 0x978   : > { %v6349_v25 = vpack.c.bf16 %v6329_v23, %v6329_v23 }
 0x97a   : > { %6357 = vst [vmem:[#allocation3] sm:$0xf] %v6349_v25  ;;  %6952 = vmatmul.bf16.vlgmr.msra.gmra.mxu1 %v11476_v43  ;;  %v6563_v32 = vpop.f32.mrf.mxu0  ;;  %v11562_v25 = vld [vmem:[%s16228_s7 + $0x170] sm:$0xff] }
 0x97b   : > { %v6583_v53 = vpack.c.bf16 %v6563_v32, %v6563_v32  ;;  %7939 = vmatpush.bf16.msrb.mxu3 %v11562_v25 }
 0x97d   : > { %6806 = vmatmul.bf16.gmra.mxu3 %v11470_v1  ;;  %v6407_v5 = vpop.f32.mrf.mxu2  ;;  %6591 = vst [vmem:[#allocation3 + $0xc] sm:$0xf] %v6583_v53 }
 0x97e   : > { %v6427_v20 = vpack.c.bf16 %v6407_v5, %v6407_v5 }
 0x97f   : > { %v6331_v13 = vpop.f32.mrf.mxu1  ;;  %7940 = vmatpush.bf16.msrb.mxu3 %v11561_v15 }
 0x980   : > { %v6485_v59 = vpop.f32.mrf.mxu3  ;;  %v6350_v50 = vpack.c.bf16 %v6331_v13, %v6331_v13  ;;  %6435 = vst [vmem:[#allocation3 + $0x4] sm:$0xf] %v6427_v20  ;;  %v11550_v20 = vld [vmem:[%s16228_s7 + $0x110] sm:$0xff] }
 0x981   : > { %v6505_v49 = vpack.c.bf16 %v6485_v59, %v6485_v59  ;;  %v10544_v45 = vld [vmem:[#allocation3] sm:$0xf]  ;;  %7914 = vmatpush.bf16.msrb.mxu2 %v11550_v20 }
 0x982   : > { %6358 = vst [vmem:[#allocation3 + $0x24] sm:$0xf] %v6350_v50  ;;  %v6565_v41 = vpop.f32.mrf.mxu0 }
 0x983   : > { %6513 = vst [vmem:[#allocation3 + $0x8] sm:$0xf] %v6505_v49  ;;  %v6584_v56 = vpack.c.bf16 %v6565_v41, %v6565_v41 }
 0x985   : > { %v6409_v26 = vpop.f32.mrf.mxu2  ;;  %6592 = vst [vmem:[#allocation3 + $0x30] sm:$0xf] %v6584_v56  ;;  %v11481_v56 = vld [vmem:[#allocation3 + $0xc] sm:$0xf] }
 0x986   : > { %v6428_v62 = vpack.c.bf16 %v6409_v26, %v6409_v26  ;;  %v11549_v26 = vld [vmem:[%s16228_s7 + $0x108] sm:$0xff] }
 0x987   : > { %v6334_v28 = vpop.f32.mrf.mxu1  ;;  %v11480_v54 = vld [vmem:[#allocation3 + $0x4] sm:$0xf]  ;;  %7915 = vmatpush.bf16.msrb.mxu2 %v11549_v26 }
 0x988   : > { %v6487_v46 = vpop.f32.mrf.mxu3  ;;  %v6351_v11 = vpack.c.bf16 %v6334_v28, %v6334_v28  ;;  %6436 = vst [vmem:[#allocation3 + $0x28] sm:$0xf] %v6428_v62 }
 0x989   : > { %v6506_v42 = vpack.c.bf16 %v6487_v46, %v6487_v46  ;;  %v11484_v21 = vld [vmem:[#allocation3 + $0x20] sm:$0xf0] }
 0x98a   : > { %6359 = vst [vmem:[#allocation3 + $0x48] sm:$0xf] %v6351_v11  ;;  %v10545_v12 = vor.u32 %v11484_v21, %v10544_v45  ;;  %6957 = vmatmul.bf16.gmra.mxu1 %v11477_v14  ;;  %v10552_v44 = vld [vmem:[#allocation3 + $0x8] sm:$0xf]  ;;  %v6568_v37 = vpop.f32.mrf.mxu0  ;;  %v11479_v14 = vld [vmem:[%s16227_s6 + $0x118] sm:$0xff]  ;;  %v11560_v11 = vld [vmem:[%s16228_s7 + $0x160] sm:$0xff] }
 0x98b   : > { %6514 = vst [vmem:[#allocation3 + $0x2c] sm:$0xf] %v6506_v42  ;;  %v6585_v49 = vpack.c.bf16 %v6568_v37, %v6568_v37  ;;  %7941 = vmatpush.bf16.msrb.mxu3 %v11560_v11  ;;  %v11566_v11 = vld [vmem:[%s16228_s7 + $0x190] sm:$0xff] }
 0x98c   : > { %7801 = vmatmul.bf16.vlgmr.msra.gmra.mxu2 %v10545_v12 }
 0x98d   : > { %6811 = vmatmul.bf16.gmra.mxu3 %v11471_v22  ;;  %v6412_v31 = vpop.f32.mrf.mxu2  ;;  %6593 = vst [vmem:[#allocation3 + $0x54] sm:$0xf] %v6585_v49 }
 0x98e   : > { %v6429_v10 = vpack.c.bf16 %v6412_v31, %v6412_v31 }
 0x98f   : > { %v6336_v6 = vpop.f32.mrf.mxu1  ;;  %v10546_v3 = vld [vmem:[#allocation3 + $0x24] sm:$0xf0] }
 0x990   : > { %v6490_v4 = vpop.f32.mrf.mxu3  ;;  %v6352_v48 = vpack.c.bf16 %v6336_v6, %v6336_v6  ;;  %6437 = vst [vmem:[#allocation3 + $0x4c] sm:$0xf] %v6429_v10  ;;  %v10549_v0 = vor.u32 %v11480_v54, %v10546_v3  ;;  %v11557_v54 = vld [vmem:[%s16228_s7 + $0x148] sm:$0xff]  ;;  %v10554_v3 = vld [vmem:[#allocation3 + $0x2c] sm:$0xf0] }
 0x991   : > { %v6507_v16 = vpack.c.bf16 %v6490_v4, %v6490_v4  ;;  %v10580_v17 = vld [vmem:[#allocation3 + $0x48] sm:$0xf]  ;;  %v11548_v4 = vld [vmem:[%s16228_s7 + $0x100] sm:$0xff] }
 0x992   : > { %v11485_v7 = vld [vmem:[#allocation3 + $0x28] sm:$0xf0]  ;;  %6360 = vst [vmem:[#allocation3 + $0x6c] sm:$0xf] %v6352_v48  ;;  %v6570_v57 = vpop.f32.mrf.mxu0  ;;  %7916 = vmatpush.bf16.msrb.mxu2 %v11548_v4 }
 0x993   : > { %6515 = vst [vmem:[#allocation3 + $0x50] sm:$0xf] %v6507_v16  ;;  %v10553_v39 = vor.u32 %v11485_v7, %v10552_v44  ;;  %v6586_v50 = vpack.c.bf16 %v6570_v57, %v6570_v57  ;;  %v11559_v44 = vld [vmem:[%s16228_s7 + $0x158] sm:$0xff]  ;;  %v11558_v7 = vld [vmem:[%s16228_s7 + $0x150] sm:$0xff] }
 0x994   : > { %7942 = vmatpush.bf16.msrb.mxu3 %v11559_v44  ;;  %v11567_v57 = vld [vmem:[%s16228_s7 + $0x198] sm:$0xff] }
 0x995   : > { %7859 = vmatmul.bf16.vlgmr.msra.gmra.mxu0 %v10553_v39  ;;  %v6414_v63 = vpop.f32.mrf.mxu2  ;;  %6594 = vst [vmem:[#allocation3 + $0x78] sm:$0xf] %v6586_v50 }
 0x996   : > { %v6430_v30 = vpack.c.bf16 %v6414_v63, %v6414_v63 }
 0x997   : > { %v6339_v34 = vpop.f32.mrf.mxu1  ;;  %v11489_v46 = vld [vmem:[#allocation3 + $0x4c] sm:$0xf] }
 0x998   : > { %v6492_v55 = vpop.f32.mrf.mxu3  ;;  %v6353_v19 = vpack.c.bf16 %v6339_v34, %v6339_v34  ;;  %6438 = vst [vmem:[#allocation3 + $0x70] sm:$0xf] %v6430_v30  ;;  %7943 = vmatpush.bf16.msrb.mxu3 %v11558_v7  ;;  %v11556_v34 = vld [vmem:[%s16228_s7 + $0x140] sm:$0xff] }
 0x999   : > { %v6508_v24 = vpack.c.bf16 %v6492_v55, %v6492_v55  ;;  %v11493_v36 = vld [vmem:[#allocation3 + $0x68] sm:$0xf0] }
 0x99a   : > { %v10581_v9 = vor.u32 %v11493_v36, %v10580_v17  ;;  %6361 = vst [vmem:[#allocation3 + $0x90] sm:$0xf] %v6353_v19  ;;  %6962 = vmatmul.bf16.gmra.mxu1 %v11478_v8  ;;  %v10588_v60 = vld [vmem:[#allocation3 + $0x50] sm:$0xf]  ;;  %v10557_v8 = vor.u32 %v11481_v56, %v10554_v3  ;;  %v11576_v56 = vld [vmem:[%s16228_s7 + $0x1e0] sm:$0xff] }
 0x99b   : > { %6516 = vst [vmem:[#allocation3 + $0x74] sm:$0xf] %v6508_v24 }
 0x99c   : > { %7806 = vmatmul.bf16.gmra.mxu2 %v10581_v9  ;;  %7944 = vmatpush.bf16.msrb.mxu3 %v11557_v54  ;;  %v10590_v50 = vld [vmem:[#allocation3 + $0x74] sm:$0xf0] }
 0x99d   : > { %7830 = vmatmul.bf16.vlgmr.msra.gmra.mxu3 %v10549_v0  ;;  %v6417_v43 = vpop.f32.mrf.mxu2 }
 0x99e   : > { %v6431_v59 = vpack.c.bf16 %v6417_v43, %v6417_v43 }
 0x99f   : > { %v6341_v18 = vpop.f32.mrf.mxu1  ;;  %v10582_v42 = vld [vmem:[#allocation3 + $0x6c] sm:$0xf0] }
 0x9a0   : > { %v6495_v23 = vpop.f32.mrf.mxu3  ;;  %v6354_v13 = vpack.c.bf16 %v6341_v18, %v6341_v18  ;;  %6439 = vst [vmem:[#allocation3 + $0x94] sm:$0xf] %v6431_v59  ;;  %v10585_v40 = vor.u32 %v11489_v46, %v10582_v42  ;;  %7945 = vmatpush.bf16.msrb.mxu3 %v11556_v34  ;;  %v11579_v42 = vld [vmem:[%s16228_s7 + $0x1f8] sm:$0xff] }
 0x9a1   : > { %v6509_v1 = vpack.c.bf16 %v6495_v23, %v6495_v23  ;;  %v10616_v12 = vld [vmem:[#allocation3 + $0x90] sm:$0xf]  ;;  %11604 = vmatpush.bf16.msra.mxu1 %v11579_v42 }
 0x9a2   : > { %v11494_v38 = vld [vmem:[#allocation3 + $0x70] sm:$0xf0]  ;;  %6362 = vst [vmem:[#allocation3 + $0xb4] sm:$0xf] %v6354_v13 }
 0x9a3   : > { %v10589_v5 = vor.u32 %v11494_v38, %v10588_v60  ;;  %6517 = vst [vmem:[#allocation3 + $0x98] sm:$0xf] %v6509_v1  ;;  %v11568_v38 = vld [vmem:[%s16228_s7 + $0x1a0] sm:$0xff]  ;;  %v11490_v13 = vld [vmem:[#allocation3 + $0x54] sm:$0xf] }
 0x9a4   : > { %7970 = vmatpush.bf16.msrb.mxu0 %v11568_v38  ;;  %v11583_v38 = vld [vmem:[%s16228_s7 + $0x218] sm:$0xff] }
 0x9a5   : > { %7864 = vmatmul.bf16.gmra.mxu0 %v10589_v5  ;;  %v6419_v62 = vpop.f32.mrf.mxu2 }
 0x9a6   : > { %v6432_v45 = vpack.c.bf16 %v6419_v62, %v6419_v62 }
 0x9a7   : > { %v6344_v32 = vpop.f32.mrf.mxu1  ;;  %v11498_v55 = vld [vmem:[#allocation3 + $0x94] sm:$0xf] }
 0x9a8   : > { %v6497_v28 = vpop.f32.mrf.mxu3  ;;  %v6355_v21 = vpack.c.bf16 %v6344_v32, %v6344_v32  ;;  %6440 = vst [vmem:[#allocation3 + $0xb8] sm:$0xf] %v6432_v45  ;;  %7971 = vmatpush.bf16.msrb.mxu0 %v11567_v57  ;;  %v11572_v57 = vld [vmem:[%s16228_s7 + $0x1c0] sm:$0xff] }
 0x9a9   : > { %v6510_v22 = vpack.c.bf16 %v6497_v28, %v6497_v28  ;;  %v11502_v51 = vld [vmem:[#allocation3 + $0xb0] sm:$0xf0] }
 0x9aa   : > { %6363 = vst [vmem:[#allocation3 + $0xd8] sm:$0xf] %v6355_v21  ;;  %6967 = vmatmul.bf16.gmra.mxu1 %v11479_v14  ;;  %v10617_v33 = vor.u32 %v11502_v51, %v10616_v12  ;;  %v10624_v31 = vld [vmem:[#allocation3 + $0x98] sm:$0xf]  ;;  %v6875_v61 = vpop.f32.mrf.mxu0  ;;  %v10593_v14 = vor.u32 %v11490_v13, %v10590_v50  ;;  %v11578_v12 = vld [vmem:[%s16228_s7 + $0x1f0] sm:$0xff] }
 0x9ab   : > { %6518 = vst [vmem:[#allocation3 + $0xbc] sm:$0xf] %v6510_v22  ;;  %v6895_v20 = vpack.c.bf16 %v6875_v61, %v6875_v61  ;;  %11605 = vmatpush.bf16.msra.mxu1 %v11578_v12  ;;  %v11582_v50 = vld [vmem:[%s16228_s7 + $0x210] sm:$0xff] }
 0x9ac   : > { %7811 = vmatmul.bf16.gmra.mxu2 %v10617_v33  ;;  %7972 = vmatpush.bf16.msrb.mxu0 %v11566_v11 }
 0x9ad   : > { %7835 = vmatmul.bf16.gmra.mxu3 %v10585_v40  ;;  %v6422_v10 = vpop.f32.mrf.mxu2  ;;  %6903 = vst [vmem:[#allocation3 + $0x1c] sm:$0xf] %v6895_v20 }
 0x9ae   : > { %v6433_v48 = vpack.c.bf16 %v6422_v10, %v6422_v10 }
 0x9af   : > { %v6346_v52 = vpop.f32.mrf.mxu1  ;;  %v10618_v29 = vld [vmem:[#allocation3 + $0xb4] sm:$0xf0] }
 0x9b0   : > { %v6500_v16 = vpop.f32.mrf.mxu3  ;;  %v6356_v39 = vpack.c.bf16 %v6346_v52, %v6346_v52  ;;  %6441 = vst [vmem:[#allocation3 + $0xdc] sm:$0xf] %v6433_v48  ;;  %v10621_v0 = vor.u32 %v11498_v55, %v10618_v29  ;;  %v11564_v48 = vld [vmem:[%s16228_s7 + $0x180] sm:$0xff]  ;;  %v11575_v29 = vld [vmem:[%s16228_s7 + $0x1d8] sm:$0xff] }
 0x9b1   : > { %v6511_v6 = vpack.c.bf16 %v6500_v16, %v6500_v16  ;;  %v10652_v35 = vld [vmem:[#allocation3 + $0xd8] sm:$0xf]  ;;  %v11565_v16 = vld [vmem:[%s16228_s7 + $0x188] sm:$0xff] }
 0x9b2   : > { %v11503_v53 = vld [vmem:[#allocation3 + $0xb8] sm:$0xf0]  ;;  %6364 = vst [vmem:[#allocation3 + $0xfc] sm:$0xf] %v6356_v39  ;;  %v6877_v2 = vpop.f32.mrf.mxu0  ;;  %7973 = vmatpush.bf16.msrb.mxu0 %v11565_v16 }
 0x9b3   : > { %6519 = vst [vmem:[#allocation3 + $0xe0] sm:$0xf] %v6511_v6  ;;  %v10625_v41 = vor.u32 %v11503_v53, %v10624_v31  ;;  %v6896_v44 = vpack.c.bf16 %v6877_v2, %v6877_v2  ;;  %v11577_v31 = vld [vmem:[%s16228_s7 + $0x1e8] sm:$0xff]  ;;  %v11587_v6 = vld [vmem:[%s16228_s7 + $0x238] sm:$0xff] }
 0x9b4   : > { %8025 = vmatpush.bf16.msra.mxu2 %v11587_v6  ;;  %11606 = vmatpush.bf16.msra.mxu1 %v11577_v31 }
 0x9b5   : > { %7869 = vmatmul.bf16.gmra.mxu0 %v10625_v41  ;;  %v6424_v30 = vpop.f32.mrf.mxu2  ;;  %6904 = vst [vmem:[#allocation3 + $0x40] sm:$0xf] %v6896_v44 }
 0x9b6   : > { %v6434_v19 = vpack.c.bf16 %v6424_v30, %v6424_v30  ;;  %7974 = vmatpush.bf16.msrb.mxu0 %v11564_v48 }
 0x9b7   : > { %v6641_v17 = vpop.f32.mrf.mxu1  ;;  %v11507_v15 = vld [vmem:[#allocation3 + $0xdc] sm:$0xf] }
 0x9b8   : > { %v6502_v24 = vpop.f32.mrf.mxu3  ;;  %v6661_v36 = vpack.c.bf16 %v6641_v17, %v6641_v17  ;;  %6442 = vst [vmem:[#allocation3 + $0x100] sm:$0xf] %v6434_v19  ;;  %8026 = vmatpush.bf16.msra.mxu2 %v11586_v27  ;;  %11607 = vmatpush.bf16.msra.mxu1 %v11576_v56 }
 0x9b9   : > { %v6512_v63 = vpack.c.bf16 %v6502_v24, %v6502_v24  ;;  %v11511_v37 = vld [vmem:[#allocation3 + $0xf8] sm:$0xf0]  ;;  %v11585_v24 = vld [vmem:[%s16228_s7 + $0x228] sm:$0xff] }
 0x9ba   : > { %6669 = vst [vmem:[#allocation3 + $0x10] sm:$0xf] %v6661_v36  ;;  %v10653_v9 = vor.u32 %v11511_v37, %v10652_v35  ;;  %7888 = vmatmul.bf16.vlgmr.msrb.gmra.mxu1 %v10557_v8  ;;  %v10660_v23 = vld [vmem:[#allocation3 + $0xe0] sm:$0xf]  ;;  %v6880_v28 = vpop.f32.mrf.mxu0  ;;  %7996 = vmatpush.bf16.msra.mxu0 %v11579_v42 }
 0x9bb   : > { %6520 = vst [vmem:[#allocation3 + $0x104] sm:$0xf] %v6512_v63  ;;  %v6897_v54 = vpack.c.bf16 %v6880_v28, %v6880_v28 }
 0x9bc   : > { %7816 = vmatmul.bf16.gmra.mxu2 %v10653_v9  ;;  %11608 = vmatpush.bf16.msra.mxu1 %v11575_v29  ;;  %v11574_v9 = vld [vmem:[%s16228_s7 + $0x1d0] sm:$0xff] }
 0x9bd   : > { %7840 = vmatmul.bf16.gmra.mxu3 %v10621_v0  ;;  %v6719_v43 = vpop.f32.mrf.mxu2  ;;  %6905 = vst [vmem:[#allocation3 + $0x64] sm:$0xf] %v6897_v54  ;;  %8027 = vmatpush.bf16.msra.mxu2 %v11585_v24 }
 0x9be   : > { %v6739_v18 = vpack.c.bf16 %v6719_v43, %v6719_v43  ;;  %7997 = vmatpush.bf16.msra.mxu0 %v11578_v12  ;;  %v11573_v43 = vld [vmem:[%s16228_s7 + $0x1c8] sm:$0xff] }
 0x9bf   : > { %v6643_v25 = vpop.f32.mrf.mxu1  ;;  %v10654_v46 = vld [vmem:[#allocation3 + $0xfc] sm:$0xf0] }
 0x9c0   : > { %v6573_v60 = vpop.f32.mrf.mxu3  ;;  %v6662_v49 = vpack.c.bf16 %v6643_v25, %v6643_v25  ;;  %6747 = vst [vmem:[#allocation3 + $0x14] sm:$0xf] %v6739_v18  ;;  %v10657_v40 = vor.u32 %v11507_v15, %v10654_v46  ;;  %11609 = vmatpush.bf16.msra.mxu1 %v11574_v9 }
 0x9c1   : > { %v6587_v1 = vpack.c.bf16 %v6573_v60, %v6573_v60  ;;  %v10560_v51 = vld [vmem:[#allocation3 + $0x10] sm:$0xf]  ;;  %8028 = vmatpush.bf16.msra.mxu2 %v11584_v47 }
 0x9c2   : > { %v11512_v59 = vld [vmem:[#allocation3 + $0x100] sm:$0xf0]  ;;  %6670 = vst [vmem:[#allocation3 + $0x34] sm:$0xf] %v6662_v49  ;;  %v6882_v41 = vpop.f32.mrf.mxu0  ;;  %7998 = vmatpush.bf16.msra.mxu0 %v11577_v31 }
 0x9c3   : > { %6595 = vst [vmem:[#allocation3 + $0x9c] sm:$0xf] %v6587_v1  ;;  %v10661_v5 = vor.u32 %v11512_v59, %v10660_v23  ;;  %v6898_v37 = vpack.c.bf16 %v6882_v41, %v6882_v41 }
 0x9c4   : > { %11610 = vmatpush.bf16.msra.mxu1 %v11573_v43  ;;  %v11492_v27 = vld [vmem:[#allocation3 + $0x64] sm:$0xf] }
 0x9c5   : > { %7874 = vmatmul.bf16.gmra.mxu0 %v10661_v5  ;;  %v6721_v62 = vpop.f32.mrf.mxu2  ;;  %6906 = vst [vmem:[#allocation3 + $0x88] sm:$0xf] %v6898_v37  ;;  %8029 = vmatpush.bf16.msra.mxu2 %v11583_v38 }
 0x9c6   : > { %v6740_v45 = vpack.c.bf16 %v6721_v62, %v6721_v62  ;;  %7999 = vmatpush.bf16.msra.mxu0 %v11576_v56 }
 0x9c7   : > { %v6646_v32 = vpop.f32.mrf.mxu1  ;;  %v11482_v3 = vld [vmem:[#allocation3 + $0x14] sm:$0xf] }
 0x9c8   : > { %v6575_v26 = vpop.f32.mrf.mxu3  ;;  %v6663_v21 = vpack.c.bf16 %v6646_v32, %v6646_v32  ;;  %6748 = vst [vmem:[#allocation3 + $0x38] sm:$0xf] %v6740_v45  ;;  %11611 = vmatpush.bf16.msra.mxu1 %v11572_v57 }
 0x9c9   : > { %v6588_v22 = vpack.c.bf16 %v6575_v26, %v6575_v26  ;;  %v11486_v4 = vld [vmem:[#allocation3 + $0x30] sm:$0xf0]  ;;  %8030 = vmatpush.bf16.msra.mxu2 %v11582_v50  ;;  %v11581_v26 = vld [vmem:[%s16228_s7 + $0x208] sm:$0xff] }
 0x9ca   : > { %6671 = vst [vmem:[#allocation3 + $0x58] sm:$0xf] %v6663_v21  ;;  %v10561_v33 = vor.u32 %v11486_v4, %v10560_v51  ;;  %7893 = vmatmul.bf16.gmra.mxu1 %v10593_v14  ;;  %v11499_v8 = vld [vmem:[#allocation3 + $0x9c] sm:$0xf]  ;;  %v6885_v23 = vpop.f32.mrf.mxu0  ;;  %8000 = vmatpush.bf16.msra.mxu0 %v11575_v29  ;;  %v11580_v4 = vld [vmem:[%s16228_s7 + $0x200] sm:$0xff] }
 0x9cb   : > { %6596 = vst [vmem:[#allocation3 + $0xc0] sm:$0xf] %v6588_v22  ;;  %v6899_v20 = vpack.c.bf16 %v6885_v23, %v6885_v23 }
 0x9cc   : > { %7917 = vmatmul.bf16.vlgmr.msrb.gmra.mxu2 %v10561_v33  ;;  %v10606_v54 = vld [vmem:[#allocation3 + $0x84] sm:$0xf0] }
 0x9cd   : > { %7845 = vmatmul.bf16.gmra.mxu3 %v10657_v40  ;;  %v6724_v52 = vpop.f32.mrf.mxu2  ;;  %6907 = vst [vmem:[#allocation3 + $0xac] sm:$0xf] %v6899_v20  ;;  %8031 = vmatpush.bf16.msra.mxu2 %v11581_v26 }
 0x9ce   : > { %v6741_v39 = vpack.c.bf16 %v6724_v52, %v6724_v52  ;;  %8001 = vmatpush.bf16.msra.mxu0 %v11574_v9 }
 0x9cf   : > { %v6648_v53 = vpop.f32.mrf.mxu1  ;;  %v10562_v55 = vld [vmem:[#allocation3 + $0x34] sm:$0xf0] }
 0x9d0   : > { %v6578_v10 = vpop.f32.mrf.mxu3  ;;  %v6664_v61 = vpack.c.bf16 %v6648_v53, %v6648_v53  ;;  %6749 = vst [vmem:[#allocation3 + $0x5c] sm:$0xf] %v6741_v39  ;;  %v10565_v34 = vor.u32 %v11482_v3, %v10562_v55 }
 0x9d1   : > { %v6589_v7 = vpack.c.bf16 %v6578_v10, %v6578_v10  ;;  %v10596_v2 = vld [vmem:[#allocation3 + $0x58] sm:$0xf]  ;;  %8032 = vmatpush.bf16.msra.mxu2 %v11580_v4 }
 0x9d2   : > { %6672 = vst [vmem:[#allocation3 + $0x7c] sm:$0xf] %v6664_v61  ;;  %v10626_v30 = vld [vmem:[#allocation3 + $0xbc] sm:$0xf0]  ;;  %v6887_v42 = vpop.f32.mrf.mxu0  ;;  %8002 = vmatpush.bf16.msra.mxu0 %v11573_v43 }
 0x9d3   : > { %6597 = vst [vmem:[#allocation3 + $0xe4] sm:$0xf] %v6589_v7  ;;  %v10629_v35 = vor.u32 %v11499_v8, %v10626_v30  ;;  %v6900_v51 = vpack.c.bf16 %v6887_v42, %v6887_v42 }
 0x9d4   : > { %v11501_v38 = vld [vmem:[#allocation3 + $0xac] sm:$0xf] }
 0x9d5   : > { %v6726_v58 = vpop.f32.mrf.mxu2  ;;  %6908 = vst [vmem:[#allocation3 + $0xd0] sm:$0xf] %v6900_v51 }
 0x9d6   : > { %v6742_v19 = vpack.c.bf16 %v6726_v58, %v6726_v58  ;;  %8003 = vmatpush.bf16.msra.mxu0 %v11572_v57 }
 0x9d7   : > { %v6651_v17 = vpop.f32.mrf.mxu1  ;;  %v11491_v15 = vld [vmem:[#allocation3 + $0x5c] sm:$0xf] }
 0x9d8   : > { %v6580_v63 = vpop.f32.mrf.mxu3  ;;  %v6665_v36 = vpack.c.bf16 %v6651_v17, %v6651_v17  ;;  %6750 = vst [vmem:[#allocation3 + $0x80] sm:$0xf] %v6742_v19 }
 0x9d9   : > { %v6590_v0 = vpack.c.bf16 %v6580_v63, %v6580_v63  ;;  %v11495_v60 = vld [vmem:[#allocation3 + $0x78] sm:$0xf0]  ;;  %v10609_v63 = vor.u32 %v11492_v27, %v10606_v54 }
 0x9da   : > { %6673 = vst [vmem:[#allocation3 + $0xa0] sm:$0xf] %v6665_v36  ;;  %v10597_v1 = vor.u32 %v11495_v60, %v10596_v2  ;;  %7898 = vmatmul.bf16.gmra.mxu1 %v10629_v35  ;;  %v11508_v22 = vld [vmem:[#allocation3 + $0xe4] sm:$0xf]  ;;  %v6890_v10 = vpop.f32.mrf.mxu0 }
 0x9db   : > { %6598 = vst [vmem:[#allocation3 + $0x108] sm:$0xf] %v6590_v0  ;;  %v6901_v56 = vpack.c.bf16 %v6890_v10, %v6890_v10 }
 0x9dc   : > { %7922 = vmatmul.bf16.gmra.mxu2 %v10597_v1 }
 0x9dd   : > { %7946 = vmatmul.bf16.vlgmr.msrb.gmra.mxu3 %v10565_v34  ;;  %v6729_v59 = vpop.f32.mrf.mxu2  ;;  %6909 = vst [vmem:[#allocation3 + $0xf4] sm:$0xf] %v6901_v56 }
 0x9de   : > { %v6743_v5 = vpack.c.bf16 %v6729_v59, %v6729_v59 }
 0x9df   : > { %v6653_v49 = vpop.f32.mrf.mxu1  ;;  %v10598_v46 = vld [vmem:[#allocation3 + $0x7c] sm:$0xf0] }
 0x9e0   : > { %v6797_v25 = vpop.f32.mrf.mxu3  ;;  %v6666_v13 = vpack.c.bf16 %v6653_v49, %v6653_v49  ;;  %6751 = vst [vmem:[#allocation3 + $0xa4] sm:$0xf] %v6743_v5  ;;  %v10601_v11 = vor.u32 %v11491_v15, %v10598_v46 }
 0x9e1   : > { %v6817_v18 = vpack.c.bf16 %v6797_v25, %v6797_v25  ;;  %v10632_v33 = vld [vmem:[#allocation3 + $0xa0] sm:$0xf]  ;;  %v10642_v25 = vld [vmem:[#allocation3 + $0xcc] sm:$0xf0] }
 0x9e2   : > { %6674 = vst [vmem:[#allocation3 + $0xc4] sm:$0xf] %v6666_v13  ;;  %v10662_v14 = vld [vmem:[#allocation3 + $0x104] sm:$0xf0]  ;;  %v6892_v34 = vpop.f32.mrf.mxu0  ;;  %v10645_v13 = vor.u32 %v11501_v38, %v10642_v25 }
 0x9e3   : > { %6825 = vst [vmem:[#allocation3 + $0x18] sm:$0xf] %v6817_v18  ;;  %v10665_v12 = vor.u32 %v11508_v22, %v10662_v14  ;;  %v6902_v19 = vpack.c.bf16 %v6892_v34, %v6892_v34 }
 0x9e5   : > { %v6731_v40 = vpop.f32.mrf.mxu2  ;;  %6910 = vst [vmem:[#allocation3 + $0x118] sm:$0xf] %v6902_v19 }
 0x9e6   : > { %v6744_v45 = vpack.c.bf16 %v6731_v40, %v6731_v40 }
 0x9e7   : > { %v6656_v32 = vpop.f32.mrf.mxu1  ;;  %v11500_v3 = vld [vmem:[#allocation3 + $0xa4] sm:$0xf] }
 0x9e8   : > { %v6799_v28 = vpop.f32.mrf.mxu3  ;;  %v6667_v21 = vpack.c.bf16 %v6656_v32, %v6656_v32  ;;  %6752 = vst [vmem:[#allocation3 + $0xc8] sm:$0xf] %v6744_v45 }
 0x9e9   : > { %v6818_v62 = vpack.c.bf16 %v6799_v28, %v6799_v28  ;;  %v11504_v44 = vld [vmem:[#allocation3 + $0xc0] sm:$0xf0] }
 0x9ea   : > { %6675 = vst [vmem:[#allocation3 + $0xe8] sm:$0xf] %v6667_v21  ;;  %v10633_v16 = vor.u32 %v11504_v44, %v10632_v33  ;;  %7903 = vmatmul.bf16.gmra.mxu1 %v10665_v12  ;;  %v10568_v6 = vld [vmem:[#allocation3 + $0x18] sm:$0xf]  ;;  %v11510_v21 = vld [vmem:[#allocation3 + $0xf4] sm:$0xf] }
 0x9eb   : > { %6826 = vst [vmem:[#allocation3 + $0x3c] sm:$0xf] %v6818_v62 }
 0x9ec   : > { %7927 = vmatmul.bf16.gmra.mxu2 %v10633_v16  ;;  %v10678_v12 = vld [vmem:[#allocation3 + $0x114] sm:$0xf0] }
 0x9ed   : > { %7951 = vmatmul.bf16.gmra.mxu3 %v10601_v11  ;;  %v6734_v52 = vpop.f32.mrf.mxu2  ;;  %v10681_v44 = vor.u32 %v11510_v21, %v10678_v12 }
 0x9ee   : > { %v6745_v39 = vpack.c.bf16 %v6734_v52, %v6734_v52 }
 0x9ef   : > { %v6658_v48 = vpop.f32.mrf.mxu1  ;;  %v10634_v55 = vld [vmem:[#allocation3 + $0xc4] sm:$0xf0] }
 0x9f0   : > { %v6802_v31 = vpop.f32.mrf.mxu3  ;;  %v6668_v41 = vpack.c.bf16 %v6658_v48, %v6658_v48  ;;  %6753 = vst [vmem:[#allocation3 + $0xec] sm:$0xf] %v6745_v39  ;;  %v10637_v30 = vor.u32 %v11500_v3, %v10634_v55 }
 0x9f1   : > { %v6819_v7 = vpack.c.bf16 %v6802_v31, %v6802_v31  ;;  %v10668_v36 = vld [vmem:[#allocation3 + $0xe8] sm:$0xf]  ;;  %v16157_v31 = vld [vmem:[%s16229_s8] ss:$0 sm:$0xff] }
 0x9f2   : > { %v11487_v53 = vld [vmem:[#allocation3 + $0x38] sm:$0xf0]  ;;  %6676 = vst [vmem:[#allocation3 + $0x10c] sm:$0xf] %v6668_v41 }
 0x9f3   : > { %6827 = vst [vmem:[#allocation3 + $0x60] sm:$0xf] %v6819_v7  ;;  %v10569_v61 = vor.u32 %v11487_v53, %v10568_v6 }
 0x9f5   : > { %7975 = vmatmul.bf16.vlgmr.msrb.gmra.mxu0 %v10569_v61  ;;  %v6736_v8 = vpop.f32.mrf.mxu2 }
 0x9f6   : > { %v6746_v58 = vpack.c.bf16 %v6736_v8, %v6736_v8 }
 0x9f7   : > { %v6953_v0 = vpop.f32.mrf.mxu1  ;;  %v11509_v18 = vld [vmem:[#allocation3 + $0xec] sm:$0xf] }
 0x9f8   : > { %v6804_v29 = vpop.f32.mrf.mxu3  ;;  %v6973_v17 = vpack.c.bf16 %v6953_v0, %v6953_v0  ;;  %6754 = vst [vmem:[#allocation3 + $0x110] sm:$0xf] %v6746_v58 }
 0x9f9   : > { %v6820_v24 = vpack.c.bf16 %v6804_v29, %v6804_v29  ;;  %v11513_v35 = vld [vmem:[#allocation3 + $0x108] sm:$0xf0] }
 0x9fa   : > { %6981 = vst [vmem:[#allocation3 + $0x20] sm:$0xf] %v6973_v17  ;;  %v10669_v37 = vor.u32 %v11513_v35, %v10668_v36  ;;  %8009 = vmatmul.bf16.vlgmr.msra.gmra.mxu1 %v10609_v63  ;;  %v10604_v47 = vld [vmem:[#allocation3 + $0x60] sm:$0xf] }
 0x9fb   : > { %6828 = vst [vmem:[#allocation3 + $0x84] sm:$0xf] %v6820_v24 }
 0x9fc   : > { %7932 = vmatmul.bf16.gmra.mxu2 %v10669_v37 }
 0x9fd   : > { %7956 = vmatmul.bf16.gmra.mxu3 %v10637_v30 }
 0x9ff   : > { %v6955_v60 = vpop.f32.mrf.mxu1  ;;  %v10670_v59 = vld [vmem:[#allocation3 + $0x10c] sm:$0xf0] }
 0xa00   : > { %v6807_v9 = vpop.f32.mrf.mxu3  ;;  %v6974_v1 = vpack.c.bf16 %v6955_v60, %v6955_v60  ;;  %v10673_v20 = vor.u32 %v11509_v18, %v10670_v59 }
 0xa01   : > { %v6821_v2 = vpack.c.bf16 %v6807_v9, %v6807_v9  ;;  %v10576_v15 = vld [vmem:[#allocation3 + $0x20] sm:$0xf]  ;;  %v11483_v9 = vld [vmem:[#allocation3 + $0x1c] sm:$0xf] }
 0xa02   : > { %v11496_v23 = vld [vmem:[#allocation3 + $0x80] sm:$0xf0]  ;;  %6982 = vst [vmem:[#allocation3 + $0x44] sm:$0xf] %v6974_v1 }
 0xa03   : > { %6829 = vst [vmem:[#allocation3 + $0xa8] sm:$0xf] %v6821_v2  ;;  %v10605_v43 = vor.u32 %v11496_v23, %v10604_v47  ;;  %v10570_v47 = vld [vmem:[#allocation3 + $0x3c] sm:$0xf0] }
 0xa04   : > { %v10573_v25 = vor.u32 %v11483_v9, %v10570_v47 }
 0xa05   : > { %7980 = vmatmul.bf16.gmra.mxu0 %v10605_v43 }
 0xa07   : > { %v6958_v57 = vpop.f32.mrf.mxu1 }
 0xa08   : > { %v6809_v49 = vpop.f32.mrf.mxu3  ;;  %v6975_v50 = vpack.c.bf16 %v6958_v57, %v6958_v57 }
 0xa09   : > { %v6822_v5 = vpack.c.bf16 %v6809_v49, %v6809_v49  ;;  %v11488_v46 = vld [vmem:[#allocation3 + $0x40] sm:$0xf0] }
 0xa0a   : > { %6983 = vst [vmem:[#allocation3 + $0x68] sm:$0xf] %v6975_v50  ;;  %v10577_v42 = vor.u32 %v11488_v46, %v10576_v15  ;;  %8014 = vmatmul.bf16.gmra.mxu1 %v10645_v13  ;;  %v10640_v28 = vld [vmem:[#allocation3 + $0xa8] sm:$0xf] }
 0xa0b   : > { %6830 = vst [vmem:[#allocation3 + $0xcc] sm:$0xf] %v6822_v5 }
 0xa0c   : > { %8033 = vmatmul.bf16.vlgmr.msra.gmra.mxu2 %v10577_v42 }
 0xa0d   : > { %7961 = vmatmul.bf16.gmra.mxu3 %v10673_v20 }
 0xa0f   : > { %v7802_v14 = vpop.f32.mrf.mxu2  ;;  %v6960_v62 = vpop.f32.mrf.mxu1 }
 0xa10   : > { %v6812_v26 = vpop.f32.mrf.mxu3  ;;  %v6976_v11 = vpack.c.bf16 %v6960_v62, %v6960_v62  ;;  %v7803_v53 = vadd.f32 %v16157_v31, %v7802_v14 }
 0xa11   : > { %v6823_v22 = vpack.c.bf16 %v6812_v26, %v6812_v26  ;;  %v10612_v10 = vld [vmem:[#allocation3 + $0x68] sm:$0xf] }
 0xa12   : > { %v11505_v40 = vld [vmem:[#allocation3 + $0xc8] sm:$0xf0]  ;;  %v7860_v45 = vpop.f32.mrf.mxu0  ;;  %6984 = vst [vmem:[#allocation3 + $0x8c] sm:$0xf] %v6976_v11 }
 0xa13   : > { %6831 = vst [vmem:[#allocation3 + $0xf0] sm:$0xf] %v6823_v22  ;;  %v10641_v32 = vor.u32 %v11505_v40, %v10640_v28 }
 0xa15   : > { %7985 = vmatmul.bf16.gmra.mxu0 %v10641_v32 }
 0xa17   : > { %v7804_v33 = vpop.f32.mrf.mxu2  ;;  %v6963_v16 = vpop.f32.mrf.mxu1 }
 0xa18   : > { %v6814_v51 = vpop.f32.mrf.mxu3  ;;  %v6977_v6 = vpack.c.bf16 %v6963_v16, %v6963_v16  ;;  %v7805_v24 = vadd.f32 %v16157_v31, %v7804_v33 }
 0xa19   : > { %v6824_v4 = vpack.c.bf16 %v6814_v51, %v6814_v51  ;;  %v11497_v7 = vld [vmem:[#allocation3 + $0x88] sm:$0xf0] }
 0xa1a   : > { %6985 = vst [vmem:[#allocation3 + $0xb0] sm:$0xf] %v6977_v6  ;;  %v10613_v52 = vor.u32 %v11497_v7, %v10612_v10  ;;  %8019 = vmatmul.bf16.gmra.mxu1 %v10681_v44  ;;  %v7862_v48 = vpop.f32.mrf.mxu0  ;;  %v10676_v39 = vld [vmem:[#allocation3 + $0xf0] sm:$0xf] }
 0xa1b   : > { %6832 = vst [vmem:[#allocation3 + $0x114] sm:$0xf] %v6824_v4 }
 0xa1c   : > { %8038 = vmatmul.bf16.gmra.mxu2 %v10613_v52 }
 0xa1f   : > { %v7807_v61 = vpop.f32.mrf.mxu2  ;;  %v6965_v27 = vpop.f32.mrf.mxu1 }
 0xa20   : > { %v7831_v41 = vpop.f32.mrf.mxu3  ;;  %v6978_v3 = vpack.c.bf16 %v6965_v27, %v6965_v27  ;;  %v7808_v37 = vadd.f32 %v16157_v31, %v7807_v61 }
 0xa21   : > { %v7832_v56 = vadd.f32 %v7831_v41, %v7803_v53  ;;  %v10648_v19 = vld [vmem:[#allocation3 + $0xb0] sm:$0xf] }
 0xa22   : > { %v11514_v54 = vld [vmem:[#allocation3 + $0x110] sm:$0xf0]  ;;  %6986 = vst [vmem:[#allocation3 + $0xd4] sm:$0xf] %v6978_v3  ;;  %v7865_v63 = vpop.f32.mrf.mxu0 }
 0xa23   : > { %v10677_v55 = vor.u32 %v11514_v54, %v10676_v39  ;;  %v7861_v29 = vadd.f32 %v7860_v45, %v7832_v56 }
 0xa25   : > { %7990 = vmatmul.bf16.gmra.mxu0 %v10677_v55 }
 0xa27   : > { %v7809_v30 = vpop.f32.mrf.mxu2  ;;  %v6968_v58 = vpop.f32.mrf.mxu1 }
 0xa28   : > { %v7833_v8 = vpop.f32.mrf.mxu3  ;;  %v6979_v34 = vpack.c.bf16 %v6968_v58, %v6968_v58  ;;  %v7810_v59 = vadd.f32 %v16157_v31, %v7809_v30 }
 0xa29   : > { %v7834_v0 = vadd.f32 %v7833_v8, %v7805_v24  ;;  %v11506_v36 = vld [vmem:[#allocation3 + $0xd0] sm:$0xf0] }
 0xa2a   : > { %6987 = vst [vmem:[#allocation3 + $0xf8] sm:$0xf] %v6979_v34  ;;  %v10649_v35 = vor.u32 %v11506_v36, %v10648_v19  ;;  %v7867_v23 = vpop.f32.mrf.mxu0 }
 0xa2b   : > { %v7863_v17 = vadd.f32 %v7862_v48, %v7834_v0 }
 0xa2c   : > { %8043 = vmatmul.bf16.gmra.mxu2 %v10649_v35 }
 0xa2f   : > { %v6970_v1 = vpop.f32.mrf.mxu1  ;;  %v7812_v43 = vpop.f32.mrf.mxu2 }
 0xa30   : > { %v7836_v2 = vpop.f32.mrf.mxu3  ;;  %v6980_v38 = vpack.c.bf16 %v6970_v1, %v6970_v1  ;;  %v7813_v28 = vadd.f32 %v16157_v31, %v7812_v43 }
 0xa31   : > { %v7837_v60 = vadd.f32 %v7836_v2, %v7808_v37  ;;  %v10684_v15 = vld [vmem:[#allocation3 + $0xf8] sm:$0xf] }
 0xa32   : > { %6988 = vst [vmem:[#allocation3 + $0x11c] sm:$0xf] %v6980_v38  ;;  %v7870_v42 = vpop.f32.mrf.mxu0 }
 0xa33   : > { %v16162_v18 = vadd.f32 %v7865_v63, %v7837_v60 }
 0xa35   : > { %8004 = vmatmul.bf16.vlgmr.msra.gmra.mxu0 %v10573_v25 }
 0xa37   : > { %v7814_v13 = vpop.f32.mrf.mxu2  ;;  %v7889_v20 = vpop.f32.mrf.mxu1 }
 0xa38   : > { %v7838_v49 = vpop.f32.mrf.mxu3  ;;  %v7890_v57 = vadd.f32 %v7889_v20, %v7861_v29  ;;  %v7815_v21 = vadd.f32 %v16157_v31, %v7814_v13 }
 0xa39   : > { %v7839_v5 = vadd.f32 %v7838_v49, %v7810_v59  ;;  %v11515_v46 = vld [vmem:[#allocation3 + $0x118] sm:$0xf0] }
 0xa3a   : > { %v10685_v26 = vor.u32 %v11515_v46, %v10684_v15  ;;  %v7872_v45 = vpop.f32.mrf.mxu0 }
 0xa3b   : > { %v16165_v50 = vadd.f32 %v7867_v23, %v7839_v5 }
 0xa3c   : > { %8048 = vmatmul.bf16.gmra.mxu2 %v10685_v26 }
 0xa3f   : > { %v7817_v62 = vpop.f32.mrf.mxu2  ;;  %v7891_v40 = vpop.f32.mrf.mxu1 }
 0xa40   : > { %v7841_v22 = vpop.f32.mrf.mxu3  ;;  %v7892_v11 = vadd.f32 %v7891_v40, %v7863_v17  ;;  %v7818_v44 = vadd.f32 %v16157_v31, %v7817_v62 }
 0xa41   : > { %v7842_v14 = vadd.f32 %v7841_v22, %v7813_v28 }
 0xa42   : > { %v7875_v6 = vpop.f32.mrf.mxu0 }
 0xa43   : > { %v16168_v32 = vadd.f32 %v7870_v42, %v7842_v14 }
 0xa47   : > { %v7819_v4 = vpop.f32.mrf.mxu2  ;;  %v7894_v41 = vpop.f32.mrf.mxu1 }
 0xa48   : > { %v7843_v12 = vpop.f32.mrf.mxu3  ;;  %v7820_v53 = vadd.f32 %v16157_v31, %v7819_v4  ;;  %v7895_v43 = vadd.f32 %v7894_v41, %v16162_v18 }
 0xa49   : > { %v7844_v51 = vadd.f32 %v7843_v12, %v7815_v21 }
 0xa4a   : > { %v7877_v27 = vpop.f32.mrf.mxu0 }
 0xa4b   : > { %v16171_v33 = vadd.f32 %v7872_v45, %v7844_v51 }
 0xa4f   : > { %v7918_v7 = vpop.f32.mrf.mxu2  ;;  %v7896_v29 = vpop.f32.mrf.mxu1 }
 0xa50   : > { %v7846_v16 = vpop.f32.mrf.mxu3  ;;  %v16174_v52 = vadd.f32 %v7918_v7, %v7890_v57  ;;  %v7897_v57 = vadd.f32 %v7896_v29, %v16165_v50 }
 0xa51   : > { %v7847_v10 = vadd.f32 %v7846_v16, %v7818_v44 }
 0xa53   : > { %v16176_v48 = vadd.f32 %v7875_v6, %v7847_v10 }
 0xa57   : > { %v7920_v56 = vpop.f32.mrf.mxu2  ;;  %v7899_v63 = vpop.f32.mrf.mxu1 }
 0xa58   : > { %v7848_v39 = vpop.f32.mrf.mxu3  ;;  %v16179_v54 = vadd.f32 %v7920_v56, %v7892_v11  ;;  %v7900_v40 = vadd.f32 %v7899_v63, %v16168_v32 }
 0xa59   : > { %v7849_v61 = vadd.f32 %v7848_v39, %v7820_v53 }
 0xa5b   : > { %v16181_v3 = vadd.f32 %v7877_v27, %v7849_v61 }
 0xa5f   : > { %v7923_v55 = vpop.f32.mrf.mxu2  ;;  %v7901_v0 = vpop.f32.mrf.mxu1 }
 0xa60   : > { %v7947_v58 = vpop.f32.mrf.mxu3  ;;  %v7924_v25 = vadd.f32 %v7923_v55, %v7895_v43  ;;  %v7902_v10 = vadd.f32 %v7901_v0, %v16171_v33 }
 0xa61   : > { %v7948_v7 = vadd.f32 %v7947_v58, %v16174_v52 }
 0xa67   : > { %v7925_v24 = vpop.f32.mrf.mxu2  ;;  %v7904_v17 = vpop.f32.mrf.mxu1 }
 0xa68   : > { %v7949_v35 = vpop.f32.mrf.mxu3  ;;  %v7926_v15 = vadd.f32 %v7925_v24, %v7897_v57  ;;  %v7905_v33 = vadd.f32 %v7904_v17, %v16176_v48 }
 0xa69   : > { %v7950_v52 = vadd.f32 %v7949_v35, %v16179_v54 }
 0xa6f   : > { %v7928_v8 = vpop.f32.mrf.mxu2  ;;  %v16189_v47 = vpop.f32.mrf.mxu1 }
 0xa70   : > { %v7952_v2 = vpop.f32.mrf.mxu3  ;;  %v7929_v11 = vadd.f32 %v7928_v8, %v7900_v40  ;;  %v7907_v17 = vadd.f32 %v16189_v47, %v16181_v3 }
 0xa71   : > { %v7953_v5 = vadd.f32 %v7952_v2, %v7924_v25 }
 0xa72   : > { %v7976_v30 = vpop.f32.mrf.mxu0 }
 0xa73   : > { %v7977_v53 = vadd.f32 %v7976_v30, %v7948_v7 }
 0xa77   : > { %v7930_v34 = vpop.f32.mrf.mxu2  ;;  %v8010_v1 = vpop.f32.mrf.mxu1 }
 0xa78   : > { %v7954_v38 = vpop.f32.mrf.mxu3  ;;  %v7931_v39 = vadd.f32 %v7930_v34, %v7902_v10 }
 0xa79   : > { %v7955_v22 = vadd.f32 %v7954_v38, %v7926_v15 }
 0xa7a   : > { %v16183_v31 = vpop.f32.mrf.mxu0 }
 0xa7b   : > { %v7979_v30 = vadd.f32 %v16183_v31, %v7950_v52 }
 0xa7f   : > { %v16185_v19 = vpop.f32.mrf.mxu2  ;;  %v8012_v20 = vpop.f32.mrf.mxu1 }
 0xa80   : > { %v7957_v42 = vpop.f32.mrf.mxu3  ;;  %v7934_v58 = vadd.f32 %v16185_v19, %v7905_v33 }
 0xa81   : > { %v7958_v51 = vadd.f32 %v7957_v42, %v7929_v11 }
 0xa82   : > { %v7981_v36 = vpop.f32.mrf.mxu0 }
 0xa83   : > { %v7982_v13 = vadd.f32 %v7981_v36, %v7953_v5 }
 0xa85   : > { %v8011_v46 = vadd.f32 %v8010_v1, %v7982_v13 }
 0xa87   : > { %v16187_v37 = vpop.f32.mrf.mxu2  ;;  %v8015_v50 = vpop.f32.mrf.mxu1 }
 0xa88   : > { %v7959_v44 = vpop.f32.mrf.mxu3  ;;  %v7936_v19 = vadd.f32 %v16187_v37, %v7907_v17 }
 0xa89   : > { %v7960_v27 = vadd.f32 %v7959_v44, %v7931_v39 }
 0xa8a   : > { %v7983_v9 = vpop.f32.mrf.mxu0 }
 0xa8b   : > { %v7984_v18 = vadd.f32 %v7983_v9, %v7955_v22 }
 0xa8d   : > { %v8013_v45 = vadd.f32 %v8012_v20, %v7984_v18 }
 0xa8f   : > { %v8034_v23 = vpop.f32.mrf.mxu2  ;;  %v8017_v41 = vpop.f32.mrf.mxu1 }
 0xa90   : > { %v7962_v36 = vpop.f32.mrf.mxu3 }
 0xa92   : > { %v7986_v60 = vpop.f32.mrf.mxu0 }
 0xa93   : > { %v7987_v16 = vadd.f32 %v7986_v60, %v7958_v51  ;;  %v7963_v60 = vadd.f32 %v7962_v36, %v7934_v58 }
 0xa95   : > { %v8016_v32 = vadd.f32 %v8015_v50, %v7987_v16 }
 0xa97   : > { %v8036_v49 = vpop.f32.mrf.mxu2  ;;  %v8020_v43 = vpop.f32.mrf.mxu1 }
 0xa98   : > { %v7964_v31 = vpop.f32.mrf.mxu3 }
 0xa99   : > { %v7965_v5 = vadd.f32 %v7964_v31, %v7936_v19 }
 0xa9a   : > { %v7988_v59 = vpop.f32.mrf.mxu0 }
 0xa9b   : > { %v7989_v24 = vadd.f32 %v7988_v59, %v7960_v27 }
 0xa9d   : > { %v8018_v34 = vadd.f32 %v8017_v41, %v7989_v24 }
 0xa9f   : > { %v8039_v28 = vpop.f32.mrf.mxu2  ;;  %v8022_v15 = vpop.f32.mrf.mxu1 }
 0xaa0   : > { %v8040_v14 = vadd.f32 %v8039_v28, %v8011_v46 }
 0xaa2   : > { %v7991_v26 = vpop.f32.mrf.mxu0  ;;  %v8056_v62 = vmax.f32 %v8040_v14, 0.0 }
 0xaa3   : > { %v7992_v38 = vadd.f32 %v7991_v26, %v7963_v60 }
 0xaa4   : > { %8064 = vst [vmem:[%s16198_s14 + $0x10] sm:$0xff] %v8056_v62 }
 0xaa5   : > { %v8021_v25 = vadd.f32 %v8020_v43, %v7992_v38 }
 0xaa7   : > { %v8041_v12 = vpop.f32.mrf.mxu2 }
 0xaa8   : > { %v8042_v4 = vadd.f32 %v8041_v12, %v8013_v45 }
 0xaaa   : > { %v7993_v21 = vpop.f32.mrf.mxu0  ;;  %v8057_v6 = vmax.f32 %v8042_v4, 0.0 }
 0xaab   : > { %v7994_v20 = vadd.f32 %v7993_v21, %v7965_v5 }
 0xaac   : > { %8065 = vst [vmem:[%s16198_s14 + $0x18] sm:$0xff] %v8057_v6 }
 0xaaf   : > { %v8044_v56 = vpop.f32.mrf.mxu2 }
 0xab0   : > { %v8045_v29 = vadd.f32 %v8044_v56, %v8016_v32 }
 0xab2   : > { %v8005_v61 = vpop.f32.mrf.mxu0  ;;  %v8058_v8 = vmax.f32 %v8045_v29, 0.0 }
 0xab3   : > { %v8006_v55 = vadd.f32 %v8005_v61, %v7977_v53 }
 0xab4   : > { %8066 = vst [vmem:[%s16198_s14 + $0x20] sm:$0xff] %v8058_v8 }
 0xab5   : > { %v8035_v63 = vadd.f32 %v8034_v23, %v8006_v55 }
 0xab7   : > { %v8054_v0 = vmax.f32 %v8035_v63, 0.0  ;;  %v8046_v2 = vpop.f32.mrf.mxu2 }
 0xab8   : > { %v8047_v1 = vadd.f32 %v8046_v2, %v8018_v34 }
 0xab9   : > { %8062 = vst [vmem:[%s16198_s14] sm:$0xff] %v8054_v0 }
 0xaba   : > { %v8007_v9 = vpop.f32.mrf.mxu0  ;;  %v8059_v54 = vmax.f32 %v8047_v1, 0.0 }
 0xabb   : > { %v8008_v23 = vadd.f32 %v8007_v9, %v7979_v30 }
 0xabc   : > { %8067 = vst [vmem:[%s16198_s14 + $0x28] sm:$0xff] %v8059_v54 }
 0xabd   : > { %v8037_v48 = vadd.f32 %v8036_v49, %v8008_v23  ;;  %v8023_v49 = vadd.f32 %v8022_v15, %v7994_v20 }
 0xabf   : > { %v8055_v35 = vmax.f32 %v8037_v48, 0.0  ;;  %v8049_v59 = vpop.f32.mrf.mxu2 }
 0xac0   : > { %v8050_v13 = vadd.f32 %v8049_v59, %v8021_v25 }
 0xac1   : > { %8063 = vst [vmem:[%s16198_s14 + $0x8] sm:$0xff] %v8055_v35 }
 0xac2   : > { %v8060_v57 = vmax.f32 %v8050_v13, 0.0 }
 0xac4   : > { %8068 = vst [vmem:[%s16198_s14 + $0x30] sm:$0xff] %v8060_v57 }
 0xac7   : > { %v8051_v46 = vpop.f32.mrf.mxu2 }
 0xac8   : > { %v8052_v42 = vadd.f32 %v8051_v46, %v8023_v49 }
 0xaca   : > { %v8061_v26 = vmax.f32 %v8052_v42, 0.0 }
 0xacc   : > { %8069 = vst [vmem:[%s16198_s14 + $0x38] sm:$0xff] %v8061_v26 }
 0xacd PF: > { %s19_s30 = sadd.s32 1, %s11629_s30  }
 0xace   : > { %p16_p5 = scmp.ge.s32.totalorder %s19_s30, 4  }
 0xad0   :  { %18 = sbr.rel (!%p16_p5) target bundleno = 1 (0x1), region = 102 }

</bundles_post_ra>
